<compile_context>
chip_gen: v6e
topology: v6e:2x2x1
jax: 0.10.0
libtpu: 0.0.40
codegen_flags: <defaults>
</compile_context>

<pallas_src>
import functools

import jax
import jax.numpy as jnp
from jax.experimental import pallas as pl
from jax.experimental.pallas import tpu as pltpu

BN_EPS = 1e-5


def _round_up(x, m):
    return (x + m - 1) // m * m


# ----------------------------------------------------------------------------
# Pallas kernels
# ----------------------------------------------------------------------------
def _matmul_act_kernel(x_ref, w_ref, b_ref, o_ref, *, act, alpha):
    """out = act(x @ w + b). x/w are bf16, accumulation & epilogue in f32."""
    y = jnp.dot(x_ref[...], w_ref[...], preferred_element_type=jnp.float32)
    y = y + b_ref[...]
    if act == "relu":
        y = jnp.maximum(y, 0.0)
    elif act == "leaky":
        y = jnp.where(y >= 0.0, y, alpha * y)
    o_ref[...] = y.astype(o_ref.dtype)


def _stn_chain_kernel(h_ref, w0_ref, b0_ref, w1_ref, b1_ref, w2_ref, b2_ref,
                      o_ref, *, alpha):
    """Fused STN localization head: Linear->LeakyReLU->Linear(+BN)->LeakyReLU->Linear."""
    h = jnp.dot(h_ref[...], w0_ref[...], preferred_element_type=jnp.float32)
    h = h + b0_ref[...]
    h = jnp.where(h >= 0.0, h, alpha * h)
    h = jnp.dot(h.astype(jnp.bfloat16), w1_ref[...],
                preferred_element_type=jnp.float32) + b1_ref[...]
    h = jnp.where(h >= 0.0, h, alpha * h)
    o_ref[...] = jnp.dot(h.astype(jnp.bfloat16), w2_ref[...],
                         preferred_element_type=jnp.float32) + b2_ref[...]


def _pred_chain_kernel(z_ref, w1_ref, b1_ref, w2_ref, b2_ref, w3_ref, b3_ref,
                       o_ref, *, n_classes):
    """Fused fc_pred head: (1x1Conv+BN+ReLU) x2 -> Linear -> log_softmax."""
    z = z_ref[...].astype(jnp.bfloat16)
    h = jnp.dot(z, w1_ref[...], preferred_element_type=jnp.float32) + b1_ref[...]
    h = jnp.maximum(h, 0.0)
    h = jnp.dot(h.astype(jnp.bfloat16), w2_ref[...],
                preferred_element_type=jnp.float32) + b2_ref[...]
    h = jnp.maximum(h, 0.0)
    y = jnp.dot(h.astype(jnp.bfloat16), w3_ref[...],
                preferred_element_type=jnp.float32) + b3_ref[...]
    # Mask the lane padding (built in-kernel, no extra DMA'd mask array).
    lane = jax.lax.broadcasted_iota(jnp.int32, y.shape, 1)
    y = jnp.where(lane < n_classes, y, -1e30)
    mx = jnp.max(y, axis=-1, keepdims=True)
    lse = mx + jnp.log(jnp.sum(jnp.exp(y - mx), axis=-1, keepdims=True))
    o_ref[...] = y - lse


# ----------------------------------------------------------------------------
# Kernel wrappers
# ----------------------------------------------------------------------------
def fused_linear(x, w, b, act="none", alpha=0.01, out_dtype=jnp.float32):
    """y = act(x @ w + b). w is a pre-padded bf16 (Kp, N) matrix, b is f32 (1, N).

    Only the activation is (cheaply) padded per call; tile_m adapts to M so
    tiny batches don't waste MXU/VPU work on 128 zero rows.
    """
    M, K = x.shape
    Kp, N = w.shape
    x = x.astype(jnp.bfloat16)
    tile_m = min(128, _round_up(M, 16))          # 16: bf16 sublane packing
    Mp = _round_up(M, tile_m)
    if (Mp, Kp) != (M, K):
        x = jnp.pad(x, ((0, Mp - M), (0, Kp - K)))

    kernel = functools.partial(_matmul_act_kernel, act=act, alpha=alpha)
    out = pl.pallas_call(
        kernel,
        out_shape=jax.ShapeDtypeStruct((Mp, N), out_dtype),
        grid_spec=pltpu.PrefetchScalarGridSpec(
            num_scalar_prefetch=0,
            grid=(Mp // tile_m,),
            in_specs=[
                pl.BlockSpec((tile_m, Kp), lambda i: (i, 0)),
                pl.BlockSpec((Kp, N), lambda i: (0, 0)),
                pl.BlockSpec((1, N), lambda i: (0, 0)),
            ],
            out_specs=pl.BlockSpec((tile_m, N), lambda i: (i, 0)),
        ),
        compiler_params=pltpu.CompilerParams(dimension_semantics=("parallel",)),
    )(x, w, b)
    return out[:M] if Mp != M else out


def stn_head(h, p, alpha=0.2):
    """All three STN FC layers in one pallas_call (intermediates stay on-chip)."""
    B, K = h.shape
    Kp = p["stn_w0"].shape[0]
    Np = p["stn_w2"].shape[1]
    Mp = _round_up(B, 16)
    hb = jnp.pad(h.astype(jnp.bfloat16), ((0, Mp - B), (0, Kp - K)))
    out = pl.pallas_call(
        functools.partial(_stn_chain_kernel, alpha=alpha),
        out_shape=jax.ShapeDtypeStruct((Mp, Np), jnp.float32),
    )(hb, p["stn_w0"], p["stn_b0"], p["stn_w1"], p["stn_b1"],
      p["stn_w2"], p["stn_b2"])
    return out[:B, :3]


def pred_head(z, p, n_classes=10):
    """fc_pred (two 1x1 convs on 1x1 spatial + Linear + log_softmax) fused."""
    B, K = z.shape
    Kp = p["p1_w"].shape[0]
    Np = p["fc_w"].shape[1]
    Mp = _round_up(B, 8)
    zp = jnp.pad(z, ((0, Mp - B), (0, Kp - K)))
    out = pl.pallas_call(
        functools.partial(_pred_chain_kernel, n_classes=n_classes),
        out_shape=jax.ShapeDtypeStruct((Mp, Np), jnp.float32),
    )(zp, p["p1_w"], p["p1_b"], p["p2_w"], p["p2_b"], p["fc_w"], p["fc_b"])
    return out[:B, :n_classes]


# ----------------------------------------------------------------------------
# Conv = im2col (JAX layout glue, bf16) + Pallas fused matmul.
# ----------------------------------------------------------------------------
# TODO(synk): for large batch, move the patch gather inside the kernel with
# pl.ds strided reads instead of materializing the im2col matrix in HBM.
def im2col(x_nhwc, kh, kw, stride, pad):
    B, H, W, C = x_nhwc.shape
    Ho = (H + 2 * pad - kh) // stride + 1
    Wo = (W + 2 * pad - kw) // stride + 1
    xp = jnp.pad(x_nhwc, ((0, 0), (pad, pad), (pad, pad), (0, 0))) if pad else x_nhwc
    cols = [xp[:, i:i + stride * Ho:stride, j:j + stride * Wo:stride, :]
            for i in range(kh) for j in range(kw)]
    patches = jnp.concatenate(cols, axis=-1)            # (B, Ho, Wo, kh*kw*C)
    return patches.reshape(B * Ho * Wo, kh * kw * C), Ho, Wo


def conv_block(x_nhwc, w, b, kh, kw, stride, pad, act, out_dtype=jnp.bfloat16):
    B = x_nhwc.shape[0]
    patches, Ho, Wo = im2col(x_nhwc, kh, kw, stride, pad)
    y = fused_linear(patches, w, b, act=act, out_dtype=out_dtype)
    return y.reshape(B, Ho, Wo, y.shape[-1])


# ----------------------------------------------------------------------------
# STN helpers (tiny, plain JAX).
# ----------------------------------------------------------------------------
def convert_avec_to_A(a_vec):
    a0, a1, a2 = a_vec[:, 0], a_vec[:, 1], a_vec[:, 2]
    return jnp.stack(
        [jnp.stack([a0, a1], axis=-1), jnp.stack([a1, a2], axis=-1)], axis=1)


def symeig2x2_smallest_vec(A):
    """Unit eigenvector of the smallest eigenvalue of symmetric 2x2 matrices
    (torch.symeig ascending ordering; sign arbitrary, as in torch)."""
    a = A[:, 0, 0]
    b = A[:, 0, 1]
    c = A[:, 1, 1]
    m = 0.5 * (a + c)
    r = jnp.sqrt(jnp.maximum(0.25 * (a - c) ** 2 + b * b, 0.0))
    lam_min = m - r
    v1 = jnp.stack([b, lam_min - a], axis=-1)
    v2 = jnp.stack([lam_min - c, b], axis=-1)
    use_v1 = (jnp.abs(b) + jnp.abs(lam_min - a)) >= (jnp.abs(lam_min - c) + jnp.abs(b))
    v = jnp.where(use_v1[:, None], v1, v2)
    nrm = jnp.linalg.norm(v, axis=-1, keepdims=True)
    v = jnp.where(nrm > 1e-12, v / jnp.maximum(nrm, 1e-12), jnp.array([1.0, 0.0]))
    return v  # (B, 2) -> (tcos, tsin)


def affine_grid(theta, size):
    # F.affine_grid, align_corners=False
    B, C, H, W = size
    xs = (jnp.arange(W, dtype=jnp.float32) * 2.0 + 1.0) / W - 1.0
    ys = (jnp.arange(H, dtype=jnp.float32) * 2.0 + 1.0) / H - 1.0
    X, Y = jnp.meshgrid(xs, ys)
    base = jnp.stack([X, Y, jnp.ones_like(X)], axis=-1)        # (H, W, 3)
    return jnp.einsum("bij,hwj->bhwi", theta, base)            # (B, H, W, 2)


# TODO(synk): F.grid_sample is a data-dependent bilinear gather; kept in plain
# JAX (no clean Pallas/TPU gather equivalent at this granularity).
def grid_sample_bilinear(img_nchw, grid):
    B, C, H, W = img_nchw.shape
    gx = (grid[..., 0] + 1.0) * W / 2.0 - 0.5
    gy = (grid[..., 1] + 1.0) * H / 2.0 - 0.5
    x0 = jnp.floor(gx)
    y0 = jnp.floor(gy)
    x1 = x0 + 1.0
    y1 = y0 + 1.0
    wx1 = gx - x0
    wx0 = 1.0 - wx1
    wy1 = gy - y0
    wy0 = 1.0 - wy1

    def sample_one(img, xi, yi):
        valid = ((xi >= 0) & (xi < W) & (yi >= 0) & (yi < H)).astype(img.dtype)
        xi_c = jnp.clip(xi, 0, W - 1).astype(jnp.int32)
        yi_c = jnp.clip(yi, 0, H - 1).astype(jnp.int32)
        return img[:, yi_c, xi_c] * valid[None]

    def sample_batch(img, x0b, x1b, y0b, y1b, wx0b, wx1b, wy0b, wy1b):
        return (sample_one(img, x0b, y0b) * (wx0b * wy0b)[None]
                + sample_one(img, x1b, y0b) * (wx1b * wy0b)[None]
                + sample_one(img, x0b, y1b) * (wx0b * wy1b)[None]
                + sample_one(img, x1b, y1b) * (wx1b * wy1b)[None])

    return jax.vmap(sample_batch)(img_nchw, x0, x1, y0, y1, wx0, wx1, wy0, wy1)


# ----------------------------------------------------------------------------
# Parameters: deterministic init, BN folded, matmul layout, bf16, padded ONCE.
# ----------------------------------------------------------------------------
def init_params(key, nh=256, nz=64, nu=2):
    keys = iter(jax.random.split(key, 24))

    def rnd(shape, std=0.05):
        return std * jax.random.normal(next(keys), shape, dtype=jnp.float32)

    # Eval-mode BN with fresh running stats (mean=0, var=1, gamma=1, beta=0)
    # folds exactly into the preceding layer: w' = w*s, b' = b*s, s=1/sqrt(1+eps).
    bn_scale = (1.0 + BN_EPS) ** -0.5

    def pack(w, b, fold_bn=False, n_pad=None):
        K, N = w.shape
        if fold_bn:
            w = w * bn_scale
            b = b * bn_scale
        Kp = _round_up(K, 128)
        Np = n_pad if n_pad is not None else N
        wp = jnp.zeros((Kp, Np), jnp.float32).at[:K, :N].set(w).astype(jnp.bfloat16)
        bp = jnp.zeros((1, Np), jnp.float32).at[0, :N].set(b.astype(jnp.float32))
        return wp, bp

    def conv_w(cout, cin, k):
        w = rnd((cout, cin, k, k))                              # PyTorch layout
        return jnp.transpose(w, (2, 3, 1, 0)).reshape(k * k * cin, cout)

    p = {}
    # fc_stn: Linear(nu+784,nh) -> LeakyReLU(0.2) -> Linear(nh,nh)+BN -> LeakyReLU(0.2) -> Linear(nh,3)
    p["stn_w0"], p["stn_b0"] = pack(rnd((nu + 28 * 28, nh)), rnd((nh,)))
    p["stn_w1"], p["stn_b1"] = pack(rnd((nh, nh)), rnd((nh,)), fold_bn=True)
    p["stn_w2"], p["stn_b2"] = pack(rnd((nh, 3)), rnd((3,)), n_pad=128)
    # conv encoder (BN folded into convs 1-3)
    p["c1_w"], p["c1_b"] = pack(conv_w(nh, 1, 3), rnd((nh,)), fold_bn=True)
    p["c2_w"], p["c2_b"] = pack(conv_w(nh, nh, 3), rnd((nh,)), fold_bn=True)
    p["c3_w"], p["c3_b"] = pack(conv_w(nh, nh, 3), rnd((nh,)), fold_bn=True)
    p["c4_w"], p["c4_b"] = pack(conv_w(nz, nh, 4), rnd((nz,)))
    # fc_pred: Conv1x1(nz,nh)+BN+ReLU, Conv1x1(nh,nh)+BN+ReLU, squeeze, Linear(nh,10)
    p["p1_w"], p["p1_b"] = pack(rnd((nz, nh)), rnd((nh,)), fold_bn=True)
    p["p2_w"], p["p2_b"] = pack(rnd((nh, nh)), rnd((nh,)), fold_bn=True)
    p["fc_w"], p["fc_b"] = pack(rnd((nh, 10)), rnd((10,)), n_pad=128)
    return p


# ----------------------------------------------------------------------------
# CUA.forward(init=True): f (log-probs), x_align (STN-warped x), e (= z), g (argmax)
# ----------------------------------------------------------------------------
def dann_forward(params, x_nchw, u):
    p = params
    B = x_nchw.shape[0]
    x_flat = x_nchw.reshape(B, -1)

    # --- STN localization head: single fused Pallas kernel ---
    a_vec = stn_head(jnp.concatenate([u, x_flat], axis=1), p)       # (B, 3)

    A = convert_avec_to_A(a_vec)                  # (B, 2, 2) symmetric
    v = symeig2x2_smallest_vec(A)                 # eigvec of smallest eigenvalue
    tcos, tsin = v[:, 0], v[:, 1]
    zeros = jnp.zeros_like(tcos)
    theta = jnp.stack(
        [jnp.stack([tcos, tsin, zeros], axis=-1),
         jnp.stack([-tsin, tcos, zeros], axis=-1)], axis=1)          # (B, 2, 3)
    grid = affine_grid(theta, x_nchw.shape)
    x_align = grid_sample_bilinear(x_nchw, grid)                     # (B,1,28,28)

    # --- conv encoder: im2col + fused Pallas matmul per conv (bf16 MXU) ---
    h = jnp.transpose(x_align, (0, 2, 3, 1)).astype(jnp.bfloat16)    # NHWC
    h = conv_block(h, p["c1_w"], p["c1_b"], 3, 3, 2, 1, "relu")
    h = conv_block(h, p["c2_w"], p["c2_b"], 3, 3, 2, 1, "relu")
    h = conv_block(h, p["c3_w"], p["c3_b"], 3, 3, 2, 1, "relu")
    h = conv_block(h, p["c4_w"], p["c4_b"], 4, 4, 1, 0, "relu",
                   out_dtype=jnp.float32)                            # (B,1,1,nz)
    z = h.reshape(B, -1)                                             # (B, nz)

    # --- fc_pred + in-kernel log_softmax: single fused Pallas kernel ---
    f = pred_head(z, p)                                              # (B, 10)

    g = jnp.argmax(f, axis=1)                 # CUA.forward: self.g
    e = z.reshape(B, -1, 1, 1)                # matches torch z: (B, nz, 1, 1)
    return f, x_align, e, g


if __name__ == "__main__":
    key = jax.random.PRNGKey(0)
    k_param, k_x, k_u = jax.random.split(key, 3)

    B, nu, nh, nz = 2, 2, 256, 64             # x: B x 1 x 28 x 28, u: B x nu
    params = init_params(k_param, nh=nh, nz=nz, nu=nu)
    x = jax.random.normal(k_x, (B, 1, 28, 28), dtype=jnp.float32)
    u = jax.random.uniform(k_u, (B, nu), dtype=jnp.float32)

    f, x_align, e, g = jax.jit(dann_forward)(params, x, u)
    jax.block_until_ready((f, x_align, e, g))

    assert f.shape == (B, 10)
    assert x_align.shape == (B, 1, 28, 28)
    assert e.shape == (B, nz, 1, 1)
    assert g.shape == (B,)
    assert bool(jnp.all(jnp.isfinite(f)))
    print("KERNEL_OK")
</pallas_src>

<mosaic_0001>
module attributes {stable_mosaic.version = 11 : i64} {
  func.func @_stn_chain_kernel(%arg0: memref<16x896xbf16, #tpu.memory_space<vmem>>, %arg1: memref<896x256xbf16, #tpu.memory_space<vmem>>, %arg2: memref<1x256xf32, #tpu.memory_space<vmem>>, %arg3: memref<256x256xbf16, #tpu.memory_space<vmem>>, %arg4: memref<1x256xf32, #tpu.memory_space<vmem>>, %arg5: memref<256x128xbf16, #tpu.memory_space<vmem>>, %arg6: memref<1x128xf32, #tpu.memory_space<vmem>>, %arg7: memref<16x128xf32, #tpu.memory_space<vmem>>) attributes {dimension_semantics = [], scalar_prefetch = 0 : i64, scratch_operands = 0 : i64, tpu.core_type = #tpu.core_type<tc>} {
    %c0 = arith.constant 0 : index
    %c0_0 = arith.constant 0 : index
    %0 = vector.load %arg0[%c0, %c0_0] : memref<16x896xbf16, #tpu.memory_space<vmem>>, vector<16x896xbf16>
    %c0_1 = arith.constant 0 : index
    %c0_2 = arith.constant 0 : index
    %1 = vector.load %arg1[%c0_1, %c0_2] : memref<896x256xbf16, #tpu.memory_space<vmem>>, vector<896x256xbf16>
    %cst = arith.constant dense<0.000000e+00> : vector<16x256xf32>
    %2 = tpu.matmul %0, %1, %cst {dimension_numbers = #tpu.dot_dimension_numbers<[1], [0], [0], [1], [0, 0, 1, 1], [], []>} : vector<16x896xbf16>, vector<896x256xbf16>, vector<16x256xf32> -> vector<16x256xf32>
    %c0_3 = arith.constant 0 : index
    %c0_4 = arith.constant 0 : index
    %3 = vector.load %arg2[%c0_3, %c0_4] : memref<1x256xf32, #tpu.memory_space<vmem>>, vector<1x256xf32>
    %4 = vector.broadcast %3 : vector<1x256xf32> to vector<16x256xf32>
    %5 = arith.addf %2, %4 : vector<16x256xf32>
    %cst_5 = arith.constant 0.000000e+00 : f32
    %6 = vector.broadcast %cst_5 : f32 to vector<16x256xf32>
    %7 = arith.cmpf oge, %5, %6 : vector<16x256xf32>
    %cst_6 = arith.constant 2.000000e-01 : f32
    %8 = vector.broadcast %cst_6 : f32 to vector<16x256xf32>
    %9 = arith.mulf %8, %5 : vector<16x256xf32>
    %10 = arith.select %7, %5, %9 : vector<16x256xi1>, vector<16x256xf32>
    %11 = arith.truncf %10 : vector<16x256xf32> to vector<16x256xbf16>
    %c0_7 = arith.constant 0 : index
    %c0_8 = arith.constant 0 : index
    %12 = vector.load %arg3[%c0_7, %c0_8] : memref<256x256xbf16, #tpu.memory_space<vmem>>, vector<256x256xbf16>
    %cst_9 = arith.constant dense<0.000000e+00> : vector<16x256xf32>
    %13 = tpu.matmul %11, %12, %cst_9 {dimension_numbers = #tpu.dot_dimension_numbers<[1], [0], [0], [1], [0, 0, 1, 1], [], []>} : vector<16x256xbf16>, vector<256x256xbf16>, vector<16x256xf32> -> vector<16x256xf32>
    %c0_10 = arith.constant 0 : index
    %c0_11 = arith.constant 0 : index
    %14 = vector.load %arg4[%c0_10, %c0_11] : memref<1x256xf32, #tpu.memory_space<vmem>>, vector<1x256xf32>
    %15 = vector.broadcast %14 : vector<1x256xf32> to vector<16x256xf32>
    %16 = arith.addf %13, %15 : vector<16x256xf32>
    %cst_12 = arith.constant 0.000000e+00 : f32
    %17 = vector.broadcast %cst_12 : f32 to vector<16x256xf32>
    %18 = arith.cmpf oge, %16, %17 : vector<16x256xf32>
    %cst_13 = arith.constant 2.000000e-01 : f32
    %19 = vector.broadcast %cst_13 : f32 to vector<16x256xf32>
    %20 = arith.mulf %19, %16 : vector<16x256xf32>
    %21 = arith.select %18, %16, %20 : vector<16x256xi1>, vector<16x256xf32>
    %22 = arith.truncf %21 : vector<16x256xf32> to vector<16x256xbf16>
    %c0_14 = arith.constant 0 : index
    %c0_15 = arith.constant 0 : index
    %23 = vector.load %arg5[%c0_14, %c0_15] : memref<256x128xbf16, #tpu.memory_space<vmem>>, vector<256x128xbf16>
    %cst_16 = arith.constant dense<0.000000e+00> : vector<16x128xf32>
    %24 = tpu.matmul %22, %23, %cst_16 {dimension_numbers = #tpu.dot_dimension_numbers<[1], [0], [0], [1], [0, 0, 1, 1], [], []>} : vector<16x256xbf16>, vector<256x128xbf16>, vector<16x128xf32> -> vector<16x128xf32>
    %c0_17 = arith.constant 0 : index
    %c0_18 = arith.constant 0 : index
    %25 = vector.load %arg6[%c0_17, %c0_18] : memref<1x128xf32, #tpu.memory_space<vmem>>, vector<1x128xf32>
    %26 = vector.broadcast %25 : vector<1x128xf32> to vector<16x128xf32>
    %27 = arith.addf %24, %26 : vector<16x128xf32>
    %c0_19 = arith.constant 0 : index
    %c0_20 = arith.constant 0 : index
    %28 = vector.load %arg7[%c0_19, %c0_20] : memref<16x128xf32, #tpu.memory_space<vmem>>, vector<16x128xf32>
    tpu.vector_store %arg7[%c0_19, %c0_20], %27 {strides = array<i32>} : memref<16x128xf32, #tpu.memory_space<vmem>>, vector<16x128xf32>,
    return
  }
}

module attributes {stable_mosaic.version = 11 : i64} {
  func.func @_matmul_act_kernel(%arg0: i32, %arg1: memref<128x128xbf16, #tpu.memory_space<vmem>>, %arg2: memref<128x256xbf16, #tpu.memory_space<vmem>>, %arg3: memref<1x256xf32, #tpu.memory_space<vmem>>, %arg4: memref<128x256xbf16, #tpu.memory_space<vmem>>) attributes {dimension_semantics = [#tpu.dimension_semantics<parallel>], iteration_bounds = array<i64: 4>, scalar_prefetch = 0 : i64, scratch_operands = 0 : i64, tpu.core_type = #tpu.core_type<tc>, window_params = [{transform_indices = @transform_0, window_bounds = array<i64: 128, 128>}, {pipeline_mode = #tpu.pipeline_mode<synchronous>, transform_indices = @transform_1, window_bounds = array<i64: 128, 256>}, {pipeline_mode = #tpu.pipeline_mode<synchronous>, transform_indices = @transform_2, window_bounds = array<i64: 1, 256>}, {transform_indices = @transform_3, window_bounds = array<i64: 128, 256>}]} {
    %c0 = arith.constant 0 : index
    %c0_0 = arith.constant 0 : index
    %0 = vector.load %arg1[%c0, %c0_0] : memref<128x128xbf16, #tpu.memory_space<vmem>>, vector<128x128xbf16>
    %c0_1 = arith.constant 0 : index
    %c0_2 = arith.constant 0 : index
    %1 = vector.load %arg2[%c0_1, %c0_2] : memref<128x256xbf16, #tpu.memory_space<vmem>>, vector<128x256xbf16>
    %cst = arith.constant dense<0.000000e+00> : vector<128x256xf32>
    %2 = tpu.matmul %0, %1, %cst {dimension_numbers = #tpu.dot_dimension_numbers<[1], [0], [0], [1], [0, 0, 1, 1], [], []>} : vector<128x128xbf16>, vector<128x256xbf16>, vector<128x256xf32> -> vector<128x256xf32>
    %c0_3 = arith.constant 0 : index
    %c0_4 = arith.constant 0 : index
    %3 = vector.load %arg3[%c0_3, %c0_4] : memref<1x256xf32, #tpu.memory_space<vmem>>, vector<1x256xf32>
    %4 = vector.broadcast %3 : vector<1x256xf32> to vector<128x256xf32>
    %5 = arith.addf %2, %4 : vector<128x256xf32>
    %cst_5 = arith.constant 0.000000e+00 : f32
    %6 = vector.broadcast %cst_5 : f32 to vector<128x256xf32>
    %7 = arith.maximumf %5, %6 : vector<128x256xf32>
    %8 = arith.truncf %7 : vector<128x256xf32> to vector<128x256xbf16>
    %c0_6 = arith.constant 0 : index
    %c0_7 = arith.constant 0 : index
    %9 = vector.load %arg4[%c0_6, %c0_7] : memref<128x256xbf16, #tpu.memory_space<vmem>>, vector<128x256xbf16>
    tpu.vector_store %arg4[%c0_6, %c0_7], %8 {strides = array<i32>} : memref<128x256xbf16, #tpu.memory_space<vmem>>, vector<128x256xbf16>,
    return
  }
  func.func @transform_0(%arg0: i32) -> (i32, i32) {
    %c0_i32 = arith.constant 0 : i32
    %c0_i32_0 = arith.constant 0 : i32
    return %arg0, %c0_i32 : i32, i32
  }
  func.func @transform_1(%arg0: i32) -> (i32, i32) {
    %c0_i32 = arith.constant 0 : i32
    %c0_i32_0 = arith.constant 0 : i32
    %c0_i32_1 = arith.constant 0 : i32
    return %c0_i32, %c0_i32_0 : i32, i32
  }
  func.func @transform_2(%arg0: i32) -> (i32, i32) {
    %c0_i32 = arith.constant 0 : i32
    %c0_i32_0 = arith.constant 0 : i32
    %c0_i32_1 = arith.constant 0 : i32
    return %c0_i32, %c0_i32_0 : i32, i32
  }
  func.func @transform_3(%arg0: i32) -> (i32, i32) {
    %c0_i32 = arith.constant 0 : i32
    %c0_i32_0 = arith.constant 0 : i32
    return %arg0, %c0_i32 : i32, i32
  }
}

module attributes {stable_mosaic.version = 11 : i64} {
  func.func @_matmul_act_kernel(%arg0: i32, %arg1: memref<112x2304xbf16, #tpu.memory_space<vmem>>, %arg2: memref<2304x256xbf16, #tpu.memory_space<vmem>>, %arg3: memref<1x256xf32, #tpu.memory_space<vmem>>, %arg4: memref<112x256xbf16, #tpu.memory_space<vmem>>) attributes {dimension_semantics = [#tpu.dimension_semantics<parallel>], iteration_bounds = array<i64: 1>, scalar_prefetch = 0 : i64, scratch_operands = 0 : i64, tpu.core_type = #tpu.core_type<tc>, window_params = [{transform_indices = @transform_0, window_bounds = array<i64: 112, 2304>}, {pipeline_mode = #tpu.pipeline_mode<synchronous>, transform_indices = @transform_1, window_bounds = array<i64: 2304, 256>}, {pipeline_mode = #tpu.pipeline_mode<synchronous>, transform_indices = @transform_2, window_bounds = array<i64: 1, 256>}, {transform_indices = @transform_3, window_bounds = array<i64: 112, 256>}]} {
    %c0 = arith.constant 0 : index
    %c0_0 = arith.constant 0 : index
    %0 = vector.load %arg1[%c0, %c0_0] : memref<112x2304xbf16, #tpu.memory_space<vmem>>, vector<112x2304xbf16>
    %c0_1 = arith.constant 0 : index
    %c0_2 = arith.constant 0 : index
    %1 = vector.load %arg2[%c0_1, %c0_2] : memref<2304x256xbf16, #tpu.memory_space<vmem>>, vector<2304x256xbf16>
    %cst = arith.constant dense<0.000000e+00> : vector<112x256xf32>
    %2 = tpu.matmul %0, %1, %cst {dimension_numbers = #tpu.dot_dimension_numbers<[1], [0], [0], [1], [0, 0, 1, 1], [], []>} : vector<112x2304xbf16>, vector<2304x256xbf16>, vector<112x256xf32> -> vector<112x256xf32>
    %c0_3 = arith.constant 0 : index
    %c0_4 = arith.constant 0 : index
    %3 = vector.load %arg3[%c0_3, %c0_4] : memref<1x256xf32, #tpu.memory_space<vmem>>, vector<1x256xf32>
    %4 = vector.broadcast %3 : vector<1x256xf32> to vector<112x256xf32>
    %5 = arith.addf %2, %4 : vector<112x256xf32>
    %cst_5 = arith.constant 0.000000e+00 : f32
    %6 = vector.broadcast %cst_5 : f32 to vector<112x256xf32>
    %7 = arith.maximumf %5, %6 : vector<112x256xf32>
    %8 = arith.truncf %7 : vector<112x256xf32> to vector<112x256xbf16>
    %c0_6 = arith.constant 0 : index
    %c0_7 = arith.constant 0 : index
    %9 = vector.load %arg4[%c0_6, %c0_7] : memref<112x256xbf16, #tpu.memory_space<vmem>>, vector<112x256xbf16>
    tpu.vector_store %arg4[%c0_6, %c0_7], %8 {strides = array<i32>} : memref<112x256xbf16, #tpu.memory_space<vmem>>, vector<112x256xbf16>,
    return
  }
  func.func @transform_0(%arg0: i32) -> (i32, i32) {
    %c0_i32 = arith.constant 0 : i32
    %c0_i32_0 = arith.constant 0 : i32
    return %arg0, %c0_i32 : i32, i32
  }
  func.func @transform_1(%arg0: i32) -> (i32, i32) {
    %c0_i32 = arith.constant 0 : i32
    %c0_i32_0 = arith.constant 0 : i32
    %c0_i32_1 = arith.constant 0 : i32
    return %c0_i32, %c0_i32_0 : i32, i32
  }
  func.func @transform_2(%arg0: i32) -> (i32, i32) {
    %c0_i32 = arith.constant 0 : i32
    %c0_i32_0 = arith.constant 0 : i32
    %c0_i32_1 = arith.constant 0 : i32
    return %c0_i32, %c0_i32_0 : i32, i32
  }
  func.func @transform_3(%arg0: i32) -> (i32, i32) {
    %c0_i32 = arith.constant 0 : i32
    %c0_i32_0 = arith.constant 0 : i32
    return %arg0, %c0_i32 : i32, i32
  }
}

module attributes {stable_mosaic.version = 11 : i64} {
  func.func @_matmul_act_kernel(%arg0: i32, %arg1: memref<32x2304xbf16, #tpu.memory_space<vmem>>, %arg2: memref<2304x256xbf16, #tpu.memory_space<vmem>>, %arg3: memref<1x256xf32, #tpu.memory_space<vmem>>, %arg4: memref<32x256xbf16, #tpu.memory_space<vmem>>) attributes {dimension_semantics = [#tpu.dimension_semantics<parallel>], iteration_bounds = array<i64: 1>, scalar_prefetch = 0 : i64, scratch_operands = 0 : i64, tpu.core_type = #tpu.core_type<tc>, window_params = [{transform_indices = @transform_0, window_bounds = array<i64: 32, 2304>}, {pipeline_mode = #tpu.pipeline_mode<synchronous>, transform_indices = @transform_1, window_bounds = array<i64: 2304, 256>}, {pipeline_mode = #tpu.pipeline_mode<synchronous>, transform_indices = @transform_2, window_bounds = array<i64: 1, 256>}, {transform_indices = @transform_3, window_bounds = array<i64: 32, 256>}]} {
    %c0 = arith.constant 0 : index
    %c0_0 = arith.constant 0 : index
    %0 = vector.load %arg1[%c0, %c0_0] : memref<32x2304xbf16, #tpu.memory_space<vmem>>, vector<32x2304xbf16>
    %c0_1 = arith.constant 0 : index
    %c0_2 = arith.constant 0 : index
    %1 = vector.load %arg2[%c0_1, %c0_2] : memref<2304x256xbf16, #tpu.memory_space<vmem>>, vector<2304x256xbf16>
    %cst = arith.constant dense<0.000000e+00> : vector<32x256xf32>
    %2 = tpu.matmul %0, %1, %cst {dimension_numbers = #tpu.dot_dimension_numbers<[1], [0], [0], [1], [0, 0, 1, 1], [], []>} : vector<32x2304xbf16>, vector<2304x256xbf16>, vector<32x256xf32> -> vector<32x256xf32>
    %c0_3 = arith.constant 0 : index
    %c0_4 = arith.constant 0 : index
    %3 = vector.load %arg3[%c0_3, %c0_4] : memref<1x256xf32, #tpu.memory_space<vmem>>, vector<1x256xf32>
    %4 = vector.broadcast %3 : vector<1x256xf32> to vector<32x256xf32>
    %5 = arith.addf %2, %4 : vector<32x256xf32>
    %cst_5 = arith.constant 0.000000e+00 : f32
    %6 = vector.broadcast %cst_5 : f32 to vector<32x256xf32>
    %7 = arith.maximumf %5, %6 : vector<32x256xf32>
    %8 = arith.truncf %7 : vector<32x256xf32> to vector<32x256xbf16>
    %c0_6 = arith.constant 0 : index
    %c0_7 = arith.constant 0 : index
    %9 = vector.load %arg4[%c0_6, %c0_7] : memref<32x256xbf16, #tpu.memory_space<vmem>>, vector<32x256xbf16>
    tpu.vector_store %arg4[%c0_6, %c0_7], %8 {strides = array<i32>} : memref<32x256xbf16, #tpu.memory_space<vmem>>, vector<32x256xbf16>,
    return
  }
  func.func @transform_0(%arg0: i32) -> (i32, i32) {
    %c0_i32 = arith.constant 0 : i32
    %c0_i32_0 = arith.constant 0 : i32
    return %arg0, %c0_i32 : i32, i32
  }
  func.func @transform_1(%arg0: i32) -> (i32, i32) {
    %c0_i32 = arith.constant 0 : i32
    %c0_i32_0 = arith.constant 0 : i32
    %c0_i32_1 = arith.constant 0 : i32
    return %c0_i32, %c0_i32_0 : i32, i32
  }
  func.func @transform_2(%arg0: i32) -> (i32, i32) {
    %c0_i32 = arith.constant 0 : i32
    %c0_i32_0 = arith.constant 0 : i32
    %c0_i32_1 = arith.constant 0 : i32
    return %c0_i32, %c0_i32_0 : i32, i32
  }
  func.func @transform_3(%arg0: i32) -> (i32, i32) {
    %c0_i32 = arith.constant 0 : i32
    %c0_i32_0 = arith.constant 0 : i32
    return %arg0, %c0_i32 : i32, i32
  }
}

module attributes {stable_mosaic.version = 11 : i64} {
  func.func @_matmul_act_kernel(%arg0: i32, %arg1: memref<16x4096xbf16, #tpu.memory_space<vmem>>, %arg2: memref<4096x64xbf16, #tpu.memory_space<vmem>>, %arg3: memref<1x64xf32, #tpu.memory_space<vmem>>, %arg4: memref<16x64xf32, #tpu.memory_space<vmem>>) attributes {dimension_semantics = [#tpu.dimension_semantics<parallel>], iteration_bounds = array<i64: 1>, scalar_prefetch = 0 : i64, scratch_operands = 0 : i64, tpu.core_type = #tpu.core_type<tc>, window_params = [{transform_indices = @transform_0, window_bounds = array<i64: 16, 4096>}, {pipeline_mode = #tpu.pipeline_mode<synchronous>, transform_indices = @transform_1, window_bounds = array<i64: 4096, 64>}, {pipeline_mode = #tpu.pipeline_mode<synchronous>, transform_indices = @transform_2, window_bounds = array<i64: 1, 64>}, {transform_indices = @transform_3, window_bounds = array<i64: 16, 64>}]} {
    %c0 = arith.constant 0 : index
    %c0_0 = arith.constant 0 : index
    %0 = vector.load %arg1[%c0, %c0_0] : memref<16x4096xbf16, #tpu.memory_space<vmem>>, vector<16x4096xbf16>
    %c0_1 = arith.constant 0 : index
    %c0_2 = arith.constant 0 : index
    %1 = vector.load %arg2[%c0_1, %c0_2] : memref<4096x64xbf16, #tpu.memory_space<vmem>>, vector<4096x64xbf16>
    %cst = arith.constant dense<0.000000e+00> : vector<16x64xf32>
    %2 = tpu.matmul %0, %1, %cst {dimension_numbers = #tpu.dot_dimension_numbers<[1], [0], [0], [1], [0, 0, 1, 1], [], []>} : vector<16x4096xbf16>, vector<4096x64xbf16>, vector<16x64xf32> -> vector<16x64xf32>
    %c0_3 = arith.constant 0 : index
    %c0_4 = arith.constant 0 : index
    %3 = vector.load %arg3[%c0_3, %c0_4] : memref<1x64xf32, #tpu.memory_space<vmem>>, vector<1x64xf32>
    %4 = vector.broadcast %3 : vector<1x64xf32> to vector<16x64xf32>
    %5 = arith.addf %2, %4 : vector<16x64xf32>
    %cst_5 = arith.constant 0.000000e+00 : f32
    %6 = vector.broadcast %cst_5 : f32 to vector<16x64xf32>
    %7 = arith.maximumf %5, %6 : vector<16x64xf32>
    %c0_6 = arith.constant 0 : index
    %c0_7 = arith.constant 0 : index
    %8 = vector.load %arg4[%c0_6, %c0_7] : memref<16x64xf32, #tpu.memory_space<vmem>>, vector<16x64xf32>
    tpu.vector_store %arg4[%c0_6, %c0_7], %7 {strides = array<i32>} : memref<16x64xf32, #tpu.memory_space<vmem>>, vector<16x64xf32>,
    return
  }
  func.func @transform_0(%arg0: i32) -> (i32, i32) {
    %c0_i32 = arith.constant 0 : i32
    %c0_i32_0 = arith.constant 0 : i32
    return %arg0, %c0_i32 : i32, i32
  }
  func.func @transform_1(%arg0: i32) -> (i32, i32) {
    %c0_i32 = arith.constant 0 : i32
    %c0_i32_0 = arith.constant 0 : i32
    %c0_i32_1 = arith.constant 0 : i32
    return %c0_i32, %c0_i32_0 : i32, i32
  }
  func.func @transform_2(%arg0: i32) -> (i32, i32) {
    %c0_i32 = arith.constant 0 : i32
    %c0_i32_0 = arith.constant 0 : i32
    %c0_i32_1 = arith.constant 0 : i32
    return %c0_i32, %c0_i32_0 : i32, i32
  }
  func.func @transform_3(%arg0: i32) -> (i32, i32) {
    %c0_i32 = arith.constant 0 : i32
    %c0_i32_0 = arith.constant 0 : i32
    return %arg0, %c0_i32 : i32, i32
  }
}

module attributes {stable_mosaic.version = 11 : i64} {
  func.func @_pred_chain_kernel(%arg0: memref<8x128xf32, #tpu.memory_space<vmem>>, %arg1: memref<128x256xbf16, #tpu.memory_space<vmem>>, %arg2: memref<1x256xf32, #tpu.memory_space<vmem>>, %arg3: memref<256x256xbf16, #tpu.memory_space<vmem>>, %arg4: memref<1x256xf32, #tpu.memory_space<vmem>>, %arg5: memref<256x128xbf16, #tpu.memory_space<vmem>>, %arg6: memref<1x128xf32, #tpu.memory_space<vmem>>, %arg7: memref<8x128xf32, #tpu.memory_space<vmem>>) attributes {dimension_semantics = [], scalar_prefetch = 0 : i64, scratch_operands = 0 : i64, tpu.core_type = #tpu.core_type<tc>} {
    %c0 = arith.constant 0 : index
    %c0_0 = arith.constant 0 : index
    %0 = vector.load %arg0[%c0, %c0_0] : memref<8x128xf32, #tpu.memory_space<vmem>>, vector<8x128xf32>
    %1 = arith.truncf %0 : vector<8x128xf32> to vector<8x128xbf16>
    %c0_1 = arith.constant 0 : index
    %c0_2 = arith.constant 0 : index
    %2 = vector.load %arg1[%c0_1, %c0_2] : memref<128x256xbf16, #tpu.memory_space<vmem>>, vector<128x256xbf16>
    %cst = arith.constant dense<0.000000e+00> : vector<8x256xf32>
    %3 = tpu.matmul %1, %2, %cst {dimension_numbers = #tpu.dot_dimension_numbers<[1], [0], [0], [1], [0, 0, 1, 1], [], []>} : vector<8x128xbf16>, vector<128x256xbf16>, vector<8x256xf32> -> vector<8x256xf32>
    %c0_3 = arith.constant 0 : index
    %c0_4 = arith.constant 0 : index
    %4 = vector.load %arg2[%c0_3, %c0_4] : memref<1x256xf32, #tpu.memory_space<vmem>>, vector<1x256xf32>
    %5 = vector.broadcast %4 : vector<1x256xf32> to vector<8x256xf32>
    %6 = arith.addf %3, %5 : vector<8x256xf32>
    %cst_5 = arith.constant 0.000000e+00 : f32
    %7 = vector.broadcast %cst_5 : f32 to vector<8x256xf32>
    %8 = arith.maximumf %6, %7 : vector<8x256xf32>
    %9 = arith.truncf %8 : vector<8x256xf32> to vector<8x256xbf16>
    %c0_6 = arith.constant 0 : index
    %c0_7 = arith.constant 0 : index
    %10 = vector.load %arg3[%c0_6, %c0_7] : memref<256x256xbf16, #tpu.memory_space<vmem>>, vector<256x256xbf16>
    %cst_8 = arith.constant dense<0.000000e+00> : vector<8x256xf32>
    %11 = tpu.matmul %9, %10, %cst_8 {dimension_numbers = #tpu.dot_dimension_numbers<[1], [0], [0], [1], [0, 0, 1, 1], [], []>} : vector<8x256xbf16>, vector<256x256xbf16>, vector<8x256xf32> -> vector<8x256xf32>
    %c0_9 = arith.constant 0 : index
    %c0_10 = arith.constant 0 : index
    %12 = vector.load %arg4[%c0_9, %c0_10] : memref<1x256xf32, #tpu.memory_space<vmem>>, vector<1x256xf32>
    %13 = vector.broadcast %12 : vector<1x256xf32> to vector<8x256xf32>
    %14 = arith.addf %11, %13 : vector<8x256xf32>
    %cst_11 = arith.constant 0.000000e+00 : f32
    %15 = vector.broadcast %cst_11 : f32 to vector<8x256xf32>
    %16 = arith.maximumf %14, %15 : vector<8x256xf32>
    %17 = arith.truncf %16 : vector<8x256xf32> to vector<8x256xbf16>
    %c0_12 = arith.constant 0 : index
    %c0_13 = arith.constant 0 : index
    %18 = vector.load %arg5[%c0_12, %c0_13] : memref<256x128xbf16, #tpu.memory_space<vmem>>, vector<256x128xbf16>
    %cst_14 = arith.constant dense<0.000000e+00> : vector<8x128xf32>
    %19 = tpu.matmul %17, %18, %cst_14 {dimension_numbers = #tpu.dot_dimension_numbers<[1], [0], [0], [1], [0, 0, 1, 1], [], []>} : vector<8x256xbf16>, vector<256x128xbf16>, vector<8x128xf32> -> vector<8x128xf32>
    %c0_15 = arith.constant 0 : index
    %c0_16 = arith.constant 0 : index
    %20 = vector.load %arg6[%c0_15, %c0_16] : memref<1x128xf32, #tpu.memory_space<vmem>>, vector<1x128xf32>
    %21 = vector.broadcast %20 : vector<1x128xf32> to vector<8x128xf32>
    %22 = arith.addf %19, %21 : vector<8x128xf32>
    %23 = tpu.iota {dimensions = array<i32: 1>} : vector<8x128xi32>
    %c10_i32 = arith.constant 10 : i32
    %24 = vector.broadcast %c10_i32 : i32 to vector<8x128xi32>
    %25 = arith.cmpi slt, %23, %24 : vector<8x128xi32>
    %cst_17 = arith.constant -1.000000e+30 : f32
    %26 = vector.broadcast %cst_17 : f32 to vector<8x128xf32>
    %27 = arith.select %25, %22, %26 : vector<8x128xi1>, vector<8x128xf32>
    %cst_18 = arith.constant dense<0xFF800000> : vector<8xf32>
    %28 = vector.multi_reduction <maximumf>, %27, %cst_18 [1] : vector<8x128xf32> to vector<8xf32>
    %29 = vector.shape_cast %28 : vector<8xf32> to vector<8x1xf32>
    %30 = vector.broadcast %29 : vector<8x1xf32> to vector<8x128xf32>
    %31 = arith.subf %27, %30 : vector<8x128xf32>
    %32 = math.exp %31 : vector<8x128xf32>
    %cst_19 = arith.constant dense<0.000000e+00> : vector<8xf32>
    %33 = vector.multi_reduction <add>, %32, %cst_19 [1] : vector<8x128xf32> to vector<8xf32>
    %34 = vector.shape_cast %33 : vector<8xf32> to vector<8x1xf32>
    %35 = math.log %34 : vector<8x1xf32>
    %36 = arith.addf %29, %35 : vector<8x1xf32>
    %37 = vector.broadcast %36 : vector<8x1xf32> to vector<8x128xf32>
    %38 = arith.subf %27, %37 : vector<8x128xf32>
    %c0_20 = arith.constant 0 : index
    %c0_21 = arith.constant 0 : index
    %39 = vector.load %arg7[%c0_20, %c0_21] : memref<8x128xf32, #tpu.memory_space<vmem>>, vector<8x128xf32>
    tpu.vector_store %arg7[%c0_20, %c0_21], %38 {strides = array<i32>} : memref<8x128xf32, #tpu.memory_space<vmem>>, vector<8x128xf32>,
    return
  }
}

</mosaic_0001>

<bundles_post_ra>
// kernel: dann_forward.6
= control target key start
LH: loop header
LB: loop body
LE: loop exit
PB: predicated region body
PF: predicated region fallthrough
CT: control target
= control target key end

     0   :  { %12 = vsyncpa [#allocation3], 0  ;;  %s2143_s0 = inlined_call_operand.vmem [shape: bf16[16,896], index: 0, kind: input, shape index: {}]   ;;  %s2144_s1 = inlined_call_operand.hbm [shape: bf16[896,256], index: 1, kind: input, shape index: {}]   ;;  %s2145_s2 = inlined_call_operand.hbm [shape: f32[1,256], index: 2, kind: input, shape index: {}]   ;;  %s2146_s3 = inlined_call_operand.hbm [shape: bf16[256,256], index: 3, kind: input, shape index: {}]   ;;  %s2147_s4 = inlined_call_operand.hbm [shape: f32[1,256], index: 4, kind: input, shape index: {}]   ;;  %s2148_s5 = inlined_call_operand.hbm [shape: bf16[256,128], index: 5, kind: input, shape index: {}]   ;;  %s2149_s6 = inlined_call_operand.hbm [shape: f32[1,128], index: 6, kind: input, shape index: {}]   ;;  %s2150_s7 = inlined_call_operand.vmem [shape: f32[16,128], index: 7, kind: output, shape index: {}]  }
   0x1   :  { %13 = vsyncpa [#allocation5], 0 }
   0x2   :  { %14 = vsyncpa [#allocation8], 0 }
   0x3   :  { %15 = vsyncpa [#allocation11], 0  ;;  %s2035_s24 = smov [#allocation4]   ;;  %s2036_s26 = smov [#allocation7]  }
   0x4   :  { %s36_s25 = sshll.u32 %s2035_s24, 4  ;;  %s58_s27 = sshll.u32 %s2036_s26, 4  ;;  %s37_s25 = int_to_ptr.vmem [resolvable:$true] %s36_s25  ;;  %s59_s27 = int_to_ptr.vmem [resolvable:$true] %s58_s27 }
   0x5   :  { %s1915_s28 = scalar_lea.vmem %s37_s25, 32  ;;  %p1920_p1 = scmp.lt.s32.totalorder %s37_s25, %s37_s25 }
   0x6   :  { %p1916_p0 = scmp.ne.s32.totalorder %s37_s25, %s1915_s28  ;;  %p1921_p2 = scmp.lt.s32.totalorder %s1915_s28, %s1915_s28 }
   0x8   :  { %p1922_p3 = por %p1921_p2, %p1920_p1 }
   0xa   :  { %p1923_p4 = pnand %p1922_p3, %p1916_p0 }
   0xc   :  { %1926 = shalt.err (!%p1923_p4)
}
   0xd   :  { %39 = dma.hbm_to_vmem [thread:$0]  %s2145_s2, 32, %s37_s25, [#allocation5]  }
   0xe   :  { %s1935_s8 = scalar_lea.vmem %s59_s27, 32  ;;  %p1940_p6 = scmp.lt.s32.totalorder %s59_s27, %s59_s27 }
   0xf   :  { %p1936_p5 = scmp.ne.s32.totalorder %s59_s27, %s1935_s8  ;;  %p1941_p7 = scmp.lt.s32.totalorder %s1935_s8, %s1935_s8 }
  0x11   :  { %p1942_p8 = por %p1941_p7, %p1940_p6 }
  0x13   :  { %p1943_p9 = pnand %p1942_p8, %p1936_p5 }
  0x15   :  { %1946 = shalt.err (!%p1943_p9)
}
  0x16   :  { %61 = dma.hbm_to_vmem [thread:$0]  %s2147_s4, 32, %s59_s27, [#allocation8]  }
  0x17   :  { %s2037_s11 = smov [#allocation2]  }
  0x18   :  { %s23_s12 = sshll.u32 %s2037_s11, 4  ;;  %s24_s12 = int_to_ptr.vmem [resolvable:$true] %s23_s12 }
  0x19   :  { %s1955_s13 = scalar_lea.vmem %s24_s12, 14336  ;;  %p1960_p11 = scmp.lt.s32.totalorder %s24_s12, %s24_s12 }
  0x1a   :  { %p1956_p10 = scmp.ne.s32.totalorder %s24_s12, %s1955_s13  ;;  %p1961_p12 = scmp.lt.s32.totalorder %s1955_s13, %s1955_s13 }
  0x1c   :  { %p1962_p13 = por %p1961_p12, %p1960_p11 }
  0x1e   :  { %p1963_p0 = pnand %p1962_p13, %p1956_p10 }
  0x20   :  { %1966 = shalt.err (!%p1963_p0)
}
  0x21   :  { %s2038_s2 = smov 128   ;;  %s2039_s14 = smov 8  }
  0x22   :  { %29 = dma.hbm_to_vmem [thread:$0]  %s2144_s1, 14336, %s24_s12, [#allocation3], %s2038_s2, %s2038_s2, %s2039_s14  }
  0x23   :  { %s2040_s17 = smov [#allocation6]   ;;  %s2041_s4 = smov [#allocation9]  }
  0x24   :  { %s45_s18 = sshll.u32 %s2040_s17, 4  ;;  %s67_s19 = sshll.u32 %s2041_s4, 4  ;;  %s46_s18 = int_to_ptr.vmem [resolvable:$true] %s45_s18  ;;  %s68_s19 = int_to_ptr.vmem [resolvable:$true] %s67_s19 }
  0x25   :  { %s1975_s20 = scalar_lea.vmem %s46_s18, 4096  ;;  %p1980_p2 = scmp.lt.s32.totalorder %s46_s18, %s46_s18 }
  0x26   :  { %p1976_p1 = scmp.ne.s32.totalorder %s46_s18, %s1975_s20  ;;  %p1981_p3 = scmp.lt.s32.totalorder %s1975_s20, %s1975_s20 }
  0x28   :  { %p1982_p4 = por %p1981_p3, %p1980_p2 }
  0x2a   :  { %p1983_p5 = pnand %p1982_p4, %p1976_p1 }
  0x2c   :  { %1986 = shalt.err (!%p1983_p5)
}
  0x2d   :  { %51 = dma.hbm_to_vmem [thread:$0]  %s2146_s3, 4096, %s46_s18, [#allocation5], %s2038_s2, %s2038_s2, %s2039_s14  }
  0x2e   :  { %s1995_s23 = scalar_lea.vmem %s68_s19, 2048  ;;  %p2000_p7 = scmp.lt.s32.totalorder %s68_s19, %s68_s19 }
  0x2f   :  { %p1996_p6 = scmp.ne.s32.totalorder %s68_s19, %s1995_s23  ;;  %p2001_p8 = scmp.lt.s32.totalorder %s1995_s23, %s1995_s23 }
  0x31   :  { %p2002_p9 = por %p2001_p8, %p2000_p7 }
  0x33   :  { %p2003_p10 = pnand %p2002_p9, %p1996_p6 }
  0x35   :  { %2006 = shalt.err (!%p2003_p10)
}
  0x36   :  { %s2042_s1 = smov 64   ;;  %s2043_s24 = smov 4  }
  0x37   :  { %73 = dma.hbm_to_vmem [thread:$0]  %s2148_s5, 2048, %s68_s19, [#allocation8], %s2042_s1, %s2042_s1, %s2043_s24  }
  0x38   :  { %s2044_s27 = smov [#allocation10]  }
  0x39   :  { %s80_s28 = sshll.u32 %s2044_s27, 4  ;;  %s81_s28 = int_to_ptr.vmem [resolvable:$true] %s80_s28 }
  0x3a   :  { %s2015_s29 = scalar_lea.vmem %s81_s28, 16  ;;  %s2019_s3 = scalar_lea.vmem %s81_s28, 32 }
  0x3b   :  { %p2016_p11 = scmp.ne.s32.totalorder %s81_s28, %s2015_s29  ;;  %p2020_p12 = scmp.lt.s32.totalorder %s81_s28, %s81_s28 }
  0x3c   :  { %p2021_p13 = scmp.lt.s32.totalorder %s2019_s3, %s2015_s29 }
  0x3e   :  { %p2022_p0 = por %p2021_p13, %p2020_p12 }
  0x40   :  { %p2023_p1 = pnand %p2022_p0, %p2016_p11 }
  0x42   :  { %2026 = shalt.err (!%p2023_p1)
}
  0x43   :  { %83 = dma.hbm_to_vmem [thread:$0]  %s2149_s6, 16, %s81_s28, [#allocation11]  }
  0x44   :  { %2027 = dma.done.wait [#allocation3], 14336  }
  0x45   :  { %2028 = vsyncadd [#allocation3], 4294952960 }
  0x46   :  { %2029 = dma.done.wait [#allocation5], 4128  }
  0x47   :  { %2030 = vsyncadd [#allocation5], 4294963168 }
  0x48   :  { %2031 = dma.done.wait [#allocation8], 2080  }
  0x49   :  { %2032 = vsyncadd [#allocation8], 4294965216 }
  0x4a   :  { %2033 = dma.done.wait [#allocation11], 16  }
  0x4b   :  { %2034 = vsyncadd [#allocation11], 4294967280  ;;  %v1665_v0 = vld [vmem:[#allocation2 + $0x74] ss:$8 sps:$4 sm:$0xff]   ;;  %v1667_v1 = vld [vmem:[#allocation2 + $0x70] ss:$8 sps:$4 sm:$0xff]  }
  0x4c   :  { %831 = vmatprep.subr.bf16.mxu0 %v1665_v0  ;;  %v1668_v2 = vld [vmem:[#allocation2 + $0x174] ss:$8 sps:$4 sm:$0xff]   ;;  %v1670_v3 = vld [vmem:[#allocation2 + $0x170] ss:$8 sps:$4 sm:$0xff]   ;;  %v1671_v4 = vld [vmem:[#allocation2 + $0x64] ss:$8 sps:$4 sm:$0xff]  }
  0x4d   :  { %832 = vmatpush1.bf16.msra.mxu0 %v1667_v1  ;;  %v1673_v5 = vld [vmem:[#allocation2 + $0x60] ss:$8 sps:$4 sm:$0xff]   ;;  %874 = vmatprep.subr.bf16.mxu1 %v1668_v2  ;;  %v1674_v6 = vld [vmem:[#allocation2 + $0x164] ss:$8 sps:$4 sm:$0xff]   ;;  %v1677_v8 = vld [vmem:[#allocation2 + $0x54] ss:$8 sps:$4 sm:$0xff]  }
  0x4e   :  { %875 = vmatpush1.bf16.msra.mxu1 %v1670_v3  ;;  %833 = vmatprep.subr.bf16.mxu0 %v1671_v4  ;;  %v1676_v7 = vld [vmem:[#allocation2 + $0x160] ss:$8 sps:$4 sm:$0xff]   ;;  %v1679_v9 = vld [vmem:[#allocation2 + $0x50] ss:$8 sps:$4 sm:$0xff]   ;;  %v1680_v10 = vld [vmem:[#allocation2 + $0x154] ss:$8 sps:$4 sm:$0xff]  }
  0x4f   :  { %876 = vmatprep.subr.bf16.mxu1 %v1674_v6  ;;  %v1683_v11 = vld [vmem:[#allocation2 + $0x44] ss:$8 sps:$4 sm:$0xff]   ;;  %v1682_v12 = vld [vmem:[#allocation2 + $0x150] ss:$8 sps:$4 sm:$0xff]   ;;  %v1685_v14 = vld [vmem:[#allocation2 + $0x40] ss:$8 sps:$4 sm:$0xff]  }
  0x50   :  { %v1686_v13 = vld [vmem:[#allocation2 + $0x144] ss:$8 sps:$4 sm:$0xff]   ;;  %v1689_v15 = vld [vmem:[#allocation2 + $0x34] ss:$8 sps:$4 sm:$0xff]   ;;  %v1688_v16 = vld [vmem:[#allocation2 + $0x140] ss:$8 sps:$4 sm:$0xff]  }
  0x51   :  { %834 = vmatpush1.bf16.msra.mxu0 %v1673_v5  ;;  %v1692_v17 = vld [vmem:[#allocation2 + $0x134] ss:$8 sps:$4 sm:$0xff]   ;;  %v1691_v18 = vld [vmem:[#allocation2 + $0x30] ss:$8 sps:$4 sm:$0xff]   ;;  %v1695_v19 = vld [vmem:[#allocation2 + $0x24] ss:$8 sps:$4 sm:$0xff]  }
  0x52   :  { %835 = vmatprep.subr.bf16.mxu0 %v1677_v8  ;;  %877 = vmatpush1.bf16.msra.mxu1 %v1676_v7  ;;  %v1694_v20 = vld [vmem:[#allocation2 + $0x130] ss:$8 sps:$4 sm:$0xff]   ;;  %v1698_v21 = vld [vmem:[#allocation2 + $0x124] ss:$8 sps:$4 sm:$0xff]   ;;  %v1697_v22 = vld [vmem:[#allocation2 + $0x20] ss:$8 sps:$4 sm:$0xff]  }
  0x53   :  { %878 = vmatprep.subr.bf16.mxu1 %v1680_v10  ;;  %v1701_v23 = vld [vmem:[#allocation2 + $0x14] ss:$8 sps:$4 sm:$0xff]   ;;  %v1700_v24 = vld [vmem:[#allocation2 + $0x120] ss:$8 sps:$4 sm:$0xff]   ;;  %v1703_v26 = vld [vmem:[#allocation2 + $0x10] ss:$8 sps:$4 sm:$0xff]  }
  0x54   :  { %v1704_v25 = vld [vmem:[#allocation2 + $0x114] ss:$8 sps:$4 sm:$0xff]   ;;  %v1707_v27 = vld [vmem:[#allocation2 + $0x4] ss:$8 sps:$4 sm:$0xff]   ;;  %v1706_v28 = vld [vmem:[#allocation2 + $0x110] ss:$8 sps:$4 sm:$0xff]  }
  0x55   :  { %836 = vmatpush1.bf16.msra.mxu0 %v1679_v9  ;;  %v1710_v29 = vld [vmem:[#allocation2 + $0x104] ss:$8 sps:$4 sm:$0xff]   ;;  %v1709_v30 = vld [vmem:[#allocation2] ss:$8 sps:$4 sm:$0xff]   ;;  %v1713_v31 = vld [vmem:[#allocation2 + $0xf4] ss:$8 sps:$4 sm:$0xff]  }
  0x56   :  { %837 = vmatprep.subr.bf16.mxu0 %v1683_v11  ;;  %879 = vmatpush1.bf16.msra.mxu1 %v1682_v12  ;;  %v1712_v32 = vld [vmem:[#allocation2 + $0x100] ss:$8 sps:$4 sm:$0xff]   ;;  %v1716_v33 = vld [vmem:[#allocation2 + $0x1f4] ss:$8 sps:$4 sm:$0xff]   ;;  %v1715_v34 = vld [vmem:[#allocation2 + $0xf0] ss:$8 sps:$4 sm:$0xff]  }
  0x57   :  { %880 = vmatprep.subr.bf16.mxu1 %v1686_v13  ;;  %v1719_v35 = vld [vmem:[#allocation2 + $0xe4] ss:$8 sps:$4 sm:$0xff]   ;;  %v1718_v36 = vld [vmem:[#allocation2 + $0x1f0] ss:$8 sps:$4 sm:$0xff]   ;;  %v1721_v38 = vld [vmem:[#allocation2 + $0xe0] ss:$8 sps:$4 sm:$0xff]  }
  0x58   :  { %v1722_v37 = vld [vmem:[#allocation2 + $0x1e4] ss:$8 sps:$4 sm:$0xff]   ;;  %v1725_v39 = vld [vmem:[#allocation2 + $0xd4] ss:$8 sps:$4 sm:$0xff]   ;;  %v1724_v40 = vld [vmem:[#allocation2 + $0x1e0] ss:$8 sps:$4 sm:$0xff]  }
  0x59   :  { %838 = vmatpush1.bf16.msra.mxu0 %v1685_v14  ;;  %v1728_v41 = vld [vmem:[#allocation2 + $0x1d4] ss:$8 sps:$4 sm:$0xff]   ;;  %v1727_v42 = vld [vmem:[#allocation2 + $0xd0] ss:$8 sps:$4 sm:$0xff]   ;;  %v1731_v43 = vld [vmem:[#allocation2 + $0xc4] ss:$8 sps:$4 sm:$0xff]  }
  0x5a   :  { %839 = vmatprep.subr.bf16.mxu0 %v1689_v15  ;;  %881 = vmatpush1.bf16.msra.mxu1 %v1688_v16  ;;  %v1730_v44 = vld [vmem:[#allocation2 + $0x1d0] ss:$8 sps:$4 sm:$0xff]   ;;  %v1734_v45 = vld [vmem:[#allocation2 + $0x1c4] ss:$8 sps:$4 sm:$0xff]   ;;  %v1733_v46 = vld [vmem:[#allocation2 + $0xc0] ss:$8 sps:$4 sm:$0xff]  }
  0x5b   :  { %882 = vmatprep.subr.bf16.mxu1 %v1692_v17  ;;  %v1762_v47 = vld [vmem:[%s2143_s0 + $0x4] ss:$28 sps:$4 sm:$0xff]   ;;  %v1737_v48 = vld [vmem:[#allocation2 + $0xb4] ss:$8 sps:$4 sm:$0xff]   ;;  %v1769_v51 = vld [vmem:[%s2143_s0 + $0xc] ss:$28 sps:$4 sm:$0xff]  }
  0x5c   :  { %v1736_v49 = vld [vmem:[#allocation2 + $0x1c0] ss:$8 sps:$4 sm:$0xff]   ;;  %863 = vmatprep.mubr.bf16.mxu0 %v1762_v47  ;;  %v1740_v50 = vld [vmem:[#allocation2 + $0x1b4] ss:$8 sps:$4 sm:$0xff]   ;;  %v1739_v52 = vld [vmem:[#allocation2 + $0xb0] ss:$8 sps:$4 sm:$0xff]   ;;  %906 = vmatprep.mubr.bf16.mxu1 %v1769_v51 }
  0x5d   :  { %840 = vmatpush1.bf16.msra.mxu0 %v1691_v18  ;;  %v1743_v53 = vld [vmem:[#allocation2 + $0xa4] ss:$8 sps:$4 sm:$0xff]   ;;  %v1742_v54 = vld [vmem:[#allocation2 + $0x1b0] ss:$8 sps:$4 sm:$0xff]   ;;  %v1745_v56 = vld [vmem:[#allocation2 + $0xa0] ss:$8 sps:$4 sm:$0xff]  }
  0x5e   :  { %841 = vmatprep.subr.bf16.mxu0 %v1695_v19  ;;  %883 = vmatpush1.bf16.msra.mxu1 %v1694_v20  ;;  %v1746_v55 = vld [vmem:[#allocation2 + $0x1a4] ss:$8 sps:$4 sm:$0xff]   ;;  %v1749_v57 = vld [vmem:[#allocation2 + $0x94] ss:$8 sps:$4 sm:$0xff]   ;;  %v1748_v58 = vld [vmem:[#allocation2 + $0x1a0] ss:$8 sps:$4 sm:$0xff]  }
  0x5f   :  { %884 = vmatprep.subr.bf16.mxu1 %v1698_v21  ;;  %v1752_v59 = vld [vmem:[#allocation2 + $0x194] ss:$8 sps:$4 sm:$0xff]   ;;  %v1751_v60 = vld [vmem:[#allocation2 + $0x90] ss:$8 sps:$4 sm:$0xff]   ;;  %v1755_v61 = vld [vmem:[#allocation2 + $0x84] ss:$8 sps:$4 sm:$0xff]  }
  0x60   :  { %v1754_v62 = vld [vmem:[#allocation2 + $0x190] ss:$8 sps:$4 sm:$0xff]   ;;  %v1758_v63 = vld [vmem:[#allocation2 + $0x184] ss:$8 sps:$4 sm:$0xff]   ;;  %v1757_v0 = vld [vmem:[#allocation2 + $0x80] ss:$8 sps:$4 sm:$0xff]  }
  0x61   :  { %842 = vmatpush1.bf16.msra.mxu0 %v1697_v22  ;;  %v1766_v1 = vld [vmem:[#allocation2 + $0x274] ss:$8 sps:$4 sm:$0xff]   ;;  %v1763_v2 = vld [vmem:[#allocation2 + $0x180] ss:$8 sps:$4 sm:$0xff]   ;;  %v1764_v5 = vld [vmem:[#allocation2 + $0x270] ss:$8 sps:$4 sm:$0xff]  }
  0x62   :  { %843 = vmatprep.subr.bf16.mxu0 %v1701_v23  ;;  %885 = vmatpush1.bf16.msra.mxu1 %v1700_v24  ;;  %v1760_v3 = vld [vmem:[%s2143_s0] ss:$28 sps:$4 sm:$0xff]   ;;  %v1767_v6 = vld [vmem:[%s2143_s0 + $0x8] ss:$28 sps:$4 sm:$0xff]   ;;  %v1791_v8 = vld [vmem:[#allocation2 + $0x370] ss:$8 sps:$4 sm:$0xff]  }
  0x63   :  { %886 = vmatprep.subr.bf16.mxu1 %v1704_v25  ;;  %v1793_v4 = vld [vmem:[#allocation2 + $0x374] ss:$8 sps:$4 sm:$0xff]   ;;  %v1772_v7 = vld [vmem:[#allocation2 + $0x264] ss:$8 sps:$4 sm:$0xff]   ;;  %v1770_v10 = vld [vmem:[#allocation2 + $0x260] ss:$8 sps:$4 sm:$0xff]  }
  0x64   :  { %v1799_v9 = vld [vmem:[#allocation2 + $0x364] ss:$8 sps:$4 sm:$0xff]   ;;  %v1775_v11 = vld [vmem:[#allocation2 + $0x254] ss:$8 sps:$4 sm:$0xff]   ;;  %v1797_v12 = vld [vmem:[#allocation2 + $0x360] ss:$8 sps:$4 sm:$0xff]  }
  0x65   :  { %844 = vmatpush1.bf16.msra.mxu0 %v1703_v26  ;;  %v2045_v13 = vmov 0   ;;  %v1805_v14 = vld [vmem:[#allocation2 + $0x354] ss:$8 sps:$4 sm:$0xff]   ;;  %v1773_v15 = vld [vmem:[#allocation2 + $0x250] ss:$8 sps:$4 sm:$0xff]  }
  0x66   :  { %845 = vmatprep.subr.bf16.mxu0 %v1707_v27  ;;  %887 = vmatpush1.bf16.msra.mxu1 %v1706_v28  ;;  %v1778_v16 = vld [vmem:[#allocation2 + $0x244] ss:$8 sps:$4 sm:$0xff]   ;;  %v1803_v17 = vld [vmem:[#allocation2 + $0x350] ss:$8 sps:$4 sm:$0xff]   ;;  %v1776_v19 = vld [vmem:[#allocation2 + $0x240] ss:$8 sps:$4 sm:$0xff]  }
  0x67   :  { %888 = vmatprep.subr.bf16.mxu1 %v1710_v29  ;;  %v1811_v18 = vld [vmem:[#allocation2 + $0x344] ss:$8 sps:$4 sm:$0xff]   ;;  %v1781_v20 = vld [vmem:[#allocation2 + $0x234] ss:$8 sps:$4 sm:$0xff]   ;;  %v1779_v21 = vld [vmem:[#allocation2 + $0x230] ss:$8 sps:$4 sm:$0xff]  }
  0x68   :  { %v1809_v22 = vld [vmem:[#allocation2 + $0x340] ss:$8 sps:$4 sm:$0xff]   ;;  %v1817_v23 = vld [vmem:[#allocation2 + $0x334] ss:$8 sps:$4 sm:$0xff]   ;;  %v1784_v24 = vld [vmem:[#allocation2 + $0x224] ss:$8 sps:$4 sm:$0xff]  }
  0x69   :  { %846 = vmatpush1.bf16.msra.mxu0 %v1709_v30  ;;  %v1815_v25 = vld [vmem:[#allocation2 + $0x330] ss:$8 sps:$4 sm:$0xff]   ;;  %v1823_v27 = vld [vmem:[#allocation2 + $0x324] ss:$8 sps:$4 sm:$0xff]   ;;  %v1782_v28 = vld [vmem:[#allocation2 + $0x220] ss:$8 sps:$4 sm:$0xff]  }
  0x6a   :  { %847 = vmatprep.subr.bf16.mxu0 %v1713_v31  ;;  %889 = vmatpush1.bf16.msra.mxu1 %v1712_v32  ;;  %v1842_v26 = vld [vmem:[%s2143_s0 + $0x14] ss:$28 sps:$4 sm:$0xff]   ;;  %v1821_v30 = vld [vmem:[#allocation2 + $0x320] ss:$8 sps:$4 sm:$0xff]  }
  0x6b   :  { %890 = vmatprep.subr.bf16.mxu1 %v1716_v33  ;;  %v1787_v29 = vld [vmem:[#allocation2 + $0x214] ss:$8 sps:$4 sm:$0xff]   ;;  %v1785_v32 = vld [vmem:[#allocation2 + $0x210] ss:$8 sps:$4 sm:$0xff]   ;;  %v1790_v33 = vld [vmem:[#allocation2 + $0x204] ss:$8 sps:$4 sm:$0xff]  }
  0x6c   :  { %v1829_v31 = vld [vmem:[#allocation2 + $0x314] ss:$8 sps:$4 sm:$0xff]  }
  0x6d   :  { %848 = vmatpush2.bf16.msra.mxu0 %v1715_v34  ;;  %v1827_v34 = vld [vmem:[#allocation2 + $0x310] ss:$8 sps:$4 sm:$0xff]   ;;  %v1820_v47 = vld [vmem:[#allocation2 + $0x2b4] ss:$8 sps:$4 sm:$0xff]  }
  0x6e   :  { %849 = vmatprep.subr.bf16.mxu0 %v1719_v35  ;;  %891 = vmatpush2.bf16.msra.mxu1 %v1718_v36  ;;  %v1835_v35 = vld [vmem:[#allocation2 + $0x304] ss:$8 sps:$4 sm:$0xff]   ;;  %v1788_v36 = vld [vmem:[#allocation2 + $0x200] ss:$8 sps:$4 sm:$0xff]   ;;  %v1832_v51 = vld [vmem:[#allocation2 + $0x294] ss:$8 sps:$4 sm:$0xff]  }
  0x6f   :  { %892 = vmatprep.subr.bf16.mxu1 %v1722_v37  ;;  %v1796_v37 = vld [vmem:[#allocation2 + $0x2f4] ss:$8 sps:$4 sm:$0xff]  }
  0x71   :  { %850 = vmatpush2.bf16.msra.mxu0 %v1721_v38  ;;  %v1833_v38 = vld [vmem:[#allocation2 + $0x300] ss:$8 sps:$4 sm:$0xff]  }
  0x72   :  { %851 = vmatprep.subr.bf16.mxu0 %v1725_v39  ;;  %893 = vmatpush2.bf16.msra.mxu1 %v1724_v40  ;;  %v1794_v39 = vld [vmem:[#allocation2 + $0x2f0] ss:$8 sps:$4 sm:$0xff]   ;;  %v1802_v40 = vld [vmem:[#allocation2 + $0x2e4] ss:$8 sps:$4 sm:$0xff]  }
  0x73   :  { %894 = vmatprep.subr.bf16.mxu1 %v1728_v41  ;;  %v1839_v41 = vld [vmem:[%s2143_s0 + $0x18] ss:$28 sps:$4 sm:$0xff]  }
  0x75   :  { %852 = vmatpush2.bf16.msra.mxu0 %v1727_v42  ;;  %v1800_v42 = vld [vmem:[#allocation2 + $0x2e0] ss:$8 sps:$4 sm:$0xff]  }
  0x76   :  { %853 = vmatprep.subr.bf16.mxu0 %v1731_v43  ;;  %895 = vmatpush2.bf16.msra.mxu1 %v1730_v44  ;;  %v1808_v43 = vld [vmem:[#allocation2 + $0x2d4] ss:$8 sps:$4 sm:$0xff]   ;;  %v1806_v44 = vld [vmem:[#allocation2 + $0x2d0] ss:$8 sps:$4 sm:$0xff]  }
  0x77   :  { %896 = vmatprep.subr.bf16.mxu1 %v1734_v45  ;;  %v1814_v45 = vld [vmem:[#allocation2 + $0x2c4] ss:$8 sps:$4 sm:$0xff]  }
  0x79   :  { %854 = vmatpush2.bf16.msra.mxu0 %v1733_v46  ;;  %v1812_v46 = vld [vmem:[#allocation2 + $0x2c0] ss:$8 sps:$4 sm:$0xff]  }
  0x7a   :  { %855 = vmatprep.subr.bf16.mxu0 %v1737_v48  ;;  %897 = vmatpush2.bf16.msra.mxu1 %v1736_v49  ;;  %v1818_v48 = vld [vmem:[#allocation2 + $0x2b0] ss:$8 sps:$4 sm:$0xff]   ;;  %v1826_v49 = vld [vmem:[#allocation2 + $0x2a4] ss:$8 sps:$4 sm:$0xff]  }
  0x7b   :  { %898 = vmatprep.subr.bf16.mxu1 %v1740_v50  ;;  %v1824_v50 = vld [vmem:[#allocation2 + $0x2a0] ss:$8 sps:$4 sm:$0xff]  }
  0x7d   :  { %856 = vmatpush2.bf16.msra.mxu0 %v1739_v52  ;;  %v1830_v52 = vld [vmem:[#allocation2 + $0x290] ss:$8 sps:$4 sm:$0xff]  }
  0x7e   :  { %857 = vmatprep.subr.bf16.mxu0 %v1743_v53  ;;  %899 = vmatpush2.bf16.msra.mxu1 %v1742_v54  ;;  %v1838_v53 = vld [vmem:[#allocation2 + $0x284] ss:$8 sps:$4 sm:$0xff]   ;;  %v1836_v54 = vld [vmem:[#allocation2 + $0x280] ss:$8 sps:$4 sm:$0xff]  }
  0x7f   :  { %900 = vmatprep.subr.bf16.mxu1 %v1746_v55  ;;  %v1840_v55 = vld [vmem:[%s2143_s0 + $0x10] ss:$28 sps:$4 sm:$0xff]  }
  0x81   :  { %858 = vmatpush2.bf16.msra.mxu0 %v1745_v56  ;;  %v1843_v56 = vld [vmem:[#allocation6 + $0x70] ss:$8 sps:$4 sm:$0xff]  }
  0x82   :  { %859 = vmatprep.subr.bf16.mxu0 %v1749_v57  ;;  %901 = vmatpush2.bf16.msra.mxu1 %v1748_v58  ;;  %v1845_v57 = vld [vmem:[#allocation6 + $0x74] ss:$8 sps:$4 sm:$0xff]   ;;  %v1848_v58 = vld [vmem:[#allocation6 + $0x64] ss:$8 sps:$4 sm:$0xff]  }
  0x83   :  { %902 = vmatprep.subr.bf16.mxu1 %v1752_v59  ;;  %v1846_v59 = vld [vmem:[#allocation6 + $0x60] ss:$8 sps:$4 sm:$0xff]  }
  0x85   :  { %860 = vmatpush2.bf16.msra.mxu0 %v1751_v60  ;;  %v1851_v60 = vld [vmem:[#allocation6 + $0x54] ss:$8 sps:$4 sm:$0xff]  }
  0x86   :  { %861 = vmatprep.subr.bf16.mxu0 %v1755_v61  ;;  %903 = vmatpush2.bf16.msra.mxu1 %v1754_v62  ;;  %v1849_v61 = vld [vmem:[#allocation6 + $0x50] ss:$8 sps:$4 sm:$0xff]   ;;  %v1854_v62 = vld [vmem:[#allocation6 + $0x44] ss:$8 sps:$4 sm:$0xff]  }
  0x87   :  { %904 = vmatprep.subr.bf16.mxu1 %v1758_v63  ;;  %v1852_v63 = vld [vmem:[#allocation6 + $0x40] ss:$8 sps:$4 sm:$0xff]  }
  0x89   :  { %862 = vmatpush2.bf16.msra.mxu0 %v1757_v0  ;;  %v1857_v0 = vld [vmem:[#allocation6 + $0x34] ss:$8 sps:$4 sm:$0xff]  }
  0x8a   :  { %917 = vmatprep.subr.bf16.mxu0 %v1766_v1  ;;  %905 = vmatpush2.bf16.msra.mxu1 %v1763_v2  ;;  %v1855_v1 = vld [vmem:[#allocation6 + $0x30] ss:$8 sps:$4 sm:$0xff]   ;;  %v1860_v2 = vld [vmem:[#allocation6 + $0x24] ss:$8 sps:$4 sm:$0xff]  }
  0x8b   :  { %960 = vmatprep.subr.bf16.mxu1 %v1793_v4  ;;  %v1863_v4 = vld [vmem:[#allocation6 + $0x14] ss:$8 sps:$4 sm:$0xff]  }
  0x8c   :  { %864 = vmatmul.mubr.bf16.vlgmr.msra.gmra.mxu0 %v1760_v3  ;;  %v1858_v3 = vld [vmem:[#allocation6 + $0x20] ss:$8 sps:$4 sm:$0xff]  }
  0x8d   :  { %918 = vmatpush1.bf16.msra.mxu0 %v1764_v5  ;;  %907 = vmatmul.mubr.bf16.vlgmr.msra.gmra.mxu1 %v1767_v6  ;;  %v1861_v5 = vld [vmem:[#allocation6 + $0x10] ss:$8 sps:$4 sm:$0xff]   ;;  %v1866_v6 = vld [vmem:[#allocation6 + $0x4] ss:$8 sps:$4 sm:$0xff]  }
  0x8e   :  { %919 = vmatprep.subr.bf16.mxu0 %v1772_v7  ;;  %961 = vmatpush1.bf16.msra.mxu1 %v1791_v8  ;;  %v1864_v7 = vld [vmem:[#allocation6] ss:$8 sps:$4 sm:$0xff]   ;;  %v1869_v8 = vld [vmem:[#allocation6 + $0xf4] ss:$8 sps:$4 sm:$0xff]  }
  0x8f   :  { %992 = vmatprep.mubr.bf16.mxu1 %v2045_v13  ;;  %962 = vmatprep.subr.bf16.mxu1 %v1799_v9  ;;  %v1867_v9 = vld [vmem:[#allocation6 + $0xf0] ss:$8 sps:$4 sm:$0xff]  }
  0x90   :  { %949 = vmatprep.mubr.bf16.mxu0 %v1842_v26  ;;  %v1873_v13 = vld [vmem:[#allocation6 + $0xd0] ss:$8 sps:$4 sm:$0xff]  }
  0x91   :  { %920 = vmatpush1.bf16.msra.mxu0 %v1770_v10  ;;  %v1872_v10 = vld [vmem:[#allocation6 + $0xe4] ss:$8 sps:$4 sm:$0xff]   ;;  %v1893_v26 = vld [vmem:[#allocation9 + $0x70] sm:$0xff]  }
  0x92   :  { %921 = vmatprep.subr.bf16.mxu0 %v1775_v11  ;;  %963 = vmatpush1.bf16.msra.mxu1 %v1797_v12  ;;  %v1870_v11 = vld [vmem:[#allocation6 + $0xe0] ss:$8 sps:$4 sm:$0xff]   ;;  %v1875_v12 = vld [vmem:[#allocation6 + $0xd4] ss:$8 sps:$4 sm:$0xff]  }
  0x93   :  { %964 = vmatprep.subr.bf16.mxu1 %v1805_v14  ;;  %v1878_v14 = vld [vmem:[#allocation6 + $0xc4] ss:$8 sps:$4 sm:$0xff]  }
  0x95   :  { %922 = vmatpush1.bf16.msra.mxu0 %v1773_v15  ;;  %v1876_v15 = vld [vmem:[#allocation6 + $0xc0] ss:$8 sps:$4 sm:$0xff]  }
  0x96   :  { %923 = vmatprep.subr.bf16.mxu0 %v1778_v16  ;;  %965 = vmatpush1.bf16.msra.mxu1 %v1803_v17  ;;  %v1881_v16 = vld [vmem:[#allocation6 + $0xb4] ss:$8 sps:$4 sm:$0xff]   ;;  %v1879_v17 = vld [vmem:[#allocation6 + $0xb0] ss:$8 sps:$4 sm:$0xff]  }
  0x97   :  { %966 = vmatprep.subr.bf16.mxu1 %v1811_v18  ;;  %v1884_v18 = vld [vmem:[#allocation6 + $0xa4] ss:$8 sps:$4 sm:$0xff]  }
  0x99   :  { %924 = vmatpush1.bf16.msra.mxu0 %v1776_v19  ;;  %v1882_v19 = vld [vmem:[#allocation6 + $0xa0] ss:$8 sps:$4 sm:$0xff]  }
  0x9a   :  { %925 = vmatprep.subr.bf16.mxu0 %v1781_v20  ;;  %967 = vmatpush1.bf16.msra.mxu1 %v1809_v22  ;;  %v1887_v20 = vld [vmem:[#allocation6 + $0x94] ss:$8 sps:$4 sm:$0xff]   ;;  %v1888_v22 = vld [vmem:[#allocation6 + $0x80] ss:$8 sps:$4 sm:$0xff]  }
  0x9b   :  { %968 = vmatprep.subr.bf16.mxu1 %v1817_v23  ;;  %v1890_v23 = vld [vmem:[#allocation6 + $0x84] ss:$8 sps:$4 sm:$0xff]  }
  0x9d   :  { %926 = vmatpush1.bf16.msra.mxu0 %v1779_v21  ;;  %v1885_v21 = vld [vmem:[#allocation6 + $0x90] ss:$8 sps:$4 sm:$0xff]  }
  0x9e   :  { %927 = vmatprep.subr.bf16.mxu0 %v1784_v24  ;;  %969 = vmatpush1.bf16.msra.mxu1 %v1815_v25  ;;  %v1891_v24 = vld [vmem:[#allocation9 + $0x78] sm:$0xff]  }
  0x9f   :  { %970 = vmatprep.subr.bf16.mxu1 %v1823_v27  ;;  %v1892_v25 = vld [vmem:[#allocation9 + $0x38] sm:$0xff]   ;;  %v1894_v27 = vld [vmem:[#allocation9 + $0x30] sm:$0xff]  }
  0xa1   :  { %928 = vmatpush1.bf16.msra.mxu0 %v1782_v28  ;;  %v1895_v28 = vld [vmem:[#allocation9 + $0x68] sm:$0xff]  }
  0xa2   :  { %929 = vmatprep.subr.bf16.mxu0 %v1787_v29  ;;  %971 = vmatpush1.bf16.msra.mxu1 %v1821_v30  ;;  %v1896_v29 = vld [vmem:[#allocation9 + $0x28] sm:$0xff]   ;;  %v1897_v30 = vld [vmem:[#allocation9 + $0x60] sm:$0xff]  }
  0xa3   :  { %972 = vmatprep.subr.bf16.mxu1 %v1829_v31  ;;  %v1898_v31 = vld [vmem:[#allocation9 + $0x20] sm:$0xff]  }
  0xa5   :  { %930 = vmatpush1.bf16.msra.mxu0 %v1785_v32  ;;  %v1899_v32 = vld [vmem:[#allocation9 + $0x58] sm:$0xff]  }
  0xa6   :  { %931 = vmatprep.subr.bf16.mxu0 %v1790_v33  ;;  %973 = vmatpush1.bf16.msra.mxu1 %v1827_v34  ;;  %v225_v33 = vlaneseq }
  0xa7   :  { %974 = vmatprep.subr.bf16.mxu1 %v1835_v35 }
  0xa8   :  { %v2125_v35 = vshrl.u32 %v225_v33, 7 }
  0xa9   :  { %932 = vmatpush1.bf16.msra.mxu0 %v1788_v36 }
  0xaa   :  { %933 = vmatprep.subr.bf16.mxu0 %v1796_v37  ;;  %975 = vmatpush1.bf16.msra.mxu1 %v1833_v38  ;;  %v227_v38 = vsub.s32 0, %v2125_v35 }
  0xab   :  { %1221 = vmatprep.subr.bf16.mxu1 %v1845_v57 }
  0xad   :  { %934 = vmatpush2.bf16.msra.mxu0 %v1794_v39  ;;  %993 = vmatmul.mubr.bf16.vlgmr.msra.gmra.mxu1 %v1839_v41  ;;  %v231_v39 = vsub.s32 1, %v2125_v35 }
  0xae   :  { %935 = vmatprep.subr.bf16.mxu0 %v1802_v40  ;;  %1222 = vmatpush1.bf16.msra.mxu1 %v1843_v56  ;;  %v223_v40 = vld [vmem:[#allocation4] sm:$0x3] }
  0xaf   :  { %1223 = vmatprep.subr.bf16.mxu1 %v1848_v58 }
  0xb1   :  { %936 = vmatpush2.bf16.msra.mxu0 %v1800_v42 }
  0xb2   :  { %937 = vmatprep.subr.bf16.mxu0 %v1808_v43  ;;  %1224 = vmatpush1.bf16.msra.mxu1 %v1846_v59  ;;  %v228_v43 = vrot.slane %v223_v40, %v227_v38 }
  0xb3   :  { %1225 = vmatprep.subr.bf16.mxu1 %v1851_v60 }
  0xb5   :  { %938 = vmatpush2.bf16.msra.mxu0 %v1806_v44  ;;  %v232_v44 = vrot.slane %v223_v40, %v231_v39 }
  0xb6   :  { %939 = vmatprep.subr.bf16.mxu0 %v1814_v45  ;;  %1226 = vmatpush1.bf16.msra.mxu1 %v1849_v61 }
  0xb7   :  { %1227 = vmatprep.subr.bf16.mxu1 %v1854_v62 }
  0xb9   :  { %940 = vmatpush2.bf16.msra.mxu0 %v1812_v46 }
  0xba   :  { %941 = vmatprep.subr.bf16.mxu0 %v1820_v47  ;;  %1228 = vmatpush1.bf16.msra.mxu1 %v1852_v63 }
  0xbb   :  { %1229 = vmatprep.subr.bf16.mxu1 %v1857_v0 }
  0xbd   :  { %942 = vmatpush2.bf16.msra.mxu0 %v1818_v48 }
  0xbe   :  { %943 = vmatprep.subr.bf16.mxu0 %v1826_v49  ;;  %1230 = vmatpush1.bf16.msra.mxu1 %v1855_v1 }
  0xbf   :  { %1231 = vmatprep.subr.bf16.mxu1 %v1860_v2 }
  0xc1   :  { %944 = vmatpush2.bf16.msra.mxu0 %v1824_v50 }
  0xc2   :  { %945 = vmatprep.subr.bf16.mxu0 %v1832_v51  ;;  %1232 = vmatpush1.bf16.msra.mxu1 %v1858_v3 }
  0xc3   :  { %1233 = vmatprep.subr.bf16.mxu1 %v1863_v4 }
  0xc5   :  { %946 = vmatpush2.bf16.msra.mxu0 %v1830_v52 }
  0xc6   :  { %947 = vmatprep.subr.bf16.mxu0 %v1838_v53  ;;  %1234 = vmatpush1.bf16.msra.mxu1 %v1861_v5 }
  0xc7   :  { %1235 = vmatprep.subr.bf16.mxu1 %v1866_v6 }
  0xc9   :  { %948 = vmatpush2.bf16.msra.mxu0 %v1836_v54 }
  0xca   :  { %1236 = vmatpush1.bf16.msra.mxu1 %v1864_v7  ;;  %1632 = vmatprep.subr.bf16.mxu0 %v1891_v24  ;;  %v1906_v24 = vld [vmem:[#allocation9] sm:$0xff]  }
  0xcb   :  { %1237 = vmatprep.subr.bf16.mxu1 %v1869_v8 }
  0xcc   :  { %950 = vmatmul.mubr.bf16.vlgmr.msra.gmra.mxu0 %v1840_v55 }
  0xcd   :  { %1633 = vmatpush3.bf16.msra.mxu0 %v1892_v25  ;;  %v1049_v25 = vld [vmem:[#allocation7] sm:$0x3] }
  0xce   :  { %1238 = vmatpush2.bf16.msra.mxu1 %v1867_v9  ;;  %1634 = vmatprep.subr.bf16.mxu0 %v1893_v26  ;;  %v1058_v26 = vrot.slane %v1049_v25, %v231_v39 }
  0xcf   :  { %1239 = vmatprep.subr.bf16.mxu1 %v1872_v10 }
  0xd1   :  { %1635 = vmatpush3.bf16.msra.mxu0 %v1894_v27  ;;  %v1054_v27 = vrot.slane %v1049_v25, %v227_v38 }
  0xd2   :  { %1240 = vmatpush2.bf16.msra.mxu1 %v1870_v11  ;;  %1636 = vmatprep.subr.bf16.mxu0 %v1895_v28 }
  0xd3   :  { %1241 = vmatprep.subr.bf16.mxu1 %v1875_v12 }
  0xd5   :  { %1637 = vmatpush3.bf16.msra.mxu0 %v1896_v29 }
  0xd6   :  { %1242 = vmatpush2.bf16.msra.mxu1 %v1873_v13  ;;  %1638 = vmatprep.subr.bf16.mxu0 %v1897_v30 }
  0xd7   :  { %1243 = vmatprep.subr.bf16.mxu1 %v1878_v14 }
  0xd9   :  { %1639 = vmatpush3.bf16.msra.mxu0 %v1898_v31 }
  0xda   :  { %1244 = vmatpush2.bf16.msra.mxu1 %v1876_v15  ;;  %1640 = vmatprep.subr.bf16.mxu0 %v1899_v32 }
  0xdb   :  { %1245 = vmatprep.subr.bf16.mxu1 %v1881_v16 }
  0xde   :  { %1246 = vmatpush2.bf16.msra.mxu1 %v1879_v17 }
  0xdf   :  { %1247 = vmatprep.subr.bf16.mxu1 %v1884_v18  ;;  %v1900_v18 = vld [vmem:[#allocation9 + $0x18] sm:$0xff]  }
  0xe0   :  { %1641 = vmatpush3.bf16.msra.mxu0 %v1900_v18 }
  0xe2   :  { %1248 = vmatpush2.bf16.msra.mxu1 %v1882_v19  ;;  %v1901_v19 = vld [vmem:[#allocation9 + $0x50] sm:$0xff]  }
  0xe3   :  { %1249 = vmatprep.subr.bf16.mxu1 %v1887_v20  ;;  %v1902_v20 = vld [vmem:[#allocation9 + $0x10] sm:$0xff]   ;;  %1642 = vmatprep.subr.bf16.mxu0 %v1901_v19 }
  0xe4   :  { %1643 = vmatpush3.bf16.msra.mxu0 %v1902_v20 }
  0xe6   :  { %1250 = vmatpush2.bf16.msra.mxu1 %v1885_v21  ;;  %v1903_v21 = vld [vmem:[#allocation9 + $0x48] sm:$0xff]  }
  0xe7   :  { %1251 = vmatprep.subr.bf16.mxu1 %v1890_v23  ;;  %1644 = vmatprep.subr.bf16.mxu0 %v1903_v21  ;;  %v1905_v23 = vld [vmem:[#allocation9 + $0x40] sm:$0xff]  }
  0xea   :  { %1252 = vmatpush2.bf16.msra.mxu1 %v1888_v22  ;;  %v1904_v22 = vld [vmem:[#allocation9 + $0x8] sm:$0xff]  }
  0xeb   :  { %1645 = vmatpush3.bf16.msra.mxu0 %v1904_v22 }
  0xec   :  { %1646 = vmatprep.subr.bf16.mxu0 %v1905_v23 }
  0xef   :  { %1647 = vmatpush3.bf16.msra.mxu0 %v1906_v24 }
 0x14c   :  { %v865_v36 = vpop.f32.mrf.mxu0 }
 0x14d   :  { %v908_v34 = vpop.f32.mrf.mxu1  ;;  %v866_v47 = vadd.f32 %v865_v36, %v228_v43 }
 0x14e   :  { %v867_v41 = vpop.f32.mrf.mxu0 }
 0x14f   :  { %v910_v37 = vpop.f32.mrf.mxu1  ;;  %v868_v48 = vadd.f32 %v867_v41, %v232_v44  ;;  %v909_v53 = vadd.f32 %v908_v34, %v866_v47  ;;  %v1615_v47 = vld [vmem:[#allocation10] ss:$0 sm:$0xff] }
 0x150   :  { %v869_v45 = vpop.f32.mrf.mxu0 }
 0x151   :  { %v912_v42 = vpop.f32.mrf.mxu1  ;;  %v870_v51 = vadd.f32 %v869_v45, %v228_v43  ;;  %v911_v54 = vadd.f32 %v910_v37, %v868_v48 }
 0x152   :  { %v871_v50 = vpop.f32.mrf.mxu0 }
 0x153   :  { %v914_v46 = vpop.f32.mrf.mxu1  ;;  %v872_v56 = vadd.f32 %v871_v50, %v232_v44  ;;  %v913_v58 = vadd.f32 %v912_v42, %v870_v51 }
 0x155   :  { %v915_v0 = vadd.f32 %v914_v46, %v872_v56 }
 0x16d   :  { %v994_v49 = vpop.f32.mrf.mxu1 }
 0x16f   :  { %v996_v55 = vpop.f32.mrf.mxu1 }
 0x171   :  { %v998_v62 = vpop.f32.mrf.mxu1 }
 0x173   :  { %v1000_v6 = vpop.f32.mrf.mxu1 }
 0x18c   :  { %v951_v52 = vpop.f32.mrf.mxu0 }
 0x18d   :  { %v952_v59 = vadd.f32 %v951_v52, %v909_v53 }
 0x18e   :  { %v953_v57 = vpop.f32.mrf.mxu0 }
 0x18f   :  { %v954_v60 = vadd.f32 %v953_v57, %v911_v54  ;;  %v995_v3 = vadd.f32 %v994_v49, %v952_v59 }
 0x190   :  { %v955_v61 = vpop.f32.mrf.mxu0 }
 0x191   :  { %v956_v63 = vadd.f32 %v955_v61, %v913_v58  ;;  %v997_v1 = vadd.f32 %v996_v55, %v954_v60  ;;  %v1007_v10 = vmul.f32 0.2, %v995_v3  ;;  %vm1003_vm2 = vcmp.ge.f32.partialorder %v995_v3, 0.0 }
 0x192   :  { %v957_v2 = vpop.f32.mrf.mxu0 }
 0x193   :  { %v999_v4 = vadd.f32 %v998_v62, %v956_v63  ;;  %v958_v5 = vadd.f32 %v957_v2, %v915_v0  ;;  %v1008_v8 = vmul.f32 0.2, %v997_v1  ;;  %vm1004_vm1 = vcmp.ge.f32.partialorder %v997_v1, 0.0 }
 0x194   :  { %v1011_v15 = vsel %vm1003_vm2, %v995_v3, %v1007_v10 }
 0x195   :  { %v1009_v7 = vmul.f32 0.2, %v999_v4  ;;  %vm1005_vm0 = vcmp.ge.f32.partialorder %v999_v4, 0.0  ;;  %v1001_v9 = vadd.f32 %v1000_v6, %v958_v5  ;;  %v1012_v13 = vsel %vm1004_vm1, %v997_v1, %v1008_v8 }
 0x197   :  { %vm1006_vm3 = vcmp.ge.f32.partialorder %v1001_v9, 0.0  ;;  %v1010_v11 = vmul.f32 0.2, %v1001_v9  ;;  %v1013_v12 = vsel %vm1005_vm0, %v999_v4, %v1009_v7 }
 0x198   :  { %v1015_v17 = vpack.c.bf16 %v1013_v12, %v1011_v15 }
 0x199   :  { %v1014_v14 = vsel %vm1006_vm3, %v1001_v9, %v1010_v11 }
 0x19a   :  { %v1016_v16 = vpack.c.bf16 %v1014_v14, %v1012_v13 }
 0x19c   :  { %1253 = vmatprep.mubr.bf16.mxu1 %v1016_v16 }
 0x19d   :  { %1254 = vmatmul.mubr.bf16.vlgmr.msra.gmra.mxu1 %v1015_v17 }
 0x25d   :  { %v1255_v28 = vpop.f32.mrf.mxu1 }
 0x25e   :  { %v1256_v31 = vadd.f32 %v1255_v28, %v1054_v27 }
 0x25f   :  { %v1257_v29 = vpop.f32.mrf.mxu1 }
 0x260   :  { %v1258_v30 = vadd.f32 %v1257_v29, %v1058_v26  ;;  %v1268_v41 = vmul.f32 0.2, %v1256_v31  ;;  %vm1264_vm6 = vcmp.ge.f32.partialorder %v1256_v31, 0.0 }
 0x261   :  { %v1259_v32 = vpop.f32.mrf.mxu1 }
 0x262   :  { %v1260_v33 = vadd.f32 %v1259_v32, %v1054_v27  ;;  %v1269_v36 = vmul.f32 0.2, %v1258_v30  ;;  %vm1265_vm5 = vcmp.ge.f32.partialorder %v1258_v30, 0.0  ;;  %v1272_v38 = vsel %vm1264_vm6, %v1256_v31, %v1268_v41 }
 0x263   :  { %v1261_v34 = vpop.f32.mrf.mxu1 }
 0x264   :  { %vm1266_vm4 = vcmp.ge.f32.partialorder %v1260_v33, 0.0  ;;  %v1270_v37 = vmul.f32 0.2, %v1260_v33  ;;  %v1262_v40 = vadd.f32 %v1261_v34, %v1058_v26  ;;  %v1273_v43 = vsel %vm1265_vm5, %v1258_v30, %v1269_v36 }
 0x266   :  { %vm1267_vm7 = vcmp.ge.f32.partialorder %v1262_v40, 0.0  ;;  %v1271_v42 = vmul.f32 0.2, %v1262_v40  ;;  %v1274_v39 = vsel %vm1266_vm4, %v1260_v33, %v1270_v37 }
 0x267   :  { %v1276_v45 = vpack.c.bf16 %v1274_v39, %v1272_v38 }
 0x268   :  { %v1275_v35 = vsel %vm1267_vm7, %v1262_v40, %v1271_v42 }
 0x269   :  { %v1277_v44 = vpack.c.bf16 %v1275_v35, %v1273_v43 }
 0x26b   :  { %1445 = vmatprep.mubr.bf16.mxu0 %v1277_v44 }
 0x26c   :  { %1446 = vmatmul.mubr.bf16.vlgmr.msra.gmra.mxu0 %v1276_v45 }
 0x32c   :  { %v1648_v46 = vpop.f32.mrf.mxu0 }
 0x32e   :  { %v1649_v48 = vpop.f32.mrf.mxu0 }
 0x32f   :  { %v1650_v49 = vadd.f32 %v1649_v48, %v1648_v46 }
 0x330   :  { %v1651_v50 = vpop.f32.mrf.mxu0 }
 0x331   :  { %v1448_v51 = vadd.f32 %v1650_v49, %v1615_v47 }
 0x332   :  { %v1652_v52 = vpop.f32.mrf.mxu0 }
 0x333   :  { %1454 = vst [vmem:[%s2150_s7] sm:$0xff] %v1448_v51  ;;  %v1653_v53 = vadd.f32 %v1652_v52, %v1651_v50 }
 0x335   :  { %v1451_v54 = vadd.f32 %v1653_v53, %v1615_v47 }
 0x337   :  { %1455 = vst [vmem:[%s2150_s7 + $0x8] sm:$0xff] %v1451_v54 }
 0x338   :  { %1460 = vsyncpa [#allocation3], 1 }
 0x339   :  { %1461 = vsyncpa [#allocation5], 1 }
 0x33a   :  { %1462 = vsyncpa [#allocation8], 1 }
 0x33b   :  { %1463 = vsyncpa [#allocation11], 1 }

// kernel: dann_forward.7
= control target key start
LH: loop header
LB: loop body
LE: loop exit
PB: predicated region body
PF: predicated region fallthrough
CT: control target
= control target key end

     0   :  { %s819_s12 = smov 0   ;;  %s963_s0 = inlined_call_operand.vmem [shape: bf16[512,128], index: 0, kind: input, shape index: {}]   ;;  %s964_s1 = inlined_call_operand.vmem [shape: bf16[128,256], index: 1, kind: input, shape index: {}]   ;;  %s965_s2 = inlined_call_operand.vmem [shape: f32[1,256], index: 2, kind: input, shape index: {}]   ;;  %s966_s3 = inlined_call_operand.vmem [shape: bf16[512,256], index: 3, kind: output, shape index: {}]  }
   0x1 LB: > { %s664_s13 = sadd.s32 4294967295, %s796_s12   ;;  %p668_p0 = scmp.ge.s32.totalorder %s796_s12, 1  ;;  %s796_s12 = sphi %s819_s12, %s13_s12  }
   0x2   : > { %p138_p1 = scmp.lt.s32.totalorder %s796_s12, 5 }
   0x4   : > { %p139_p2 = pnand %p668_p0, %p138_p1 }
   0x5   : > { %s669_s16 = sshll.u32 (!%p139_p2), %s664_s13, 4 }
   0x6   : > { %142 = sbr.rel (%p139_p2) target bundleno = 275 (0x113), region = 32  ;;  %p164_p3 = scmp.lt.s32.totalorder (!%p139_p2), %s669_s16, 63 }
   0xb   : > { %v758_v0 = vld [vmem:[%s964_s1 + $0x74] ss:$8 sps:$4 sm:$0xff]   ;;  %v760_v1 = vld [vmem:[%s964_s1 + $0x70] ss:$8 sps:$4 sm:$0xff]   ;;  %v798_v2 = vmov 0   ;;  %s968_s16 = smov (!%p164_p3, %s669_s16), 63  ;;  %v211_v25 = vlaneseq }
   0xc   : > { %381 = vmatprep.mubr.bf16.mxu0 %v798_v2  ;;  %421 = vmatprep.mubr.bf16.mxu1 %v798_v2  ;;  %v761_v3 = vld [vmem:[%s964_s1 + $0x64] ss:$8 sps:$4 sm:$0xff]   ;;  %v763_v4 = vld [vmem:[%s964_s1 + $0x60] ss:$8 sps:$4 sm:$0xff]   ;;  %v764_v5 = vld [vmem:[%s964_s1 + $0x54] ss:$8 sps:$4 sm:$0xff]  }
   0xd   : > { %349 = vmatprep.subr.bf16.mxu0 %v758_v0  ;;  %733 = vmatprep.subr.bf16.mxu1 %v758_v0  ;;  %s670_s25 = sshll.u32 %s968_s16, 2  ;;  %v766_v6 = vld [vmem:[%s964_s1 + $0x50] ss:$8 sps:$4 sm:$0xff]   ;;  %v767_v7 = vld [vmem:[%s964_s1 + $0x44] ss:$8 sps:$4 sm:$0xff]   ;;  %v212_v26 = vshrl.u32 %v211_v25, 7 }
   0xe   : > { %350 = vmatpush1.bf16.msra.mxu0 %v760_v1  ;;  %741 = vmatpush1.bf16.msra.mxu1 %v760_v1  ;;  %s856_s5 = scalar_lea.vmem %s963_s0, %s670_s25  ;;  %v769_v8 = vld [vmem:[%s964_s1 + $0x40] ss:$8 sps:$4 sm:$0xff]   ;;  %v770_v9 = vld [vmem:[%s964_s1 + $0x34] ss:$8 sps:$4 sm:$0xff]   ;;  %v772_v10 = vld [vmem:[%s964_s1 + $0x30] ss:$8 sps:$4 sm:$0xff]  }
   0xf   : > { %351 = vmatprep.subr.bf16.mxu0 %v761_v3  ;;  %734 = vmatprep.subr.bf16.mxu1 %v761_v3  ;;  %v773_v11 = vld [vmem:[%s964_s1 + $0x24] ss:$8 sps:$4 sm:$0xff]   ;;  %v775_v12 = vld [vmem:[%s964_s1 + $0x20] ss:$8 sps:$4 sm:$0xff]   ;;  %v776_v13 = vld [vmem:[%s964_s1 + $0x14] ss:$8 sps:$4 sm:$0xff]  }
  0x10   : > { %v778_v14 = vld [vmem:[%s964_s1 + $0x10] ss:$8 sps:$4 sm:$0xff]   ;;  %v779_v15 = vld [vmem:[%s964_s1 + $0x4] ss:$8 sps:$4 sm:$0xff]   ;;  %v781_v16 = vld [vmem:[%s964_s1] ss:$8 sps:$4 sm:$0xff]  }
  0x11   : > { %v782_v17 = vld [vmem:[%s856_s5] sm:$0xff]   ;;  %v784_v19 = vld [vmem:[%s856_s5 + $0x8] sm:$0xff]   ;;  %v786_v21 = vld [vmem:[%s856_s5 + $0x10] sm:$0xff]   ;;  %v213_v27 = vsub.s32 0, %v212_v26  ;;  %v217_v29 = vsub.s32 1, %v212_v26  ;;  %s716_s28 = sshll.u32 %s968_s16, 3 }
  0x12   : > { %352 = vmatpush1.bf16.msra.mxu0 %v763_v4  ;;  %742 = vmatpush1.bf16.msra.mxu1 %v763_v4  ;;  %v783_v18 = vld [vmem:[%s856_s5 + $0x20] sm:$0xff]   ;;  %v785_v20 = vld [vmem:[%s856_s5 + $0x28] sm:$0xff]   ;;  %v787_v22 = vld [vmem:[%s856_s5 + $0x30] sm:$0xff]   ;;  %s914_s4 = scalar_lea.vmem %s966_s3, %s716_s28 }
  0x13   : > { %353 = vmatprep.subr.bf16.mxu0 %v764_v5  ;;  %735 = vmatprep.subr.bf16.mxu1 %v764_v5  ;;  %v788_v23 = vld [vmem:[%s856_s5 + $0x18] sm:$0xff]   ;;  %v209_v28 = vld [vmem:[%s965_s2] sm:$0x3] }
  0x14   : > { %v789_v24 = vld [vmem:[%s856_s5 + $0x38] sm:$0xff]   ;;  %v902_v30 = vrot.slane %v209_v28, %v213_v27  ;;  %v904_v31 = vrot.slane %v209_v28, %v217_v29 }
  0x16   : > { %354 = vmatpush1.bf16.msra.mxu0 %v766_v6  ;;  %743 = vmatpush1.bf16.msra.mxu1 %v766_v6 }
  0x17   : > { %355 = vmatprep.subr.bf16.mxu0 %v767_v7  ;;  %736 = vmatprep.subr.bf16.mxu1 %v767_v7 }
  0x1a   : > { %356 = vmatpush1.bf16.msra.mxu0 %v769_v8  ;;  %744 = vmatpush1.bf16.msra.mxu1 %v769_v8 }
  0x1b   : > { %357 = vmatprep.subr.bf16.mxu0 %v770_v9  ;;  %737 = vmatprep.subr.bf16.mxu1 %v770_v9 }
  0x1e   : > { %358 = vmatpush1.bf16.msra.mxu0 %v772_v10  ;;  %745 = vmatpush1.bf16.msra.mxu1 %v772_v10 }
  0x1f   : > { %359 = vmatprep.subr.bf16.mxu0 %v773_v11  ;;  %738 = vmatprep.subr.bf16.mxu1 %v773_v11 }
  0x22   : > { %360 = vmatpush1.bf16.msra.mxu0 %v775_v12  ;;  %746 = vmatpush1.bf16.msra.mxu1 %v775_v12 }
  0x23   : > { %361 = vmatprep.subr.bf16.mxu0 %v776_v13  ;;  %739 = vmatprep.subr.bf16.mxu1 %v776_v13 }
  0x26   : > { %362 = vmatpush1.bf16.msra.mxu0 %v778_v14  ;;  %747 = vmatpush1.bf16.msra.mxu1 %v778_v14 }
  0x27   : > { %363 = vmatprep.subr.bf16.mxu0 %v779_v15  ;;  %740 = vmatprep.subr.bf16.mxu1 %v779_v15 }
  0x2a   : > { %364 = vmatpush1.bf16.msra.mxu0 %v781_v16  ;;  %748 = vmatpush1.bf16.msra.mxu1 %v781_v16 }
  0x2d   : > { %382 = vmatmul.mubr.bf16.vlgmr.msra.gmra.mxu0 %v782_v17  ;;  %422 = vmatmul.mubr.bf16.vlgmr.msra.gmra.mxu1 %v783_v18 }
  0x2e   : > { %391 = vmatprep.mubr.bf16.mxu0 %v798_v2  ;;  %431 = vmatprep.mubr.bf16.mxu1 %v798_v2 }
  0x35   : > { %392 = vmatmul.mubr.bf16.gmra.mxu0 %v784_v19  ;;  %432 = vmatmul.mubr.bf16.gmra.mxu1 %v785_v20 }
  0x36   : > { %401 = vmatprep.mubr.bf16.mxu0 %v798_v2  ;;  %441 = vmatprep.mubr.bf16.mxu1 %v798_v2 }
  0x3d   : > { %402 = vmatmul.mubr.bf16.gmra.mxu0 %v786_v21  ;;  %442 = vmatmul.mubr.bf16.gmra.mxu1 %v787_v22 }
  0x3e   : > { %411 = vmatprep.mubr.bf16.mxu0 %v798_v2  ;;  %451 = vmatprep.mubr.bf16.mxu1 %v798_v2 }
  0x45   : > { %412 = vmatmul.mubr.bf16.gmra.mxu0 %v788_v23  ;;  %452 = vmatmul.mubr.bf16.gmra.mxu1 %v789_v24 }
  0xed   : > { %v383_v32 = vpop.f32.mrf.mxu0  ;;  %v423_v33 = vpop.f32.mrf.mxu1 }
  0xee   : > { %v384_v34 = vadd.f32 %v383_v32, %v902_v30  ;;  %v424_v35 = vadd.f32 %v423_v33, %v902_v30 }
  0xef   : > { %v385_v36 = vpop.f32.mrf.mxu0  ;;  %v425_v37 = vpop.f32.mrf.mxu1 }
  0xf0   : > { %v386_v38 = vadd.f32 %v385_v36, %v904_v31  ;;  %v426_v39 = vadd.f32 %v425_v37, %v904_v31  ;;  %v462_v42 = vmax.f32 %v384_v34, 0.0  ;;  %v478_v43 = vmax.f32 %v424_v35, 0.0 }
  0xf1   : > { %v387_v40 = vpop.f32.mrf.mxu0  ;;  %v427_v41 = vpop.f32.mrf.mxu1 }
  0xf2   : > { %v463_v44 = vmax.f32 %v386_v38, 0.0  ;;  %v479_v45 = vmax.f32 %v426_v39, 0.0  ;;  %v388_v46 = vadd.f32 %v387_v40, %v902_v30  ;;  %v428_v47 = vadd.f32 %v427_v41, %v902_v30 }
  0xf3   : > { %v389_v48 = vpop.f32.mrf.mxu0  ;;  %v429_v49 = vpop.f32.mrf.mxu1 }
  0xf4   : > { %v717_v50 = vpack.c.bf16 %v463_v44, %v462_v42  ;;  %v725_v51 = vpack.c.bf16 %v479_v45, %v478_v43  ;;  %v390_v52 = vadd.f32 %v389_v48, %v904_v31  ;;  %v430_v53 = vadd.f32 %v429_v49, %v904_v31 }
  0xf5   : > { %v393_v54 = vpop.f32.mrf.mxu0  ;;  %v433_v55 = vpop.f32.mrf.mxu1  ;;  %v464_v58 = vmax.f32 %v388_v46, 0.0  ;;  %v480_v59 = vmax.f32 %v428_v47, 0.0 }
  0xf6   : > { %590 = vst [vmem:[%s914_s4] sm:$0xff] %v717_v50  ;;  %598 = vst [vmem:[%s914_s4 + $0x40] sm:$0xff] %v725_v51  ;;  %v394_v56 = vadd.f32 %v393_v54, %v902_v30  ;;  %v434_v57 = vadd.f32 %v433_v55, %v902_v30  ;;  %v465_v60 = vmax.f32 %v390_v52, 0.0  ;;  %v481_v61 = vmax.f32 %v430_v53, 0.0 }
  0xf7   : > { %v395_v62 = vpop.f32.mrf.mxu0  ;;  %v435_v63 = vpop.f32.mrf.mxu1 }
  0xf8   : > { %v396_v0 = vadd.f32 %v395_v62, %v904_v31  ;;  %v436_v1 = vadd.f32 %v435_v63, %v904_v31  ;;  %v718_v2 = vpack.c.bf16 %v465_v60, %v464_v58  ;;  %v726_v3 = vpack.c.bf16 %v481_v61, %v480_v59 }
  0xf9   : > { %v397_v4 = vpop.f32.mrf.mxu0  ;;  %v437_v5 = vpop.f32.mrf.mxu1  ;;  %v466_v6 = vmax.f32 %v394_v56, 0.0  ;;  %v482_v7 = vmax.f32 %v434_v57, 0.0 }
  0xfa   : > { %v467_v8 = vmax.f32 %v396_v0, 0.0  ;;  %v483_v9 = vmax.f32 %v436_v1, 0.0  ;;  %591 = vst [vmem:[%s914_s4 + $0x8] sm:$0xff] %v718_v2  ;;  %599 = vst [vmem:[%s914_s4 + $0x48] sm:$0xff] %v726_v3  ;;  %v398_v10 = vadd.f32 %v397_v4, %v902_v30  ;;  %v438_v11 = vadd.f32 %v437_v5, %v902_v30 }
  0xfb   : > { %v399_v12 = vpop.f32.mrf.mxu0  ;;  %v439_v13 = vpop.f32.mrf.mxu1 }
  0xfc   : > { %v719_v14 = vpack.c.bf16 %v467_v8, %v466_v6  ;;  %v727_v15 = vpack.c.bf16 %v483_v9, %v482_v7  ;;  %v400_v16 = vadd.f32 %v399_v12, %v904_v31  ;;  %v440_v17 = vadd.f32 %v439_v13, %v904_v31 }
  0xfd   : > { %v403_v18 = vpop.f32.mrf.mxu0  ;;  %v443_v19 = vpop.f32.mrf.mxu1  ;;  %v468_v22 = vmax.f32 %v398_v10, 0.0  ;;  %v484_v23 = vmax.f32 %v438_v11, 0.0 }
  0xfe   : > { %592 = vst [vmem:[%s914_s4 + $0x10] sm:$0xff] %v719_v14  ;;  %600 = vst [vmem:[%s914_s4 + $0x50] sm:$0xff] %v727_v15  ;;  %v404_v20 = vadd.f32 %v403_v18, %v902_v30  ;;  %v444_v21 = vadd.f32 %v443_v19, %v902_v30  ;;  %v469_v24 = vmax.f32 %v400_v16, 0.0  ;;  %v485_v25 = vmax.f32 %v440_v17, 0.0 }
  0xff   : > { %v405_v26 = vpop.f32.mrf.mxu0  ;;  %v445_v27 = vpop.f32.mrf.mxu1 }
 0x100   : > { %v406_v28 = vadd.f32 %v405_v26, %v904_v31  ;;  %v446_v29 = vadd.f32 %v445_v27, %v904_v31  ;;  %v720_v32 = vpack.c.bf16 %v469_v24, %v468_v22  ;;  %v728_v33 = vpack.c.bf16 %v485_v25, %v484_v23 }
 0x101   : > { %v407_v34 = vpop.f32.mrf.mxu0  ;;  %v447_v35 = vpop.f32.mrf.mxu1  ;;  %v470_v36 = vmax.f32 %v404_v20, 0.0  ;;  %v486_v37 = vmax.f32 %v444_v21, 0.0 }
 0x102   : > { %v471_v38 = vmax.f32 %v406_v28, 0.0  ;;  %v487_v39 = vmax.f32 %v446_v29, 0.0  ;;  %593 = vst [vmem:[%s914_s4 + $0x18] sm:$0xff] %v720_v32  ;;  %601 = vst [vmem:[%s914_s4 + $0x58] sm:$0xff] %v728_v33  ;;  %v408_v40 = vadd.f32 %v407_v34, %v902_v30  ;;  %v448_v41 = vadd.f32 %v447_v35, %v902_v30 }
 0x103   : > { %v409_v42 = vpop.f32.mrf.mxu0  ;;  %v449_v43 = vpop.f32.mrf.mxu1 }
 0x104   : > { %v721_v44 = vpack.c.bf16 %v471_v38, %v470_v36  ;;  %v729_v45 = vpack.c.bf16 %v487_v39, %v486_v37  ;;  %v410_v46 = vadd.f32 %v409_v42, %v904_v31  ;;  %v450_v47 = vadd.f32 %v449_v43, %v904_v31 }
 0x105   : > { %v413_v48 = vpop.f32.mrf.mxu0  ;;  %v453_v49 = vpop.f32.mrf.mxu1  ;;  %v472_v52 = vmax.f32 %v408_v40, 0.0  ;;  %v488_v53 = vmax.f32 %v448_v41, 0.0 }
 0x106   : > { %594 = vst [vmem:[%s914_s4 + $0x20] sm:$0xff] %v721_v44  ;;  %602 = vst [vmem:[%s914_s4 + $0x60] sm:$0xff] %v729_v45  ;;  %v414_v50 = vadd.f32 %v413_v48, %v902_v30  ;;  %v454_v51 = vadd.f32 %v453_v49, %v902_v30  ;;  %v473_v54 = vmax.f32 %v410_v46, 0.0  ;;  %v489_v55 = vmax.f32 %v450_v47, 0.0 }
 0x107   : > { %v415_v56 = vpop.f32.mrf.mxu0  ;;  %v455_v57 = vpop.f32.mrf.mxu1 }
 0x108   : > { %v416_v58 = vadd.f32 %v415_v56, %v904_v31  ;;  %v456_v59 = vadd.f32 %v455_v57, %v904_v31  ;;  %v722_v60 = vpack.c.bf16 %v473_v54, %v472_v52  ;;  %v730_v61 = vpack.c.bf16 %v489_v55, %v488_v53 }
 0x109   : > { %v417_v62 = vpop.f32.mrf.mxu0  ;;  %v457_v63 = vpop.f32.mrf.mxu1  ;;  %v474_v0 = vmax.f32 %v414_v50, 0.0  ;;  %v490_v1 = vmax.f32 %v454_v51, 0.0 }
 0x10a   : > { %v475_v2 = vmax.f32 %v416_v58, 0.0  ;;  %v491_v3 = vmax.f32 %v456_v59, 0.0  ;;  %595 = vst [vmem:[%s914_s4 + $0x28] sm:$0xff] %v722_v60  ;;  %603 = vst [vmem:[%s914_s4 + $0x68] sm:$0xff] %v730_v61  ;;  %v418_v4 = vadd.f32 %v417_v62, %v902_v30  ;;  %v458_v5 = vadd.f32 %v457_v63, %v902_v30 }
 0x10b   : > { %v419_v6 = vpop.f32.mrf.mxu0  ;;  %v459_v7 = vpop.f32.mrf.mxu1 }
 0x10c   : > { %v723_v8 = vpack.c.bf16 %v475_v2, %v474_v0  ;;  %v731_v9 = vpack.c.bf16 %v491_v3, %v490_v1  ;;  %v420_v10 = vadd.f32 %v419_v6, %v904_v31  ;;  %v460_v11 = vadd.f32 %v459_v7, %v904_v31 }
 0x10d   : > { %v476_v12 = vmax.f32 %v418_v4, 0.0  ;;  %v492_v13 = vmax.f32 %v458_v5, 0.0 }
 0x10e   : > { %596 = vst [vmem:[%s914_s4 + $0x30] sm:$0xff] %v723_v8  ;;  %604 = vst [vmem:[%s914_s4 + $0x70] sm:$0xff] %v731_v9  ;;  %v477_v14 = vmax.f32 %v420_v10, 0.0  ;;  %v493_v15 = vmax.f32 %v460_v11, 0.0 }
 0x110   : > { %v724_v16 = vpack.c.bf16 %v477_v14, %v476_v12  ;;  %v732_v17 = vpack.c.bf16 %v493_v15, %v492_v13 }
 0x112   : > { %597 = vst [vmem:[%s914_s4 + $0x38] sm:$0xff] %v724_v16  ;;  %605 = vst [vmem:[%s914_s4 + $0x78] sm:$0xff] %v732_v17 }
 0x113 PF: > { %s13_s12 = sadd.s32 1, %s796_s12  }
 0x114   : > { %p10_p4 = scmp.ge.s32.totalorder %s13_s12, 6  }
 0x116   :  { %12 = sbr.rel (!%p10_p4) target bundleno = 1 (0x1), region = 62 }

// kernel: dann_forward.8
= control target key start
LH: loop header
LB: loop body
LE: loop exit
PB: predicated region body
PF: predicated region fallthrough
CT: control target
= control target key end

     0   :  { %s6361_s1 = inlined_call_operand.vmem [shape: bf16[2304,256], index: 1, kind: input, shape index: {}]   ;;  %s6362_s0 = inlined_call_operand.vmem [shape: bf16[112,2304], index: 0, kind: input, shape index: {}]   ;;  %s6363_s2 = inlined_call_operand.vmem [shape: f32[1,256], index: 2, kind: input, shape index: {}]   ;;  %s6364_s3 = inlined_call_operand.vmem [shape: bf16[112,256], index: 3, kind: output, shape index: {}]  }
   0x1   :  { %v4041_v0 = vld [vmem:[%s6361_s1 + $0x74] ss:$8 sps:$4 sm:$0xff]   ;;  %v4045_v2 = vld [vmem:[%s6361_s1 + $0x70] ss:$8 sps:$4 sm:$0xff]   ;;  %v4047_v4 = vld [vmem:[%s6361_s1 + $0x64] ss:$8 sps:$4 sm:$0xff]  }
   0x2   :  { %v4043_v1 = vld [vmem:[%s6361_s1 + $0x174] ss:$8 sps:$4 sm:$0xff]   ;;  %2510 = vmatprep.subr.bf16.mxu0 %v4041_v0  ;;  %v4046_v3 = vld [vmem:[%s6361_s1 + $0x170] ss:$8 sps:$4 sm:$0xff]   ;;  %v4049_v5 = vld [vmem:[%s6361_s1 + $0x164] ss:$8 sps:$4 sm:$0xff]  }
   0x3   :  { %2613 = vmatprep.subr.bf16.mxu1 %v4043_v1  ;;  %2511 = vmatpush1.bf16.msra.mxu0 %v4045_v2  ;;  %v4051_v6 = vld [vmem:[%s6361_s1 + $0x60] ss:$8 sps:$4 sm:$0xff]   ;;  %v4053_v8 = vld [vmem:[%s6361_s1 + $0x54] ss:$8 sps:$4 sm:$0xff]   ;;  %v4057_v10 = vld [vmem:[%s6361_s1 + $0x50] ss:$8 sps:$4 sm:$0xff]  }
   0x4   :  { %2614 = vmatpush1.bf16.msra.mxu1 %v4046_v3  ;;  %2512 = vmatprep.subr.bf16.mxu0 %v4047_v4  ;;  %v4052_v7 = vld [vmem:[%s6361_s1 + $0x160] ss:$8 sps:$4 sm:$0xff]   ;;  %v4055_v9 = vld [vmem:[%s6361_s1 + $0x154] ss:$8 sps:$4 sm:$0xff]   ;;  %v4058_v11 = vld [vmem:[%s6361_s1 + $0x150] ss:$8 sps:$4 sm:$0xff]  }
   0x5   :  { %2615 = vmatprep.subr.bf16.mxu1 %v4049_v5  ;;  %v4059_v12 = vld [vmem:[%s6361_s1 + $0x44] ss:$8 sps:$4 sm:$0xff]   ;;  %v4063_v14 = vld [vmem:[%s6361_s1 + $0x40] ss:$8 sps:$4 sm:$0xff]   ;;  %v4065_v16 = vld [vmem:[%s6361_s1 + $0x34] ss:$8 sps:$4 sm:$0xff]  }
   0x6   :  { %v4061_v13 = vld [vmem:[%s6361_s1 + $0x144] ss:$8 sps:$4 sm:$0xff]   ;;  %v4064_v15 = vld [vmem:[%s6361_s1 + $0x140] ss:$8 sps:$4 sm:$0xff]   ;;  %v4067_v17 = vld [vmem:[%s6361_s1 + $0x134] ss:$8 sps:$4 sm:$0xff]  }
   0x7   :  { %2513 = vmatpush1.bf16.msra.mxu0 %v4051_v6  ;;  %v4069_v18 = vld [vmem:[%s6361_s1 + $0x30] ss:$8 sps:$4 sm:$0xff]   ;;  %v4071_v20 = vld [vmem:[%s6361_s1 + $0x24] ss:$8 sps:$4 sm:$0xff]   ;;  %v4075_v22 = vld [vmem:[%s6361_s1 + $0x20] ss:$8 sps:$4 sm:$0xff]  }
   0x8   :  { %2616 = vmatpush1.bf16.msra.mxu1 %v4052_v7  ;;  %2514 = vmatprep.subr.bf16.mxu0 %v4053_v8  ;;  %v4070_v19 = vld [vmem:[%s6361_s1 + $0x130] ss:$8 sps:$4 sm:$0xff]   ;;  %v4073_v21 = vld [vmem:[%s6361_s1 + $0x124] ss:$8 sps:$4 sm:$0xff]   ;;  %v4076_v23 = vld [vmem:[%s6361_s1 + $0x120] ss:$8 sps:$4 sm:$0xff]  }
   0x9   :  { %2617 = vmatprep.subr.bf16.mxu1 %v4055_v9  ;;  %v4077_v24 = vld [vmem:[%s6361_s1 + $0x14] ss:$8 sps:$4 sm:$0xff]   ;;  %v4081_v26 = vld [vmem:[%s6361_s1 + $0x10] ss:$8 sps:$4 sm:$0xff]   ;;  %v4083_v28 = vld [vmem:[%s6361_s1 + $0x4] ss:$8 sps:$4 sm:$0xff]  }
   0xa   :  { %v4079_v25 = vld [vmem:[%s6361_s1 + $0x114] ss:$8 sps:$4 sm:$0xff]   ;;  %v4082_v27 = vld [vmem:[%s6361_s1 + $0x110] ss:$8 sps:$4 sm:$0xff]   ;;  %v4085_v29 = vld [vmem:[%s6361_s1 + $0x104] ss:$8 sps:$4 sm:$0xff]  }
   0xb   :  { %2515 = vmatpush1.bf16.msra.mxu0 %v4057_v10  ;;  %v4087_v30 = vld [vmem:[%s6361_s1] ss:$8 sps:$4 sm:$0xff]   ;;  %v4089_v32 = vld [vmem:[%s6361_s1 + $0xf4] ss:$8 sps:$4 sm:$0xff]   ;;  %v4093_v34 = vld [vmem:[%s6361_s1 + $0xf0] ss:$8 sps:$4 sm:$0xff]  }
   0xc   :  { %2618 = vmatpush1.bf16.msra.mxu1 %v4058_v11  ;;  %2516 = vmatprep.subr.bf16.mxu0 %v4059_v12  ;;  %v4088_v31 = vld [vmem:[%s6361_s1 + $0x100] ss:$8 sps:$4 sm:$0xff]   ;;  %v4091_v33 = vld [vmem:[%s6361_s1 + $0x1f4] ss:$8 sps:$4 sm:$0xff]   ;;  %v4094_v35 = vld [vmem:[%s6361_s1 + $0x1f0] ss:$8 sps:$4 sm:$0xff]  }
   0xd   :  { %2619 = vmatprep.subr.bf16.mxu1 %v4061_v13  ;;  %v4095_v36 = vld [vmem:[%s6361_s1 + $0xe4] ss:$8 sps:$4 sm:$0xff]   ;;  %v4099_v38 = vld [vmem:[%s6361_s1 + $0xe0] ss:$8 sps:$4 sm:$0xff]   ;;  %v4101_v40 = vld [vmem:[%s6361_s1 + $0xd4] ss:$8 sps:$4 sm:$0xff]  }
   0xe   :  { %v4097_v37 = vld [vmem:[%s6361_s1 + $0x1e4] ss:$8 sps:$4 sm:$0xff]   ;;  %v4100_v39 = vld [vmem:[%s6361_s1 + $0x1e0] ss:$8 sps:$4 sm:$0xff]   ;;  %v4103_v41 = vld [vmem:[%s6361_s1 + $0x1d4] ss:$8 sps:$4 sm:$0xff]  }
   0xf   :  { %2517 = vmatpush1.bf16.msra.mxu0 %v4063_v14  ;;  %v4105_v42 = vld [vmem:[%s6361_s1 + $0xd0] ss:$8 sps:$4 sm:$0xff]   ;;  %v4107_v44 = vld [vmem:[%s6361_s1 + $0xc4] ss:$8 sps:$4 sm:$0xff]   ;;  %v4111_v46 = vld [vmem:[%s6361_s1 + $0xc0] ss:$8 sps:$4 sm:$0xff]  }
  0x10   :  { %2620 = vmatpush1.bf16.msra.mxu1 %v4064_v15  ;;  %2518 = vmatprep.subr.bf16.mxu0 %v4065_v16  ;;  %v4106_v43 = vld [vmem:[%s6361_s1 + $0x1d0] ss:$8 sps:$4 sm:$0xff]   ;;  %v4109_v45 = vld [vmem:[%s6361_s1 + $0x1c4] ss:$8 sps:$4 sm:$0xff]   ;;  %v4112_v47 = vld [vmem:[%s6361_s1 + $0x1c0] ss:$8 sps:$4 sm:$0xff]  }
  0x11   :  { %2621 = vmatprep.subr.bf16.mxu1 %v4067_v17  ;;  %v4113_v48 = vld [vmem:[%s6361_s1 + $0xb4] ss:$8 sps:$4 sm:$0xff]   ;;  %v4139_v49 = vld [vmem:[%s6362_s0 + $0x4] ss:$72 sps:$4 sm:$0xff]   ;;  %v4117_v52 = vld [vmem:[%s6361_s1 + $0xb0] ss:$8 sps:$4 sm:$0xff]  }
  0x12   :  { %v4115_v50 = vld [vmem:[%s6361_s1 + $0x1b4] ss:$8 sps:$4 sm:$0xff]   ;;  %2542 = vmatprep.mubr.bf16.mxu0 %v4139_v49  ;;  %v4118_v53 = vld [vmem:[%s6361_s1 + $0x1b0] ss:$8 sps:$4 sm:$0xff]   ;;  %v4119_v54 = vld [vmem:[%s6361_s1 + $0xa4] ss:$8 sps:$4 sm:$0xff]  }
  0x13   :  { %2519 = vmatpush1.bf16.msra.mxu0 %v4069_v18  ;;  %v4142_v51 = vld [vmem:[%s6362_s0 + $0xc] ss:$72 sps:$4 sm:$0xff]   ;;  %v4123_v56 = vld [vmem:[%s6361_s1 + $0xa0] ss:$8 sps:$4 sm:$0xff]   ;;  %v4129_v60 = vld [vmem:[%s6361_s1 + $0x90] ss:$8 sps:$4 sm:$0xff]  }
  0x14   :  { %2622 = vmatpush1.bf16.msra.mxu1 %v4070_v19  ;;  %2520 = vmatprep.subr.bf16.mxu0 %v4071_v20  ;;  %v4121_v55 = vld [vmem:[%s6361_s1 + $0x1a4] ss:$8 sps:$4 sm:$0xff]   ;;  %v4124_v57 = vld [vmem:[%s6361_s1 + $0x1a0] ss:$8 sps:$4 sm:$0xff]   ;;  %v4125_v58 = vld [vmem:[%s6361_s1 + $0x94] ss:$8 sps:$4 sm:$0xff]  }
  0x15   :  { %2623 = vmatprep.subr.bf16.mxu1 %v4073_v21  ;;  %2645 = vmatprep.mubr.bf16.mxu1 %v4142_v51  ;;  %v4127_v59 = vld [vmem:[%s6361_s1 + $0x194] ss:$8 sps:$4 sm:$0xff]   ;;  %v4130_v61 = vld [vmem:[%s6361_s1 + $0x190] ss:$8 sps:$4 sm:$0xff]   ;;  %v4131_v62 = vld [vmem:[%s6361_s1 + $0x84] ss:$8 sps:$4 sm:$0xff]  }
  0x16   :  { %v4133_v63 = vld [vmem:[%s6361_s1 + $0x184] ss:$8 sps:$4 sm:$0xff]   ;;  %v4135_v0 = vld [vmem:[%s6361_s1 + $0x80] ss:$8 sps:$4 sm:$0xff]   ;;  %v4145_v2 = vld [vmem:[%s6361_s1 + $0x274] ss:$8 sps:$4 sm:$0xff]  }
  0x17   :  { %2521 = vmatpush1.bf16.msra.mxu0 %v4075_v22  ;;  %v4136_v1 = vld [vmem:[%s6361_s1 + $0x180] ss:$8 sps:$4 sm:$0xff]   ;;  %v4148_v3 = vld [vmem:[%s6361_s1 + $0x374] ss:$8 sps:$4 sm:$0xff]   ;;  %v4143_v6 = vld [vmem:[%s6361_s1 + $0x270] ss:$8 sps:$4 sm:$0xff]  }
  0x18   :  { %2624 = vmatpush1.bf16.msra.mxu1 %v4076_v23  ;;  %2522 = vmatprep.subr.bf16.mxu0 %v4077_v24  ;;  %v4137_v4 = vld [vmem:[%s6362_s0] ss:$72 sps:$4 sm:$0xff]   ;;  %v4146_v7 = vld [vmem:[%s6361_s1 + $0x370] ss:$8 sps:$4 sm:$0xff]   ;;  %v4151_v8 = vld [vmem:[%s6361_s1 + $0x264] ss:$8 sps:$4 sm:$0xff]  }
  0x19   :  { %2625 = vmatprep.subr.bf16.mxu1 %v4079_v25  ;;  %v4140_v5 = vld [vmem:[%s6362_s0 + $0x8] ss:$72 sps:$4 sm:$0xff]   ;;  %v4154_v9 = vld [vmem:[%s6361_s1 + $0x364] ss:$8 sps:$4 sm:$0xff]   ;;  %v4161_v10 = vld [vmem:[%s6362_s0 + $0x94] ss:$72 sps:$4 sm:$0xff]  }
  0x1a   :  { %v4164_v11 = vld [vmem:[%s6362_s0 + $0x9c] ss:$72 sps:$4 sm:$0xff]   ;;  %v4149_v12 = vld [vmem:[%s6361_s1 + $0x260] ss:$8 sps:$4 sm:$0xff]   ;;  %v4155_v16 = vld [vmem:[%s6361_s1 + $0x250] ss:$8 sps:$4 sm:$0xff]  }
  0x1b   :  { %2523 = vmatpush1.bf16.msra.mxu0 %v4081_v26  ;;  %v4152_v13 = vld [vmem:[%s6361_s1 + $0x360] ss:$8 sps:$4 sm:$0xff]   ;;  %v4157_v14 = vld [vmem:[%s6361_s1 + $0x254] ss:$8 sps:$4 sm:$0xff]   ;;  %v4163_v17 = vld [vmem:[%s6362_s0 + $0x90] ss:$72 sps:$4 sm:$0xff]  }
  0x1c   :  { %2626 = vmatpush1.bf16.msra.mxu1 %v4082_v27  ;;  %2524 = vmatprep.subr.bf16.mxu0 %v4083_v28  ;;  %v4160_v15 = vld [vmem:[%s6361_s1 + $0x354] ss:$8 sps:$4 sm:$0xff]   ;;  %v4172_v18 = vld [vmem:[%s6362_s0 + $0x98] ss:$72 sps:$4 sm:$0xff]   ;;  %v4168_v20 = vld [vmem:[%s6361_s1 + $0x244] ss:$8 sps:$4 sm:$0xff]  }
  0x1d   :  { %2627 = vmatprep.subr.bf16.mxu1 %v4085_v29  ;;  %v4158_v19 = vld [vmem:[%s6361_s1 + $0x350] ss:$8 sps:$4 sm:$0xff]   ;;  %v4171_v21 = vld [vmem:[%s6361_s1 + $0x344] ss:$8 sps:$4 sm:$0xff]   ;;  %v4166_v24 = vld [vmem:[%s6361_s1 + $0x240] ss:$8 sps:$4 sm:$0xff]  }
  0x1e   :  { %v4179_v22 = vld [vmem:[%s6362_s0 + $0x124] ss:$72 sps:$4 sm:$0xff]   ;;  %v4169_v25 = vld [vmem:[%s6361_s1 + $0x340] ss:$8 sps:$4 sm:$0xff]   ;;  %v4175_v26 = vld [vmem:[%s6361_s1 + $0x234] ss:$8 sps:$4 sm:$0xff]  }
  0x1f   :  { %2525 = vmatpush1.bf16.msra.mxu0 %v4087_v30  ;;  %v4182_v23 = vld [vmem:[%s6362_s0 + $0x12c] ss:$72 sps:$4 sm:$0xff]   ;;  %v4173_v28 = vld [vmem:[%s6361_s1 + $0x230] ss:$8 sps:$4 sm:$0xff]   ;;  %v4181_v29 = vld [vmem:[%s6362_s0 + $0x120] ss:$72 sps:$4 sm:$0xff]  }
  0x20   :  { %2628 = vmatpush1.bf16.msra.mxu1 %v4088_v31  ;;  %2526 = vmatprep.subr.bf16.mxu0 %v4089_v32  ;;  %v4178_v27 = vld [vmem:[%s6361_s1 + $0x334] ss:$8 sps:$4 sm:$0xff]   ;;  %v4190_v30 = vld [vmem:[%s6362_s0 + $0x128] ss:$72 sps:$4 sm:$0xff]   ;;  %v4186_v32 = vld [vmem:[%s6361_s1 + $0x224] ss:$8 sps:$4 sm:$0xff]  }
  0x21   :  { %2629 = vmatprep.subr.bf16.mxu1 %v4091_v33  ;;  %v4176_v31 = vld [vmem:[%s6361_s1 + $0x330] ss:$8 sps:$4 sm:$0xff]   ;;  %v4189_v33 = vld [vmem:[%s6361_s1 + $0x324] ss:$8 sps:$4 sm:$0xff]   ;;  %v4205_v49 = vld [vmem:[%s6361_s1 + $0x300] ss:$8 sps:$4 sm:$0xff]  }
  0x22   :  { %v4214_v51 = vld [vmem:[%s6361_s1 + $0x3f4] ss:$8 sps:$4 sm:$0xff]  }
  0x23   :  { %2527 = vmatpush2.bf16.msra.mxu0 %v4093_v34  ;;  %v4197_v34 = vld [vmem:[%s6362_s0 + $0x1b4] ss:$72 sps:$4 sm:$0xff]  }
  0x24   :  { %2630 = vmatpush2.bf16.msra.mxu1 %v4094_v35  ;;  %2528 = vmatprep.subr.bf16.mxu0 %v4095_v36  ;;  %v4200_v35 = vld [vmem:[%s6362_s0 + $0x1bc] ss:$72 sps:$4 sm:$0xff]   ;;  %v4184_v36 = vld [vmem:[%s6361_s1 + $0x220] ss:$8 sps:$4 sm:$0xff]  }
  0x25   :  { %2631 = vmatprep.subr.bf16.mxu1 %v4097_v37  ;;  %v4187_v37 = vld [vmem:[%s6361_s1 + $0x320] ss:$8 sps:$4 sm:$0xff]  }
  0x27   :  { %2529 = vmatpush2.bf16.msra.mxu0 %v4099_v38  ;;  %v4193_v38 = vld [vmem:[%s6361_s1 + $0x214] ss:$8 sps:$4 sm:$0xff]  }
  0x28   :  { %2632 = vmatpush2.bf16.msra.mxu1 %v4100_v39  ;;  %2530 = vmatprep.subr.bf16.mxu0 %v4101_v40  ;;  %v4196_v39 = vld [vmem:[%s6361_s1 + $0x314] ss:$8 sps:$4 sm:$0xff]   ;;  %v4191_v40 = vld [vmem:[%s6361_s1 + $0x210] ss:$8 sps:$4 sm:$0xff]  }
  0x29   :  { %2633 = vmatprep.subr.bf16.mxu1 %v4103_v41  ;;  %v4199_v41 = vld [vmem:[%s6362_s0 + $0x1b0] ss:$72 sps:$4 sm:$0xff]  }
  0x2b   :  { %2531 = vmatpush2.bf16.msra.mxu0 %v4105_v42  ;;  %v4208_v42 = vld [vmem:[%s6362_s0 + $0x1b8] ss:$72 sps:$4 sm:$0xff]  }
  0x2c   :  { %2634 = vmatpush2.bf16.msra.mxu1 %v4106_v43  ;;  %2532 = vmatprep.subr.bf16.mxu0 %v4107_v44  ;;  %v4194_v43 = vld [vmem:[%s6361_s1 + $0x310] ss:$8 sps:$4 sm:$0xff]   ;;  %v4204_v44 = vld [vmem:[%s6361_s1 + $0x204] ss:$8 sps:$4 sm:$0xff]  }
  0x2d   :  { %2635 = vmatprep.subr.bf16.mxu1 %v4109_v45  ;;  %v4207_v45 = vld [vmem:[%s6361_s1 + $0x304] ss:$8 sps:$4 sm:$0xff]  }
  0x2f   :  { %2533 = vmatpush2.bf16.msra.mxu0 %v4111_v46  ;;  %v4215_v46 = vld [vmem:[%s6362_s0 + $0x244] ss:$72 sps:$4 sm:$0xff]  }
  0x30   :  { %2636 = vmatpush2.bf16.msra.mxu1 %v4112_v47  ;;  %2534 = vmatprep.subr.bf16.mxu0 %v4113_v48  ;;  %v4218_v47 = vld [vmem:[%s6362_s0 + $0x24c] ss:$72 sps:$4 sm:$0xff]   ;;  %v4202_v48 = vld [vmem:[%s6361_s1 + $0x200] ss:$8 sps:$4 sm:$0xff]  }
  0x31   :  { %2637 = vmatprep.subr.bf16.mxu1 %v4115_v50  ;;  %v4211_v50 = vld [vmem:[%s6361_s1 + $0x2f4] ss:$8 sps:$4 sm:$0xff]  }
  0x33   :  { %2535 = vmatpush2.bf16.msra.mxu0 %v4117_v52  ;;  %v4209_v52 = vld [vmem:[%s6361_s1 + $0x2f0] ss:$8 sps:$4 sm:$0xff]  }
  0x34   :  { %2638 = vmatpush2.bf16.msra.mxu1 %v4118_v53  ;;  %2536 = vmatprep.subr.bf16.mxu0 %v4119_v54  ;;  %v4217_v53 = vld [vmem:[%s6362_s0 + $0x240] ss:$72 sps:$4 sm:$0xff]  }
  0x35   :  { %2639 = vmatprep.subr.bf16.mxu1 %v4121_v55  ;;  %v4226_v54 = vld [vmem:[%s6362_s0 + $0x248] ss:$72 sps:$4 sm:$0xff]  }
  0x36   :  { %v4212_v55 = vld [vmem:[%s6361_s1 + $0x3f0] ss:$8 sps:$4 sm:$0xff]  }
  0x37   :  { %2537 = vmatpush2.bf16.msra.mxu0 %v4123_v56  ;;  %v4222_v56 = vld [vmem:[%s6361_s1 + $0x2e4] ss:$8 sps:$4 sm:$0xff]  }
  0x38   :  { %2640 = vmatpush2.bf16.msra.mxu1 %v4124_v57  ;;  %2538 = vmatprep.subr.bf16.mxu0 %v4125_v58  ;;  %v4225_v57 = vld [vmem:[%s6361_s1 + $0x3e4] ss:$8 sps:$4 sm:$0xff]   ;;  %v4233_v58 = vld [vmem:[%s6362_s0 + $0x2d4] ss:$72 sps:$4 sm:$0xff]  }
  0x39   :  { %2641 = vmatprep.subr.bf16.mxu1 %v4127_v59  ;;  %v4236_v59 = vld [vmem:[%s6362_s0 + $0x2dc] ss:$72 sps:$4 sm:$0xff]  }
  0x3b   :  { %2539 = vmatpush2.bf16.msra.mxu0 %v4129_v60  ;;  %v4220_v60 = vld [vmem:[%s6361_s1 + $0x2e0] ss:$8 sps:$4 sm:$0xff]  }
  0x3c   :  { %2642 = vmatpush2.bf16.msra.mxu1 %v4130_v61  ;;  %2540 = vmatprep.subr.bf16.mxu0 %v4131_v62  ;;  %v4223_v61 = vld [vmem:[%s6361_s1 + $0x3e0] ss:$8 sps:$4 sm:$0xff]   ;;  %v4229_v62 = vld [vmem:[%s6361_s1 + $0x2d4] ss:$8 sps:$4 sm:$0xff]  }
  0x3d   :  { %2643 = vmatprep.subr.bf16.mxu1 %v4133_v63  ;;  %v4232_v63 = vld [vmem:[%s6361_s1 + $0x3d4] ss:$8 sps:$4 sm:$0xff]  }
  0x3f   :  { %2541 = vmatpush2.bf16.msra.mxu0 %v4135_v0  ;;  %v4227_v0 = vld [vmem:[%s6361_s1 + $0x2d0] ss:$8 sps:$4 sm:$0xff]  }
  0x40   :  { %2644 = vmatpush2.bf16.msra.mxu1 %v4136_v1  ;;  %2716 = vmatprep.subr.bf16.mxu0 %v4145_v2  ;;  %v4230_v1 = vld [vmem:[%s6361_s1 + $0x3d0] ss:$8 sps:$4 sm:$0xff]  }
  0x41   :  { %2819 = vmatprep.subr.bf16.mxu1 %v4148_v3  ;;  %v4235_v2 = vld [vmem:[%s6362_s0 + $0x2d0] ss:$72 sps:$4 sm:$0xff]  }
  0x42   :  { %2543 = vmatmul.mubr.bf16.vlgmr.msra.gmra.mxu0 %v4137_v4  ;;  %v4244_v3 = vld [vmem:[%s6362_s0 + $0x2d8] ss:$72 sps:$4 sm:$0xff]   ;;  %v4240_v4 = vld [vmem:[%s6361_s1 + $0x2c4] ss:$8 sps:$4 sm:$0xff]  }
  0x43   :  { %2646 = vmatmul.mubr.bf16.vlgmr.msra.gmra.mxu1 %v4140_v5  ;;  %2717 = vmatpush1.bf16.msra.mxu0 %v4143_v6  ;;  %v4243_v5 = vld [vmem:[%s6361_s1 + $0x3c4] ss:$8 sps:$4 sm:$0xff]  }
  0x44   :  { %2820 = vmatpush1.bf16.msra.mxu1 %v4146_v7  ;;  %2718 = vmatprep.subr.bf16.mxu0 %v4151_v8  ;;  %v4251_v6 = vld [vmem:[%s6362_s0 + $0x364] ss:$72 sps:$4 sm:$0xff]   ;;  %v4238_v8 = vld [vmem:[%s6361_s1 + $0x2c0] ss:$8 sps:$4 sm:$0xff]  }
  0x45   :  { %2821 = vmatprep.subr.bf16.mxu1 %v4154_v9  ;;  %2552 = vmatprep.mubr.bf16.mxu0 %v4161_v10  ;;  %v4254_v7 = vld [vmem:[%s6362_s0 + $0x36c] ss:$72 sps:$4 sm:$0xff]   ;;  %v4241_v9 = vld [vmem:[%s6361_s1 + $0x3c0] ss:$8 sps:$4 sm:$0xff]  }
  0x46   :  { %2655 = vmatprep.mubr.bf16.mxu1 %v4164_v11  ;;  %v4247_v10 = vld [vmem:[%s6361_s1 + $0x2b4] ss:$8 sps:$4 sm:$0xff]  }
  0x47   :  { %2719 = vmatpush1.bf16.msra.mxu0 %v4149_v12  ;;  %v4250_v11 = vld [vmem:[%s6361_s1 + $0x3b4] ss:$8 sps:$4 sm:$0xff]   ;;  %v4245_v12 = vld [vmem:[%s6361_s1 + $0x2b0] ss:$8 sps:$4 sm:$0xff]  }
  0x48   :  { %2822 = vmatpush1.bf16.msra.mxu1 %v4152_v13  ;;  %2720 = vmatprep.subr.bf16.mxu0 %v4157_v14  ;;  %v4248_v13 = vld [vmem:[%s6361_s1 + $0x3b0] ss:$8 sps:$4 sm:$0xff]   ;;  %v4253_v14 = vld [vmem:[%s6362_s0 + $0x360] ss:$72 sps:$4 sm:$0xff]  }
  0x49   :  { %2823 = vmatprep.subr.bf16.mxu1 %v4160_v15  ;;  %v4262_v15 = vld [vmem:[%s6362_s0 + $0x368] ss:$72 sps:$4 sm:$0xff]  }
  0x4a   :  { %2553 = vmatmul.mubr.bf16.gmra.mxu0 %v4163_v17  ;;  %v4261_v17 = vld [vmem:[%s6361_s1 + $0x3a4] ss:$8 sps:$4 sm:$0xff]  }
  0x4b   :  { %2656 = vmatmul.mubr.bf16.gmra.mxu1 %v4172_v18  ;;  %2721 = vmatpush1.bf16.msra.mxu0 %v4155_v16  ;;  %v4258_v16 = vld [vmem:[%s6361_s1 + $0x2a4] ss:$8 sps:$4 sm:$0xff]   ;;  %v4277_v18 = vld [vmem:[%s6362_s0 + $0x14] ss:$72 sps:$4 sm:$0xff]  }
  0x4c   :  { %2824 = vmatpush1.bf16.msra.mxu1 %v4158_v19  ;;  %2722 = vmatprep.subr.bf16.mxu0 %v4168_v20  ;;  %v4280_v19 = vld [vmem:[%s6362_s0 + $0x1c] ss:$72 sps:$4 sm:$0xff]   ;;  %v4256_v20 = vld [vmem:[%s6361_s1 + $0x2a0] ss:$8 sps:$4 sm:$0xff]  }
  0x4d   :  { %2825 = vmatprep.subr.bf16.mxu1 %v4171_v21  ;;  %2562 = vmatprep.mubr.bf16.mxu0 %v4179_v22  ;;  %v4259_v21 = vld [vmem:[%s6361_s1 + $0x3a0] ss:$8 sps:$4 sm:$0xff]   ;;  %v4265_v22 = vld [vmem:[%s6361_s1 + $0x294] ss:$8 sps:$4 sm:$0xff]  }
  0x4e   :  { %2665 = vmatprep.mubr.bf16.mxu1 %v4182_v23  ;;  %v4268_v23 = vld [vmem:[%s6361_s1 + $0x394] ss:$8 sps:$4 sm:$0xff]  }
  0x4f   :  { %2723 = vmatpush1.bf16.msra.mxu0 %v4166_v24  ;;  %v4263_v24 = vld [vmem:[%s6361_s1 + $0x290] ss:$8 sps:$4 sm:$0xff]  }
  0x50   :  { %2826 = vmatpush1.bf16.msra.mxu1 %v4169_v25  ;;  %2724 = vmatprep.subr.bf16.mxu0 %v4175_v26  ;;  %v4266_v25 = vld [vmem:[%s6361_s1 + $0x390] ss:$8 sps:$4 sm:$0xff]   ;;  %v4271_v26 = vld [vmem:[%s6361_s1 + $0x284] ss:$8 sps:$4 sm:$0xff]  }
  0x51   :  { %2827 = vmatprep.subr.bf16.mxu1 %v4178_v27  ;;  %v4274_v27 = vld [vmem:[%s6361_s1 + $0x384] ss:$8 sps:$4 sm:$0xff]  }
  0x52   :  { %2563 = vmatmul.mubr.bf16.gmra.mxu0 %v4181_v29  ;;  %v4272_v29 = vld [vmem:[%s6361_s1 + $0x380] ss:$8 sps:$4 sm:$0xff]  }
  0x53   :  { %2666 = vmatmul.mubr.bf16.gmra.mxu1 %v4190_v30  ;;  %2725 = vmatpush1.bf16.msra.mxu0 %v4173_v28  ;;  %v4269_v28 = vld [vmem:[%s6361_s1 + $0x280] ss:$8 sps:$4 sm:$0xff]   ;;  %v4283_v30 = vld [vmem:[%s6361_s1 + $0x474] ss:$8 sps:$4 sm:$0xff]  }
  0x54   :  { %2828 = vmatpush1.bf16.msra.mxu1 %v4176_v31  ;;  %2726 = vmatprep.subr.bf16.mxu0 %v4186_v32  ;;  %v4286_v31 = vld [vmem:[%s6361_s1 + $0x574] ss:$8 sps:$4 sm:$0xff]   ;;  %v4275_v32 = vld [vmem:[%s6362_s0 + $0x10] ss:$72 sps:$4 sm:$0xff]  }
  0x55   :  { %2829 = vmatprep.subr.bf16.mxu1 %v4189_v33  ;;  %2572 = vmatprep.mubr.bf16.mxu0 %v4197_v34  ;;  %v4278_v33 = vld [vmem:[%s6362_s0 + $0x18] ss:$72 sps:$4 sm:$0xff]  }
  0x56   :  { %2675 = vmatprep.mubr.bf16.mxu1 %v4200_v35  ;;  %v4281_v34 = vld [vmem:[%s6361_s1 + $0x470] ss:$8 sps:$4 sm:$0xff]  }
  0x57   :  { %2727 = vmatpush1.bf16.msra.mxu0 %v4184_v36  ;;  %v4284_v35 = vld [vmem:[%s6361_s1 + $0x570] ss:$8 sps:$4 sm:$0xff]   ;;  %v4289_v36 = vld [vmem:[%s6361_s1 + $0x464] ss:$8 sps:$4 sm:$0xff]  }
  0x58   :  { %2830 = vmatpush1.bf16.msra.mxu1 %v4187_v37  ;;  %2728 = vmatprep.subr.bf16.mxu0 %v4193_v38  ;;  %v4292_v37 = vld [vmem:[%s6361_s1 + $0x564] ss:$8 sps:$4 sm:$0xff]  }
  0x59   :  { %2831 = vmatprep.subr.bf16.mxu1 %v4196_v39  ;;  %v4293_v38 = vld [vmem:[%s6362_s0 + $0xa4] ss:$72 sps:$4 sm:$0xff]  }
  0x5a   :  { %2573 = vmatmul.mubr.bf16.gmra.mxu0 %v4199_v41  ;;  %v4302_v39 = vld [vmem:[%s6362_s0 + $0xac] ss:$72 sps:$4 sm:$0xff]   ;;  %v4290_v41 = vld [vmem:[%s6361_s1 + $0x560] ss:$8 sps:$4 sm:$0xff]  }
  0x5b   :  { %2676 = vmatmul.mubr.bf16.gmra.mxu1 %v4208_v42  ;;  %2729 = vmatpush1.bf16.msra.mxu0 %v4191_v40  ;;  %v4287_v40 = vld [vmem:[%s6361_s1 + $0x460] ss:$8 sps:$4 sm:$0xff]   ;;  %v4298_v42 = vld [vmem:[%s6361_s1 + $0x454] ss:$8 sps:$4 sm:$0xff]  }
  0x5c   :  { %2832 = vmatpush1.bf16.msra.mxu1 %v4194_v43  ;;  %2730 = vmatprep.subr.bf16.mxu0 %v4204_v44  ;;  %v4301_v43 = vld [vmem:[%s6361_s1 + $0x554] ss:$8 sps:$4 sm:$0xff]   ;;  %v4295_v44 = vld [vmem:[%s6362_s0 + $0xa0] ss:$72 sps:$4 sm:$0xff]  }
  0x5d   :  { %2833 = vmatprep.subr.bf16.mxu1 %v4207_v45  ;;  %2582 = vmatprep.mubr.bf16.mxu0 %v4215_v46  ;;  %v4296_v45 = vld [vmem:[%s6361_s1 + $0x450] ss:$8 sps:$4 sm:$0xff]  }
  0x5e   :  { %2685 = vmatprep.mubr.bf16.mxu1 %v4218_v47  ;;  %v4299_v46 = vld [vmem:[%s6361_s1 + $0x550] ss:$8 sps:$4 sm:$0xff]  }
  0x5f   :  { %2731 = vmatpush1.bf16.msra.mxu0 %v4202_v48  ;;  %v4304_v47 = vld [vmem:[%s6362_s0 + $0xa8] ss:$72 sps:$4 sm:$0xff]   ;;  %v4307_v48 = vld [vmem:[%s6361_s1 + $0x444] ss:$8 sps:$4 sm:$0xff]  }
  0x60   :  { %2834 = vmatpush1.bf16.msra.mxu1 %v4205_v49  ;;  %2732 = vmatprep.subr.bf16.mxu0 %v4211_v50  ;;  %v4310_v49 = vld [vmem:[%s6361_s1 + $0x544] ss:$8 sps:$4 sm:$0xff]   ;;  %v4311_v50 = vld [vmem:[%s6362_s0 + $0x134] ss:$72 sps:$4 sm:$0xff]  }
  0x61   :  { %2835 = vmatprep.subr.bf16.mxu1 %v4214_v51  ;;  %v4320_v51 = vld [vmem:[%s6362_s0 + $0x13c] ss:$72 sps:$4 sm:$0xff]  }
  0x62   :  { %2583 = vmatmul.mubr.bf16.gmra.mxu0 %v4217_v53  ;;  %v4308_v53 = vld [vmem:[%s6361_s1 + $0x540] ss:$8 sps:$4 sm:$0xff]  }
  0x63   :  { %2686 = vmatmul.mubr.bf16.gmra.mxu1 %v4226_v54  ;;  %2733 = vmatpush2.bf16.msra.mxu0 %v4209_v52  ;;  %v4305_v52 = vld [vmem:[%s6361_s1 + $0x440] ss:$8 sps:$4 sm:$0xff]   ;;  %v4316_v54 = vld [vmem:[%s6361_s1 + $0x434] ss:$8 sps:$4 sm:$0xff]  }
  0x64   :  { %2836 = vmatpush2.bf16.msra.mxu1 %v4212_v55  ;;  %2734 = vmatprep.subr.bf16.mxu0 %v4222_v56  ;;  %v4319_v55 = vld [vmem:[%s6361_s1 + $0x534] ss:$8 sps:$4 sm:$0xff]   ;;  %v4313_v56 = vld [vmem:[%s6362_s0 + $0x130] ss:$72 sps:$4 sm:$0xff]  }
  0x65   :  { %2837 = vmatprep.subr.bf16.mxu1 %v4225_v57  ;;  %2592 = vmatprep.mubr.bf16.mxu0 %v4233_v58  ;;  %v4314_v57 = vld [vmem:[%s6361_s1 + $0x430] ss:$8 sps:$4 sm:$0xff]  }
  0x66   :  { %2695 = vmatprep.mubr.bf16.mxu1 %v4236_v59  ;;  %v4317_v58 = vld [vmem:[%s6361_s1 + $0x530] ss:$8 sps:$4 sm:$0xff]  }
  0x67   :  { %2735 = vmatpush2.bf16.msra.mxu0 %v4220_v60  ;;  %v4322_v59 = vld [vmem:[%s6362_s0 + $0x138] ss:$72 sps:$4 sm:$0xff]   ;;  %v4325_v60 = vld [vmem:[%s6361_s1 + $0x424] ss:$8 sps:$4 sm:$0xff]  }
  0x68   :  { %2838 = vmatpush2.bf16.msra.mxu1 %v4223_v61  ;;  %2736 = vmatprep.subr.bf16.mxu0 %v4229_v62  ;;  %v4328_v61 = vld [vmem:[%s6361_s1 + $0x524] ss:$8 sps:$4 sm:$0xff]  }
  0x69   :  { %2839 = vmatprep.subr.bf16.mxu1 %v4232_v63  ;;  %v4329_v62 = vld [vmem:[%s6362_s0 + $0x1c4] ss:$72 sps:$4 sm:$0xff]  }
  0x6a   :  { %2593 = vmatmul.mubr.bf16.gmra.mxu0 %v4235_v2  ;;  %v4338_v63 = vld [vmem:[%s6362_s0 + $0x1cc] ss:$72 sps:$4 sm:$0xff]  }
  0x6b   :  { %2696 = vmatmul.mubr.bf16.gmra.mxu1 %v4244_v3  ;;  %2737 = vmatpush2.bf16.msra.mxu0 %v4227_v0  ;;  %v4323_v0 = vld [vmem:[%s6361_s1 + $0x420] ss:$8 sps:$4 sm:$0xff]   ;;  %v4334_v2 = vld [vmem:[%s6361_s1 + $0x414] ss:$8 sps:$4 sm:$0xff]  }
  0x6c   :  { %2840 = vmatpush2.bf16.msra.mxu1 %v4230_v1  ;;  %2738 = vmatprep.subr.bf16.mxu0 %v4240_v4  ;;  %v4326_v1 = vld [vmem:[%s6361_s1 + $0x520] ss:$8 sps:$4 sm:$0xff]   ;;  %v4337_v3 = vld [vmem:[%s6361_s1 + $0x514] ss:$8 sps:$4 sm:$0xff]  }
  0x6d   :  { %2841 = vmatprep.subr.bf16.mxu1 %v4243_v5  ;;  %2602 = vmatprep.mubr.bf16.mxu0 %v4251_v6  ;;  %v4331_v4 = vld [vmem:[%s6362_s0 + $0x1c0] ss:$72 sps:$4 sm:$0xff]   ;;  %v4332_v5 = vld [vmem:[%s6361_s1 + $0x410] ss:$8 sps:$4 sm:$0xff]  }
  0x6e   :  { %2705 = vmatprep.mubr.bf16.mxu1 %v4254_v7  ;;  %v4335_v6 = vld [vmem:[%s6361_s1 + $0x510] ss:$8 sps:$4 sm:$0xff]  }
  0x6f   :  { %2739 = vmatpush2.bf16.msra.mxu0 %v4238_v8  ;;  %v4340_v7 = vld [vmem:[%s6362_s0 + $0x1c8] ss:$72 sps:$4 sm:$0xff]   ;;  %v4343_v8 = vld [vmem:[%s6361_s1 + $0x404] ss:$8 sps:$4 sm:$0xff]  }
  0x70   :  { %2842 = vmatpush2.bf16.msra.mxu1 %v4241_v9  ;;  %2740 = vmatprep.subr.bf16.mxu0 %v4247_v10  ;;  %v4346_v9 = vld [vmem:[%s6361_s1 + $0x504] ss:$8 sps:$4 sm:$0xff]   ;;  %v4347_v10 = vld [vmem:[%s6362_s0 + $0x254] ss:$72 sps:$4 sm:$0xff]  }
  0x71   :  { %2843 = vmatprep.subr.bf16.mxu1 %v4250_v11  ;;  %v4356_v11 = vld [vmem:[%s6362_s0 + $0x25c] ss:$72 sps:$4 sm:$0xff]  }
  0x72   :  { %2603 = vmatmul.mubr.bf16.gmra.mxu0 %v4253_v14  ;;  %v4352_v14 = vld [vmem:[%s6361_s1 + $0x4f4] ss:$8 sps:$4 sm:$0xff]  }
  0x73   :  { %2706 = vmatmul.mubr.bf16.gmra.mxu1 %v4262_v15  ;;  %2741 = vmatpush2.bf16.msra.mxu0 %v4245_v12  ;;  %v4341_v12 = vld [vmem:[%s6361_s1 + $0x400] ss:$8 sps:$4 sm:$0xff]   ;;  %v4355_v15 = vld [vmem:[%s6361_s1 + $0x5f4] ss:$8 sps:$4 sm:$0xff]  }
  0x74   :  { %2844 = vmatpush2.bf16.msra.mxu1 %v4248_v13  ;;  %2742 = vmatprep.subr.bf16.mxu0 %v4258_v16  ;;  %v4344_v13 = vld [vmem:[%s6361_s1 + $0x500] ss:$8 sps:$4 sm:$0xff]   ;;  %v4349_v16 = vld [vmem:[%s6362_s0 + $0x250] ss:$72 sps:$4 sm:$0xff]  }
  0x75   :  { %2845 = vmatprep.subr.bf16.mxu1 %v4261_v17  ;;  %2748 = vmatprep.mubr.bf16.mxu0 %v4277_v18  ;;  %v4350_v17 = vld [vmem:[%s6361_s1 + $0x4f0] ss:$8 sps:$4 sm:$0xff]  }
  0x76   :  { %2851 = vmatprep.mubr.bf16.mxu1 %v4280_v19  ;;  %v4353_v18 = vld [vmem:[%s6361_s1 + $0x5f0] ss:$8 sps:$4 sm:$0xff]  }
  0x77   :  { %2743 = vmatpush2.bf16.msra.mxu0 %v4256_v20  ;;  %v4358_v19 = vld [vmem:[%s6362_s0 + $0x258] ss:$72 sps:$4 sm:$0xff]   ;;  %v4361_v20 = vld [vmem:[%s6361_s1 + $0x4e4] ss:$8 sps:$4 sm:$0xff]  }
  0x78   :  { %2846 = vmatpush2.bf16.msra.mxu1 %v4259_v21  ;;  %2744 = vmatprep.subr.bf16.mxu0 %v4265_v22  ;;  %v4364_v21 = vld [vmem:[%s6361_s1 + $0x5e4] ss:$8 sps:$4 sm:$0xff]  }
  0x79   :  { %2847 = vmatprep.subr.bf16.mxu1 %v4268_v23  ;;  %v4365_v22 = vld [vmem:[%s6362_s0 + $0x2e4] ss:$72 sps:$4 sm:$0xff]  }
  0x7a   :  { %v4374_v23 = vld [vmem:[%s6362_s0 + $0x2ec] ss:$72 sps:$4 sm:$0xff]  }
  0x7b   :  { %2745 = vmatpush2.bf16.msra.mxu0 %v4263_v24  ;;  %v4359_v24 = vld [vmem:[%s6361_s1 + $0x4e0] ss:$8 sps:$4 sm:$0xff]  }
  0x7c   :  { %2848 = vmatpush2.bf16.msra.mxu1 %v4266_v25  ;;  %2746 = vmatprep.subr.bf16.mxu0 %v4271_v26  ;;  %v4362_v25 = vld [vmem:[%s6361_s1 + $0x5e0] ss:$8 sps:$4 sm:$0xff]   ;;  %v4370_v26 = vld [vmem:[%s6361_s1 + $0x4d4] ss:$8 sps:$4 sm:$0xff]  }
  0x7d   :  { %2849 = vmatprep.subr.bf16.mxu1 %v4274_v27  ;;  %v4373_v27 = vld [vmem:[%s6361_s1 + $0x5d4] ss:$8 sps:$4 sm:$0xff]  }
  0x7f   :  { %2747 = vmatpush2.bf16.msra.mxu0 %v4269_v28  ;;  %v4367_v28 = vld [vmem:[%s6362_s0 + $0x2e0] ss:$72 sps:$4 sm:$0xff]  }
  0x80   :  { %2850 = vmatpush2.bf16.msra.mxu1 %v4272_v29  ;;  %2922 = vmatprep.subr.bf16.mxu0 %v4283_v30  ;;  %v4368_v29 = vld [vmem:[%s6361_s1 + $0x4d0] ss:$8 sps:$4 sm:$0xff]  }
  0x81   :  { %3025 = vmatprep.subr.bf16.mxu1 %v4286_v31  ;;  %v4371_v30 = vld [vmem:[%s6361_s1 + $0x5d0] ss:$8 sps:$4 sm:$0xff]  }
  0x82   :  { %2749 = vmatmul.mubr.bf16.vlgmr.msra.gmra.mxu0 %v4275_v32  ;;  %v4376_v31 = vld [vmem:[%s6362_s0 + $0x2e8] ss:$72 sps:$4 sm:$0xff]   ;;  %v4379_v32 = vld [vmem:[%s6361_s1 + $0x4c4] ss:$8 sps:$4 sm:$0xff]  }
  0x83   :  { %2852 = vmatmul.mubr.bf16.vlgmr.msra.gmra.mxu1 %v4278_v33  ;;  %2923 = vmatpush1.bf16.msra.mxu0 %v4281_v34  ;;  %v4382_v33 = vld [vmem:[%s6361_s1 + $0x5c4] ss:$8 sps:$4 sm:$0xff]   ;;  %v4383_v34 = vld [vmem:[%s6362_s0 + $0x374] ss:$72 sps:$4 sm:$0xff]  }
  0x84   :  { %3026 = vmatpush1.bf16.msra.mxu1 %v4284_v35  ;;  %2924 = vmatprep.subr.bf16.mxu0 %v4289_v36  ;;  %v4392_v35 = vld [vmem:[%s6362_s0 + $0x37c] ss:$72 sps:$4 sm:$0xff]   ;;  %v4377_v36 = vld [vmem:[%s6361_s1 + $0x4c0] ss:$8 sps:$4 sm:$0xff]  }
  0x85   :  { %3027 = vmatprep.subr.bf16.mxu1 %v4292_v37  ;;  %2758 = vmatprep.mubr.bf16.mxu0 %v4293_v38  ;;  %v4380_v37 = vld [vmem:[%s6361_s1 + $0x5c0] ss:$8 sps:$4 sm:$0xff]   ;;  %v4388_v38 = vld [vmem:[%s6361_s1 + $0x4b4] ss:$8 sps:$4 sm:$0xff]  }
  0x86   :  { %2861 = vmatprep.mubr.bf16.mxu1 %v4302_v39  ;;  %v4391_v39 = vld [vmem:[%s6361_s1 + $0x5b4] ss:$8 sps:$4 sm:$0xff]  }
  0x87   :  { %2925 = vmatpush1.bf16.msra.mxu0 %v4287_v40  ;;  %v4385_v40 = vld [vmem:[%s6362_s0 + $0x370] ss:$72 sps:$4 sm:$0xff]  }
  0x88   :  { %3028 = vmatpush1.bf16.msra.mxu1 %v4290_v41  ;;  %2926 = vmatprep.subr.bf16.mxu0 %v4298_v42  ;;  %v4386_v41 = vld [vmem:[%s6361_s1 + $0x4b0] ss:$8 sps:$4 sm:$0xff]  }
  0x89   :  { %3029 = vmatprep.subr.bf16.mxu1 %v4301_v43  ;;  %v4389_v42 = vld [vmem:[%s6361_s1 + $0x5b0] ss:$8 sps:$4 sm:$0xff]  }
  0x8a   :  { %2759 = vmatmul.mubr.bf16.gmra.mxu0 %v4295_v44  ;;  %v4394_v43 = vld [vmem:[%s6362_s0 + $0x378] ss:$72 sps:$4 sm:$0xff]   ;;  %v4397_v44 = vld [vmem:[%s6361_s1 + $0x4a4] ss:$8 sps:$4 sm:$0xff]  }
  0x8b   :  { %2862 = vmatmul.mubr.bf16.gmra.mxu1 %v4304_v47  ;;  %2927 = vmatpush1.bf16.msra.mxu0 %v4296_v45  ;;  %v4400_v45 = vld [vmem:[%s6361_s1 + $0x5a4] ss:$8 sps:$4 sm:$0xff]  }
  0x8c   :  { %3030 = vmatpush1.bf16.msra.mxu1 %v4299_v46  ;;  %2928 = vmatprep.subr.bf16.mxu0 %v4307_v48  ;;  %v4415_v46 = vld [vmem:[%s6362_s0 + $0x24] ss:$72 sps:$4 sm:$0xff]   ;;  %v4395_v48 = vld [vmem:[%s6361_s1 + $0x4a0] ss:$8 sps:$4 sm:$0xff]  }
  0x8d   :  { %3031 = vmatprep.subr.bf16.mxu1 %v4310_v49  ;;  %2768 = vmatprep.mubr.bf16.mxu0 %v4311_v50  ;;  %v4418_v47 = vld [vmem:[%s6362_s0 + $0x2c] ss:$72 sps:$4 sm:$0xff]   ;;  %v4398_v49 = vld [vmem:[%s6361_s1 + $0x5a0] ss:$8 sps:$4 sm:$0xff]  }
  0x8e   :  { %2871 = vmatprep.mubr.bf16.mxu1 %v4320_v51  ;;  %v4403_v50 = vld [vmem:[%s6361_s1 + $0x494] ss:$8 sps:$4 sm:$0xff]  }
  0x8f   :  { %2929 = vmatpush1.bf16.msra.mxu0 %v4305_v52  ;;  %v4406_v51 = vld [vmem:[%s6361_s1 + $0x594] ss:$8 sps:$4 sm:$0xff]   ;;  %v4401_v52 = vld [vmem:[%s6361_s1 + $0x490] ss:$8 sps:$4 sm:$0xff]  }
  0x90   :  { %3032 = vmatpush1.bf16.msra.mxu1 %v4308_v53  ;;  %2930 = vmatprep.subr.bf16.mxu0 %v4316_v54  ;;  %v4404_v53 = vld [vmem:[%s6361_s1 + $0x590] ss:$8 sps:$4 sm:$0xff]   ;;  %v4409_v54 = vld [vmem:[%s6361_s1 + $0x484] ss:$8 sps:$4 sm:$0xff]  }
  0x91   :  { %3033 = vmatprep.subr.bf16.mxu1 %v4319_v55  ;;  %v4412_v55 = vld [vmem:[%s6361_s1 + $0x584] ss:$8 sps:$4 sm:$0xff]  }
  0x92   :  { %2769 = vmatmul.mubr.bf16.gmra.mxu0 %v4313_v56  ;;  %v4407_v56 = vld [vmem:[%s6361_s1 + $0x480] ss:$8 sps:$4 sm:$0xff]  }
  0x93   :  { %2872 = vmatmul.mubr.bf16.gmra.mxu1 %v4322_v59  ;;  %2931 = vmatpush1.bf16.msra.mxu0 %v4314_v57  ;;  %v4410_v57 = vld [vmem:[%s6361_s1 + $0x580] ss:$8 sps:$4 sm:$0xff]   ;;  %v4424_v59 = vld [vmem:[%s6361_s1 + $0x774] ss:$8 sps:$4 sm:$0xff]  }
  0x94   :  { %3034 = vmatpush1.bf16.msra.mxu1 %v4317_v58  ;;  %2932 = vmatprep.subr.bf16.mxu0 %v4325_v60  ;;  %v4421_v58 = vld [vmem:[%s6361_s1 + $0x674] ss:$8 sps:$4 sm:$0xff]   ;;  %v4413_v60 = vld [vmem:[%s6362_s0 + $0x20] ss:$72 sps:$4 sm:$0xff]  }
  0x95   :  { %3035 = vmatprep.subr.bf16.mxu1 %v4328_v61  ;;  %2778 = vmatprep.mubr.bf16.mxu0 %v4329_v62  ;;  %v4416_v61 = vld [vmem:[%s6362_s0 + $0x28] ss:$72 sps:$4 sm:$0xff]  }
  0x96   :  { %2881 = vmatprep.mubr.bf16.mxu1 %v4338_v63  ;;  %v4419_v62 = vld [vmem:[%s6361_s1 + $0x670] ss:$8 sps:$4 sm:$0xff]  }
  0x97   :  { %2933 = vmatpush1.bf16.msra.mxu0 %v4323_v0  ;;  %v4422_v63 = vld [vmem:[%s6361_s1 + $0x770] ss:$8 sps:$4 sm:$0xff]   ;;  %v4427_v0 = vld [vmem:[%s6361_s1 + $0x664] ss:$8 sps:$4 sm:$0xff]  }
  0x98   :  { %3036 = vmatpush1.bf16.msra.mxu1 %v4326_v1  ;;  %2934 = vmatprep.subr.bf16.mxu0 %v4334_v2  ;;  %v4430_v1 = vld [vmem:[%s6361_s1 + $0x764] ss:$8 sps:$4 sm:$0xff]   ;;  %v4431_v2 = vld [vmem:[%s6362_s0 + $0xb4] ss:$72 sps:$4 sm:$0xff]  }
  0x99   :  { %3037 = vmatprep.subr.bf16.mxu1 %v4337_v3  ;;  %v4440_v3 = vld [vmem:[%s6362_s0 + $0xbc] ss:$72 sps:$4 sm:$0xff]  }
  0x9a   :  { %2779 = vmatmul.mubr.bf16.gmra.mxu0 %v4331_v4  ;;  %v4425_v4 = vld [vmem:[%s6361_s1 + $0x660] ss:$8 sps:$4 sm:$0xff]  }
  0x9b   :  { %2882 = vmatmul.mubr.bf16.gmra.mxu1 %v4340_v7  ;;  %2935 = vmatpush1.bf16.msra.mxu0 %v4332_v5  ;;  %v4428_v5 = vld [vmem:[%s6361_s1 + $0x760] ss:$8 sps:$4 sm:$0xff]   ;;  %v4439_v7 = vld [vmem:[%s6361_s1 + $0x754] ss:$8 sps:$4 sm:$0xff]  }
  0x9c   :  { %3038 = vmatpush1.bf16.msra.mxu1 %v4335_v6  ;;  %2936 = vmatprep.subr.bf16.mxu0 %v4343_v8  ;;  %v4436_v6 = vld [vmem:[%s6361_s1 + $0x654] ss:$8 sps:$4 sm:$0xff]   ;;  %v4433_v8 = vld [vmem:[%s6362_s0 + $0xb0] ss:$72 sps:$4 sm:$0xff]  }
  0x9d   :  { %3039 = vmatprep.subr.bf16.mxu1 %v4346_v9  ;;  %2788 = vmatprep.mubr.bf16.mxu0 %v4347_v10  ;;  %v4434_v9 = vld [vmem:[%s6361_s1 + $0x650] ss:$8 sps:$4 sm:$0xff]  }
  0x9e   :  { %2891 = vmatprep.mubr.bf16.mxu1 %v4356_v11  ;;  %v4437_v10 = vld [vmem:[%s6361_s1 + $0x750] ss:$8 sps:$4 sm:$0xff]  }
  0x9f   :  { %2937 = vmatpush1.bf16.msra.mxu0 %v4341_v12  ;;  %v4442_v11 = vld [vmem:[%s6362_s0 + $0xb8] ss:$72 sps:$4 sm:$0xff]   ;;  %v4445_v12 = vld [vmem:[%s6361_s1 + $0x644] ss:$8 sps:$4 sm:$0xff]  }
  0xa0   :  { %3040 = vmatpush1.bf16.msra.mxu1 %v4344_v13  ;;  %2938 = vmatprep.subr.bf16.mxu0 %v4352_v14  ;;  %v4448_v13 = vld [vmem:[%s6361_s1 + $0x744] ss:$8 sps:$4 sm:$0xff]  }
  0xa1   :  { %3041 = vmatprep.subr.bf16.mxu1 %v4355_v15  ;;  %v4449_v14 = vld [vmem:[%s6362_s0 + $0x144] ss:$72 sps:$4 sm:$0xff]  }
  0xa2   :  { %2789 = vmatmul.mubr.bf16.gmra.mxu0 %v4349_v16  ;;  %v4458_v15 = vld [vmem:[%s6362_s0 + $0x14c] ss:$72 sps:$4 sm:$0xff]   ;;  %v4443_v16 = vld [vmem:[%s6361_s1 + $0x640] ss:$8 sps:$4 sm:$0xff]  }
  0xa3   :  { %2892 = vmatmul.mubr.bf16.gmra.mxu1 %v4358_v19  ;;  %2939 = vmatpush2.bf16.msra.mxu0 %v4350_v17  ;;  %v4446_v17 = vld [vmem:[%s6361_s1 + $0x740] ss:$8 sps:$4 sm:$0xff]   ;;  %v4457_v19 = vld [vmem:[%s6361_s1 + $0x734] ss:$8 sps:$4 sm:$0xff]  }
  0xa4   :  { %3042 = vmatpush2.bf16.msra.mxu1 %v4353_v18  ;;  %2940 = vmatprep.subr.bf16.mxu0 %v4361_v20  ;;  %v4454_v18 = vld [vmem:[%s6361_s1 + $0x634] ss:$8 sps:$4 sm:$0xff]   ;;  %v4451_v20 = vld [vmem:[%s6362_s0 + $0x140] ss:$72 sps:$4 sm:$0xff]  }
  0xa5   :  { %3043 = vmatprep.subr.bf16.mxu1 %v4364_v21  ;;  %2798 = vmatprep.mubr.bf16.mxu0 %v4365_v22  ;;  %v4452_v21 = vld [vmem:[%s6361_s1 + $0x630] ss:$8 sps:$4 sm:$0xff]  }
  0xa6   :  { %2901 = vmatprep.mubr.bf16.mxu1 %v4374_v23  ;;  %v4455_v22 = vld [vmem:[%s6361_s1 + $0x730] ss:$8 sps:$4 sm:$0xff]  }
  0xa7   :  { %2941 = vmatpush2.bf16.msra.mxu0 %v4359_v24  ;;  %v4460_v23 = vld [vmem:[%s6362_s0 + $0x148] ss:$72 sps:$4 sm:$0xff]   ;;  %v4463_v24 = vld [vmem:[%s6361_s1 + $0x624] ss:$8 sps:$4 sm:$0xff]  }
  0xa8   :  { %3044 = vmatpush2.bf16.msra.mxu1 %v4362_v25  ;;  %2942 = vmatprep.subr.bf16.mxu0 %v4370_v26  ;;  %v4466_v25 = vld [vmem:[%s6361_s1 + $0x724] ss:$8 sps:$4 sm:$0xff]   ;;  %v4467_v26 = vld [vmem:[%s6362_s0 + $0x1d4] ss:$72 sps:$4 sm:$0xff]  }
  0xa9   :  { %3045 = vmatprep.subr.bf16.mxu1 %v4373_v27  ;;  %v4476_v27 = vld [vmem:[%s6362_s0 + $0x1dc] ss:$72 sps:$4 sm:$0xff]  }
  0xaa   :  { %2799 = vmatmul.mubr.bf16.gmra.mxu0 %v4367_v28  ;;  %v4461_v28 = vld [vmem:[%s6361_s1 + $0x620] ss:$8 sps:$4 sm:$0xff]  }
  0xab   :  { %2902 = vmatmul.mubr.bf16.gmra.mxu1 %v4376_v31  ;;  %2943 = vmatpush2.bf16.msra.mxu0 %v4368_v29  ;;  %v4464_v29 = vld [vmem:[%s6361_s1 + $0x720] ss:$8 sps:$4 sm:$0xff]   ;;  %v4475_v31 = vld [vmem:[%s6361_s1 + $0x714] ss:$8 sps:$4 sm:$0xff]  }
  0xac   :  { %3046 = vmatpush2.bf16.msra.mxu1 %v4371_v30  ;;  %2944 = vmatprep.subr.bf16.mxu0 %v4379_v32  ;;  %v4472_v30 = vld [vmem:[%s6361_s1 + $0x614] ss:$8 sps:$4 sm:$0xff]   ;;  %v4469_v32 = vld [vmem:[%s6362_s0 + $0x1d0] ss:$72 sps:$4 sm:$0xff]  }
  0xad   :  { %3047 = vmatprep.subr.bf16.mxu1 %v4382_v33  ;;  %2808 = vmatprep.mubr.bf16.mxu0 %v4383_v34  ;;  %v4470_v33 = vld [vmem:[%s6361_s1 + $0x610] ss:$8 sps:$4 sm:$0xff]  }
  0xae   :  { %2911 = vmatprep.mubr.bf16.mxu1 %v4392_v35  ;;  %v4473_v34 = vld [vmem:[%s6361_s1 + $0x710] ss:$8 sps:$4 sm:$0xff]  }
  0xaf   :  { %2945 = vmatpush2.bf16.msra.mxu0 %v4377_v36  ;;  %v4478_v35 = vld [vmem:[%s6362_s0 + $0x1d8] ss:$72 sps:$4 sm:$0xff]   ;;  %v4481_v36 = vld [vmem:[%s6361_s1 + $0x604] ss:$8 sps:$4 sm:$0xff]  }
  0xb0   :  { %3048 = vmatpush2.bf16.msra.mxu1 %v4380_v37  ;;  %2946 = vmatprep.subr.bf16.mxu0 %v4388_v38  ;;  %v4484_v37 = vld [vmem:[%s6361_s1 + $0x704] ss:$8 sps:$4 sm:$0xff]  }
  0xb1   :  { %3049 = vmatprep.subr.bf16.mxu1 %v4391_v39  ;;  %v4485_v38 = vld [vmem:[%s6362_s0 + $0x264] ss:$72 sps:$4 sm:$0xff]  }
  0xb2   :  { %2809 = vmatmul.mubr.bf16.gmra.mxu0 %v4385_v40  ;;  %v4494_v39 = vld [vmem:[%s6362_s0 + $0x26c] ss:$72 sps:$4 sm:$0xff]   ;;  %v4479_v40 = vld [vmem:[%s6361_s1 + $0x600] ss:$8 sps:$4 sm:$0xff]  }
  0xb3   :  { %2912 = vmatmul.mubr.bf16.gmra.mxu1 %v4394_v43  ;;  %2947 = vmatpush2.bf16.msra.mxu0 %v4386_v41  ;;  %v4482_v41 = vld [vmem:[%s6361_s1 + $0x700] ss:$8 sps:$4 sm:$0xff]   ;;  %v4493_v43 = vld [vmem:[%s6361_s1 + $0x7f4] ss:$8 sps:$4 sm:$0xff]  }
  0xb4   :  { %3050 = vmatpush2.bf16.msra.mxu1 %v4389_v42  ;;  %2948 = vmatprep.subr.bf16.mxu0 %v4397_v44  ;;  %v4490_v42 = vld [vmem:[%s6361_s1 + $0x6f4] ss:$8 sps:$4 sm:$0xff]   ;;  %v4487_v44 = vld [vmem:[%s6362_s0 + $0x260] ss:$72 sps:$4 sm:$0xff]  }
  0xb5   :  { %3051 = vmatprep.subr.bf16.mxu1 %v4400_v45  ;;  %2954 = vmatprep.mubr.bf16.mxu0 %v4415_v46  ;;  %v4488_v45 = vld [vmem:[%s6361_s1 + $0x6f0] ss:$8 sps:$4 sm:$0xff]  }
  0xb6   :  { %3057 = vmatprep.mubr.bf16.mxu1 %v4418_v47  ;;  %v4491_v46 = vld [vmem:[%s6361_s1 + $0x7f0] ss:$8 sps:$4 sm:$0xff]  }
  0xb7   :  { %2949 = vmatpush2.bf16.msra.mxu0 %v4395_v48  ;;  %v4496_v47 = vld [vmem:[%s6362_s0 + $0x268] ss:$72 sps:$4 sm:$0xff]   ;;  %v4499_v48 = vld [vmem:[%s6361_s1 + $0x6e4] ss:$8 sps:$4 sm:$0xff]  }
  0xb8   :  { %3052 = vmatpush2.bf16.msra.mxu1 %v4398_v49  ;;  %2950 = vmatprep.subr.bf16.mxu0 %v4403_v50  ;;  %v4502_v49 = vld [vmem:[%s6361_s1 + $0x7e4] ss:$8 sps:$4 sm:$0xff]   ;;  %v4503_v50 = vld [vmem:[%s6362_s0 + $0x2f4] ss:$72 sps:$4 sm:$0xff]  }
  0xb9   :  { %3053 = vmatprep.subr.bf16.mxu1 %v4406_v51  ;;  %v4512_v51 = vld [vmem:[%s6362_s0 + $0x2fc] ss:$72 sps:$4 sm:$0xff]  }
  0xbb   :  { %2951 = vmatpush2.bf16.msra.mxu0 %v4401_v52  ;;  %v4497_v52 = vld [vmem:[%s6361_s1 + $0x6e0] ss:$8 sps:$4 sm:$0xff]  }
  0xbc   :  { %3054 = vmatpush2.bf16.msra.mxu1 %v4404_v53  ;;  %2952 = vmatprep.subr.bf16.mxu0 %v4409_v54  ;;  %v4500_v53 = vld [vmem:[%s6361_s1 + $0x7e0] ss:$8 sps:$4 sm:$0xff]   ;;  %v4508_v54 = vld [vmem:[%s6361_s1 + $0x6d4] ss:$8 sps:$4 sm:$0xff]  }
  0xbd   :  { %3055 = vmatprep.subr.bf16.mxu1 %v4412_v55  ;;  %v4511_v55 = vld [vmem:[%s6361_s1 + $0x7d4] ss:$8 sps:$4 sm:$0xff]  }
  0xbf   :  { %2953 = vmatpush2.bf16.msra.mxu0 %v4407_v56  ;;  %v4505_v56 = vld [vmem:[%s6362_s0 + $0x2f0] ss:$72 sps:$4 sm:$0xff]  }
  0xc0   :  { %3056 = vmatpush2.bf16.msra.mxu1 %v4410_v57  ;;  %3128 = vmatprep.subr.bf16.mxu0 %v4421_v58  ;;  %v4506_v57 = vld [vmem:[%s6361_s1 + $0x6d0] ss:$8 sps:$4 sm:$0xff]  }
  0xc1   :  { %3231 = vmatprep.subr.bf16.mxu1 %v4424_v59  ;;  %v4514_v58 = vld [vmem:[%s6362_s0 + $0x2f8] ss:$72 sps:$4 sm:$0xff]  }
  0xc2   :  { %2955 = vmatmul.mubr.bf16.vlgmr.msra.gmra.mxu0 %v4413_v60  ;;  %v4509_v59 = vld [vmem:[%s6361_s1 + $0x7d0] ss:$8 sps:$4 sm:$0xff]   ;;  %v4517_v60 = vld [vmem:[%s6361_s1 + $0x6c4] ss:$8 sps:$4 sm:$0xff]  }
  0xc3   :  { %3058 = vmatmul.mubr.bf16.vlgmr.msra.gmra.mxu1 %v4416_v61  ;;  %3129 = vmatpush1.bf16.msra.mxu0 %v4419_v62  ;;  %v4520_v61 = vld [vmem:[%s6361_s1 + $0x7c4] ss:$8 sps:$4 sm:$0xff]  }
  0xc4   :  { %3232 = vmatpush1.bf16.msra.mxu1 %v4422_v63  ;;  %3130 = vmatprep.subr.bf16.mxu0 %v4427_v0  ;;  %v4521_v62 = vld [vmem:[%s6362_s0 + $0x384] ss:$72 sps:$4 sm:$0xff]   ;;  %v4515_v0 = vld [vmem:[%s6361_s1 + $0x6c0] ss:$8 sps:$4 sm:$0xff]  }
  0xc5   :  { %3233 = vmatprep.subr.bf16.mxu1 %v4430_v1  ;;  %2964 = vmatprep.mubr.bf16.mxu0 %v4431_v2  ;;  %v4530_v63 = vld [vmem:[%s6362_s0 + $0x38c] ss:$72 sps:$4 sm:$0xff]   ;;  %v4518_v1 = vld [vmem:[%s6361_s1 + $0x7c0] ss:$8 sps:$4 sm:$0xff]  }
  0xc6   :  { %3067 = vmatprep.mubr.bf16.mxu1 %v4440_v3  ;;  %v4526_v2 = vld [vmem:[%s6361_s1 + $0x6b4] ss:$8 sps:$4 sm:$0xff]  }
  0xc7   :  { %3131 = vmatpush1.bf16.msra.mxu0 %v4425_v4  ;;  %v4529_v3 = vld [vmem:[%s6361_s1 + $0x7b4] ss:$8 sps:$4 sm:$0xff]   ;;  %v4523_v4 = vld [vmem:[%s6362_s0 + $0x380] ss:$72 sps:$4 sm:$0xff]  }
  0xc8   :  { %3234 = vmatpush1.bf16.msra.mxu1 %v4428_v5  ;;  %3132 = vmatprep.subr.bf16.mxu0 %v4436_v6  ;;  %v4524_v5 = vld [vmem:[%s6361_s1 + $0x6b0] ss:$8 sps:$4 sm:$0xff]  }
  0xc9   :  { %3235 = vmatprep.subr.bf16.mxu1 %v4439_v7  ;;  %v4532_v6 = vld [vmem:[%s6362_s0 + $0x388] ss:$72 sps:$4 sm:$0xff]  }
  0xca   :  { %2965 = vmatmul.mubr.bf16.gmra.mxu0 %v4433_v8  ;;  %v4527_v7 = vld [vmem:[%s6361_s1 + $0x7b0] ss:$8 sps:$4 sm:$0xff]   ;;  %v4535_v8 = vld [vmem:[%s6361_s1 + $0x6a4] ss:$8 sps:$4 sm:$0xff]  }
  0xcb   :  { %3068 = vmatmul.mubr.bf16.gmra.mxu1 %v4442_v11  ;;  %3133 = vmatpush1.bf16.msra.mxu0 %v4434_v9  ;;  %v4538_v9 = vld [vmem:[%s6361_s1 + $0x7a4] ss:$8 sps:$4 sm:$0xff]  }
  0xcc   :  { %3236 = vmatpush1.bf16.msra.mxu1 %v4437_v10  ;;  %3134 = vmatprep.subr.bf16.mxu0 %v4445_v12  ;;  %v4553_v10 = vld [vmem:[%s6362_s0 + $0x34] ss:$72 sps:$4 sm:$0xff]   ;;  %v4533_v12 = vld [vmem:[%s6361_s1 + $0x6a0] ss:$8 sps:$4 sm:$0xff]  }
  0xcd   :  { %3237 = vmatprep.subr.bf16.mxu1 %v4448_v13  ;;  %2974 = vmatprep.mubr.bf16.mxu0 %v4449_v14  ;;  %v4556_v11 = vld [vmem:[%s6362_s0 + $0x3c] ss:$72 sps:$4 sm:$0xff]   ;;  %v4536_v13 = vld [vmem:[%s6361_s1 + $0x7a0] ss:$8 sps:$4 sm:$0xff]   ;;  %v430_v14 = vlaneseq }
  0xce   :  { %3077 = vmatprep.mubr.bf16.mxu1 %v4458_v15  ;;  %v4541_v15 = vld [vmem:[%s6361_s1 + $0x694] ss:$8 sps:$4 sm:$0xff]  }
  0xcf   :  { %3135 = vmatpush1.bf16.msra.mxu0 %v4443_v16  ;;  %v4544_v16 = vld [vmem:[%s6361_s1 + $0x794] ss:$8 sps:$4 sm:$0xff]  }
  0xd0   :  { %3238 = vmatpush1.bf16.msra.mxu1 %v4446_v17  ;;  %3136 = vmatprep.subr.bf16.mxu0 %v4454_v18  ;;  %v4539_v17 = vld [vmem:[%s6361_s1 + $0x690] ss:$8 sps:$4 sm:$0xff]  }
  0xd1   :  { %3239 = vmatprep.subr.bf16.mxu1 %v4457_v19  ;;  %v4542_v18 = vld [vmem:[%s6361_s1 + $0x790] ss:$8 sps:$4 sm:$0xff]   ;;  %v431_v19 = vshrl.u32 %v430_v14, 7  ;;  %v4586_v14 = vld [vmem:[%s6361_s1 + $0x824] ss:$8 sps:$4 sm:$0xff]  }
  0xd2   :  { %2975 = vmatmul.mubr.bf16.gmra.mxu0 %v4451_v20  ;;  %v4547_v20 = vld [vmem:[%s6361_s1 + $0x684] ss:$8 sps:$4 sm:$0xff]  }
  0xd3   :  { %3078 = vmatmul.mubr.bf16.gmra.mxu1 %v4460_v23  ;;  %3137 = vmatpush1.bf16.msra.mxu0 %v4452_v21  ;;  %v4550_v21 = vld [vmem:[%s6361_s1 + $0x784] ss:$8 sps:$4 sm:$0xff]   ;;  %v4548_v23 = vld [vmem:[%s6361_s1 + $0x780] ss:$8 sps:$4 sm:$0xff]  }
  0xd4   :  { %3240 = vmatpush1.bf16.msra.mxu1 %v4455_v22  ;;  %3138 = vmatprep.subr.bf16.mxu0 %v4463_v24  ;;  %v4545_v22 = vld [vmem:[%s6361_s1 + $0x680] ss:$8 sps:$4 sm:$0xff]   ;;  %v432_v24 = vsub.s32 0, %v431_v19 }
  0xd5   :  { %3241 = vmatprep.subr.bf16.mxu1 %v4466_v25  ;;  %2984 = vmatprep.mubr.bf16.mxu0 %v4467_v26  ;;  %v428_v25 = vld [vmem:[%s6363_s2] sm:$0x3]  ;;  %v4559_v26 = vld [vmem:[%s6361_s1 + $0x874] ss:$8 sps:$4 sm:$0xff]  }
  0xd6   :  { %3087 = vmatprep.mubr.bf16.mxu1 %v4476_v27  ;;  %v4551_v27 = vld [vmem:[%s6362_s0 + $0x30] ss:$72 sps:$4 sm:$0xff]  }
  0xd7   :  { %3139 = vmatpush1.bf16.msra.mxu0 %v4461_v28  ;;  %v436_v28 = vsub.s32 1, %v431_v19 }
  0xd8   :  { %3242 = vmatpush1.bf16.msra.mxu1 %v4464_v29  ;;  %3140 = vmatprep.subr.bf16.mxu0 %v4472_v30  ;;  %v4554_v29 = vld [vmem:[%s6362_s0 + $0x38] ss:$72 sps:$4 sm:$0xff]   ;;  %v5720_v30 = vrot.slane %v428_v25, %v432_v24 }
  0xd9   :  { %3243 = vmatprep.subr.bf16.mxu1 %v4475_v31  ;;  %v4557_v31 = vld [vmem:[%s6361_s1 + $0x870] ss:$8 sps:$4 sm:$0xff]  }
  0xda   :  { %2985 = vmatmul.mubr.bf16.gmra.mxu0 %v4469_v32  ;;  %v4562_v32 = vld [vmem:[%s6361_s1 + $0x864] ss:$8 sps:$4 sm:$0xff]  }
  0xdb   :  { %3088 = vmatmul.mubr.bf16.gmra.mxu1 %v4478_v35  ;;  %3141 = vmatpush1.bf16.msra.mxu0 %v4470_v33  ;;  %v5728_v33 = vrot.slane %v428_v25, %v436_v28  ;;  %v4569_v35 = vld [vmem:[%s6362_s0 + $0xcc] ss:$72 sps:$4 sm:$0xff]  }
  0xdc   :  { %3244 = vmatpush1.bf16.msra.mxu1 %v4473_v34  ;;  %3142 = vmatprep.subr.bf16.mxu0 %v4481_v36  ;;  %v4563_v34 = vld [vmem:[%s6362_s0 + $0xc4] ss:$72 sps:$4 sm:$0xff]  }
  0xdd   :  { %3245 = vmatprep.subr.bf16.mxu1 %v4484_v37  ;;  %2994 = vmatprep.mubr.bf16.mxu0 %v4485_v38 }
  0xde   :  { %3097 = vmatprep.mubr.bf16.mxu1 %v4494_v39  ;;  %v4560_v39 = vld [vmem:[%s6361_s1 + $0x860] ss:$8 sps:$4 sm:$0xff]  }
  0xdf   :  { %3143 = vmatpush1.bf16.msra.mxu0 %v4479_v40 }
  0xe0   :  { %3246 = vmatpush1.bf16.msra.mxu1 %v4482_v41  ;;  %3144 = vmatprep.subr.bf16.mxu0 %v4490_v42  ;;  %v4568_v42 = vld [vmem:[%s6361_s1 + $0x854] ss:$8 sps:$4 sm:$0xff]  }
  0xe1   :  { %3247 = vmatprep.subr.bf16.mxu1 %v4493_v43 }
  0xe2   :  { %2995 = vmatmul.mubr.bf16.gmra.mxu0 %v4487_v44 }
  0xe3   :  { %3098 = vmatmul.mubr.bf16.gmra.mxu1 %v4496_v47  ;;  %3145 = vmatpush2.bf16.msra.mxu0 %v4488_v45  ;;  %v4565_v45 = vld [vmem:[%s6362_s0 + $0xc0] ss:$72 sps:$4 sm:$0xff]  }
  0xe4   :  { %3248 = vmatpush2.bf16.msra.mxu1 %v4491_v46  ;;  %3146 = vmatprep.subr.bf16.mxu0 %v4499_v48  ;;  %v4571_v48 = vld [vmem:[%s6362_s0 + $0xc8] ss:$72 sps:$4 sm:$0xff]  }
  0xe5   :  { %3249 = vmatprep.subr.bf16.mxu1 %v4502_v49  ;;  %3004 = vmatprep.mubr.bf16.mxu0 %v4503_v50 }
  0xe6   :  { %3107 = vmatprep.mubr.bf16.mxu1 %v4512_v51  ;;  %v4566_v51 = vld [vmem:[%s6361_s1 + $0x850] ss:$8 sps:$4 sm:$0xff]  }
  0xe7   :  { %3147 = vmatpush2.bf16.msra.mxu0 %v4497_v52 }
  0xe8   :  { %3250 = vmatpush2.bf16.msra.mxu1 %v4500_v53  ;;  %3148 = vmatprep.subr.bf16.mxu0 %v4508_v54  ;;  %v4574_v54 = vld [vmem:[%s6361_s1 + $0x844] ss:$8 sps:$4 sm:$0xff]  }
  0xe9   :  { %3251 = vmatprep.subr.bf16.mxu1 %v4511_v55 }
  0xea   :  { %3005 = vmatmul.mubr.bf16.gmra.mxu0 %v4505_v56 }
  0xeb   :  { %3108 = vmatmul.mubr.bf16.gmra.mxu1 %v4514_v58  ;;  %3149 = vmatpush2.bf16.msra.mxu0 %v4506_v57  ;;  %v4575_v57 = vld [vmem:[%s6362_s0 + $0x154] ss:$72 sps:$4 sm:$0xff]  }
  0xec   :  { %3252 = vmatpush2.bf16.msra.mxu1 %v4509_v59  ;;  %3150 = vmatprep.subr.bf16.mxu0 %v4517_v60  ;;  %v4581_v58 = vld [vmem:[%s6362_s0 + $0x15c] ss:$72 sps:$4 sm:$0xff]  }
  0xed   :  { %3253 = vmatprep.subr.bf16.mxu1 %v4520_v61  ;;  %3014 = vmatprep.mubr.bf16.mxu0 %v4521_v62 }
  0xee   :  { %3117 = vmatprep.mubr.bf16.mxu1 %v4530_v63  ;;  %v4572_v63 = vld [vmem:[%s6361_s1 + $0x840] ss:$8 sps:$4 sm:$0xff]  }
  0xef   :  { %3151 = vmatpush2.bf16.msra.mxu0 %v4515_v0 }
  0xf0   :  { %3254 = vmatpush2.bf16.msra.mxu1 %v4518_v1  ;;  %3152 = vmatprep.subr.bf16.mxu0 %v4526_v2  ;;  %v4580_v2 = vld [vmem:[%s6361_s1 + $0x834] ss:$8 sps:$4 sm:$0xff]  }
  0xf1   :  { %3255 = vmatprep.subr.bf16.mxu1 %v4529_v3 }
  0xf2   :  { %3015 = vmatmul.mubr.bf16.gmra.mxu0 %v4523_v4 }
  0xf3   :  { %3118 = vmatmul.mubr.bf16.gmra.mxu1 %v4532_v6  ;;  %3153 = vmatpush2.bf16.msra.mxu0 %v4524_v5  ;;  %v4577_v5 = vld [vmem:[%s6362_s0 + $0x150] ss:$72 sps:$4 sm:$0xff]  }
  0xf4   :  { %3256 = vmatpush2.bf16.msra.mxu1 %v4527_v7  ;;  %3154 = vmatprep.subr.bf16.mxu0 %v4535_v8  ;;  %v4583_v8 = vld [vmem:[%s6362_s0 + $0x158] ss:$72 sps:$4 sm:$0xff]  }
  0xf5   :  { %3257 = vmatprep.subr.bf16.mxu1 %v4538_v9  ;;  %3160 = vmatprep.mubr.bf16.mxu0 %v4553_v10 }
  0xf6   :  { %3263 = vmatprep.mubr.bf16.mxu1 %v4556_v11  ;;  %v4578_v11 = vld [vmem:[%s6361_s1 + $0x830] ss:$8 sps:$4 sm:$0xff]  }
  0xf7   :  { %3155 = vmatpush2.bf16.msra.mxu0 %v4533_v12 }
  0xf8   :  { %3258 = vmatpush2.bf16.msra.mxu1 %v4536_v13  ;;  %3156 = vmatprep.subr.bf16.mxu0 %v4541_v15 }
  0xf9   :  { %3259 = vmatprep.subr.bf16.mxu1 %v4544_v16 }
  0xfb   :  { %3157 = vmatpush2.bf16.msra.mxu0 %v4539_v17  ;;  %v4587_v17 = vld [vmem:[%s6362_s0 + $0x1e4] ss:$72 sps:$4 sm:$0xff]  }
  0xfc   :  { %3260 = vmatpush2.bf16.msra.mxu1 %v4542_v18  ;;  %3158 = vmatprep.subr.bf16.mxu0 %v4547_v20  ;;  %v4593_v18 = vld [vmem:[%s6362_s0 + $0x1ec] ss:$72 sps:$4 sm:$0xff]  }
  0xfd   :  { %3261 = vmatprep.subr.bf16.mxu1 %v4550_v21 }
  0xff   :  { %3159 = vmatpush2.bf16.msra.mxu0 %v4545_v22 }
 0x100   :  { %3262 = vmatpush2.bf16.msra.mxu1 %v4548_v23  ;;  %3334 = vmatprep.subr.bf16.mxu0 %v4559_v26  ;;  %v4584_v23 = vld [vmem:[%s6361_s1 + $0x820] ss:$8 sps:$4 sm:$0xff]  }
 0x101   :  { %4009 = vmatprep.subr.bf16.mxu1 %v4559_v26  ;;  %v4592_v26 = vld [vmem:[%s6361_s1 + $0x814] ss:$8 sps:$4 sm:$0xff]  }
 0x102   :  { %v2544_v36 = vpop.f32.mrf.mxu0  ;;  %3161 = vmatmul.mubr.bf16.vlgmr.msra.gmra.mxu0 %v4551_v27 }
 0x103   :  { %3264 = vmatmul.mubr.bf16.vlgmr.msra.gmra.mxu1 %v4554_v29  ;;  %v2647_v37 = vpop.f32.mrf.mxu1  ;;  %v2545_v38 = vadd.f32 %v2544_v36, %v5720_v30  ;;  %3335 = vmatpush1.bf16.msra.mxu0 %v4557_v31 }
 0x104   :  { %4025 = vmatpush1.bf16.msra.mxu1 %v4557_v31  ;;  %v2546_v40 = vpop.f32.mrf.mxu0  ;;  %3336 = vmatprep.subr.bf16.mxu0 %v4562_v32  ;;  %v4589_v31 = vld [vmem:[%s6362_s0 + $0x1e0] ss:$72 sps:$4 sm:$0xff]  }
 0x105   :  { %v2649_v41 = vpop.f32.mrf.mxu1  ;;  %4010 = vmatprep.subr.bf16.mxu1 %v4562_v32  ;;  %v2547_v43 = vadd.f32 %v2546_v40, %v5728_v33  ;;  %v5744_v44 = vadd.f32 %v2647_v37, %v2545_v38  ;;  %3170 = vmatprep.mubr.bf16.mxu0 %v4563_v34  ;;  %v4595_v34 = vld [vmem:[%s6362_s0 + $0x1e8] ss:$72 sps:$4 sm:$0xff]   ;;  %v4598_v40 = vld [vmem:[%s6361_s1 + $0x804] ss:$8 sps:$4 sm:$0xff]  }
 0x106   :  { %3273 = vmatprep.mubr.bf16.mxu1 %v4569_v35  ;;  %v2548_v46 = vpop.f32.mrf.mxu0  ;;  %v4590_v37 = vld [vmem:[%s6361_s1 + $0x810] ss:$8 sps:$4 sm:$0xff]  }
 0x107   :  { %v2651_v47 = vpop.f32.mrf.mxu1  ;;  %v2549_v49 = vadd.f32 %v2548_v46, %v5720_v30  ;;  %v5753_v50 = vadd.f32 %v2649_v41, %v2547_v43  ;;  %3337 = vmatpush1.bf16.msra.mxu0 %v4560_v39  ;;  %v4599_v43 = vld [vmem:[%s6362_s0 + $0x274] ss:$72 sps:$4 sm:$0xff]  }
 0x108   :  { %4026 = vmatpush1.bf16.msra.mxu1 %v4560_v39  ;;  %v2550_v52 = vpop.f32.mrf.mxu0  ;;  %3338 = vmatprep.subr.bf16.mxu0 %v4568_v42 }
 0x109   :  { %v2653_v53 = vpop.f32.mrf.mxu1  ;;  %4011 = vmatprep.subr.bf16.mxu1 %v4568_v42  ;;  %v2551_v55 = vadd.f32 %v2550_v52, %v5728_v33  ;;  %v5762_v56 = vadd.f32 %v2651_v47, %v2549_v49 }
 0x10a   :  { %3171 = vmatmul.mubr.bf16.gmra.mxu0 %v4565_v45  ;;  %v2554_v59 = vpop.f32.mrf.mxu0  ;;  %v4605_v45 = vld [vmem:[%s6362_s0 + $0x27c] ss:$72 sps:$4 sm:$0xff]  }
 0x10b   :  { %3274 = vmatmul.mubr.bf16.gmra.mxu1 %v4571_v48  ;;  %v2657_v60 = vpop.f32.mrf.mxu1  ;;  %v5770_v61 = vadd.f32 %v2653_v53, %v2551_v55  ;;  %3339 = vmatpush1.bf16.msra.mxu0 %v4566_v51  ;;  %v2555_v62 = vadd.f32 %v2554_v59, %v5720_v30  ;;  %v4601_v59 = vld [vmem:[%s6362_s0 + $0x270] ss:$72 sps:$4 sm:$0xff]  }
 0x10c   :  { %4027 = vmatpush1.bf16.msra.mxu1 %v4566_v51  ;;  %3340 = vmatprep.subr.bf16.mxu0 %v4574_v54  ;;  %v2556_v0 = vpop.f32.mrf.mxu0  ;;  %v4596_v51 = vld [vmem:[%s6361_s1 + $0x800] ss:$8 sps:$4 sm:$0xff]  }
 0x10d   :  { %4012 = vmatprep.subr.bf16.mxu1 %v4574_v54  ;;  %v2659_v1 = vpop.f32.mrf.mxu1  ;;  %v2557_v3 = vadd.f32 %v2556_v0, %v5728_v33  ;;  %v5780_v4 = vadd.f32 %v2657_v60, %v2555_v62  ;;  %3180 = vmatprep.mubr.bf16.mxu0 %v4575_v57  ;;  %v4604_v54 = vld [vmem:[%s6361_s1 + $0x8f4] ss:$8 sps:$4 sm:$0xff]   ;;  %v4607_v62 = vld [vmem:[%s6362_s0 + $0x278] ss:$72 sps:$4 sm:$0xff]  }
 0x10e   :  { %3283 = vmatprep.mubr.bf16.mxu1 %v4581_v58  ;;  %v2558_v6 = vpop.f32.mrf.mxu0 }
 0x10f   :  { %v2661_v7 = vpop.f32.mrf.mxu1  ;;  %3341 = vmatpush1.bf16.msra.mxu0 %v4572_v63  ;;  %v2559_v9 = vadd.f32 %v2558_v6, %v5720_v30  ;;  %v5789_v10 = vadd.f32 %v2659_v1, %v2557_v3  ;;  %v4602_v1 = vld [vmem:[%s6361_s1 + $0x8f0] ss:$8 sps:$4 sm:$0xff]  }
 0x110   :  { %4028 = vmatpush1.bf16.msra.mxu1 %v4572_v63  ;;  %3342 = vmatprep.subr.bf16.mxu0 %v4580_v2  ;;  %v2560_v12 = vpop.f32.mrf.mxu0 }
 0x111   :  { %4013 = vmatprep.subr.bf16.mxu1 %v4580_v2  ;;  %v2663_v13 = vpop.f32.mrf.mxu1  ;;  %v2561_v15 = vadd.f32 %v2560_v12, %v5728_v33  ;;  %v5798_v16 = vadd.f32 %v2661_v7, %v2559_v9  ;;  %v4617_v9 = vld [vmem:[%s6362_s0 + $0x30c] ss:$72 sps:$4 sm:$0xff]  }
 0x112   :  { %3181 = vmatmul.mubr.bf16.gmra.mxu0 %v4577_v5  ;;  %v2564_v19 = vpop.f32.mrf.mxu0  ;;  %v4610_v5 = vld [vmem:[%s6361_s1 + $0x8e4] ss:$8 sps:$4 sm:$0xff]  }
 0x113   :  { %3284 = vmatmul.mubr.bf16.gmra.mxu1 %v4583_v8  ;;  %v2667_v20 = vpop.f32.mrf.mxu1  ;;  %3343 = vmatpush1.bf16.msra.mxu0 %v4578_v11  ;;  %v2565_v21 = vadd.f32 %v2564_v19, %v5720_v30  ;;  %v5807_v22 = vadd.f32 %v2663_v13, %v2561_v15  ;;  %v4611_v8 = vld [vmem:[%s6362_s0 + $0x304] ss:$72 sps:$4 sm:$0xff]   ;;  %v4608_v15 = vld [vmem:[%s6361_s1 + $0x8e0] ss:$8 sps:$4 sm:$0xff]   ;;  %v4616_v19 = vld [vmem:[%s6361_s1 + $0x8d4] ss:$8 sps:$4 sm:$0xff]  }
 0x114   :  { %4029 = vmatpush1.bf16.msra.mxu1 %v4578_v11  ;;  %3344 = vmatprep.subr.bf16.mxu0 %v4586_v14  ;;  %v2566_v24 = vpop.f32.mrf.mxu0 }
 0x115   :  { %4014 = vmatprep.subr.bf16.mxu1 %v4586_v14  ;;  %v2669_v25 = vpop.f32.mrf.mxu1  ;;  %v2567_v27 = vadd.f32 %v2566_v24, %v5728_v33  ;;  %v5816_v28 = vadd.f32 %v2667_v20, %v2565_v21  ;;  %3190 = vmatprep.mubr.bf16.mxu0 %v4587_v17  ;;  %v4613_v24 = vld [vmem:[%s6362_s0 + $0x300] ss:$72 sps:$4 sm:$0xff]  }
 0x116   :  { %3293 = vmatprep.mubr.bf16.mxu1 %v4593_v18  ;;  %v2568_v29 = vpop.f32.mrf.mxu0 }
 0x117   :  { %v2671_v32 = vpop.f32.mrf.mxu1  ;;  %3345 = vmatpush1.bf16.msra.mxu0 %v4584_v23  ;;  %v2569_v35 = vadd.f32 %v2568_v29, %v5720_v30  ;;  %v5825_v36 = vadd.f32 %v2669_v25, %v2567_v27 }
 0x118   :  { %4030 = vmatpush1.bf16.msra.mxu1 %v4584_v23  ;;  %3346 = vmatprep.subr.bf16.mxu0 %v4592_v26  ;;  %v2570_v38 = vpop.f32.mrf.mxu0 }
 0x119   :  { %4015 = vmatprep.subr.bf16.mxu1 %v4592_v26  ;;  %v2673_v39 = vpop.f32.mrf.mxu1  ;;  %v2571_v41 = vadd.f32 %v2570_v38, %v5728_v33  ;;  %v5834_v42 = vadd.f32 %v2671_v32, %v2569_v35  ;;  %v4619_v26 = vld [vmem:[%s6362_s0 + $0x308] ss:$72 sps:$4 sm:$0xff]   ;;  %v4622_v35 = vld [vmem:[%s6361_s1 + $0x8c4] ss:$8 sps:$4 sm:$0xff]  }
 0x11a   :  { %3191 = vmatmul.mubr.bf16.gmra.mxu0 %v4589_v31  ;;  %v2574_v46 = vpop.f32.mrf.mxu0  ;;  %v4614_v31 = vld [vmem:[%s6361_s1 + $0x8d0] ss:$8 sps:$4 sm:$0xff]  }
 0x11b   :  { %3294 = vmatmul.mubr.bf16.gmra.mxu1 %v4595_v34  ;;  %v2677_v47 = vpop.f32.mrf.mxu1  ;;  %3347 = vmatpush1.bf16.msra.mxu0 %v4590_v37  ;;  %v2575_v48 = vadd.f32 %v2574_v46, %v5720_v30  ;;  %v5843_v49 = vadd.f32 %v2673_v39, %v2571_v41  ;;  %v4623_v39 = vld [vmem:[%s6362_s0 + $0x394] ss:$72 sps:$4 sm:$0xff]  }
 0x11c   :  { %4031 = vmatpush1.bf16.msra.mxu1 %v4590_v37  ;;  %3348 = vmatprep.subr.bf16.mxu0 %v4598_v40  ;;  %v2576_v52 = vpop.f32.mrf.mxu0 }
 0x11d   :  { %4016 = vmatprep.subr.bf16.mxu1 %v4598_v40  ;;  %v2679_v53 = vpop.f32.mrf.mxu1  ;;  %v2577_v55 = vadd.f32 %v2576_v52, %v5728_v33  ;;  %v5852_v57 = vadd.f32 %v2677_v47, %v2575_v48  ;;  %3200 = vmatprep.mubr.bf16.mxu0 %v4599_v43  ;;  %v4629_v40 = vld [vmem:[%s6362_s0 + $0x39c] ss:$72 sps:$4 sm:$0xff]   ;;  %v4620_v47 = vld [vmem:[%s6361_s1 + $0x8c0] ss:$8 sps:$4 sm:$0xff]  }
 0x11e   :  { %3303 = vmatprep.mubr.bf16.mxu1 %v4605_v45  ;;  %v2578_v58 = vpop.f32.mrf.mxu0  ;;  %v4628_v52 = vld [vmem:[%s6361_s1 + $0x8b4] ss:$8 sps:$4 sm:$0xff]  }
 0x11f   :  { %v2681_v60 = vpop.f32.mrf.mxu1  ;;  %3349 = vmatpush1.bf16.msra.mxu0 %v4596_v51  ;;  %v2579_v63 = vadd.f32 %v2578_v58, %v5720_v30  ;;  %v5861_v0 = vadd.f32 %v2679_v53, %v2577_v55  ;;  %v4625_v58 = vld [vmem:[%s6362_s0 + $0x390] ss:$72 sps:$4 sm:$0xff]  }
 0x120   :  { %4032 = vmatpush1.bf16.msra.mxu1 %v4596_v51  ;;  %3350 = vmatprep.subr.bf16.mxu0 %v4604_v54  ;;  %v2580_v2 = vpop.f32.mrf.mxu0 }
 0x121   :  { %4017 = vmatprep.subr.bf16.mxu1 %v4604_v54  ;;  %v2683_v3 = vpop.f32.mrf.mxu1  ;;  %v2581_v6 = vadd.f32 %v2580_v2, %v5728_v33  ;;  %v5870_v7 = vadd.f32 %v2681_v60, %v2579_v63  ;;  %v4631_v60 = vld [vmem:[%s6362_s0 + $0x398] ss:$72 sps:$4 sm:$0xff]  }
 0x122   :  { %3201 = vmatmul.mubr.bf16.gmra.mxu0 %v4601_v59  ;;  %v2584_v11 = vpop.f32.mrf.mxu0 }
 0x123   :  { %3304 = vmatmul.mubr.bf16.gmra.mxu1 %v4607_v62  ;;  %v2687_v12 = vpop.f32.mrf.mxu1  ;;  %3351 = vmatpush2.bf16.msra.mxu0 %v4602_v1  ;;  %v2585_v13 = vadd.f32 %v2584_v11, %v5720_v30  ;;  %v5879_v14 = vadd.f32 %v2683_v3, %v2581_v6  ;;  %v4646_v11 = vld [vmem:[%s6362_s0 + $0x284] ss:$72 sps:$4 sm:$0xff]  }
 0x124   :  { %4033 = vmatpush2.bf16.msra.mxu1 %v4602_v1  ;;  %3352 = vmatprep.subr.bf16.mxu0 %v4610_v5  ;;  %v2586_v17 = vpop.f32.mrf.mxu0  ;;  %v4626_v1 = vld [vmem:[%s6361_s1 + $0x8b0] ss:$8 sps:$4 sm:$0xff]  }
 0x125   :  { %4018 = vmatprep.subr.bf16.mxu1 %v4610_v5  ;;  %v2689_v18 = vpop.f32.mrf.mxu1  ;;  %v2587_v20 = vadd.f32 %v2586_v17, %v5728_v33  ;;  %v5888_v21 = vadd.f32 %v2687_v12, %v2585_v13  ;;  %3210 = vmatprep.mubr.bf16.mxu0 %v4611_v8  ;;  %v4634_v5 = vld [vmem:[%s6361_s1 + $0x8a4] ss:$8 sps:$4 sm:$0xff]  }
 0x126   :  { %3313 = vmatprep.mubr.bf16.mxu1 %v4617_v9  ;;  %v2588_v23 = vpop.f32.mrf.mxu0  ;;  %v4643_v9 = vld [vmem:[%s6362_s0 + $0x44] ss:$72 sps:$4 sm:$0xff]  }
 0x127   :  { %v2691_v25 = vpop.f32.mrf.mxu1  ;;  %3353 = vmatpush2.bf16.msra.mxu0 %v4608_v15  ;;  %v2589_v27 = vadd.f32 %v2588_v23, %v5720_v30  ;;  %v5897_v29 = vadd.f32 %v2689_v18, %v2587_v20  ;;  %v4632_v18 = vld [vmem:[%s6361_s1 + $0x8a0] ss:$8 sps:$4 sm:$0xff]   ;;  %v4637_v23 = vld [vmem:[%s6361_s1 + $0x894] ss:$8 sps:$4 sm:$0xff]  }
 0x128   :  { %4034 = vmatpush2.bf16.msra.mxu1 %v4608_v15  ;;  %3354 = vmatprep.subr.bf16.mxu0 %v4616_v19  ;;  %v2590_v32 = vpop.f32.mrf.mxu0 }
 0x129   :  { %4019 = vmatprep.subr.bf16.mxu1 %v4616_v19  ;;  %v2693_v34 = vpop.f32.mrf.mxu1  ;;  %v2591_v37 = vadd.f32 %v2590_v32, %v5728_v33  ;;  %v5906_v38 = vadd.f32 %v2691_v25, %v2589_v27 }
 0x12a   :  { %3211 = vmatmul.mubr.bf16.gmra.mxu0 %v4613_v24  ;;  %v2594_v41 = vpop.f32.mrf.mxu0 }
 0x12b   :  { %3314 = vmatmul.mubr.bf16.gmra.mxu1 %v4619_v26  ;;  %v2697_v43 = vpop.f32.mrf.mxu1  ;;  %3355 = vmatpush2.bf16.msra.mxu0 %v4614_v31  ;;  %v2595_v45 = vadd.f32 %v2594_v41, %v5720_v30  ;;  %v5915_v46 = vadd.f32 %v2693_v34, %v2591_v37  ;;  %v4635_v34 = vld [vmem:[%s6361_s1 + $0x890] ss:$8 sps:$4 sm:$0xff]  }
 0x12c   :  { %4035 = vmatpush2.bf16.msra.mxu1 %v4614_v31  ;;  %3356 = vmatprep.subr.bf16.mxu0 %v4622_v35  ;;  %v2596_v48 = vpop.f32.mrf.mxu0 }
 0x12d   :  { %4020 = vmatprep.subr.bf16.mxu1 %v4622_v35  ;;  %v2699_v51 = vpop.f32.mrf.mxu1  ;;  %v2597_v53 = vadd.f32 %v2596_v48, %v5728_v33  ;;  %v5924_v54 = vadd.f32 %v2697_v43, %v2595_v45  ;;  %3220 = vmatprep.mubr.bf16.mxu0 %v4623_v39  ;;  %v4640_v39 = vld [vmem:[%s6361_s1 + $0x884] ss:$8 sps:$4 sm:$0xff]   ;;  %v4638_v43 = vld [vmem:[%s6361_s1 + $0x880] ss:$8 sps:$4 sm:$0xff]   ;;  %v4652_v48 = vld [vmem:[%s6362_s0 + $0x314] ss:$72 sps:$4 sm:$0xff]  }
 0x12e   :  { %3323 = vmatprep.mubr.bf16.mxu1 %v4629_v40  ;;  %v2598_v55 = vpop.f32.mrf.mxu0  ;;  %v4641_v45 = vld [vmem:[%s6362_s0 + $0x40] ss:$72 sps:$4 sm:$0xff]  }
 0x12f   :  { %v2701_v59 = vpop.f32.mrf.mxu1  ;;  %3357 = vmatpush2.bf16.msra.mxu0 %v4620_v47  ;;  %v2599_v62 = vadd.f32 %v2598_v55, %v5720_v30  ;;  %v5933_v63 = vadd.f32 %v2699_v51, %v2597_v53 }
 0x130   :  { %4036 = vmatpush2.bf16.msra.mxu1 %v4620_v47  ;;  %3358 = vmatprep.subr.bf16.mxu0 %v4628_v52  ;;  %v2600_v2 = vpop.f32.mrf.mxu0  ;;  %v4649_v47 = vld [vmem:[%s6362_s0 + $0xd4] ss:$72 sps:$4 sm:$0xff]  }
 0x131   :  { %4021 = vmatprep.subr.bf16.mxu1 %v4628_v52  ;;  %v2703_v3 = vpop.f32.mrf.mxu1  ;;  %v2601_v6 = vadd.f32 %v2600_v2, %v5728_v33  ;;  %v5942_v8 = vadd.f32 %v2701_v59, %v2599_v62  ;;  %v4647_v2 = vld [vmem:[%s6362_s0 + $0xd0] ss:$72 sps:$4 sm:$0xff]  }
 0x132   :  { %3221 = vmatmul.mubr.bf16.gmra.mxu0 %v4625_v58  ;;  %v2604_v12 = vpop.f32.mrf.mxu0 }
 0x133   :  { %3324 = vmatmul.mubr.bf16.gmra.mxu1 %v4631_v60  ;;  %v2707_v13 = vpop.f32.mrf.mxu1  ;;  %3359 = vmatpush2.bf16.msra.mxu0 %v4626_v1  ;;  %v2605_v15 = vadd.f32 %v2604_v12, %v5720_v30  ;;  %v5951_v17 = vadd.f32 %v2703_v3, %v2601_v6  ;;  %v4650_v3 = vld [vmem:[%s6362_s0 + $0x310] ss:$72 sps:$4 sm:$0xff]   ;;  %v4658_v6 = vld [vmem:[%s6362_s0 + $0x3a4] ss:$72 sps:$4 sm:$0xff]  }
 0x134   :  { %4037 = vmatpush2.bf16.msra.mxu1 %v4626_v1  ;;  %3360 = vmatprep.subr.bf16.mxu0 %v4634_v5  ;;  %v2606_v19 = vpop.f32.mrf.mxu0 }
 0x135   :  { %4022 = vmatprep.subr.bf16.mxu1 %v4634_v5  ;;  %v2709_v20 = vpop.f32.mrf.mxu1  ;;  %v2607_v24 = vadd.f32 %v2606_v19, %v5728_v33  ;;  %v5960_v25 = vadd.f32 %v2707_v13, %v2605_v15  ;;  %3366 = vmatprep.mubr.bf16.mxu0 %v4643_v9 }
 0x136   :  { %3406 = vmatprep.mubr.bf16.mxu1 %v4646_v11  ;;  %v2608_v26 = vpop.f32.mrf.mxu0 }
 0x137   :  { %v2711_v27 = vpop.f32.mrf.mxu1  ;;  %3361 = vmatpush2.bf16.msra.mxu0 %v4632_v18  ;;  %v2609_v31 = vadd.f32 %v2608_v26, %v5720_v30  ;;  %v5963_v32 = vadd.f32 %v2709_v20, %v2607_v24 }
 0x138   :  { %4038 = vmatpush2.bf16.msra.mxu1 %v4632_v18  ;;  %3362 = vmatprep.subr.bf16.mxu0 %v4637_v23  ;;  %v2610_v35 = vpop.f32.mrf.mxu0 }
 0x139   :  { %4023 = vmatprep.subr.bf16.mxu1 %v4637_v23  ;;  %v2713_v37 = vpop.f32.mrf.mxu1  ;;  %v2611_v40 = vadd.f32 %v2610_v35, %v5728_v33  ;;  %v5972_v41 = vadd.f32 %v2711_v27, %v2609_v31  ;;  %v4644_v33 = vld [vmem:[%s6362_s0 + $0x280] ss:$72 sps:$4 sm:$0xff]  }
 0x13a   :  { %v4653_v31 = vld [vmem:[%s6362_s0 + $0x160] ss:$72 sps:$4 sm:$0xff]  }
 0x13b   :  { %3363 = vmatpush2.bf16.msra.mxu0 %v4635_v34  ;;  %v5974_v30 = vadd.f32 %v2713_v37, %v2611_v40 }
 0x13c   :  { %4039 = vmatpush2.bf16.msra.mxu1 %v4635_v34  ;;  %3364 = vmatprep.subr.bf16.mxu0 %v4640_v39 }
 0x13d   :  { %4024 = vmatprep.subr.bf16.mxu1 %v4640_v39 }
 0x13f   :  { %3365 = vmatpush2.bf16.msra.mxu0 %v4638_v43 }
 0x140   :  { %4040 = vmatpush2.bf16.msra.mxu1 %v4638_v43 }
 0x142   :  { %v2750_v51 = vpop.f32.mrf.mxu0  ;;  %3367 = vmatmul.mubr.bf16.vlgmr.msra.gmra.mxu0 %v4641_v45 }
 0x143   :  { %3407 = vmatmul.mubr.bf16.vlgmr.msra.gmra.mxu1 %v4644_v33  ;;  %v2853_v52 = vpop.f32.mrf.mxu1  ;;  %v2751_v53 = vadd.f32 %v2750_v51, %v5744_v44  ;;  %3376 = vmatprep.mubr.bf16.mxu0 %v4649_v47 }
 0x144   :  { %3416 = vmatprep.mubr.bf16.mxu1 %v4652_v48  ;;  %v2752_v55 = vpop.f32.mrf.mxu0 }
 0x145   :  { %v2855_v58 = vpop.f32.mrf.mxu1  ;;  %v2753_v59 = vadd.f32 %v2752_v55, %v5753_v50  ;;  %v5993_v60 = vadd.f32 %v2853_v52, %v2751_v53  ;;  %v4655_v50 = vld [vmem:[%s6362_s0 + $0x164] ss:$72 sps:$4 sm:$0xff]  }
 0x146   :  { %v2754_v62 = vpop.f32.mrf.mxu0 }
 0x147   :  { %v2857_v1 = vpop.f32.mrf.mxu1  ;;  %v2755_v44 = vadd.f32 %v2754_v62, %v5762_v56  ;;  %v6002_v5 = vadd.f32 %v2855_v58, %v2753_v59 }
 0x148   :  { %v2756_v9 = vpop.f32.mrf.mxu0 }
 0x149   :  { %v2859_v11 = vpop.f32.mrf.mxu1  ;;  %v2757_v12 = vadd.f32 %v2756_v9, %v5770_v61  ;;  %v6011_v13 = vadd.f32 %v2857_v1, %v2755_v44 }
 0x14a   :  { %v2760_v15 = vpop.f32.mrf.mxu0  ;;  %3377 = vmatmul.mubr.bf16.gmra.mxu0 %v4647_v2 }
 0x14b   :  { %3417 = vmatmul.mubr.bf16.gmra.mxu1 %v4650_v3  ;;  %v2863_v56 = vpop.f32.mrf.mxu1  ;;  %v2761_v18 = vadd.f32 %v2760_v15, %v5780_v4  ;;  %v6014_v19 = vadd.f32 %v2859_v11, %v2757_v12  ;;  %3386 = vmatprep.mubr.bf16.mxu0 %v4655_v50  ;;  %v4656_v4 = vld [vmem:[%s6362_s0 + $0x3a0] ss:$72 sps:$4 sm:$0xff]  }
 0x14c   :  { %3426 = vmatprep.mubr.bf16.mxu1 %v4658_v6  ;;  %v2762_v20 = vpop.f32.mrf.mxu0 }
 0x14d   :  { %v2865_v23 = vpop.f32.mrf.mxu1  ;;  %v2763_v24 = vadd.f32 %v2762_v20, %v5789_v10  ;;  %v6017_v26 = vadd.f32 %v2863_v56, %v2761_v18  ;;  %v4661_v10 = vld [vmem:[%s6362_s0 + $0x1f4] ss:$72 sps:$4 sm:$0xff]  }
 0x14e   :  { %v2764_v27 = vpop.f32.mrf.mxu0 }
 0x14f   :  { %v2867_v61 = vpop.f32.mrf.mxu1  ;;  %v2765_v34 = vadd.f32 %v2764_v27, %v5798_v16  ;;  %v6026_v35 = vadd.f32 %v2865_v23, %v2763_v24 }
 0x150   :  { %v2766_v37 = vpop.f32.mrf.mxu0 }
 0x151   :  { %v2869_v39 = vpop.f32.mrf.mxu1  ;;  %v2767_v40 = vadd.f32 %v2766_v37, %v5807_v22  ;;  %v6032_v43 = vadd.f32 %v2867_v61, %v2765_v34  ;;  %v4659_v22 = vld [vmem:[%s6362_s0 + $0x1f0] ss:$72 sps:$4 sm:$0xff]  }
 0x152   :  { %v2770_v45 = vpop.f32.mrf.mxu0  ;;  %3387 = vmatmul.mubr.bf16.gmra.mxu0 %v4653_v31 }
 0x153   :  { %3427 = vmatmul.mubr.bf16.gmra.mxu1 %v4656_v4  ;;  %v2873_v33 = vpop.f32.mrf.mxu1  ;;  %v2771_v47 = vadd.f32 %v2770_v45, %v5816_v28  ;;  %v6035_v48 = vadd.f32 %v2869_v39, %v2767_v40  ;;  %3396 = vmatprep.mubr.bf16.mxu0 %v4661_v10 }
 0x154   :  { %v2772_v16 = vpop.f32.mrf.mxu0 }
 0x155   :  { %v2875_v51 = vpop.f32.mrf.mxu1  ;;  %v2773_v52 = vadd.f32 %v2772_v16, %v5825_v36  ;;  %v6038_v53 = vadd.f32 %v2873_v33, %v2771_v47 }
 0x156   :  { %v2774_v55 = vpop.f32.mrf.mxu0 }
 0x157   :  { %v2877_v58 = vpop.f32.mrf.mxu1  ;;  %v2775_v59 = vadd.f32 %v2774_v55, %v5834_v42  ;;  %v6044_v62 = vadd.f32 %v2875_v51, %v2773_v52 }
 0x158   :  { %v2776_v28 = vpop.f32.mrf.mxu0 }
 0x159   :  { %v2879_v1 = vpop.f32.mrf.mxu1  ;;  %v2777_v2 = vadd.f32 %v2776_v28, %v5843_v49  ;;  %v6047_v3 = vadd.f32 %v2877_v58, %v2775_v59 }
 0x15a   :  { %v2780_v44 = vpop.f32.mrf.mxu0  ;;  %3397 = vmatmul.mubr.bf16.gmra.mxu0 %v4659_v22 }
 0x15b   :  { %v2883_v36 = vpop.f32.mrf.mxu1  ;;  %v2781_v50 = vadd.f32 %v2780_v44, %v5852_v57  ;;  %v6050_v6 = vadd.f32 %v2879_v1, %v2777_v2 }
 0x15c   :  { %v2782_v9 = vpop.f32.mrf.mxu0 }
 0x15d   :  { %v2885_v11 = vpop.f32.mrf.mxu1  ;;  %v2783_v12 = vadd.f32 %v2782_v9, %v5861_v0  ;;  %v6053_v42 = vadd.f32 %v2883_v36, %v2781_v50 }
 0x15e   :  { %v2784_v15 = vpop.f32.mrf.mxu0 }
 0x15f   :  { %v2887_v56 = vpop.f32.mrf.mxu1  ;;  %v2785_v18 = vadd.f32 %v2784_v15, %v5870_v7  ;;  %v6056_v49 = vadd.f32 %v2885_v11, %v2783_v12 }
 0x160   :  { %v2786_v20 = vpop.f32.mrf.mxu0 }
 0x161   :  { %v2889_v23 = vpop.f32.mrf.mxu1  ;;  %v2787_v24 = vadd.f32 %v2786_v20, %v5879_v14  ;;  %v6059_v27 = vadd.f32 %v2887_v56, %v2785_v18 }
 0x162   :  { %v2790_v57 = vpop.f32.mrf.mxu0 }
 0x163   :  { %v2893_v61 = vpop.f32.mrf.mxu1  ;;  %v2791_v31 = vadd.f32 %v2790_v57, %v5888_v21  ;;  %v6062_v4 = vadd.f32 %v2889_v23, %v2787_v24 }
 0x164   :  { %v2792_v0 = vpop.f32.mrf.mxu0 }
 0x165   :  { %v2895_v34 = vpop.f32.mrf.mxu1  ;;  %v2793_v10 = vadd.f32 %v2792_v0, %v5897_v29  ;;  %v6065_v37 = vadd.f32 %v2893_v61, %v2791_v31 }
 0x166   :  { %v2794_v7 = vpop.f32.mrf.mxu0 }
 0x167   :  { %v2897_v39 = vpop.f32.mrf.mxu1  ;;  %v2795_v40 = vadd.f32 %v2794_v7, %v5906_v38  ;;  %v6068_v45 = vadd.f32 %v2895_v34, %v2793_v10 }
 0x168   :  { %v2796_v14 = vpop.f32.mrf.mxu0 }
 0x169   :  { %v2899_v33 = vpop.f32.mrf.mxu1  ;;  %v2797_v47 = vadd.f32 %v2796_v14, %v5915_v46  ;;  %v6071_v16 = vadd.f32 %v2897_v39, %v2795_v40 }
 0x16a   :  { %v2800_v21 = vpop.f32.mrf.mxu0 }
 0x16b   :  { %v2903_v51 = vpop.f32.mrf.mxu1  ;;  %v2801_v52 = vadd.f32 %v2800_v21, %v5924_v54  ;;  %v6074_v55 = vadd.f32 %v2899_v33, %v2797_v47 }
 0x16c   :  { %v2802_v29 = vpop.f32.mrf.mxu0 }
 0x16d   :  { %v2905_v58 = vpop.f32.mrf.mxu1  ;;  %v2803_v22 = vadd.f32 %v2802_v29, %v5933_v63  ;;  %v6077_v59 = vadd.f32 %v2903_v51, %v2801_v52 }
 0x16e   :  { %v2804_v38 = vpop.f32.mrf.mxu0 }
 0x16f   :  { %v2907_v28 = vpop.f32.mrf.mxu1  ;;  %v2805_v1 = vadd.f32 %v2804_v38, %v5942_v8  ;;  %v6080_v2 = vadd.f32 %v2905_v58, %v2803_v22 }
 0x170   :  { %v2806_v46 = vpop.f32.mrf.mxu0 }
 0x171   :  { %v2909_v44 = vpop.f32.mrf.mxu1  ;;  %v2807_v36 = vadd.f32 %v2806_v46, %v5951_v17  ;;  %v6083_v50 = vadd.f32 %v2907_v28, %v2805_v1 }
 0x172   :  { %v2810_v54 = vpop.f32.mrf.mxu0 }
 0x173   :  { %v2913_v9 = vpop.f32.mrf.mxu1  ;;  %v2811_v11 = vadd.f32 %v2810_v54, %v5960_v25  ;;  %v6086_v12 = vadd.f32 %v2909_v44, %v2807_v36 }
 0x174   :  { %v2812_v63 = vpop.f32.mrf.mxu0 }
 0x175   :  { %v2915_v15 = vpop.f32.mrf.mxu1  ;;  %v2813_v56 = vadd.f32 %v2812_v63, %v5963_v32  ;;  %v6089_v18 = vadd.f32 %v2913_v9, %v2811_v11 }
 0x176   :  { %v2814_v8 = vpop.f32.mrf.mxu0 }
 0x177   :  { %v2917_v20 = vpop.f32.mrf.mxu1  ;;  %v2815_v23 = vadd.f32 %v2814_v8, %v5972_v41  ;;  %v6092_v24 = vadd.f32 %v2915_v15, %v2813_v56 }
 0x178   :  { %v2816_v17 = vpop.f32.mrf.mxu0 }
 0x179   :  { %v2919_v57 = vpop.f32.mrf.mxu1  ;;  %v2817_v61 = vadd.f32 %v2816_v17, %v5974_v30  ;;  %v6095_v31 = vadd.f32 %v2917_v20, %v2815_v23 }
 0x17b   :  { %v6097_v25 = vadd.f32 %v2919_v57, %v2817_v61 }
 0x182   :  { %v2956_v0 = vpop.f32.mrf.mxu0 }
 0x183   :  { %v3059_v34 = vpop.f32.mrf.mxu1  ;;  %v2957_v32 = vadd.f32 %v2956_v0, %v5993_v60 }
 0x184   :  { %v2958_v10 = vpop.f32.mrf.mxu0 }
 0x185   :  { %v3061_v7 = vpop.f32.mrf.mxu1  ;;  %v2959_v39 = vadd.f32 %v2958_v10, %v6002_v5  ;;  %v6101_v40 = vadd.f32 %v3059_v34, %v2957_v32 }
 0x186   :  { %v2960_v41 = vpop.f32.mrf.mxu0 }
 0x187   :  { %v3063_v14 = vpop.f32.mrf.mxu1  ;;  %v2961_v33 = vadd.f32 %v2960_v41, %v6011_v13  ;;  %v6104_v47 = vadd.f32 %v3061_v7, %v2959_v39 }
 0x188   :  { %v2962_v30 = vpop.f32.mrf.mxu0 }
 0x189   :  { %v3065_v21 = vpop.f32.mrf.mxu1  ;;  %v2963_v51 = vadd.f32 %v2962_v30, %v6014_v19  ;;  %v6107_v52 = vadd.f32 %v3063_v14, %v2961_v33 }
 0x18a   :  { %v2966_v29 = vpop.f32.mrf.mxu0 }
 0x18b   :  { %v3069_v60 = vpop.f32.mrf.mxu1  ;;  %v2967_v58 = vadd.f32 %v2966_v29, %v6017_v26  ;;  %v6110_v22 = vadd.f32 %v3065_v21, %v2963_v51 }
 0x18c   :  { %v2968_v5 = vpop.f32.mrf.mxu0 }
 0x18d   :  { %v3071_v38 = vpop.f32.mrf.mxu1  ;;  %v2969_v28 = vadd.f32 %v2968_v5, %v6026_v35  ;;  %v6113_v1 = vadd.f32 %v3069_v60, %v2967_v58 }
 0x18e   :  { %v2970_v13 = vpop.f32.mrf.mxu0 }
 0x18f   :  { %v3073_v46 = vpop.f32.mrf.mxu1  ;;  %v2971_v44 = vadd.f32 %v2970_v13, %v6032_v43  ;;  %v6116_v36 = vadd.f32 %v3071_v38, %v2969_v28 }
 0x190   :  { %v2972_v19 = vpop.f32.mrf.mxu0 }
 0x191   :  { %v3075_v54 = vpop.f32.mrf.mxu1  ;;  %v2973_v9 = vadd.f32 %v2972_v19, %v6035_v48  ;;  %v6119_v11 = vadd.f32 %v3073_v46, %v2971_v44 }
 0x192   :  { %v2976_v26 = vpop.f32.mrf.mxu0 }
 0x193   :  { %v3079_v63 = vpop.f32.mrf.mxu1  ;;  %v2977_v15 = vadd.f32 %v2976_v26, %v6038_v53  ;;  %v6122_v56 = vadd.f32 %v3075_v54, %v2973_v9 }
 0x194   :  { %v2978_v35 = vpop.f32.mrf.mxu0 }
 0x195   :  { %v3081_v8 = vpop.f32.mrf.mxu1  ;;  %v2979_v20 = vadd.f32 %v2978_v35, %v6044_v62  ;;  %v6125_v23 = vadd.f32 %v3079_v63, %v2977_v15 }
 0x196   :  { %v2980_v43 = vpop.f32.mrf.mxu0 }
 0x197   :  { %v3083_v17 = vpop.f32.mrf.mxu1  ;;  %v2981_v57 = vadd.f32 %v2980_v43, %v6047_v3  ;;  %v6128_v61 = vadd.f32 %v3081_v8, %v2979_v20 }
 0x198   :  { %v2982_v48 = vpop.f32.mrf.mxu0 }
 0x199   :  { %v3085_v0 = vpop.f32.mrf.mxu1  ;;  %v2983_v34 = vadd.f32 %v2982_v48, %v6050_v6  ;;  %v6131_v32 = vadd.f32 %v3083_v17, %v2981_v57 }
 0x19a   :  { %v2986_v53 = vpop.f32.mrf.mxu0 }
 0x19b   :  { %6365 = vst [vmem:[#allocation2_spill] sm:$0xff] %v6131_v32  ;;  %v3089_v10 = vpop.f32.mrf.mxu1  ;;  %v2987_v7 = vadd.f32 %v2986_v53, %v6053_v42  ;;  %v6134_v39 = vadd.f32 %v3085_v0, %v2983_v34 }
 0x19c   :  { %v2988_v62 = vpop.f32.mrf.mxu0 }
 0x19d   :  { %6366 = vst [vmem:[#allocation3_spill] sm:$0xff] %v6134_v39  ;;  %v3091_v41 = vpop.f32.mrf.mxu1  ;;  %v2989_v14 = vadd.f32 %v2988_v62, %v6056_v49  ;;  %v6137_v33 = vadd.f32 %v3089_v10, %v2987_v7 }
 0x19e   :  { %v2990_v3 = vpop.f32.mrf.mxu0 }
 0x19f   :  { %6367 = vst [vmem:[#allocation4_spill] sm:$0xff] %v6137_v33  ;;  %v3093_v30 = vpop.f32.mrf.mxu1  ;;  %v2991_v21 = vadd.f32 %v2990_v3, %v6059_v27  ;;  %v6140_v51 = vadd.f32 %v3091_v41, %v2989_v14 }
 0x1a0   :  { %v2992_v6 = vpop.f32.mrf.mxu0 }
 0x1a1   :  { %6368 = vst [vmem:[#allocation5_spill] sm:$0xff] %v6140_v51  ;;  %v3095_v29 = vpop.f32.mrf.mxu1  ;;  %v2993_v60 = vadd.f32 %v2992_v6, %v6062_v4  ;;  %v6143_v58 = vadd.f32 %v3093_v30, %v2991_v21 }
 0x1a2   :  { %v2996_v42 = vpop.f32.mrf.mxu0 }
 0x1a3   :  { %6369 = vst [vmem:[#allocation6_spill] sm:$0xff] %v6143_v58  ;;  %v3099_v5 = vpop.f32.mrf.mxu1  ;;  %v2997_v38 = vadd.f32 %v2996_v42, %v6065_v37  ;;  %v6146_v28 = vadd.f32 %v3095_v29, %v2993_v60 }
 0x1a4   :  { %v2998_v49 = vpop.f32.mrf.mxu0 }
 0x1a5   :  { %6370 = vst [vmem:[#allocation7_spill] sm:$0xff] %v6146_v28  ;;  %v3101_v13 = vpop.f32.mrf.mxu1  ;;  %v2999_v46 = vadd.f32 %v2998_v49, %v6068_v45  ;;  %v6149_v44 = vadd.f32 %v3099_v5, %v2997_v38 }
 0x1a6   :  { %v3000_v27 = vpop.f32.mrf.mxu0 }
 0x1a7   :  { %v3103_v19 = vpop.f32.mrf.mxu1  ;;  %v3001_v54 = vadd.f32 %v3000_v27, %v6071_v16  ;;  %v6152_v9 = vadd.f32 %v3101_v13, %v2999_v46 }
 0x1a8   :  { %v3002_v4 = vpop.f32.mrf.mxu0 }
 0x1a9   :  { %v3105_v26 = vpop.f32.mrf.mxu1  ;;  %v3003_v63 = vadd.f32 %v3002_v4, %v6074_v55  ;;  %v6155_v15 = vadd.f32 %v3103_v19, %v3001_v54 }
 0x1aa   :  { %v3006_v37 = vpop.f32.mrf.mxu0 }
 0x1ab   :  { %v3109_v35 = vpop.f32.mrf.mxu1  ;;  %v3007_v8 = vadd.f32 %v3006_v37, %v6077_v59  ;;  %v6158_v20 = vadd.f32 %v3105_v26, %v3003_v63 }
 0x1ac   :  { %v3008_v45 = vpop.f32.mrf.mxu0 }
 0x1ad   :  { %v3111_v43 = vpop.f32.mrf.mxu1  ;;  %v3009_v17 = vadd.f32 %v3008_v45, %v6080_v2  ;;  %v6161_v57 = vadd.f32 %v3109_v35, %v3007_v8 }
 0x1ae   :  { %v3010_v16 = vpop.f32.mrf.mxu0 }
 0x1af   :  { %v3113_v48 = vpop.f32.mrf.mxu1  ;;  %v3011_v0 = vadd.f32 %v3010_v16, %v6083_v50  ;;  %v6164_v34 = vadd.f32 %v3111_v43, %v3009_v17 }
 0x1b0   :  { %v3012_v55 = vpop.f32.mrf.mxu0 }
 0x1b1   :  { %v3115_v53 = vpop.f32.mrf.mxu1  ;;  %v3013_v10 = vadd.f32 %v3012_v55, %v6086_v12  ;;  %v6167_v7 = vadd.f32 %v3113_v48, %v3011_v0 }
 0x1b2   :  { %v3016_v59 = vpop.f32.mrf.mxu0 }
 0x1b3   :  { %v3119_v62 = vpop.f32.mrf.mxu1  ;;  %v3017_v41 = vadd.f32 %v3016_v59, %v6089_v18  ;;  %v6170_v14 = vadd.f32 %v3115_v53, %v3013_v10 }
 0x1b4   :  { %v3018_v2 = vpop.f32.mrf.mxu0 }
 0x1b5   :  { %v3121_v3 = vpop.f32.mrf.mxu1  ;;  %v3019_v30 = vadd.f32 %v3018_v2, %v6092_v24  ;;  %v6173_v21 = vadd.f32 %v3119_v62, %v3017_v41 }
 0x1b6   :  { %v3020_v50 = vpop.f32.mrf.mxu0 }
 0x1b7   :  { %v3123_v6 = vpop.f32.mrf.mxu1  ;;  %v3021_v29 = vadd.f32 %v3020_v50, %v6095_v31  ;;  %v6176_v60 = vadd.f32 %v3121_v3, %v3019_v30 }
 0x1b8   :  { %v3022_v12 = vpop.f32.mrf.mxu0 }
 0x1b9   :  { %6371 = vst [vmem:[#allocation8_spill] sm:$0xff] %v6176_v60  ;;  %v3125_v42 = vpop.f32.mrf.mxu1  ;;  %v3023_v5 = vadd.f32 %v3022_v12, %v6097_v25  ;;  %v6179_v38 = vadd.f32 %v3123_v6, %v3021_v29 }
 0x1bb   :  { %6372 = vst [vmem:[#allocation9_spill] sm:$0xff] %v6179_v38  ;;  %v6181_v18 = vadd.f32 %v3125_v42, %v3023_v5 }
 0x1bd   :  { %6373 = vst [vmem:[#allocation10_spill] sm:$0xff] %v6181_v18 }
 0x1c2   :  { %v3162_v49 = vpop.f32.mrf.mxu0 }
 0x1c3   :  { %v3265_v13 = vpop.f32.mrf.mxu1 }
 0x1c4   :  { %v3164_v46 = vpop.f32.mrf.mxu0 }
 0x1c5   :  { %v6183_v24 = vpop.f32.mrf.mxu1  ;;  %v3165_v32 = vadd.f32 %v3164_v46, %v6104_v47 }
 0x1c6   :  { %v3166_v27 = vpop.f32.mrf.mxu0 }
 0x1c7   :  { %v6185_v19 = vpop.f32.mrf.mxu1  ;;  %v3167_v60 = vadd.f32 %v3166_v27, %v6107_v52  ;;  %v3268_v52 = vadd.f32 %v6183_v24, %v3165_v32 }
 0x1c8   :  { %v3168_v54 = vpop.f32.mrf.mxu0 }
 0x1c9   :  { %v6187_v31 = vpop.f32.mrf.mxu1 }
 0x1ca   :  { %v3172_v4 = vpop.f32.mrf.mxu0 }
 0x1cb   :  { %v6189_v26 = vpop.f32.mrf.mxu1 }
 0x1cc   :  { %v3174_v63 = vpop.f32.mrf.mxu0 }
 0x1cd   :  { %v6191_v25 = vpop.f32.mrf.mxu1 }
 0x1ce   :  { %v3176_v37 = vpop.f32.mrf.mxu0 }
 0x1cf   :  { %v6193_v35 = vpop.f32.mrf.mxu1 }
 0x1d0   :  { %v6195_v8 = vpop.f32.mrf.mxu0 }
 0x1d1   :  { %v6197_v45 = vpop.f32.mrf.mxu1 }
 0x1d2   :  { %v6199_v43 = vpop.f32.mrf.mxu0 }
 0x1d3   :  { %v6201_v17 = vpop.f32.mrf.mxu1 }
 0x1d4   :  { %v6203_v16 = vpop.f32.mrf.mxu0 }
 0x1d5   :  { %v6205_v48 = vpop.f32.mrf.mxu1 }
 0x1d6   :  { %6374 = vst [vmem:[#allocation11_spill] sm:$0xff] %v6205_v48  ;;  %v6207_v0 = vpop.f32.mrf.mxu0  ;;  %v3163_v48 = vadd.f32 %v3162_v49, %v6101_v40  ;;  %v3175_v40 = vadd.f32 %v3174_v63, %v6116_v36 }
 0x1d7   :  { %6375 = vst [vmem:[#allocation12_spill] sm:$0xff] %v6207_v0  ;;  %v6209_v55 = vpop.f32.mrf.mxu1 }
 0x1d8   :  { %6376 = vst [vmem:[#allocation13_spill] sm:$0xff] %v6209_v55  ;;  %v6211_v53 = vpop.f32.mrf.mxu0  ;;  %v3278_v24 = vadd.f32 %v6191_v25, %v3175_v40 }
 0x1d9   :  { %6377 = vst [vmem:[#allocation14_spill] sm:$0xff] %v6211_v53  ;;  %v6213_v10 = vpop.f32.mrf.mxu1 }
 0x1da   :  { %6378 = vst [vmem:[#allocation15_spill] sm:$0xff] %v6213_v10  ;;  %v6215_v59 = vpop.f32.mrf.mxu0 }
 0x1db   :  { %6379 = vst [vmem:[#allocation16_spill] sm:$0xff] %v6215_v59  ;;  %v6217_v62 = vpop.f32.mrf.mxu1 }
 0x1dc   :  { %6380 = vst [vmem:[#allocation17_spill] sm:$0xff] %v6217_v62  ;;  %v6219_v41 = vpop.f32.mrf.mxu0 }
 0x1dd   :  { %6381 = vst [vmem:[#allocation18_spill] sm:$0xff] %v6219_v41  ;;  %v6221_v2 = vpop.f32.mrf.mxu1 }
 0x1de   :  { %6382 = vst [vmem:[#allocation19_spill] sm:$0xff] %v6221_v2  ;;  %v6223_v3 = vpop.f32.mrf.mxu0 }
 0x1df   :  { %6383 = vst [vmem:[#allocation20_spill] sm:$0xff] %v6223_v3  ;;  %v6225_v30 = vpop.f32.mrf.mxu1 }
 0x1e0   :  { %6384 = vst [vmem:[#allocation21_spill] sm:$0xff] %v6225_v30  ;;  %v6227_v50 = vpop.f32.mrf.mxu0 }
 0x1e1   :  { %6385 = vst [vmem:[#allocation22_spill] sm:$0xff] %v6227_v50  ;;  %v6229_v6 = vpop.f32.mrf.mxu1 }
 0x1e2   :  { %6386 = vst [vmem:[#allocation23_spill] sm:$0xff] %v6229_v6  ;;  %v3202_v29 = vpop.f32.mrf.mxu0 }
 0x1e3   :  { %v3305_v12 = vpop.f32.mrf.mxu1  ;;  %v3203_v0 = vadd.f32 %v3202_v29, %v6149_v44  ;;  %v3177_v44 = vadd.f32 %v3176_v37, %v6119_v11  ;;  %v3179_v11 = vadd.f32 %v6195_v8, %v6122_v56  ;;  %v3183_v56 = vadd.f32 %v6199_v43, %v6125_v23 }
 0x1e4   :  { %v3204_v42 = vpop.f32.mrf.mxu0 }
 0x1e5   :  { %v3307_v5 = vpop.f32.mrf.mxu1  ;;  %v3282_v25 = vadd.f32 %v6197_v45, %v3179_v11 }
 0x1e6   :  { %v3206_v28 = vpop.f32.mrf.mxu0 }
 0x1e7   :  { %v3309_v58 = vpop.f32.mrf.mxu1  ;;  %v3207_v47 = vadd.f32 %v3206_v28, %v6155_v15 }
 0x1e8   :  { %v3208_v10 = vpop.f32.mrf.mxu0 }
 0x1e9   :  { %v3311_v62 = vpop.f32.mrf.mxu1 }
 0x1ea   :  { %v3212_v51 = vpop.f32.mrf.mxu0 }
 0x1eb   :  { %v3315_v41 = vpop.f32.mrf.mxu1  ;;  %v3213_v28 = vadd.f32 %v3212_v51, %v6161_v57 }
 0x1ec   :  { %v3214_v59 = vpop.f32.mrf.mxu0 }
 0x1ed   :  { %v6231_v2 = vpop.f32.mrf.mxu1 }
 0x1ee   :  { %v3216_v3 = vpop.f32.mrf.mxu0 }
 0x1ef   :  { %v6233_v33 = vpop.f32.mrf.mxu1 }
 0x1f0   :  { %6387 = vst [vmem:[#allocation24_spill] sm:$0xff] %v6233_v33  ;;  %v6235_v30 = vpop.f32.mrf.mxu0 }
 0x1f1   :  { %v6237_v50 = vpop.f32.mrf.mxu1  ;;  %v3219_v43 = vadd.f32 %v6235_v30, %v6170_v14 }
 0x1f2   :  { %6388 = vst [vmem:[#allocation25_spill] sm:$0xff] %v6237_v50  ;;  %v6239_v6 = vpop.f32.mrf.mxu0  ;;  %v3205_v50 = vadd.f32 %v3204_v42, %v6152_v9 }
 0x1f3   :  { %v6241_v55 = vpop.f32.mrf.mxu1  ;;  %v3223_v14 = vadd.f32 %v6239_v6, %v6173_v21 }
 0x1f4   :  { %6389 = vst [vmem:[#allocation26_spill] sm:$0xff] %v6241_v55  ;;  %v6243_v18 = vpop.f32.mrf.mxu0  ;;  %v3169_v55 = vadd.f32 %v3168_v54, %v6110_v22  ;;  %v3308_v46 = vadd.f32 %v3307_v5, %v3205_v50 }
 0x1f5   :  { %6390 = vst [vmem:[#allocation27_spill] sm:$0xff] %v6243_v18  ;;  %v6245_v38 = vpop.f32.mrf.mxu1  ;;  %v3173_v18 = vadd.f32 %v3172_v4, %v6113_v1  ;;  %v3270_v1 = vadd.f32 %v6185_v19, %v3167_v60  ;;  %v3209_v4 = vadd.f32 %v3208_v10, %v6158_v20  ;;  %v3310_v60 = vadd.f32 %v3309_v58, %v3207_v47  ;;  %v6395_v47 = vld [vmem:[#allocation8_spill] sm:$0xff] }
 0x1f6   :  { %6391 = vst [vmem:[#allocation28_spill] sm:$0xff] %v6245_v38  ;;  %v6247_v53 = vpop.f32.mrf.mxu0  ;;  %v3272_v54 = vadd.f32 %v6187_v31, %v3169_v55  ;;  %v3215_v19 = vadd.f32 %v3214_v59, %v6164_v34  ;;  %v3185_v34 = vadd.f32 %v6203_v16, %v6128_v61  ;;  %v3217_v10 = vadd.f32 %v3216_v3, %v6167_v7 }
 0x1f7   :  { %6392 = vst [vmem:[#allocation29_spill] sm:$0xff] %v6247_v53  ;;  %v6249_v39 = vpop.f32.mrf.mxu1  ;;  %v3266_v53 = vadd.f32 %v3265_v13, %v3163_v48  ;;  %v3276_v13 = vadd.f32 %v6189_v26, %v3173_v18  ;;  %v3312_v8 = vadd.f32 %v3311_v62, %v3209_v4  ;;  %v6394_v40 = vld [vmem:[#allocation24_spill] sm:$0xff] }
 0x1f8   :  { %6393 = vst [vmem:[#allocation30_spill] sm:$0xff] %v6249_v39  ;;  %v6258_v33 = vpop.f32.mrf.mxu0  ;;  %v3306_v39 = vadd.f32 %v3305_v12, %v3203_v0  ;;  %v3318_v23 = vadd.f32 %v6231_v2, %v3215_v19  ;;  %v3286_v2 = vadd.f32 %v6201_v17, %v3183_v56  ;;  %v6398_v17 = vld [vmem:[#allocation12_spill] sm:$0xff]  ;;  %v6404_v56 = vld [vmem:[#allocation9_spill] sm:$0xff] }
 0x1f9   :  { %v6260_v38 = vpop.f32.mrf.mxu1  ;;  %v6399_v11 = vld [vmem:[#allocation25_spill] sm:$0xff] }
 0x1fa   :  { %v3322_v21 = vadd.f32 %v6399_v11, %v3219_v43  ;;  %v6416_v11 = vld [vmem:[#allocation6_spill] sm:$0xff] }
 0x1fb   :  { %v6401_v19 = vld [vmem:[#allocation26_spill] sm:$0xff] }
 0x202   :  { %v3368_v49 = vpop.f32.mrf.mxu0 }
 0x203   :  { %v3408_v9 = vpop.f32.mrf.mxu1  ;;  %v3369_v22 = vadd.f32 %v3368_v49, %v3266_v53  ;;  %v6396_v49 = vld [vmem:[#allocation27_spill] sm:$0xff] }
 0x204   :  { %v3409_v27 = vadd.f32 %v3408_v9, %v3306_v39  ;;  %v3370_v36 = vpop.f32.mrf.mxu0  ;;  %v3280_v39 = vadd.f32 %v6193_v35, %v3177_v44  ;;  %v3316_v35 = vadd.f32 %v3315_v41, %v3213_v28  ;;  %v3320_v44 = vadd.f32 %v6394_v40, %v3217_v10 }
 0x205   :  { %v3410_v63 = vpop.f32.mrf.mxu1  ;;  %v3371_v15 = vadd.f32 %v3370_v36, %v3268_v52  ;;  %v3437_v26 = vmax.f32 %v3369_v22, 0.0  ;;  %v3225_v9 = vadd.f32 %v6396_v49, %v6395_v47  ;;  %v6397_v36 = vld [vmem:[#allocation2_spill] sm:$0xff] }
 0x206   :  { %v3411_v32 = vadd.f32 %v3410_v63, %v3308_v46  ;;  %v3372_v31 = vpop.f32.mrf.mxu0  ;;  %v3453_v20 = vmax.f32 %v3409_v27, 0.0  ;;  %v3187_v63 = vadd.f32 %v6398_v17, %v6397_v36  ;;  %v6415_v17 = vld [vmem:[#allocation17_spill] sm:$0xff] }
 0x207   :  { %v3412_v18 = vpop.f32.mrf.mxu1  ;;  %v3438_v37 = vmax.f32 %v3371_v15, 0.0  ;;  %v3373_v51 = vadd.f32 %v3372_v31, %v3270_v1  ;;  %v3326_v31 = vadd.f32 %v6401_v19, %v3223_v14 }
 0x208   :  { %v3454_v48 = vmax.f32 %v3411_v32, 0.0  ;;  %v3413_v57 = vadd.f32 %v3412_v18, %v3310_v60  ;;  %v3374_v0 = vpop.f32.mrf.mxu0 }
 0x209   :  { %v3414_v55 = vpop.f32.mrf.mxu1  ;;  %v3995_v58 = vpack.c.bf16 %v3438_v37, %v3437_v26  ;;  %v3375_v59 = vadd.f32 %v3374_v0, %v3272_v54  ;;  %v3439_v7 = vmax.f32 %v3373_v51, 0.0  ;;  %v6403_v37 = vld [vmem:[#allocation14_spill] sm:$0xff] }
 0x20a   :  { %v4003_v53 = vpack.c.bf16 %v3454_v48, %v3453_v20  ;;  %v3415_v50 = vadd.f32 %v3414_v55, %v3312_v8  ;;  %v3378_v29 = vpop.f32.mrf.mxu0  ;;  %v3455_v16 = vmax.f32 %v3413_v57, 0.0  ;;  %v6402_v20 = vld [vmem:[#allocation3_spill] sm:$0xff]  ;;  %v6405_v8 = vld [vmem:[#allocation29_spill] sm:$0xff] }
 0x20b   :  { %v3418_v12 = vpop.f32.mrf.mxu1  ;;  %3549 = vst [vmem:[%s6364_s3] sm:$0xff] %v3995_v58  ;;  %v3379_v61 = vadd.f32 %v3378_v29, %v3276_v13  ;;  %v3440_v62 = vmax.f32 %v3375_v59, 0.0  ;;  %v3189_v48 = vadd.f32 %v6403_v37, %v6402_v20  ;;  %v3227_v51 = vadd.f32 %v6405_v8, %v6404_v56 }
 0x20c   :  { %3557 = vst [vmem:[%s6364_s3 + $0x40] sm:$0xff] %v4003_v53  ;;  %v3419_v45 = vadd.f32 %v3418_v12, %v3316_v35  ;;  %v3456_v41 = vmax.f32 %v3415_v50, 0.0  ;;  %v3380_v3 = vpop.f32.mrf.mxu0  ;;  %v6407_v53 = vld [vmem:[#allocation10_spill] sm:$0xff] }
 0x20d   :  { %v3420_v42 = vpop.f32.mrf.mxu1  ;;  %v3381_v30 = vadd.f32 %v3380_v3, %v3278_v24  ;;  %v3996_v52 = vpack.c.bf16 %v3440_v62, %v3439_v7  ;;  %v3441_v1 = vmax.f32 %v3379_v61, 0.0  ;;  %v6400_v24 = vld [vmem:[#allocation11_spill] sm:$0xff]  ;;  %v3229_v10 = vadd.f32 %v6258_v33, %v6407_v53  ;;  %v6408_v61 = vld [vmem:[#allocation13_spill] sm:$0xff]  ;;  %v6409_v7 = vld [vmem:[#allocation4_spill] sm:$0xff] }
 0x20e   :  { %v3421_v5 = vadd.f32 %v3420_v42, %v3318_v23  ;;  %v4004_v46 = vpack.c.bf16 %v3456_v41, %v3455_v16  ;;  %v3382_v22 = vpop.f32.mrf.mxu0  ;;  %v3457_v54 = vmax.f32 %v3419_v45, 0.0  ;;  %v3288_v60 = vadd.f32 %v6400_v24, %v3185_v34  ;;  %v6410_v33 = vld [vmem:[#allocation16_spill] sm:$0xff]  ;;  %v6411_v3 = vld [vmem:[#allocation5_spill] sm:$0xff]  ;;  %v6412_v42 = vld [vmem:[#allocation18_spill] sm:$0xff] }
 0x20f   :  { %v3422_v27 = vpop.f32.mrf.mxu1  ;;  %v3442_v13 = vmax.f32 %v3381_v30, 0.0  ;;  %3550 = vst [vmem:[%s6364_s3 + $0x8] sm:$0xff] %v3996_v52  ;;  %v3383_v6 = vadd.f32 %v3382_v22, %v3280_v39  ;;  %v6406_v39 = vld [vmem:[#allocation28_spill] sm:$0xff]  ;;  %v3290_v45 = vadd.f32 %v6408_v61, %v3187_v63  ;;  %v3193_v16 = vadd.f32 %v6410_v33, %v6409_v7  ;;  %v6413_v30 = vld [vmem:[#allocation30_spill] sm:$0xff]  ;;  %v6414_v22 = vld [vmem:[#allocation15_spill] sm:$0xff] }
 0x210   :  { %v3458_v4 = vmax.f32 %v3421_v5, 0.0  ;;  %3558 = vst [vmem:[%s6364_s3 + $0x48] sm:$0xff] %v4004_v46  ;;  %v3423_v28 = vadd.f32 %v3422_v27, %v3320_v44  ;;  %v3384_v15 = vpop.f32.mrf.mxu0  ;;  %v3328_v58 = vadd.f32 %v6406_v39, %v3225_v9  ;;  %v3195_v14 = vadd.f32 %v6412_v42, %v6411_v3  ;;  %v6422_v53 = vld [vmem:[#allocation23_spill] sm:$0xff] }
 0x211   :  { %v3424_v32 = vpop.f32.mrf.mxu1  ;;  %v3997_v18 = vpack.c.bf16 %v3442_v13, %v3441_v1  ;;  %v3385_v57 = vadd.f32 %v3384_v15, %v3282_v25  ;;  %v3443_v50 = vmax.f32 %v3383_v6, 0.0  ;;  %v3330_v5 = vadd.f32 %v6413_v30, %v3227_v51 }
 0x212   :  { %v4005_v26 = vpack.c.bf16 %v3458_v4, %v3457_v54  ;;  %v3425_v0 = vadd.f32 %v3424_v32, %v3322_v21  ;;  %v3388_v55 = vpop.f32.mrf.mxu0  ;;  %v3459_v25 = vmax.f32 %v3423_v28, 0.0  ;;  %v3292_v27 = vadd.f32 %v6414_v22, %v3189_v48  ;;  %v6417_v21 = vld [vmem:[#allocation20_spill] sm:$0xff] }
 0x213   :  { %v3428_v35 = vpop.f32.mrf.mxu1  ;;  %3551 = vst [vmem:[%s6364_s3 + $0x10] sm:$0xff] %v3997_v18  ;;  %v3389_v34 = vadd.f32 %v3388_v55, %v3286_v2  ;;  %v3444_v29 = vmax.f32 %v3385_v57, 0.0  ;;  %v3332_v1 = vadd.f32 %v6260_v38, %v3229_v10  ;;  %v3296_v63 = vadd.f32 %v6415_v17, %v3193_v16  ;;  %v6420_v18 = vld [vmem:[#allocation22_spill] sm:$0xff]  ;;  %v6421_v57 = vld [vmem:[#allocation21_spill] sm:$0xff] }
 0x214   :  { %3559 = vst [vmem:[%s6364_s3 + $0x50] sm:$0xff] %v4005_v26  ;;  %v3429_v59 = vadd.f32 %v3428_v35, %v3326_v31  ;;  %v3460_v12 = vmax.f32 %v3425_v0, 0.0  ;;  %v3390_v23 = vpop.f32.mrf.mxu0  ;;  %v3197_v6 = vadd.f32 %v6417_v21, %v6416_v11  ;;  %v6419_v31 = vld [vmem:[#allocation7_spill] sm:$0xff] }
 0x215   :  { %v3430_v43 = vpop.f32.mrf.mxu1  ;;  %v3391_v62 = vadd.f32 %v3390_v23, %v3288_v60  ;;  %v3998_v2 = vpack.c.bf16 %v3444_v29, %v3443_v50  ;;  %v3445_v49 = vmax.f32 %v3389_v34, 0.0  ;;  %v6418_v60 = vld [vmem:[#allocation19_spill] sm:$0xff]  ;;  %v3199_v26 = vadd.f32 %v6420_v18, %v6419_v31 }
 0x216   :  { %v3431_v41 = vadd.f32 %v3430_v43, %v3328_v58  ;;  %v4006_v40 = vpack.c.bf16 %v3460_v12, %v3459_v25  ;;  %v3392_v44 = vpop.f32.mrf.mxu0  ;;  %v3461_v9 = vmax.f32 %v3429_v59, 0.0  ;;  %v3298_v19 = vadd.f32 %v6418_v60, %v3195_v14 }
 0x217   :  { %v3432_v47 = vpop.f32.mrf.mxu1  ;;  %v3446_v52 = vmax.f32 %v3391_v62, 0.0  ;;  %3552 = vst [vmem:[%s6364_s3 + $0x18] sm:$0xff] %v3998_v2  ;;  %v3393_v54 = vadd.f32 %v3392_v44, %v3290_v45  ;;  %v3300_v0 = vadd.f32 %v6421_v57, %v3197_v6  ;;  %v3302_v10 = vadd.f32 %v6422_v53, %v3199_v26 }
 0x218   :  { %v3462_v46 = vmax.f32 %v3431_v41, 0.0  ;;  %3560 = vst [vmem:[%s6364_s3 + $0x58] sm:$0xff] %v4006_v40  ;;  %v3433_v13 = vadd.f32 %v3432_v47, %v3330_v5  ;;  %v3394_v4 = vpop.f32.mrf.mxu0 }
 0x219   :  { %v3434_v36 = vpop.f32.mrf.mxu1  ;;  %v3999_v28 = vpack.c.bf16 %v3446_v52, %v3445_v49  ;;  %v3395_v38 = vadd.f32 %v3394_v4, %v3292_v27  ;;  %v3447_v37 = vmax.f32 %v3393_v54, 0.0 }
 0x21a   :  { %v4007_v15 = vpack.c.bf16 %v3462_v46, %v3461_v9  ;;  %v3435_v32 = vadd.f32 %v3434_v36, %v3332_v1  ;;  %v3398_v24 = vpop.f32.mrf.mxu0  ;;  %v3463_v48 = vmax.f32 %v3433_v13, 0.0 }
 0x21b   :  { %3553 = vst [vmem:[%s6364_s3 + $0x20] sm:$0xff] %v3999_v28  ;;  %v3399_v20 = vadd.f32 %v3398_v24, %v3296_v63  ;;  %v3448_v56 = vmax.f32 %v3395_v38, 0.0 }
 0x21c   :  { %3561 = vst [vmem:[%s6364_s3 + $0x60] sm:$0xff] %v4007_v15  ;;  %v3464_v8 = vmax.f32 %v3435_v32, 0.0  ;;  %v3400_v51 = vpop.f32.mrf.mxu0 }
 0x21d   :  { %v3401_v55 = vadd.f32 %v3400_v51, %v3298_v19  ;;  %v4000_v35 = vpack.c.bf16 %v3448_v56, %v3447_v37  ;;  %v3449_v34 = vmax.f32 %v3399_v20, 0.0 }
 0x21e   :  { %v4008_v39 = vpack.c.bf16 %v3464_v8, %v3463_v48  ;;  %v3402_v58 = vpop.f32.mrf.mxu0 }
 0x21f   :  { %v3450_v59 = vmax.f32 %v3401_v55, 0.0  ;;  %v3403_v50 = vadd.f32 %v3402_v58, %v3300_v0  ;;  %3554 = vst [vmem:[%s6364_s3 + $0x28] sm:$0xff] %v4000_v35 }
 0x220   :  { %3562 = vst [vmem:[%s6364_s3 + $0x68] sm:$0xff] %v4008_v39  ;;  %v3404_v25 = vpop.f32.mrf.mxu0 }
 0x221   :  { %v4001_v29 = vpack.c.bf16 %v3450_v59, %v3449_v34  ;;  %v3405_v12 = vadd.f32 %v3404_v25, %v3302_v10  ;;  %v3451_v23 = vmax.f32 %v3403_v50, 0.0 }
 0x223   :  { %3555 = vst [vmem:[%s6364_s3 + $0x30] sm:$0xff] %v4001_v29  ;;  %v3452_v43 = vmax.f32 %v3405_v12, 0.0 }
 0x225   :  { %v4002_v61 = vpack.c.bf16 %v3452_v43, %v3451_v23 }
 0x227   :  { %3556 = vst [vmem:[%s6364_s3 + $0x38] sm:$0xff] %v4002_v61 }

// kernel: dann_forward.9
= control target key start
LH: loop header
LB: loop body
LE: loop exit
PB: predicated region body
PF: predicated region fallthrough
CT: control target
= control target key end

     0   :  { %s4452_s1 = inlined_call_operand.vmem [shape: bf16[2304,256], index: 1, kind: input, shape index: {}]   ;;  %s4453_s0 = inlined_call_operand.vmem [shape: bf16[32,2304], index: 0, kind: input, shape index: {}]   ;;  %s4454_s2 = inlined_call_operand.vmem [shape: f32[1,256], index: 2, kind: input, shape index: {}]   ;;  %s4455_s3 = inlined_call_operand.vmem [shape: bf16[32,256], index: 3, kind: output, shape index: {}]  }
   0x1   :  { %v2851_v0 = vld [vmem:[%s4452_s1 + $0x74] ss:$8 sps:$4 sm:$0xff]   ;;  %v2855_v2 = vld [vmem:[%s4452_s1 + $0x70] ss:$8 sps:$4 sm:$0xff]   ;;  %v2857_v4 = vld [vmem:[%s4452_s1 + $0x64] ss:$8 sps:$4 sm:$0xff]  }
   0x2   :  { %v2853_v1 = vld [vmem:[%s4452_s1 + $0x174] ss:$8 sps:$4 sm:$0xff]   ;;  %1970 = vmatprep.subr.bf16.mxu0 %v2851_v0  ;;  %v2856_v3 = vld [vmem:[%s4452_s1 + $0x170] ss:$8 sps:$4 sm:$0xff]   ;;  %v2859_v5 = vld [vmem:[%s4452_s1 + $0x164] ss:$8 sps:$4 sm:$0xff]  }
   0x3   :  { %2023 = vmatprep.subr.bf16.mxu1 %v2853_v1  ;;  %1971 = vmatpush1.bf16.msra.mxu0 %v2855_v2  ;;  %v2861_v6 = vld [vmem:[%s4452_s1 + $0x60] ss:$8 sps:$4 sm:$0xff]   ;;  %v2863_v8 = vld [vmem:[%s4452_s1 + $0x54] ss:$8 sps:$4 sm:$0xff]   ;;  %v2867_v10 = vld [vmem:[%s4452_s1 + $0x50] ss:$8 sps:$4 sm:$0xff]  }
   0x4   :  { %2024 = vmatpush1.bf16.msra.mxu1 %v2856_v3  ;;  %1972 = vmatprep.subr.bf16.mxu0 %v2857_v4  ;;  %v2862_v7 = vld [vmem:[%s4452_s1 + $0x160] ss:$8 sps:$4 sm:$0xff]   ;;  %v2865_v9 = vld [vmem:[%s4452_s1 + $0x154] ss:$8 sps:$4 sm:$0xff]   ;;  %v2868_v11 = vld [vmem:[%s4452_s1 + $0x150] ss:$8 sps:$4 sm:$0xff]  }
   0x5   :  { %2025 = vmatprep.subr.bf16.mxu1 %v2859_v5  ;;  %v2869_v12 = vld [vmem:[%s4452_s1 + $0x44] ss:$8 sps:$4 sm:$0xff]   ;;  %v2873_v14 = vld [vmem:[%s4452_s1 + $0x40] ss:$8 sps:$4 sm:$0xff]   ;;  %v2875_v16 = vld [vmem:[%s4452_s1 + $0x34] ss:$8 sps:$4 sm:$0xff]  }
   0x6   :  { %v2871_v13 = vld [vmem:[%s4452_s1 + $0x144] ss:$8 sps:$4 sm:$0xff]   ;;  %v2874_v15 = vld [vmem:[%s4452_s1 + $0x140] ss:$8 sps:$4 sm:$0xff]   ;;  %v2877_v17 = vld [vmem:[%s4452_s1 + $0x134] ss:$8 sps:$4 sm:$0xff]  }
   0x7   :  { %1973 = vmatpush1.bf16.msra.mxu0 %v2861_v6  ;;  %v2879_v18 = vld [vmem:[%s4452_s1 + $0x30] ss:$8 sps:$4 sm:$0xff]   ;;  %v2881_v20 = vld [vmem:[%s4452_s1 + $0x24] ss:$8 sps:$4 sm:$0xff]   ;;  %v2885_v22 = vld [vmem:[%s4452_s1 + $0x20] ss:$8 sps:$4 sm:$0xff]  }
   0x8   :  { %2026 = vmatpush1.bf16.msra.mxu1 %v2862_v7  ;;  %1974 = vmatprep.subr.bf16.mxu0 %v2863_v8  ;;  %v2880_v19 = vld [vmem:[%s4452_s1 + $0x130] ss:$8 sps:$4 sm:$0xff]   ;;  %v2883_v21 = vld [vmem:[%s4452_s1 + $0x124] ss:$8 sps:$4 sm:$0xff]   ;;  %v2886_v23 = vld [vmem:[%s4452_s1 + $0x120] ss:$8 sps:$4 sm:$0xff]  }
   0x9   :  { %2027 = vmatprep.subr.bf16.mxu1 %v2865_v9  ;;  %v2887_v24 = vld [vmem:[%s4452_s1 + $0x14] ss:$8 sps:$4 sm:$0xff]   ;;  %v2891_v26 = vld [vmem:[%s4452_s1 + $0x10] ss:$8 sps:$4 sm:$0xff]   ;;  %v2893_v28 = vld [vmem:[%s4452_s1 + $0x4] ss:$8 sps:$4 sm:$0xff]  }
   0xa   :  { %v2889_v25 = vld [vmem:[%s4452_s1 + $0x114] ss:$8 sps:$4 sm:$0xff]   ;;  %v2892_v27 = vld [vmem:[%s4452_s1 + $0x110] ss:$8 sps:$4 sm:$0xff]   ;;  %v2895_v29 = vld [vmem:[%s4452_s1 + $0x104] ss:$8 sps:$4 sm:$0xff]  }
   0xb   :  { %1975 = vmatpush1.bf16.msra.mxu0 %v2867_v10  ;;  %v2897_v30 = vld [vmem:[%s4452_s1] ss:$8 sps:$4 sm:$0xff]   ;;  %v2899_v32 = vld [vmem:[%s4452_s1 + $0xf4] ss:$8 sps:$4 sm:$0xff]   ;;  %v2903_v34 = vld [vmem:[%s4452_s1 + $0xf0] ss:$8 sps:$4 sm:$0xff]  }
   0xc   :  { %2028 = vmatpush1.bf16.msra.mxu1 %v2868_v11  ;;  %1976 = vmatprep.subr.bf16.mxu0 %v2869_v12  ;;  %v2898_v31 = vld [vmem:[%s4452_s1 + $0x100] ss:$8 sps:$4 sm:$0xff]   ;;  %v2901_v33 = vld [vmem:[%s4452_s1 + $0x1f4] ss:$8 sps:$4 sm:$0xff]   ;;  %v2904_v35 = vld [vmem:[%s4452_s1 + $0x1f0] ss:$8 sps:$4 sm:$0xff]  }
   0xd   :  { %2029 = vmatprep.subr.bf16.mxu1 %v2871_v13  ;;  %v2905_v36 = vld [vmem:[%s4452_s1 + $0xe4] ss:$8 sps:$4 sm:$0xff]   ;;  %v2909_v38 = vld [vmem:[%s4452_s1 + $0xe0] ss:$8 sps:$4 sm:$0xff]   ;;  %v2911_v40 = vld [vmem:[%s4452_s1 + $0xd4] ss:$8 sps:$4 sm:$0xff]  }
   0xe   :  { %v2907_v37 = vld [vmem:[%s4452_s1 + $0x1e4] ss:$8 sps:$4 sm:$0xff]   ;;  %v2910_v39 = vld [vmem:[%s4452_s1 + $0x1e0] ss:$8 sps:$4 sm:$0xff]   ;;  %v2913_v41 = vld [vmem:[%s4452_s1 + $0x1d4] ss:$8 sps:$4 sm:$0xff]  }
   0xf   :  { %1977 = vmatpush1.bf16.msra.mxu0 %v2873_v14  ;;  %v2915_v42 = vld [vmem:[%s4452_s1 + $0xd0] ss:$8 sps:$4 sm:$0xff]   ;;  %v2917_v44 = vld [vmem:[%s4452_s1 + $0xc4] ss:$8 sps:$4 sm:$0xff]   ;;  %v2921_v46 = vld [vmem:[%s4452_s1 + $0xc0] ss:$8 sps:$4 sm:$0xff]  }
  0x10   :  { %2030 = vmatpush1.bf16.msra.mxu1 %v2874_v15  ;;  %1978 = vmatprep.subr.bf16.mxu0 %v2875_v16  ;;  %v2916_v43 = vld [vmem:[%s4452_s1 + $0x1d0] ss:$8 sps:$4 sm:$0xff]   ;;  %v2919_v45 = vld [vmem:[%s4452_s1 + $0x1c4] ss:$8 sps:$4 sm:$0xff]   ;;  %v2922_v47 = vld [vmem:[%s4452_s1 + $0x1c0] ss:$8 sps:$4 sm:$0xff]  }
  0x11   :  { %2031 = vmatprep.subr.bf16.mxu1 %v2877_v17  ;;  %v2923_v48 = vld [vmem:[%s4452_s1 + $0xb4] ss:$8 sps:$4 sm:$0xff]   ;;  %v2949_v49 = vld [vmem:[%s4453_s0 + $0x4] ss:$72 sps:$4 sm:$0xff]   ;;  %v2927_v52 = vld [vmem:[%s4452_s1 + $0xb0] ss:$8 sps:$4 sm:$0xff]  }
  0x12   :  { %v2925_v50 = vld [vmem:[%s4452_s1 + $0x1b4] ss:$8 sps:$4 sm:$0xff]   ;;  %2002 = vmatprep.mubr.bf16.mxu0 %v2949_v49  ;;  %v2928_v53 = vld [vmem:[%s4452_s1 + $0x1b0] ss:$8 sps:$4 sm:$0xff]   ;;  %v2929_v54 = vld [vmem:[%s4452_s1 + $0xa4] ss:$8 sps:$4 sm:$0xff]  }
  0x13   :  { %1979 = vmatpush1.bf16.msra.mxu0 %v2879_v18  ;;  %v2952_v51 = vld [vmem:[%s4453_s0 + $0xc] ss:$72 sps:$4 sm:$0xff]   ;;  %v2933_v56 = vld [vmem:[%s4452_s1 + $0xa0] ss:$8 sps:$4 sm:$0xff]   ;;  %v2939_v60 = vld [vmem:[%s4452_s1 + $0x90] ss:$8 sps:$4 sm:$0xff]  }
  0x14   :  { %2032 = vmatpush1.bf16.msra.mxu1 %v2880_v19  ;;  %1980 = vmatprep.subr.bf16.mxu0 %v2881_v20  ;;  %v2931_v55 = vld [vmem:[%s4452_s1 + $0x1a4] ss:$8 sps:$4 sm:$0xff]   ;;  %v2934_v57 = vld [vmem:[%s4452_s1 + $0x1a0] ss:$8 sps:$4 sm:$0xff]   ;;  %v2935_v58 = vld [vmem:[%s4452_s1 + $0x94] ss:$8 sps:$4 sm:$0xff]  }
  0x15   :  { %2033 = vmatprep.subr.bf16.mxu1 %v2883_v21  ;;  %2055 = vmatprep.mubr.bf16.mxu1 %v2952_v51  ;;  %v2937_v59 = vld [vmem:[%s4452_s1 + $0x194] ss:$8 sps:$4 sm:$0xff]   ;;  %v2940_v61 = vld [vmem:[%s4452_s1 + $0x190] ss:$8 sps:$4 sm:$0xff]   ;;  %v2941_v62 = vld [vmem:[%s4452_s1 + $0x84] ss:$8 sps:$4 sm:$0xff]  }
  0x16   :  { %v2943_v63 = vld [vmem:[%s4452_s1 + $0x184] ss:$8 sps:$4 sm:$0xff]   ;;  %v2945_v0 = vld [vmem:[%s4452_s1 + $0x80] ss:$8 sps:$4 sm:$0xff]   ;;  %v2955_v2 = vld [vmem:[%s4452_s1 + $0x274] ss:$8 sps:$4 sm:$0xff]  }
  0x17   :  { %1981 = vmatpush1.bf16.msra.mxu0 %v2885_v22  ;;  %v2946_v1 = vld [vmem:[%s4452_s1 + $0x180] ss:$8 sps:$4 sm:$0xff]   ;;  %v2958_v3 = vld [vmem:[%s4452_s1 + $0x374] ss:$8 sps:$4 sm:$0xff]   ;;  %v2953_v6 = vld [vmem:[%s4452_s1 + $0x270] ss:$8 sps:$4 sm:$0xff]  }
  0x18   :  { %2034 = vmatpush1.bf16.msra.mxu1 %v2886_v23  ;;  %1982 = vmatprep.subr.bf16.mxu0 %v2887_v24  ;;  %v2947_v4 = vld [vmem:[%s4453_s0] ss:$72 sps:$4 sm:$0xff]   ;;  %v2956_v7 = vld [vmem:[%s4452_s1 + $0x370] ss:$8 sps:$4 sm:$0xff]   ;;  %v2961_v8 = vld [vmem:[%s4452_s1 + $0x264] ss:$8 sps:$4 sm:$0xff]  }
  0x19   :  { %2035 = vmatprep.subr.bf16.mxu1 %v2889_v25  ;;  %v2950_v5 = vld [vmem:[%s4453_s0 + $0x8] ss:$72 sps:$4 sm:$0xff]   ;;  %v2964_v9 = vld [vmem:[%s4452_s1 + $0x364] ss:$8 sps:$4 sm:$0xff]   ;;  %v2967_v12 = vld [vmem:[%s4452_s1 + $0x254] ss:$8 sps:$4 sm:$0xff]  }
  0x1a   :  { %v2959_v10 = vld [vmem:[%s4452_s1 + $0x260] ss:$8 sps:$4 sm:$0xff]   ;;  %v2970_v13 = vld [vmem:[%s4452_s1 + $0x354] ss:$8 sps:$4 sm:$0xff]   ;;  %v2965_v14 = vld [vmem:[%s4452_s1 + $0x250] ss:$8 sps:$4 sm:$0xff]  }
  0x1b   :  { %1983 = vmatpush1.bf16.msra.mxu0 %v2891_v26  ;;  %v2962_v11 = vld [vmem:[%s4452_s1 + $0x360] ss:$8 sps:$4 sm:$0xff]   ;;  %v2968_v15 = vld [vmem:[%s4452_s1 + $0x350] ss:$8 sps:$4 sm:$0xff]   ;;  %v2973_v16 = vld [vmem:[%s4452_s1 + $0x244] ss:$8 sps:$4 sm:$0xff]  }
  0x1c   :  { %2036 = vmatpush1.bf16.msra.mxu1 %v2892_v27  ;;  %1984 = vmatprep.subr.bf16.mxu0 %v2893_v28  ;;  %v2976_v17 = vld [vmem:[%s4452_s1 + $0x344] ss:$8 sps:$4 sm:$0xff]   ;;  %v2971_v18 = vld [vmem:[%s4452_s1 + $0x240] ss:$8 sps:$4 sm:$0xff]   ;;  %v2979_v20 = vld [vmem:[%s4452_s1 + $0x234] ss:$8 sps:$4 sm:$0xff]  }
  0x1d   :  { %2037 = vmatprep.subr.bf16.mxu1 %v2895_v29  ;;  %v2974_v19 = vld [vmem:[%s4452_s1 + $0x340] ss:$8 sps:$4 sm:$0xff]   ;;  %v2982_v21 = vld [vmem:[%s4452_s1 + $0x334] ss:$8 sps:$4 sm:$0xff]   ;;  %v2977_v23 = vld [vmem:[%s4452_s1 + $0x230] ss:$8 sps:$4 sm:$0xff]  }
  0x1e   :  { %v3025_v22 = vld [vmem:[%s4453_s0 + $0x94] ss:$72 sps:$4 sm:$0xff]   ;;  %v2980_v24 = vld [vmem:[%s4452_s1 + $0x330] ss:$8 sps:$4 sm:$0xff]   ;;  %v2985_v25 = vld [vmem:[%s4452_s1 + $0x224] ss:$8 sps:$4 sm:$0xff]  }
  0x1f   :  { %1985 = vmatpush1.bf16.msra.mxu0 %v2897_v30  ;;  %v2988_v26 = vld [vmem:[%s4452_s1 + $0x324] ss:$8 sps:$4 sm:$0xff]   ;;  %v3033_v27 = vld [vmem:[%s4453_s0 + $0x90] ss:$72 sps:$4 sm:$0xff]   ;;  %v2983_v28 = vld [vmem:[%s4452_s1 + $0x220] ss:$8 sps:$4 sm:$0xff]  }
  0x20   :  { %2038 = vmatpush1.bf16.msra.mxu1 %v2898_v31  ;;  %1986 = vmatprep.subr.bf16.mxu0 %v2899_v32  ;;  %v3034_v29 = vld [vmem:[%s4453_s0 + $0x9c] ss:$72 sps:$4 sm:$0xff]   ;;  %v2986_v30 = vld [vmem:[%s4452_s1 + $0x320] ss:$8 sps:$4 sm:$0xff]  }
  0x21   :  { %2039 = vmatprep.subr.bf16.mxu1 %v2901_v33  ;;  %v3036_v31 = vld [vmem:[%s4453_s0 + $0x98] ss:$72 sps:$4 sm:$0xff]   ;;  %v2991_v32 = vld [vmem:[%s4452_s1 + $0x214] ss:$8 sps:$4 sm:$0xff]  }
  0x22   :  { %v2994_v33 = vld [vmem:[%s4452_s1 + $0x314] ss:$8 sps:$4 sm:$0xff]   ;;  %v3010_v49 = vld [vmem:[%s4452_s1 + $0x3e0] ss:$8 sps:$4 sm:$0xff]  }
  0x23   :  { %1987 = vmatpush2.bf16.msra.mxu0 %v2903_v34  ;;  %v2989_v34 = vld [vmem:[%s4452_s1 + $0x210] ss:$8 sps:$4 sm:$0xff]   ;;  %v3018_v51 = vld [vmem:[%s4452_s1 + $0x3d4] ss:$8 sps:$4 sm:$0xff]  }
  0x24   :  { %2040 = vmatpush2.bf16.msra.mxu1 %v2904_v35  ;;  %1988 = vmatprep.subr.bf16.mxu0 %v2905_v36  ;;  %v2992_v35 = vld [vmem:[%s4452_s1 + $0x310] ss:$8 sps:$4 sm:$0xff]   ;;  %v2997_v36 = vld [vmem:[%s4452_s1 + $0x204] ss:$8 sps:$4 sm:$0xff]  }
  0x25   :  { %2041 = vmatprep.subr.bf16.mxu1 %v2907_v37  ;;  %v3000_v37 = vld [vmem:[%s4452_s1 + $0x304] ss:$8 sps:$4 sm:$0xff]  }
  0x27   :  { %1989 = vmatpush2.bf16.msra.mxu0 %v2909_v38  ;;  %v2995_v38 = vld [vmem:[%s4452_s1 + $0x200] ss:$8 sps:$4 sm:$0xff]  }
  0x28   :  { %2042 = vmatpush2.bf16.msra.mxu1 %v2910_v39  ;;  %1990 = vmatprep.subr.bf16.mxu0 %v2911_v40  ;;  %v2998_v39 = vld [vmem:[%s4452_s1 + $0x300] ss:$8 sps:$4 sm:$0xff]   ;;  %v3003_v40 = vld [vmem:[%s4452_s1 + $0x2f4] ss:$8 sps:$4 sm:$0xff]  }
  0x29   :  { %2043 = vmatprep.subr.bf16.mxu1 %v2913_v41  ;;  %v3057_v41 = vld [vmem:[%s4453_s0 + $0x14] ss:$72 sps:$4 sm:$0xff]  }
  0x2b   :  { %1991 = vmatpush2.bf16.msra.mxu0 %v2915_v42  ;;  %v3006_v42 = vld [vmem:[%s4452_s1 + $0x3f4] ss:$8 sps:$4 sm:$0xff]  }
  0x2c   :  { %2044 = vmatpush2.bf16.msra.mxu1 %v2916_v43  ;;  %1992 = vmatprep.subr.bf16.mxu0 %v2917_v44  ;;  %v3060_v43 = vld [vmem:[%s4453_s0 + $0x1c] ss:$72 sps:$4 sm:$0xff]   ;;  %v3001_v44 = vld [vmem:[%s4452_s1 + $0x2f0] ss:$8 sps:$4 sm:$0xff]  }
  0x2d   :  { %2045 = vmatprep.subr.bf16.mxu1 %v2919_v45  ;;  %v3004_v45 = vld [vmem:[%s4452_s1 + $0x3f0] ss:$8 sps:$4 sm:$0xff]  }
  0x2f   :  { %1993 = vmatpush2.bf16.msra.mxu0 %v2921_v46  ;;  %v3009_v46 = vld [vmem:[%s4452_s1 + $0x2e4] ss:$8 sps:$4 sm:$0xff]  }
  0x30   :  { %2046 = vmatpush2.bf16.msra.mxu1 %v2922_v47  ;;  %1994 = vmatprep.subr.bf16.mxu0 %v2923_v48  ;;  %v3012_v47 = vld [vmem:[%s4452_s1 + $0x3e4] ss:$8 sps:$4 sm:$0xff]   ;;  %v3007_v48 = vld [vmem:[%s4452_s1 + $0x2e0] ss:$8 sps:$4 sm:$0xff]  }
  0x31   :  { %2047 = vmatprep.subr.bf16.mxu1 %v2925_v50  ;;  %v3015_v50 = vld [vmem:[%s4452_s1 + $0x2d4] ss:$8 sps:$4 sm:$0xff]  }
  0x33   :  { %1995 = vmatpush2.bf16.msra.mxu0 %v2927_v52  ;;  %v3013_v52 = vld [vmem:[%s4452_s1 + $0x2d0] ss:$8 sps:$4 sm:$0xff]  }
  0x34   :  { %2048 = vmatpush2.bf16.msra.mxu1 %v2928_v53  ;;  %1996 = vmatprep.subr.bf16.mxu0 %v2929_v54  ;;  %v3016_v53 = vld [vmem:[%s4452_s1 + $0x3d0] ss:$8 sps:$4 sm:$0xff]   ;;  %v3021_v54 = vld [vmem:[%s4452_s1 + $0x2c4] ss:$8 sps:$4 sm:$0xff]  }
  0x35   :  { %2049 = vmatprep.subr.bf16.mxu1 %v2931_v55  ;;  %v3024_v55 = vld [vmem:[%s4452_s1 + $0x3c4] ss:$8 sps:$4 sm:$0xff]  }
  0x37   :  { %1997 = vmatpush2.bf16.msra.mxu0 %v2933_v56  ;;  %v3019_v56 = vld [vmem:[%s4452_s1 + $0x2c0] ss:$8 sps:$4 sm:$0xff]  }
  0x38   :  { %2050 = vmatpush2.bf16.msra.mxu1 %v2934_v57  ;;  %1998 = vmatprep.subr.bf16.mxu0 %v2935_v58  ;;  %v3022_v57 = vld [vmem:[%s4452_s1 + $0x3c0] ss:$8 sps:$4 sm:$0xff]   ;;  %v3029_v58 = vld [vmem:[%s4452_s1 + $0x2b4] ss:$8 sps:$4 sm:$0xff]  }
  0x39   :  { %2051 = vmatprep.subr.bf16.mxu1 %v2937_v59  ;;  %v3032_v59 = vld [vmem:[%s4452_s1 + $0x3b4] ss:$8 sps:$4 sm:$0xff]  }
  0x3b   :  { %1999 = vmatpush2.bf16.msra.mxu0 %v2939_v60  ;;  %v3027_v60 = vld [vmem:[%s4452_s1 + $0x2b0] ss:$8 sps:$4 sm:$0xff]  }
  0x3c   :  { %2052 = vmatpush2.bf16.msra.mxu1 %v2940_v61  ;;  %2000 = vmatprep.subr.bf16.mxu0 %v2941_v62  ;;  %v3030_v61 = vld [vmem:[%s4452_s1 + $0x3b0] ss:$8 sps:$4 sm:$0xff]   ;;  %v3039_v62 = vld [vmem:[%s4452_s1 + $0x2a4] ss:$8 sps:$4 sm:$0xff]  }
  0x3d   :  { %2053 = vmatprep.subr.bf16.mxu1 %v2943_v63  ;;  %v3042_v63 = vld [vmem:[%s4452_s1 + $0x3a4] ss:$8 sps:$4 sm:$0xff]  }
  0x3f   :  { %2001 = vmatpush2.bf16.msra.mxu0 %v2945_v0  ;;  %v3037_v0 = vld [vmem:[%s4452_s1 + $0x2a0] ss:$8 sps:$4 sm:$0xff]  }
  0x40   :  { %2054 = vmatpush2.bf16.msra.mxu1 %v2946_v1  ;;  %2076 = vmatprep.subr.bf16.mxu0 %v2955_v2  ;;  %v3040_v1 = vld [vmem:[%s4452_s1 + $0x3a0] ss:$8 sps:$4 sm:$0xff]   ;;  %v3045_v2 = vld [vmem:[%s4452_s1 + $0x294] ss:$8 sps:$4 sm:$0xff]  }
  0x41   :  { %2129 = vmatprep.subr.bf16.mxu1 %v2958_v3  ;;  %v3048_v3 = vld [vmem:[%s4452_s1 + $0x394] ss:$8 sps:$4 sm:$0xff]  }
  0x42   :  { %2003 = vmatmul.mubr.bf16.vlgmr.msra.gmra.mxu0 %v2947_v4  ;;  %v3043_v4 = vld [vmem:[%s4452_s1 + $0x290] ss:$8 sps:$4 sm:$0xff]  }
  0x43   :  { %2056 = vmatmul.mubr.bf16.vlgmr.msra.gmra.mxu1 %v2950_v5  ;;  %2077 = vmatpush1.bf16.msra.mxu0 %v2953_v6  ;;  %v3046_v5 = vld [vmem:[%s4452_s1 + $0x390] ss:$8 sps:$4 sm:$0xff]   ;;  %v3051_v6 = vld [vmem:[%s4452_s1 + $0x284] ss:$8 sps:$4 sm:$0xff]  }
  0x44   :  { %2130 = vmatpush1.bf16.msra.mxu1 %v2956_v7  ;;  %2078 = vmatprep.subr.bf16.mxu0 %v2961_v8  ;;  %v3054_v7 = vld [vmem:[%s4452_s1 + $0x384] ss:$8 sps:$4 sm:$0xff]   ;;  %v3049_v8 = vld [vmem:[%s4452_s1 + $0x280] ss:$8 sps:$4 sm:$0xff]  }
  0x45   :  { %2131 = vmatprep.subr.bf16.mxu1 %v2964_v9  ;;  %2012 = vmatprep.mubr.bf16.mxu0 %v3025_v22  ;;  %v3052_v9 = vld [vmem:[%s4452_s1 + $0x380] ss:$8 sps:$4 sm:$0xff]   ;;  %v3078_v22 = vld [vmem:[%s4452_s1 + $0x454] ss:$8 sps:$4 sm:$0xff]  }
  0x46   :  { %2065 = vmatprep.mubr.bf16.mxu1 %v3034_v29  ;;  %v3090_v29 = vld [vmem:[%s4452_s1 + $0x544] ss:$8 sps:$4 sm:$0xff]  }
  0x47   :  { %2079 = vmatpush1.bf16.msra.mxu0 %v2959_v10  ;;  %v3063_v10 = vld [vmem:[%s4452_s1 + $0x474] ss:$8 sps:$4 sm:$0xff]  }
  0x48   :  { %2132 = vmatpush1.bf16.msra.mxu1 %v2962_v11  ;;  %2080 = vmatprep.subr.bf16.mxu0 %v2967_v12  ;;  %v3066_v11 = vld [vmem:[%s4452_s1 + $0x574] ss:$8 sps:$4 sm:$0xff]   ;;  %v3055_v12 = vld [vmem:[%s4453_s0 + $0x10] ss:$72 sps:$4 sm:$0xff]  }
  0x49   :  { %2133 = vmatprep.subr.bf16.mxu1 %v2970_v13  ;;  %v3058_v13 = vld [vmem:[%s4453_s0 + $0x18] ss:$72 sps:$4 sm:$0xff]  }
  0x4a   :  { %2013 = vmatmul.mubr.bf16.gmra.mxu0 %v3033_v27  ;;  %v3084_v27 = vld [vmem:[%s4453_s0 + $0xa8] ss:$72 sps:$4 sm:$0xff]  }
  0x4b   :  { %2081 = vmatpush1.bf16.msra.mxu0 %v2965_v14  ;;  %2066 = vmatmul.mubr.bf16.gmra.mxu1 %v3036_v31  ;;  %v3061_v14 = vld [vmem:[%s4452_s1 + $0x470] ss:$8 sps:$4 sm:$0xff]   ;;  %v3088_v31 = vld [vmem:[%s4452_s1 + $0x540] ss:$8 sps:$4 sm:$0xff]  }
  0x4c   :  { %2134 = vmatpush1.bf16.msra.mxu1 %v2968_v15  ;;  %2082 = vmatprep.subr.bf16.mxu0 %v2973_v16  ;;  %v3064_v15 = vld [vmem:[%s4452_s1 + $0x570] ss:$8 sps:$4 sm:$0xff]   ;;  %v3069_v16 = vld [vmem:[%s4452_s1 + $0x464] ss:$8 sps:$4 sm:$0xff]  }
  0x4d   :  { %2135 = vmatprep.subr.bf16.mxu1 %v2976_v17  ;;  %2108 = vmatprep.mubr.bf16.mxu0 %v3057_v41  ;;  %v3072_v17 = vld [vmem:[%s4452_s1 + $0x564] ss:$8 sps:$4 sm:$0xff]   ;;  %v3100_v41 = vld [vmem:[%s4452_s1 + $0x520] ss:$8 sps:$4 sm:$0xff]  }
  0x4e   :  { %2161 = vmatprep.mubr.bf16.mxu1 %v3060_v43  ;;  %v3108_v43 = vld [vmem:[%s4452_s1 + $0x514] ss:$8 sps:$4 sm:$0xff]  }
  0x4f   :  { %2083 = vmatpush1.bf16.msra.mxu0 %v2971_v18  ;;  %v3073_v18 = vld [vmem:[%s4453_s0 + $0xa4] ss:$72 sps:$4 sm:$0xff]  }
  0x50   :  { %2136 = vmatpush1.bf16.msra.mxu1 %v2974_v19  ;;  %2084 = vmatprep.subr.bf16.mxu0 %v2979_v20  ;;  %v3082_v19 = vld [vmem:[%s4453_s0 + $0xac] ss:$72 sps:$4 sm:$0xff]   ;;  %v3067_v20 = vld [vmem:[%s4452_s1 + $0x460] ss:$8 sps:$4 sm:$0xff]  }
  0x51   :  { %2137 = vmatprep.subr.bf16.mxu1 %v2982_v21  ;;  %v3070_v21 = vld [vmem:[%s4452_s1 + $0x560] ss:$8 sps:$4 sm:$0xff]  }
  0x53   :  { %2085 = vmatpush1.bf16.msra.mxu0 %v2977_v23  ;;  %v3081_v23 = vld [vmem:[%s4452_s1 + $0x554] ss:$8 sps:$4 sm:$0xff]  }
  0x54   :  { %2138 = vmatpush1.bf16.msra.mxu1 %v2980_v24  ;;  %2086 = vmatprep.subr.bf16.mxu0 %v2985_v25  ;;  %v3075_v24 = vld [vmem:[%s4453_s0 + $0xa0] ss:$72 sps:$4 sm:$0xff]   ;;  %v3076_v25 = vld [vmem:[%s4452_s1 + $0x450] ss:$8 sps:$4 sm:$0xff]  }
  0x55   :  { %2139 = vmatprep.subr.bf16.mxu1 %v2988_v26  ;;  %v3079_v26 = vld [vmem:[%s4452_s1 + $0x550] ss:$8 sps:$4 sm:$0xff]  }
  0x57   :  { %2087 = vmatpush1.bf16.msra.mxu0 %v2983_v28  ;;  %v3087_v28 = vld [vmem:[%s4452_s1 + $0x444] ss:$8 sps:$4 sm:$0xff]  }
  0x58   :  { %2140 = vmatpush1.bf16.msra.mxu1 %v2986_v30  ;;  %2088 = vmatprep.subr.bf16.mxu0 %v2991_v32  ;;  %v3085_v30 = vld [vmem:[%s4452_s1 + $0x440] ss:$8 sps:$4 sm:$0xff]   ;;  %v3093_v32 = vld [vmem:[%s4452_s1 + $0x434] ss:$8 sps:$4 sm:$0xff]  }
  0x59   :  { %2141 = vmatprep.subr.bf16.mxu1 %v2994_v33  ;;  %v3165_v33 = vld [vmem:[%s4453_s0 + $0x24] ss:$72 sps:$4 sm:$0xff]  }
  0x5b   :  { %2089 = vmatpush1.bf16.msra.mxu0 %v2989_v34  ;;  %v3096_v34 = vld [vmem:[%s4452_s1 + $0x534] ss:$8 sps:$4 sm:$0xff]  }
  0x5c   :  { %2142 = vmatpush1.bf16.msra.mxu1 %v2992_v35  ;;  %2090 = vmatprep.subr.bf16.mxu0 %v2997_v36  ;;  %v3168_v35 = vld [vmem:[%s4453_s0 + $0x2c] ss:$72 sps:$4 sm:$0xff]   ;;  %v3091_v36 = vld [vmem:[%s4452_s1 + $0x430] ss:$8 sps:$4 sm:$0xff]  }
  0x5d   :  { %2143 = vmatprep.subr.bf16.mxu1 %v3000_v37  ;;  %v3094_v37 = vld [vmem:[%s4452_s1 + $0x530] ss:$8 sps:$4 sm:$0xff]  }
  0x5f   :  { %2091 = vmatpush1.bf16.msra.mxu0 %v2995_v38  ;;  %v3099_v38 = vld [vmem:[%s4452_s1 + $0x424] ss:$8 sps:$4 sm:$0xff]  }
  0x60   :  { %2144 = vmatpush1.bf16.msra.mxu1 %v2998_v39  ;;  %2092 = vmatprep.subr.bf16.mxu0 %v3003_v40  ;;  %v3102_v39 = vld [vmem:[%s4452_s1 + $0x524] ss:$8 sps:$4 sm:$0xff]   ;;  %v3097_v40 = vld [vmem:[%s4452_s1 + $0x420] ss:$8 sps:$4 sm:$0xff]  }
  0x61   :  { %2145 = vmatprep.subr.bf16.mxu1 %v3006_v42  ;;  %v3105_v42 = vld [vmem:[%s4452_s1 + $0x414] ss:$8 sps:$4 sm:$0xff]  }
  0x63   :  { %2093 = vmatpush2.bf16.msra.mxu0 %v3001_v44  ;;  %v3103_v44 = vld [vmem:[%s4452_s1 + $0x410] ss:$8 sps:$4 sm:$0xff]  }
  0x64   :  { %2146 = vmatpush2.bf16.msra.mxu1 %v3004_v45  ;;  %2094 = vmatprep.subr.bf16.mxu0 %v3009_v46  ;;  %v3106_v45 = vld [vmem:[%s4452_s1 + $0x510] ss:$8 sps:$4 sm:$0xff]   ;;  %v3111_v46 = vld [vmem:[%s4452_s1 + $0x404] ss:$8 sps:$4 sm:$0xff]  }
  0x65   :  { %2147 = vmatprep.subr.bf16.mxu1 %v3012_v47  ;;  %v3114_v47 = vld [vmem:[%s4452_s1 + $0x504] ss:$8 sps:$4 sm:$0xff]  }
  0x67   :  { %2095 = vmatpush2.bf16.msra.mxu0 %v3007_v48  ;;  %v3109_v48 = vld [vmem:[%s4452_s1 + $0x400] ss:$8 sps:$4 sm:$0xff]  }
  0x68   :  { %2148 = vmatpush2.bf16.msra.mxu1 %v3010_v49  ;;  %2096 = vmatprep.subr.bf16.mxu0 %v3015_v50  ;;  %v3112_v49 = vld [vmem:[%s4452_s1 + $0x500] ss:$8 sps:$4 sm:$0xff]   ;;  %v3117_v50 = vld [vmem:[%s4452_s1 + $0x4f4] ss:$8 sps:$4 sm:$0xff]  }
  0x69   :  { %2149 = vmatprep.subr.bf16.mxu1 %v3018_v51  ;;  %v3120_v51 = vld [vmem:[%s4452_s1 + $0x5f4] ss:$8 sps:$4 sm:$0xff]  }
  0x6b   :  { %2097 = vmatpush2.bf16.msra.mxu0 %v3013_v52  ;;  %v3115_v52 = vld [vmem:[%s4452_s1 + $0x4f0] ss:$8 sps:$4 sm:$0xff]  }
  0x6c   :  { %2150 = vmatpush2.bf16.msra.mxu1 %v3016_v53  ;;  %2098 = vmatprep.subr.bf16.mxu0 %v3021_v54  ;;  %v3118_v53 = vld [vmem:[%s4452_s1 + $0x5f0] ss:$8 sps:$4 sm:$0xff]   ;;  %v3123_v54 = vld [vmem:[%s4452_s1 + $0x4e4] ss:$8 sps:$4 sm:$0xff]  }
  0x6d   :  { %2151 = vmatprep.subr.bf16.mxu1 %v3024_v55  ;;  %v3126_v55 = vld [vmem:[%s4452_s1 + $0x5e4] ss:$8 sps:$4 sm:$0xff]  }
  0x6f   :  { %2099 = vmatpush2.bf16.msra.mxu0 %v3019_v56  ;;  %v3121_v56 = vld [vmem:[%s4452_s1 + $0x4e0] ss:$8 sps:$4 sm:$0xff]  }
  0x70   :  { %2152 = vmatpush2.bf16.msra.mxu1 %v3022_v57  ;;  %2100 = vmatprep.subr.bf16.mxu0 %v3029_v58  ;;  %v3124_v57 = vld [vmem:[%s4452_s1 + $0x5e0] ss:$8 sps:$4 sm:$0xff]   ;;  %v3129_v58 = vld [vmem:[%s4452_s1 + $0x4d4] ss:$8 sps:$4 sm:$0xff]  }
  0x71   :  { %2153 = vmatprep.subr.bf16.mxu1 %v3032_v59  ;;  %v3132_v59 = vld [vmem:[%s4452_s1 + $0x5d4] ss:$8 sps:$4 sm:$0xff]  }
  0x73   :  { %2101 = vmatpush2.bf16.msra.mxu0 %v3027_v60  ;;  %v3127_v60 = vld [vmem:[%s4452_s1 + $0x4d0] ss:$8 sps:$4 sm:$0xff]  }
  0x74   :  { %2154 = vmatpush2.bf16.msra.mxu1 %v3030_v61  ;;  %2102 = vmatprep.subr.bf16.mxu0 %v3039_v62  ;;  %v3130_v61 = vld [vmem:[%s4452_s1 + $0x5d0] ss:$8 sps:$4 sm:$0xff]   ;;  %v3135_v62 = vld [vmem:[%s4452_s1 + $0x4c4] ss:$8 sps:$4 sm:$0xff]  }
  0x75   :  { %2155 = vmatprep.subr.bf16.mxu1 %v3042_v63  ;;  %v3138_v63 = vld [vmem:[%s4452_s1 + $0x5c4] ss:$8 sps:$4 sm:$0xff]  }
  0x77   :  { %2103 = vmatpush2.bf16.msra.mxu0 %v3037_v0  ;;  %v3133_v0 = vld [vmem:[%s4452_s1 + $0x4c0] ss:$8 sps:$4 sm:$0xff]  }
  0x78   :  { %2156 = vmatpush2.bf16.msra.mxu1 %v3040_v1  ;;  %2104 = vmatprep.subr.bf16.mxu0 %v3045_v2  ;;  %v3136_v1 = vld [vmem:[%s4452_s1 + $0x5c0] ss:$8 sps:$4 sm:$0xff]   ;;  %v3141_v2 = vld [vmem:[%s4452_s1 + $0x4b4] ss:$8 sps:$4 sm:$0xff]  }
  0x79   :  { %2157 = vmatprep.subr.bf16.mxu1 %v3048_v3  ;;  %v3144_v3 = vld [vmem:[%s4452_s1 + $0x5b4] ss:$8 sps:$4 sm:$0xff]  }
  0x7b   :  { %2105 = vmatpush2.bf16.msra.mxu0 %v3043_v4  ;;  %v3139_v4 = vld [vmem:[%s4452_s1 + $0x4b0] ss:$8 sps:$4 sm:$0xff]  }
  0x7c   :  { %2158 = vmatpush2.bf16.msra.mxu1 %v3046_v5  ;;  %2106 = vmatprep.subr.bf16.mxu0 %v3051_v6  ;;  %v3142_v5 = vld [vmem:[%s4452_s1 + $0x5b0] ss:$8 sps:$4 sm:$0xff]   ;;  %v3147_v6 = vld [vmem:[%s4452_s1 + $0x4a4] ss:$8 sps:$4 sm:$0xff]  }
  0x7d   :  { %2159 = vmatprep.subr.bf16.mxu1 %v3054_v7  ;;  %v3150_v7 = vld [vmem:[%s4452_s1 + $0x5a4] ss:$8 sps:$4 sm:$0xff]  }
  0x7f   :  { %2107 = vmatpush2.bf16.msra.mxu0 %v3049_v8  ;;  %v3145_v8 = vld [vmem:[%s4452_s1 + $0x4a0] ss:$8 sps:$4 sm:$0xff]  }
  0x80   :  { %2160 = vmatpush2.bf16.msra.mxu1 %v3052_v9  ;;  %2182 = vmatprep.subr.bf16.mxu0 %v3063_v10  ;;  %v3148_v9 = vld [vmem:[%s4452_s1 + $0x5a0] ss:$8 sps:$4 sm:$0xff]   ;;  %v3153_v10 = vld [vmem:[%s4452_s1 + $0x494] ss:$8 sps:$4 sm:$0xff]  }
  0x81   :  { %2235 = vmatprep.subr.bf16.mxu1 %v3066_v11  ;;  %v3156_v11 = vld [vmem:[%s4452_s1 + $0x594] ss:$8 sps:$4 sm:$0xff]  }
  0x82   :  { %2109 = vmatmul.mubr.bf16.vlgmr.msra.gmra.mxu0 %v3055_v12  ;;  %v3151_v12 = vld [vmem:[%s4452_s1 + $0x490] ss:$8 sps:$4 sm:$0xff]  }
  0x83   :  { %2162 = vmatmul.mubr.bf16.vlgmr.msra.gmra.mxu1 %v3058_v13  ;;  %2183 = vmatpush1.bf16.msra.mxu0 %v3061_v14  ;;  %v3154_v13 = vld [vmem:[%s4452_s1 + $0x590] ss:$8 sps:$4 sm:$0xff]   ;;  %v3159_v14 = vld [vmem:[%s4452_s1 + $0x484] ss:$8 sps:$4 sm:$0xff]  }
  0x84   :  { %2236 = vmatpush1.bf16.msra.mxu1 %v3064_v15  ;;  %2184 = vmatprep.subr.bf16.mxu0 %v3069_v16  ;;  %v3162_v15 = vld [vmem:[%s4452_s1 + $0x584] ss:$8 sps:$4 sm:$0xff]   ;;  %v3157_v16 = vld [vmem:[%s4452_s1 + $0x480] ss:$8 sps:$4 sm:$0xff]  }
  0x85   :  { %2237 = vmatprep.subr.bf16.mxu1 %v3072_v17  ;;  %2118 = vmatprep.mubr.bf16.mxu0 %v3073_v18  ;;  %v3160_v17 = vld [vmem:[%s4452_s1 + $0x580] ss:$8 sps:$4 sm:$0xff]   ;;  %v3171_v18 = vld [vmem:[%s4452_s1 + $0x674] ss:$8 sps:$4 sm:$0xff]  }
  0x86   :  { %2171 = vmatprep.mubr.bf16.mxu1 %v3082_v19  ;;  %v3174_v19 = vld [vmem:[%s4452_s1 + $0x774] ss:$8 sps:$4 sm:$0xff]  }
  0x87   :  { %2185 = vmatpush1.bf16.msra.mxu0 %v3067_v20  ;;  %v3163_v20 = vld [vmem:[%s4453_s0 + $0x20] ss:$72 sps:$4 sm:$0xff]  }
  0x88   :  { %2238 = vmatpush1.bf16.msra.mxu1 %v3070_v21  ;;  %2186 = vmatprep.subr.bf16.mxu0 %v3078_v22  ;;  %v3166_v21 = vld [vmem:[%s4453_s0 + $0x28] ss:$72 sps:$4 sm:$0xff]  }
  0x89   :  { %2239 = vmatprep.subr.bf16.mxu1 %v3081_v23  ;;  %v3169_v22 = vld [vmem:[%s4452_s1 + $0x670] ss:$8 sps:$4 sm:$0xff]  }
  0x8a   :  { %2119 = vmatmul.mubr.bf16.gmra.mxu0 %v3075_v24  ;;  %v3172_v23 = vld [vmem:[%s4452_s1 + $0x770] ss:$8 sps:$4 sm:$0xff]   ;;  %v3177_v24 = vld [vmem:[%s4452_s1 + $0x664] ss:$8 sps:$4 sm:$0xff]  }
  0x8b   :  { %2172 = vmatmul.mubr.bf16.gmra.mxu1 %v3084_v27  ;;  %2187 = vmatpush1.bf16.msra.mxu0 %v3076_v25  ;;  %v3180_v25 = vld [vmem:[%s4452_s1 + $0x764] ss:$8 sps:$4 sm:$0xff]  }
  0x8c   :  { %2240 = vmatpush1.bf16.msra.mxu1 %v3079_v26  ;;  %2188 = vmatprep.subr.bf16.mxu0 %v3087_v28  ;;  %v3181_v26 = vld [vmem:[%s4453_s0 + $0xb4] ss:$72 sps:$4 sm:$0xff]   ;;  %v3175_v28 = vld [vmem:[%s4452_s1 + $0x660] ss:$8 sps:$4 sm:$0xff]  }
  0x8d   :  { %2241 = vmatprep.subr.bf16.mxu1 %v3090_v29  ;;  %2214 = vmatprep.mubr.bf16.mxu0 %v3165_v33  ;;  %v3190_v27 = vld [vmem:[%s4453_s0 + $0xbc] ss:$72 sps:$4 sm:$0xff]   ;;  %v3178_v29 = vld [vmem:[%s4452_s1 + $0x760] ss:$8 sps:$4 sm:$0xff]   ;;  %v3184_v33 = vld [vmem:[%s4452_s1 + $0x650] ss:$8 sps:$4 sm:$0xff]  }
  0x8e   :  { %2267 = vmatprep.mubr.bf16.mxu1 %v3168_v35  ;;  %v3187_v35 = vld [vmem:[%s4452_s1 + $0x750] ss:$8 sps:$4 sm:$0xff]  }
  0x8f   :  { %2189 = vmatpush1.bf16.msra.mxu0 %v3085_v30  ;;  %v3186_v30 = vld [vmem:[%s4452_s1 + $0x654] ss:$8 sps:$4 sm:$0xff]  }
  0x90   :  { %2242 = vmatpush1.bf16.msra.mxu1 %v3088_v31  ;;  %2190 = vmatprep.subr.bf16.mxu0 %v3093_v32  ;;  %v3189_v31 = vld [vmem:[%s4452_s1 + $0x754] ss:$8 sps:$4 sm:$0xff]   ;;  %v3183_v32 = vld [vmem:[%s4453_s0 + $0xb0] ss:$72 sps:$4 sm:$0xff]  }
  0x91   :  { %2243 = vmatprep.subr.bf16.mxu1 %v3096_v34  ;;  %v3192_v34 = vld [vmem:[%s4453_s0 + $0xb8] ss:$72 sps:$4 sm:$0xff]  }
  0x93   :  { %2191 = vmatpush1.bf16.msra.mxu0 %v3091_v36  ;;  %v3195_v36 = vld [vmem:[%s4452_s1 + $0x644] ss:$8 sps:$4 sm:$0xff]  }
  0x94   :  { %2244 = vmatpush1.bf16.msra.mxu1 %v3094_v37  ;;  %2192 = vmatprep.subr.bf16.mxu0 %v3099_v38  ;;  %v3198_v37 = vld [vmem:[%s4452_s1 + $0x744] ss:$8 sps:$4 sm:$0xff]   ;;  %v3273_v38 = vld [vmem:[%s4453_s0 + $0x34] ss:$72 sps:$4 sm:$0xff]  }
  0x95   :  { %2245 = vmatprep.subr.bf16.mxu1 %v3102_v39  ;;  %v3276_v39 = vld [vmem:[%s4453_s0 + $0x3c] ss:$72 sps:$4 sm:$0xff]  }
  0x97   :  { %2193 = vmatpush1.bf16.msra.mxu0 %v3097_v40  ;;  %v3193_v40 = vld [vmem:[%s4452_s1 + $0x640] ss:$8 sps:$4 sm:$0xff]  }
  0x98   :  { %2246 = vmatpush1.bf16.msra.mxu1 %v3100_v41  ;;  %2194 = vmatprep.subr.bf16.mxu0 %v3105_v42  ;;  %v3196_v41 = vld [vmem:[%s4452_s1 + $0x740] ss:$8 sps:$4 sm:$0xff]   ;;  %v3201_v42 = vld [vmem:[%s4452_s1 + $0x634] ss:$8 sps:$4 sm:$0xff]  }
  0x99   :  { %2247 = vmatprep.subr.bf16.mxu1 %v3108_v43  ;;  %v3204_v43 = vld [vmem:[%s4452_s1 + $0x734] ss:$8 sps:$4 sm:$0xff]  }
  0x9b   :  { %2195 = vmatpush1.bf16.msra.mxu0 %v3103_v44  ;;  %v3199_v44 = vld [vmem:[%s4452_s1 + $0x630] ss:$8 sps:$4 sm:$0xff]  }
  0x9c   :  { %2248 = vmatpush1.bf16.msra.mxu1 %v3106_v45  ;;  %2196 = vmatprep.subr.bf16.mxu0 %v3111_v46  ;;  %v3202_v45 = vld [vmem:[%s4452_s1 + $0x730] ss:$8 sps:$4 sm:$0xff]   ;;  %v3207_v46 = vld [vmem:[%s4452_s1 + $0x624] ss:$8 sps:$4 sm:$0xff]  }
  0x9d   :  { %2249 = vmatprep.subr.bf16.mxu1 %v3114_v47  ;;  %v3210_v47 = vld [vmem:[%s4452_s1 + $0x724] ss:$8 sps:$4 sm:$0xff]  }
  0x9f   :  { %2197 = vmatpush1.bf16.msra.mxu0 %v3109_v48  ;;  %v3205_v48 = vld [vmem:[%s4452_s1 + $0x620] ss:$8 sps:$4 sm:$0xff]  }
  0xa0   :  { %2250 = vmatpush1.bf16.msra.mxu1 %v3112_v49  ;;  %2198 = vmatprep.subr.bf16.mxu0 %v3117_v50  ;;  %v3208_v49 = vld [vmem:[%s4452_s1 + $0x720] ss:$8 sps:$4 sm:$0xff]   ;;  %v3213_v50 = vld [vmem:[%s4452_s1 + $0x614] ss:$8 sps:$4 sm:$0xff]  }
  0xa1   :  { %2251 = vmatprep.subr.bf16.mxu1 %v3120_v51  ;;  %v3216_v51 = vld [vmem:[%s4452_s1 + $0x714] ss:$8 sps:$4 sm:$0xff]  }
  0xa3   :  { %2199 = vmatpush2.bf16.msra.mxu0 %v3115_v52  ;;  %v3211_v52 = vld [vmem:[%s4452_s1 + $0x610] ss:$8 sps:$4 sm:$0xff]  }
  0xa4   :  { %2252 = vmatpush2.bf16.msra.mxu1 %v3118_v53  ;;  %2200 = vmatprep.subr.bf16.mxu0 %v3123_v54  ;;  %v3214_v53 = vld [vmem:[%s4452_s1 + $0x710] ss:$8 sps:$4 sm:$0xff]   ;;  %v3219_v54 = vld [vmem:[%s4452_s1 + $0x604] ss:$8 sps:$4 sm:$0xff]  }
  0xa5   :  { %2253 = vmatprep.subr.bf16.mxu1 %v3126_v55  ;;  %v3222_v55 = vld [vmem:[%s4452_s1 + $0x704] ss:$8 sps:$4 sm:$0xff]  }
  0xa7   :  { %2201 = vmatpush2.bf16.msra.mxu0 %v3121_v56  ;;  %v3217_v56 = vld [vmem:[%s4452_s1 + $0x600] ss:$8 sps:$4 sm:$0xff]  }
  0xa8   :  { %2254 = vmatpush2.bf16.msra.mxu1 %v3124_v57  ;;  %2202 = vmatprep.subr.bf16.mxu0 %v3129_v58  ;;  %v3220_v57 = vld [vmem:[%s4452_s1 + $0x700] ss:$8 sps:$4 sm:$0xff]   ;;  %v3225_v58 = vld [vmem:[%s4452_s1 + $0x6f4] ss:$8 sps:$4 sm:$0xff]  }
  0xa9   :  { %2255 = vmatprep.subr.bf16.mxu1 %v3132_v59  ;;  %v3228_v59 = vld [vmem:[%s4452_s1 + $0x7f4] ss:$8 sps:$4 sm:$0xff]  }
  0xab   :  { %2203 = vmatpush2.bf16.msra.mxu0 %v3127_v60  ;;  %v3223_v60 = vld [vmem:[%s4452_s1 + $0x6f0] ss:$8 sps:$4 sm:$0xff]  }
  0xac   :  { %2256 = vmatpush2.bf16.msra.mxu1 %v3130_v61  ;;  %2204 = vmatprep.subr.bf16.mxu0 %v3135_v62  ;;  %v3226_v61 = vld [vmem:[%s4452_s1 + $0x7f0] ss:$8 sps:$4 sm:$0xff]   ;;  %v3231_v62 = vld [vmem:[%s4452_s1 + $0x6e4] ss:$8 sps:$4 sm:$0xff]  }
  0xad   :  { %2257 = vmatprep.subr.bf16.mxu1 %v3138_v63  ;;  %v3234_v63 = vld [vmem:[%s4452_s1 + $0x7e4] ss:$8 sps:$4 sm:$0xff]  }
  0xaf   :  { %2205 = vmatpush2.bf16.msra.mxu0 %v3133_v0  ;;  %v3229_v0 = vld [vmem:[%s4452_s1 + $0x6e0] ss:$8 sps:$4 sm:$0xff]  }
  0xb0   :  { %2258 = vmatpush2.bf16.msra.mxu1 %v3136_v1  ;;  %2206 = vmatprep.subr.bf16.mxu0 %v3141_v2  ;;  %v3232_v1 = vld [vmem:[%s4452_s1 + $0x7e0] ss:$8 sps:$4 sm:$0xff]   ;;  %v3237_v2 = vld [vmem:[%s4452_s1 + $0x6d4] ss:$8 sps:$4 sm:$0xff]  }
  0xb1   :  { %2259 = vmatprep.subr.bf16.mxu1 %v3144_v3  ;;  %v3240_v3 = vld [vmem:[%s4452_s1 + $0x7d4] ss:$8 sps:$4 sm:$0xff]  }
  0xb3   :  { %2207 = vmatpush2.bf16.msra.mxu0 %v3139_v4  ;;  %v3235_v4 = vld [vmem:[%s4452_s1 + $0x6d0] ss:$8 sps:$4 sm:$0xff]  }
  0xb4   :  { %2260 = vmatpush2.bf16.msra.mxu1 %v3142_v5  ;;  %2208 = vmatprep.subr.bf16.mxu0 %v3147_v6  ;;  %v3238_v5 = vld [vmem:[%s4452_s1 + $0x7d0] ss:$8 sps:$4 sm:$0xff]   ;;  %v3243_v6 = vld [vmem:[%s4452_s1 + $0x6c4] ss:$8 sps:$4 sm:$0xff]  }
  0xb5   :  { %2261 = vmatprep.subr.bf16.mxu1 %v3150_v7  ;;  %v3246_v7 = vld [vmem:[%s4452_s1 + $0x7c4] ss:$8 sps:$4 sm:$0xff]  }
  0xb7   :  { %2209 = vmatpush2.bf16.msra.mxu0 %v3145_v8  ;;  %v3241_v8 = vld [vmem:[%s4452_s1 + $0x6c0] ss:$8 sps:$4 sm:$0xff]  }
  0xb8   :  { %2262 = vmatpush2.bf16.msra.mxu1 %v3148_v9  ;;  %2210 = vmatprep.subr.bf16.mxu0 %v3153_v10  ;;  %v3244_v9 = vld [vmem:[%s4452_s1 + $0x7c0] ss:$8 sps:$4 sm:$0xff]   ;;  %v3249_v10 = vld [vmem:[%s4452_s1 + $0x6b4] ss:$8 sps:$4 sm:$0xff]  }
  0xb9   :  { %2263 = vmatprep.subr.bf16.mxu1 %v3156_v11  ;;  %v3252_v11 = vld [vmem:[%s4452_s1 + $0x7b4] ss:$8 sps:$4 sm:$0xff]  }
  0xbb   :  { %2211 = vmatpush2.bf16.msra.mxu0 %v3151_v12  ;;  %v3247_v12 = vld [vmem:[%s4452_s1 + $0x6b0] ss:$8 sps:$4 sm:$0xff]  }
  0xbc   :  { %2264 = vmatpush2.bf16.msra.mxu1 %v3154_v13  ;;  %2212 = vmatprep.subr.bf16.mxu0 %v3159_v14  ;;  %v3250_v13 = vld [vmem:[%s4452_s1 + $0x7b0] ss:$8 sps:$4 sm:$0xff]   ;;  %v3255_v14 = vld [vmem:[%s4452_s1 + $0x6a4] ss:$8 sps:$4 sm:$0xff]  }
  0xbd   :  { %2265 = vmatprep.subr.bf16.mxu1 %v3162_v15  ;;  %v3258_v15 = vld [vmem:[%s4452_s1 + $0x7a4] ss:$8 sps:$4 sm:$0xff]  }
  0xbf   :  { %2213 = vmatpush2.bf16.msra.mxu0 %v3157_v16  ;;  %v3253_v16 = vld [vmem:[%s4452_s1 + $0x6a0] ss:$8 sps:$4 sm:$0xff]  }
  0xc0   :  { %2266 = vmatpush2.bf16.msra.mxu1 %v3160_v17  ;;  %2288 = vmatprep.subr.bf16.mxu0 %v3171_v18  ;;  %v3256_v17 = vld [vmem:[%s4452_s1 + $0x7a0] ss:$8 sps:$4 sm:$0xff]   ;;  %v3261_v18 = vld [vmem:[%s4452_s1 + $0x694] ss:$8 sps:$4 sm:$0xff]  }
  0xc1   :  { %2341 = vmatprep.subr.bf16.mxu1 %v3174_v19  ;;  %v3264_v19 = vld [vmem:[%s4452_s1 + $0x794] ss:$8 sps:$4 sm:$0xff]  }
  0xc2   :  { %2215 = vmatmul.mubr.bf16.vlgmr.msra.gmra.mxu0 %v3163_v20  ;;  %v3259_v20 = vld [vmem:[%s4452_s1 + $0x690] ss:$8 sps:$4 sm:$0xff]  }
  0xc3   :  { %2268 = vmatmul.mubr.bf16.vlgmr.msra.gmra.mxu1 %v3166_v21  ;;  %2289 = vmatpush1.bf16.msra.mxu0 %v3169_v22  ;;  %v3262_v21 = vld [vmem:[%s4452_s1 + $0x790] ss:$8 sps:$4 sm:$0xff]   ;;  %v3267_v22 = vld [vmem:[%s4452_s1 + $0x684] ss:$8 sps:$4 sm:$0xff]  }
  0xc4   :  { %2342 = vmatpush1.bf16.msra.mxu1 %v3172_v23  ;;  %2290 = vmatprep.subr.bf16.mxu0 %v3177_v24  ;;  %v3270_v23 = vld [vmem:[%s4452_s1 + $0x784] ss:$8 sps:$4 sm:$0xff]   ;;  %v3265_v24 = vld [vmem:[%s4452_s1 + $0x680] ss:$8 sps:$4 sm:$0xff]  }
  0xc5   :  { %2343 = vmatprep.subr.bf16.mxu1 %v3180_v25  ;;  %2224 = vmatprep.mubr.bf16.mxu0 %v3181_v26  ;;  %v3268_v25 = vld [vmem:[%s4452_s1 + $0x780] ss:$8 sps:$4 sm:$0xff]   ;;  %v3279_v26 = vld [vmem:[%s4452_s1 + $0x874] ss:$8 sps:$4 sm:$0xff]  }
  0xc6   :  { %2277 = vmatprep.mubr.bf16.mxu1 %v3190_v27  ;;  %v3271_v27 = vld [vmem:[%s4453_s0 + $0x30] ss:$72 sps:$4 sm:$0xff]  }
  0xc7   :  { %2291 = vmatpush1.bf16.msra.mxu0 %v3175_v28  ;;  %v3274_v28 = vld [vmem:[%s4453_s0 + $0x38] ss:$72 sps:$4 sm:$0xff]  }
  0xc8   :  { %2344 = vmatpush1.bf16.msra.mxu1 %v3178_v29  ;;  %2292 = vmatprep.subr.bf16.mxu0 %v3186_v30  ;;  %v3277_v29 = vld [vmem:[%s4452_s1 + $0x870] ss:$8 sps:$4 sm:$0xff]   ;;  %v3282_v30 = vld [vmem:[%s4452_s1 + $0x864] ss:$8 sps:$4 sm:$0xff]  }
  0xc9   :  { %2345 = vmatprep.subr.bf16.mxu1 %v3189_v31  ;;  %v3283_v31 = vld [vmem:[%s4453_s0 + $0xc4] ss:$72 sps:$4 sm:$0xff]  }
  0xca   :  { %2225 = vmatmul.mubr.bf16.gmra.mxu0 %v3183_v32  ;;  %v3289_v32 = vld [vmem:[%s4453_s0 + $0xcc] ss:$72 sps:$4 sm:$0xff]  }
  0xcb   :  { %2278 = vmatmul.mubr.bf16.gmra.mxu1 %v3192_v34  ;;  %2293 = vmatpush1.bf16.msra.mxu0 %v3184_v33  ;;  %v3280_v33 = vld [vmem:[%s4452_s1 + $0x860] ss:$8 sps:$4 sm:$0xff]   ;;  %v3288_v34 = vld [vmem:[%s4452_s1 + $0x854] ss:$8 sps:$4 sm:$0xff]  }
  0xcc   :  { %2346 = vmatpush1.bf16.msra.mxu1 %v3187_v35  ;;  %2294 = vmatprep.subr.bf16.mxu0 %v3195_v36  ;;  %v3285_v35 = vld [vmem:[%s4453_s0 + $0xc0] ss:$72 sps:$4 sm:$0xff]  }
  0xcd   :  { %2347 = vmatprep.subr.bf16.mxu1 %v3198_v37  ;;  %2320 = vmatprep.mubr.bf16.mxu0 %v3273_v38  ;;  %v3291_v36 = vld [vmem:[%s4453_s0 + $0xc8] ss:$72 sps:$4 sm:$0xff]   ;;  %v3294_v38 = vld [vmem:[%s4452_s1 + $0x844] ss:$8 sps:$4 sm:$0xff]  }
  0xce   :  { %2373 = vmatprep.mubr.bf16.mxu1 %v3276_v39  ;;  %v3286_v37 = vld [vmem:[%s4452_s1 + $0x850] ss:$8 sps:$4 sm:$0xff]   ;;  %v3333_v39 = vld [vmem:[%s4453_s0 + $0x44] ss:$72 sps:$4 sm:$0xff]  }
  0xcf   :  { %2295 = vmatpush1.bf16.msra.mxu0 %v3193_v40  ;;  %v3336_v40 = vld [vmem:[%s4453_s0 + $0xd4] ss:$72 sps:$4 sm:$0xff]  }
  0xd0   :  { %2348 = vmatpush1.bf16.msra.mxu1 %v3196_v41  ;;  %2296 = vmatprep.subr.bf16.mxu0 %v3201_v42  ;;  %v3292_v41 = vld [vmem:[%s4452_s1 + $0x840] ss:$8 sps:$4 sm:$0xff]   ;;  %v3297_v42 = vld [vmem:[%s4452_s1 + $0x834] ss:$8 sps:$4 sm:$0xff]  }
  0xd1   :  { %2349 = vmatprep.subr.bf16.mxu1 %v3204_v43  ;;  %v3295_v43 = vld [vmem:[%s4452_s1 + $0x830] ss:$8 sps:$4 sm:$0xff]  }
  0xd3   :  { %2297 = vmatpush1.bf16.msra.mxu0 %v3199_v44  ;;  %v3300_v44 = vld [vmem:[%s4452_s1 + $0x824] ss:$8 sps:$4 sm:$0xff]  }
  0xd4   :  { %2350 = vmatpush1.bf16.msra.mxu1 %v3202_v45  ;;  %2298 = vmatprep.subr.bf16.mxu0 %v3207_v46  ;;  %v3298_v45 = vld [vmem:[%s4452_s1 + $0x820] ss:$8 sps:$4 sm:$0xff]   ;;  %v3303_v46 = vld [vmem:[%s4452_s1 + $0x814] ss:$8 sps:$4 sm:$0xff]  }
  0xd5   :  { %2351 = vmatprep.subr.bf16.mxu1 %v3210_v47  ;;  %v3301_v47 = vld [vmem:[%s4452_s1 + $0x810] ss:$8 sps:$4 sm:$0xff]  }
  0xd7   :  { %2299 = vmatpush1.bf16.msra.mxu0 %v3205_v48  ;;  %v3306_v48 = vld [vmem:[%s4452_s1 + $0x804] ss:$8 sps:$4 sm:$0xff]  }
  0xd8   :  { %2352 = vmatpush1.bf16.msra.mxu1 %v3208_v49  ;;  %2300 = vmatprep.subr.bf16.mxu0 %v3213_v50  ;;  %v3304_v49 = vld [vmem:[%s4452_s1 + $0x800] ss:$8 sps:$4 sm:$0xff]   ;;  %v3309_v50 = vld [vmem:[%s4452_s1 + $0x8f4] ss:$8 sps:$4 sm:$0xff]  }
  0xd9   :  { %2353 = vmatprep.subr.bf16.mxu1 %v3216_v51  ;;  %v3307_v51 = vld [vmem:[%s4452_s1 + $0x8f0] ss:$8 sps:$4 sm:$0xff]  }
  0xdb   :  { %2301 = vmatpush1.bf16.msra.mxu0 %v3211_v52  ;;  %v3312_v52 = vld [vmem:[%s4452_s1 + $0x8e4] ss:$8 sps:$4 sm:$0xff]  }
  0xdc   :  { %2354 = vmatpush1.bf16.msra.mxu1 %v3214_v53  ;;  %2302 = vmatprep.subr.bf16.mxu0 %v3219_v54  ;;  %v3310_v53 = vld [vmem:[%s4452_s1 + $0x8e0] ss:$8 sps:$4 sm:$0xff]   ;;  %v3315_v54 = vld [vmem:[%s4452_s1 + $0x8d4] ss:$8 sps:$4 sm:$0xff]  }
  0xdd   :  { %2355 = vmatprep.subr.bf16.mxu1 %v3222_v55  ;;  %v3313_v55 = vld [vmem:[%s4452_s1 + $0x8d0] ss:$8 sps:$4 sm:$0xff]  }
  0xdf   :  { %2303 = vmatpush1.bf16.msra.mxu0 %v3217_v56  ;;  %v3318_v56 = vld [vmem:[%s4452_s1 + $0x8c4] ss:$8 sps:$4 sm:$0xff]  }
  0xe0   :  { %2356 = vmatpush1.bf16.msra.mxu1 %v3220_v57  ;;  %2304 = vmatprep.subr.bf16.mxu0 %v3225_v58  ;;  %v3316_v57 = vld [vmem:[%s4452_s1 + $0x8c0] ss:$8 sps:$4 sm:$0xff]   ;;  %v3321_v58 = vld [vmem:[%s4452_s1 + $0x8b4] ss:$8 sps:$4 sm:$0xff]  }
  0xe1   :  { %2357 = vmatprep.subr.bf16.mxu1 %v3228_v59  ;;  %v3319_v59 = vld [vmem:[%s4452_s1 + $0x8b0] ss:$8 sps:$4 sm:$0xff]  }
  0xe3   :  { %2305 = vmatpush2.bf16.msra.mxu0 %v3223_v60  ;;  %v3324_v60 = vld [vmem:[%s4452_s1 + $0x8a4] ss:$8 sps:$4 sm:$0xff]  }
  0xe4   :  { %2358 = vmatpush2.bf16.msra.mxu1 %v3226_v61  ;;  %2306 = vmatprep.subr.bf16.mxu0 %v3231_v62  ;;  %v3322_v61 = vld [vmem:[%s4452_s1 + $0x8a0] ss:$8 sps:$4 sm:$0xff]   ;;  %v3327_v62 = vld [vmem:[%s4452_s1 + $0x894] ss:$8 sps:$4 sm:$0xff]  }
  0xe5   :  { %2359 = vmatprep.subr.bf16.mxu1 %v3234_v63  ;;  %v3325_v63 = vld [vmem:[%s4452_s1 + $0x890] ss:$8 sps:$4 sm:$0xff]  }
  0xe7   :  { %2307 = vmatpush2.bf16.msra.mxu0 %v3229_v0  ;;  %v3330_v0 = vld [vmem:[%s4452_s1 + $0x884] ss:$8 sps:$4 sm:$0xff]  }
  0xe8   :  { %2360 = vmatpush2.bf16.msra.mxu1 %v3232_v1  ;;  %2308 = vmatprep.subr.bf16.mxu0 %v3237_v2  ;;  %v3328_v1 = vld [vmem:[%s4452_s1 + $0x880] ss:$8 sps:$4 sm:$0xff]  }
  0xe9   :  { %2361 = vmatprep.subr.bf16.mxu1 %v3240_v3  ;;  %v3331_v2 = vld [vmem:[%s4453_s0 + $0x40] ss:$72 sps:$4 sm:$0xff]   ;;  %v3334_v3 = vld [vmem:[%s4453_s0 + $0xd0] ss:$72 sps:$4 sm:$0xff]  }
  0xeb   :  { %2309 = vmatpush2.bf16.msra.mxu0 %v3235_v4 }
  0xec   :  { %2362 = vmatpush2.bf16.msra.mxu1 %v3238_v5  ;;  %2310 = vmatprep.subr.bf16.mxu0 %v3243_v6 }
  0xed   :  { %2363 = vmatprep.subr.bf16.mxu1 %v3246_v7 }
  0xef   :  { %2311 = vmatpush2.bf16.msra.mxu0 %v3241_v8 }
  0xf0   :  { %2364 = vmatpush2.bf16.msra.mxu1 %v3244_v9  ;;  %2312 = vmatprep.subr.bf16.mxu0 %v3249_v10 }
  0xf1   :  { %2365 = vmatprep.subr.bf16.mxu1 %v3252_v11 }
  0xf3   :  { %2313 = vmatpush2.bf16.msra.mxu0 %v3247_v12 }
  0xf4   :  { %2366 = vmatpush2.bf16.msra.mxu1 %v3250_v13  ;;  %2314 = vmatprep.subr.bf16.mxu0 %v3255_v14 }
  0xf5   :  { %2367 = vmatprep.subr.bf16.mxu1 %v3258_v15 }
  0xf7   :  { %2315 = vmatpush2.bf16.msra.mxu0 %v3253_v16 }
  0xf8   :  { %2368 = vmatpush2.bf16.msra.mxu1 %v3256_v17  ;;  %2316 = vmatprep.subr.bf16.mxu0 %v3261_v18 }
  0xf9   :  { %2369 = vmatprep.subr.bf16.mxu1 %v3264_v19 }
  0xfb   :  { %2317 = vmatpush2.bf16.msra.mxu0 %v3259_v20 }
  0xfc   :  { %2370 = vmatpush2.bf16.msra.mxu1 %v3262_v21  ;;  %2318 = vmatprep.subr.bf16.mxu0 %v3267_v22 }
  0xfd   :  { %2371 = vmatprep.subr.bf16.mxu1 %v3270_v23 }
  0xff   :  { %2319 = vmatpush2.bf16.msra.mxu0 %v3265_v24 }
 0x100   :  { %2372 = vmatpush2.bf16.msra.mxu1 %v3268_v25  ;;  %2394 = vmatprep.subr.bf16.mxu0 %v3279_v26 }
 0x101   :  { %2819 = vmatprep.subr.bf16.mxu1 %v3279_v26 }
 0x102   :  { %2321 = vmatmul.mubr.bf16.vlgmr.msra.gmra.mxu0 %v3271_v27  ;;  %v2004_v4 = vpop.f32.mrf.mxu0 }
 0x103   :  { %2374 = vmatmul.mubr.bf16.vlgmr.msra.gmra.mxu1 %v3274_v28  ;;  %2395 = vmatpush1.bf16.msra.mxu0 %v3277_v29  ;;  %v4329_v6 = vpop.f32.mrf.mxu1 }
 0x104   :  { %2835 = vmatpush1.bf16.msra.mxu1 %v3277_v29  ;;  %2396 = vmatprep.subr.bf16.mxu0 %v3282_v30  ;;  %v2006_v5 = vpop.f32.mrf.mxu0 }
 0x105   :  { %2820 = vmatprep.subr.bf16.mxu1 %v3282_v30  ;;  %2330 = vmatprep.mubr.bf16.mxu0 %v3283_v31  ;;  %v4333_v8 = vpop.f32.mrf.mxu1 }
 0x106   :  { %2383 = vmatprep.mubr.bf16.mxu1 %v3289_v32  ;;  %v4331_v7 = vpop.f32.mrf.mxu0 }
 0x107   :  { %2397 = vmatpush1.bf16.msra.mxu0 %v3280_v33  ;;  %v4337_v10 = vpop.f32.mrf.mxu1 }
 0x108   :  { %2836 = vmatpush1.bf16.msra.mxu1 %v3280_v33  ;;  %2398 = vmatprep.subr.bf16.mxu0 %v3288_v34  ;;  %v4335_v9 = vpop.f32.mrf.mxu0 }
 0x109   :  { %2821 = vmatprep.subr.bf16.mxu1 %v3288_v34  ;;  %v4339_v12 = vpop.f32.mrf.mxu1 }
 0x10a   :  { %2331 = vmatmul.mubr.bf16.gmra.mxu0 %v3285_v35  ;;  %v2014_v11 = vpop.f32.mrf.mxu0 }
 0x10b   :  { %2384 = vmatmul.mubr.bf16.gmra.mxu1 %v3291_v36  ;;  %2399 = vmatpush1.bf16.msra.mxu0 %v3286_v37  ;;  %v2067_v14 = vpop.f32.mrf.mxu1 }
 0x10c   :  { %2837 = vmatpush1.bf16.msra.mxu1 %v3286_v37  ;;  %2400 = vmatprep.subr.bf16.mxu0 %v3294_v38  ;;  %v2016_v13 = vpop.f32.mrf.mxu0 }
 0x10d   :  { %2822 = vmatprep.subr.bf16.mxu1 %v3294_v38  ;;  %2426 = vmatprep.mubr.bf16.mxu0 %v3333_v39  ;;  %v2069_v16 = vpop.f32.mrf.mxu1 }
 0x10e   :  { %2436 = vmatprep.mubr.bf16.mxu1 %v3336_v40  ;;  %v2018_v15 = vpop.f32.mrf.mxu0 }
 0x10f   :  { %2401 = vmatpush1.bf16.msra.mxu0 %v3292_v41  ;;  %v4343_v18 = vpop.f32.mrf.mxu1 }
 0x110   :  { %2838 = vmatpush1.bf16.msra.mxu1 %v3292_v41  ;;  %2402 = vmatprep.subr.bf16.mxu0 %v3297_v42  ;;  %v4341_v17 = vpop.f32.mrf.mxu0 }
 0x111   :  { %2823 = vmatprep.subr.bf16.mxu1 %v3297_v42  ;;  %v4345_v20 = vpop.f32.mrf.mxu1 }
 0x113   :  { %2403 = vmatpush1.bf16.msra.mxu0 %v3295_v43 }
 0x114   :  { %2839 = vmatpush1.bf16.msra.mxu1 %v3295_v43  ;;  %2404 = vmatprep.subr.bf16.mxu0 %v3300_v44 }
 0x115   :  { %2824 = vmatprep.subr.bf16.mxu1 %v3300_v44 }
 0x117   :  { %2405 = vmatpush1.bf16.msra.mxu0 %v3298_v45 }
 0x118   :  { %2840 = vmatpush1.bf16.msra.mxu1 %v3298_v45  ;;  %2406 = vmatprep.subr.bf16.mxu0 %v3303_v46 }
 0x119   :  { %2825 = vmatprep.subr.bf16.mxu1 %v3303_v46 }
 0x11b   :  { %2407 = vmatpush1.bf16.msra.mxu0 %v3301_v47 }
 0x11c   :  { %2841 = vmatpush1.bf16.msra.mxu1 %v3301_v47  ;;  %2408 = vmatprep.subr.bf16.mxu0 %v3306_v48  ;;  %v340_v47 = vlaneseq }
 0x11d   :  { %2826 = vmatprep.subr.bf16.mxu1 %v3306_v48 }
 0x11f   :  { %2409 = vmatpush1.bf16.msra.mxu0 %v3304_v49 }
 0x120   :  { %2842 = vmatpush1.bf16.msra.mxu1 %v3304_v49  ;;  %2410 = vmatprep.subr.bf16.mxu0 %v3309_v50 }
 0x121   :  { %2827 = vmatprep.subr.bf16.mxu1 %v3309_v50  ;;  %v341_v50 = vshrl.u32 %v340_v47, 7 }
 0x123   :  { %2411 = vmatpush2.bf16.msra.mxu0 %v3307_v51 }
 0x124   :  { %2843 = vmatpush2.bf16.msra.mxu1 %v3307_v51  ;;  %2412 = vmatprep.subr.bf16.mxu0 %v3312_v52 }
 0x125   :  { %2828 = vmatprep.subr.bf16.mxu1 %v3312_v52 }
 0x127   :  { %2413 = vmatpush2.bf16.msra.mxu0 %v3310_v53 }
 0x128   :  { %2844 = vmatpush2.bf16.msra.mxu1 %v3310_v53  ;;  %2414 = vmatprep.subr.bf16.mxu0 %v3315_v54  ;;  %v342_v53 = vsub.s32 0, %v341_v50 }
 0x129   :  { %2829 = vmatprep.subr.bf16.mxu1 %v3315_v54  ;;  %v338_v54 = vld [vmem:[%s4454_s2] sm:$0x3] }
 0x12b   :  { %2415 = vmatpush2.bf16.msra.mxu0 %v3313_v55 }
 0x12c   :  { %2845 = vmatpush2.bf16.msra.mxu1 %v3313_v55  ;;  %2416 = vmatprep.subr.bf16.mxu0 %v3318_v56 }
 0x12d   :  { %2830 = vmatprep.subr.bf16.mxu1 %v3318_v56 }
 0x12f   :  { %2417 = vmatpush2.bf16.msra.mxu0 %v3316_v57 }
 0x130   :  { %2846 = vmatpush2.bf16.msra.mxu1 %v3316_v57  ;;  %2418 = vmatprep.subr.bf16.mxu0 %v3321_v58  ;;  %v346_v57 = vsub.s32 1, %v341_v50 }
 0x131   :  { %2831 = vmatprep.subr.bf16.mxu1 %v3321_v58 }
 0x133   :  { %2419 = vmatpush2.bf16.msra.mxu0 %v3319_v59 }
 0x134   :  { %2847 = vmatpush2.bf16.msra.mxu1 %v3319_v59  ;;  %2420 = vmatprep.subr.bf16.mxu0 %v3324_v60  ;;  %v343_v59 = vrot.slane %v338_v54, %v342_v53 }
 0x135   :  { %2832 = vmatprep.subr.bf16.mxu1 %v3324_v60 }
 0x136   :  { %v2009_v50 = vadd.f32 %v4331_v7, %v343_v59 }
 0x137   :  { %2421 = vmatpush2.bf16.msra.mxu0 %v3322_v61 }
 0x138   :  { %2848 = vmatpush2.bf16.msra.mxu1 %v3322_v61  ;;  %2422 = vmatprep.subr.bf16.mxu0 %v3327_v62  ;;  %v347_v61 = vrot.slane %v338_v54, %v346_v57 }
 0x139   :  { %2833 = vmatprep.subr.bf16.mxu1 %v3327_v62 }
 0x13b   :  { %2423 = vmatpush2.bf16.msra.mxu0 %v3325_v63 }
 0x13c   :  { %2849 = vmatpush2.bf16.msra.mxu1 %v3325_v63  ;;  %2424 = vmatprep.subr.bf16.mxu0 %v3330_v0  ;;  %v2005_v63 = vadd.f32 %v2004_v4, %v343_v59 }
 0x13d   :  { %2834 = vmatprep.subr.bf16.mxu1 %v3330_v0  ;;  %v2015_v0 = vadd.f32 %v2014_v11, %v343_v59  ;;  %v2011_v11 = vadd.f32 %v4335_v9, %v347_v61 }
 0x13f   :  { %2425 = vmatpush2.bf16.msra.mxu0 %v3328_v1 }
 0x140   :  { %2850 = vmatpush2.bf16.msra.mxu1 %v3328_v1 }
 0x142   :  { %2427 = vmatmul.mubr.bf16.vlgmr.msra.gmra.mxu0 %v3331_v2  ;;  %v2110_v19 = vpop.f32.mrf.mxu0  ;;  %v2007_v2 = vadd.f32 %v2006_v5, %v347_v61  ;;  %v2021_v5 = vadd.f32 %v4341_v17, %v347_v61 }
 0x143   :  { %2437 = vmatmul.mubr.bf16.vlgmr.msra.gmra.mxu1 %v3334_v3  ;;  %v4347_v22 = vpop.f32.mrf.mxu1  ;;  %v2017_v3 = vadd.f32 %v2016_v13, %v347_v61 }
 0x144   :  { %v2112_v21 = vpop.f32.mrf.mxu0  ;;  %v2060_v53 = vadd.f32 %v4333_v8, %v2007_v2 }
 0x145   :  { %v4351_v24 = vpop.f32.mrf.mxu1  ;;  %v2070_v54 = vadd.f32 %v2069_v16, %v2017_v3  ;;  %v2064_v16 = vadd.f32 %v4339_v12, %v2011_v11 }
 0x146   :  { %v4349_v23 = vpop.f32.mrf.mxu0 }
 0x147   :  { %v4355_v26 = vpop.f32.mrf.mxu1 }
 0x148   :  { %v4353_v25 = vpop.f32.mrf.mxu0 }
 0x149   :  { %v4357_v28 = vpop.f32.mrf.mxu1 }
 0x14a   :  { %v2120_v27 = vpop.f32.mrf.mxu0 }
 0x14b   :  { %v2173_v30 = vpop.f32.mrf.mxu1 }
 0x14c   :  { %v2122_v29 = vpop.f32.mrf.mxu0 }
 0x14d   :  { %v4359_v32 = vpop.f32.mrf.mxu1 }
 0x14e   :  { %v2124_v31 = vpop.f32.mrf.mxu0 }
 0x14f   :  { %v4363_v34 = vpop.f32.mrf.mxu1 }
 0x150   :  { %v4361_v33 = vpop.f32.mrf.mxu0 }
 0x151   :  { %v4365_v36 = vpop.f32.mrf.mxu1 }
 0x182   :  { %v2216_v35 = vpop.f32.mrf.mxu0 }
 0x183   :  { %v4367_v37 = vpop.f32.mrf.mxu1 }
 0x184   :  { %v4369_v38 = vpop.f32.mrf.mxu0 }
 0x185   :  { %v4371_v39 = vpop.f32.mrf.mxu1 }
 0x186   :  { %v4373_v40 = vpop.f32.mrf.mxu0 }
 0x187   :  { %v4375_v41 = vpop.f32.mrf.mxu1 }
 0x188   :  { %v4377_v42 = vpop.f32.mrf.mxu0 }
 0x189   :  { %v4379_v43 = vpop.f32.mrf.mxu1 }
 0x18a   :  { %4456 = vst [vmem:[#allocation2_spill] sm:$0xff] %v4379_v43  ;;  %v2226_v44 = vpop.f32.mrf.mxu0  ;;  %v2058_v43 = vadd.f32 %v4329_v6, %v2005_v63  ;;  %v2062_v6 = vadd.f32 %v4337_v10, %v2009_v50 }
 0x18b   :  { %v2279_v45 = vpop.f32.mrf.mxu1 }
 0x18c   :  { %v2228_v46 = vpop.f32.mrf.mxu0  ;;  %v2111_v57 = vadd.f32 %v2110_v19, %v2058_v43  ;;  %v2074_v19 = vadd.f32 %v4345_v20, %v2021_v5  ;;  %v2115_v9 = vadd.f32 %v4349_v23, %v2062_v6 }
 0x18d   :  { %v4381_v48 = vpop.f32.mrf.mxu1 }
 0x18e   :  { %v2230_v49 = vpop.f32.mrf.mxu0  ;;  %v2127_v43 = vadd.f32 %v4361_v33, %v2074_v19  ;;  %v2168_v20 = vadd.f32 %v4355_v26, %v2115_v9 }
 0x18f   :  { %v4383_v51 = vpop.f32.mrf.mxu1 }
 0x190   :  { %4457 = vst [vmem:[#allocation3_spill] sm:$0xff] %v4383_v51  ;;  %v4385_v52 = vpop.f32.mrf.mxu0  ;;  %v2019_v51 = vadd.f32 %v2018_v15, %v343_v59  ;;  %v2164_v59 = vadd.f32 %v4347_v22, %v2111_v57 }
 0x191   :  { %v4390_v55 = vpop.f32.mrf.mxu1 }
 0x192   :  { %4458 = vst [vmem:[#allocation4_spill] sm:$0xff] %v4390_v55  ;;  %v2068_v55 = vadd.f32 %v2067_v14, %v2015_v0  ;;  %v2072_v7 = vadd.f32 %v4343_v18, %v2019_v51  ;;  %v2117_v18 = vadd.f32 %v4353_v25, %v2064_v16  ;;  %v2221_v25 = vadd.f32 %v4373_v40, %v2168_v20 }
 0x194   :  { %v2121_v4 = vadd.f32 %v2120_v27, %v2068_v55  ;;  %v2125_v17 = vadd.f32 %v2124_v31, %v2072_v7 }
 0x196   :  { %v2174_v8 = vadd.f32 %v2173_v30, %v2121_v4  ;;  %v2178_v23 = vadd.f32 %v4363_v34, %v2125_v17 }
 0x198   :  { %v2227_v10 = vadd.f32 %v2226_v44, %v2174_v8  ;;  %v2231_v44 = vadd.f32 %v2230_v49, %v2178_v23 }
 0x1c2   :  { %v2322_v56 = vpop.f32.mrf.mxu0 }
 0x1c3   :  { %v4392_v58 = vpop.f32.mrf.mxu1 }
 0x1c4   :  { %4459 = vst [vmem:[#allocation5_spill] sm:$0xff] %v4392_v58  ;;  %v2324_v60 = vpop.f32.mrf.mxu0 }
 0x1c5   :  { %v4394_v62 = vpop.f32.mrf.mxu1 }
 0x1c6   :  { %4460 = vst [vmem:[#allocation6_spill] sm:$0xff] %v4394_v62  ;;  %v4396_v1 = vpop.f32.mrf.mxu0  ;;  %v2123_v62 = vadd.f32 %v2122_v29, %v2070_v54  ;;  %v2217_v29 = vadd.f32 %v2216_v35, %v2164_v59  ;;  %v2180_v35 = vadd.f32 %v4365_v36, %v2127_v43  ;;  %v4462_v36 = vld [vmem:[#allocation3_spill] sm:$0xff] }
 0x1c7   :  { %v4398_v47 = vpop.f32.mrf.mxu1  ;;  %v2284_v63 = vadd.f32 %v4462_v36, %v2231_v44 }
 0x1c8   :  { %4461 = vst [vmem:[#allocation7_spill] sm:$0xff] %v4398_v47  ;;  %v4402_v58 = vpop.f32.mrf.mxu0  ;;  %v2113_v47 = vadd.f32 %v2112_v21, %v2060_v53  ;;  %v2176_v21 = vadd.f32 %v4359_v32, %v2123_v62  ;;  %v2270_v31 = vadd.f32 %v4367_v37, %v2217_v29  ;;  %v2170_v32 = vadd.f32 %v4357_v28, %v2117_v18 }
 0x1c9   :  { %v4407_v13 = vpop.f32.mrf.mxu1  ;;  %v2233_v37 = vadd.f32 %v4385_v52, %v2180_v35  ;;  %v2274_v28 = vadd.f32 %v4375_v41, %v2221_v25 }
 0x1ca   :  { %v2332_v14 = vpop.f32.mrf.mxu0  ;;  %v2166_v27 = vadd.f32 %v4351_v24, %v2113_v47  ;;  %v2229_v12 = vadd.f32 %v2228_v46, %v2176_v21  ;;  %v2280_v24 = vadd.f32 %v2279_v45, %v2227_v10  ;;  %v2323_v46 = vadd.f32 %v2322_v56, %v2270_v31 }
 0x1cb   :  { %v2385_v15 = vpop.f32.mrf.mxu1  ;;  %v2223_v34 = vadd.f32 %v4377_v42, %v2170_v32  ;;  %v4463_v0 = vld [vmem:[#allocation5_spill] sm:$0xff]  ;;  %v2327_v50 = vadd.f32 %v4396_v1, %v2274_v28 }
 0x1cc   :  { %v2334_v51 = vpop.f32.mrf.mxu0  ;;  %v2219_v30 = vadd.f32 %v4369_v38, %v2166_v27  ;;  %v2282_v38 = vadd.f32 %v4381_v48, %v2229_v12  ;;  %v2333_v26 = vadd.f32 %v2332_v14, %v2280_v24  ;;  %v2376_v2 = vadd.f32 %v4463_v0, %v2323_v46  ;;  %v4465_v48 = vld [vmem:[#allocation4_spill] sm:$0xff] }
 0x1cd   :  { %v2387_v22 = vpop.f32.mrf.mxu1  ;;  %v2286_v56 = vadd.f32 %v4465_v48, %v2233_v37 }
 0x1ce   :  { %v2336_v33 = vpop.f32.mrf.mxu0  ;;  %v2272_v61 = vadd.f32 %v4371_v39, %v2219_v30  ;;  %v2335_v62 = vadd.f32 %v2334_v51, %v2282_v38  ;;  %v2386_v3 = vadd.f32 %v2385_v15, %v2333_v26  ;;  %v4464_v39 = vld [vmem:[#allocation2_spill] sm:$0xff] }
 0x1cf   :  { %v2389_v55 = vpop.f32.mrf.mxu1  ;;  %v2276_v47 = vadd.f32 %v4464_v39, %v2223_v34  ;;  %v2337_v42 = vadd.f32 %v2336_v33, %v2284_v63  ;;  %v4467_v59 = vld [vmem:[#allocation7_spill] sm:$0xff] }
 0x1d0   :  { %v2325_v45 = vadd.f32 %v2324_v60, %v2272_v61  ;;  %v2338_v40 = vpop.f32.mrf.mxu0  ;;  %v4466_v60 = vld [vmem:[#allocation6_spill] sm:$0xff]  ;;  %v2388_v57 = vadd.f32 %v2387_v22, %v2335_v62  ;;  %v2380_v8 = vadd.f32 %v4467_v59, %v2327_v50 }
 0x1d1   :  { %v2391_v49 = vpop.f32.mrf.mxu1  ;;  %v2329_v11 = vadd.f32 %v4402_v58, %v2276_v47  ;;  %v2339_v5 = vadd.f32 %v2338_v40, %v2286_v56  ;;  %v2390_v16 = vadd.f32 %v2389_v55, %v2337_v42 }
 0x1d2   :  { %v2378_v54 = vadd.f32 %v4466_v60, %v2325_v45 }
 0x1d3   :  { %v2382_v29 = vadd.f32 %v4407_v13, %v2329_v11  ;;  %v2392_v10 = vadd.f32 %v2391_v49, %v2339_v5 }
 0x202   :  { %v2428_v53 = vpop.f32.mrf.mxu0 }
 0x203   :  { %v2438_v52 = vpop.f32.mrf.mxu1  ;;  %v2429_v41 = vadd.f32 %v2428_v53, %v2376_v2 }
 0x204   :  { %v2439_v4 = vadd.f32 %v2438_v52, %v2386_v3  ;;  %v2430_v6 = vpop.f32.mrf.mxu0 }
 0x205   :  { %v2440_v7 = vpop.f32.mrf.mxu1  ;;  %v2431_v14 = vadd.f32 %v2430_v6, %v2378_v54  ;;  %v2447_v9 = vmax.f32 %v2429_v41, 0.0 }
 0x206   :  { %v2441_v15 = vadd.f32 %v2440_v7, %v2388_v57  ;;  %v2432_v19 = vpop.f32.mrf.mxu0  ;;  %v2451_v17 = vmax.f32 %v2439_v4, 0.0 }
 0x207   :  { %v2442_v1 = vpop.f32.mrf.mxu1  ;;  %v2448_v27 = vmax.f32 %v2431_v14, 0.0  ;;  %v2433_v18 = vadd.f32 %v2432_v19, %v2380_v8 }
 0x208   :  { %v2452_v21 = vmax.f32 %v2441_v15, 0.0  ;;  %v2443_v43 = vadd.f32 %v2442_v1, %v2390_v16  ;;  %v2434_v58 = vpop.f32.mrf.mxu0 }
 0x209   :  { %v2444_v51 = vpop.f32.mrf.mxu1  ;;  %v2815_v22 = vpack.c.bf16 %v2448_v27, %v2447_v9  ;;  %v2435_v12 = vadd.f32 %v2434_v58, %v2382_v29  ;;  %v2449_v23 = vmax.f32 %v2433_v18, 0.0 }
 0x20a   :  { %v2817_v30 = vpack.c.bf16 %v2452_v21, %v2451_v17  ;;  %v2445_v20 = vadd.f32 %v2444_v51, %v2392_v10  ;;  %v2453_v31 = vmax.f32 %v2443_v43, 0.0 }
 0x20b   :  { %2479 = vst [vmem:[%s4455_s3] sm:$0xff] %v2815_v22  ;;  %v2450_v13 = vmax.f32 %v2435_v12, 0.0 }
 0x20c   :  { %2481 = vst [vmem:[%s4455_s3 + $0x10] sm:$0xff] %v2817_v30  ;;  %v2454_v24 = vmax.f32 %v2445_v20, 0.0 }
 0x20d   :  { %v2816_v32 = vpack.c.bf16 %v2450_v13, %v2449_v23 }
 0x20e   :  { %v2818_v35 = vpack.c.bf16 %v2454_v24, %v2453_v31 }
 0x20f   :  { %2480 = vst [vmem:[%s4455_s3 + $0x8] sm:$0xff] %v2816_v32 }
 0x210   :  { %2482 = vst [vmem:[%s4455_s3 + $0x18] sm:$0xff] %v2818_v35 }

// kernel: dann_forward.11
= control target key start
LH: loop header
LB: loop body
LE: loop exit
PB: predicated region body
PF: predicated region fallthrough
CT: control target
= control target key end

     0   :  { %v806_v1 = vmov 0   ;;  %v47_v63 = vlaneseq  ;;  %s1054_s1 = inlined_call_operand.vmem [shape: bf16[128,256], index: 1, kind: input, shape index: {}]   ;;  %s1055_s3 = inlined_call_operand.vmem [shape: bf16[256,256], index: 3, kind: input, shape index: {}]   ;;  %s1056_s0 = inlined_call_operand.vmem [shape: f32[8,128], index: 0, kind: input, shape index: {}]   ;;  %s1057_s5 = inlined_call_operand.vmem [shape: bf16[256,128], index: 5, kind: input, shape index: {}]   ;;  %s1058_s2 = inlined_call_operand.vmem [shape: f32[1,256], index: 2, kind: input, shape index: {}]   ;;  %s1059_s4 = inlined_call_operand.vmem [shape: f32[1,256], index: 4, kind: input, shape index: {}]   ;;  %s1060_s6 = inlined_call_operand.vmem [shape: f32[1,128], index: 6, kind: input, shape index: {}]   ;;  %s1061_s7 = inlined_call_operand.vmem [shape: f32[8,128], index: 7, kind: output, shape index: {}]  }
   0x1   :  { %v714_v0 = vld [vmem:[%s1054_s1 + $0x74] ss:$8 sps:$4 sm:$0xff]   ;;  %169 = vmatprep.mubr.bf16.mxu0 %v806_v1  ;;  %v716_v2 = vld [vmem:[%s1054_s1 + $0x70] ss:$8 sps:$4 sm:$0xff]   ;;  %v717_v3 = vld [vmem:[%s1054_s1 + $0x64] ss:$8 sps:$4 sm:$0xff]  }
   0x2   :  { %137 = vmatprep.subr.bf16.mxu0 %v714_v0  ;;  %v719_v4 = vld [vmem:[%s1054_s1 + $0x60] ss:$8 sps:$4 sm:$0xff]   ;;  %v720_v5 = vld [vmem:[%s1054_s1 + $0x54] ss:$8 sps:$4 sm:$0xff]   ;;  %v722_v6 = vld [vmem:[%s1054_s1 + $0x50] ss:$8 sps:$4 sm:$0xff]  }
   0x3   :  { %138 = vmatpush1.bf16.msra.mxu0 %v716_v2  ;;  %v723_v7 = vld [vmem:[%s1054_s1 + $0x44] ss:$8 sps:$4 sm:$0xff]   ;;  %v725_v8 = vld [vmem:[%s1054_s1 + $0x40] ss:$8 sps:$4 sm:$0xff]   ;;  %v726_v9 = vld [vmem:[%s1054_s1 + $0x34] ss:$8 sps:$4 sm:$0xff]  }
   0x4   :  { %139 = vmatprep.subr.bf16.mxu0 %v717_v3  ;;  %v738_v10 = vld [vmem:[%s1055_s3 + $0x74] ss:$8 sps:$4 sm:$0xff]   ;;  %v740_v11 = vld [vmem:[%s1055_s3 + $0x70] ss:$8 sps:$4 sm:$0xff]   ;;  %v741_v12 = vld [vmem:[%s1055_s3 + $0x64] ss:$8 sps:$4 sm:$0xff]  }
   0x5   :  { %386 = vmatprep.subr.bf16.mxu1 %v738_v10  ;;  %v728_v13 = vld [vmem:[%s1054_s1 + $0x30] ss:$8 sps:$4 sm:$0xff]   ;;  %v743_v14 = vld [vmem:[%s1055_s3 + $0x60] ss:$8 sps:$4 sm:$0xff]   ;;  %v744_v15 = vld [vmem:[%s1055_s3 + $0x54] ss:$8 sps:$4 sm:$0xff]  }
   0x6   :  { %387 = vmatpush1.bf16.msra.mxu1 %v740_v11  ;;  %v729_v16 = vld [vmem:[%s1054_s1 + $0x24] ss:$8 sps:$4 sm:$0xff]   ;;  %v731_v17 = vld [vmem:[%s1054_s1 + $0x20] ss:$8 sps:$4 sm:$0xff]   ;;  %v746_v18 = vld [vmem:[%s1055_s3 + $0x50] ss:$8 sps:$4 sm:$0xff]  }
   0x7   :  { %140 = vmatpush1.bf16.msra.mxu0 %v719_v4  ;;  %388 = vmatprep.subr.bf16.mxu1 %v741_v12  ;;  %v747_v19 = vld [vmem:[%s1055_s3 + $0x44] ss:$8 sps:$4 sm:$0xff]   ;;  %v732_v20 = vld [vmem:[%s1054_s1 + $0x14] ss:$8 sps:$4 sm:$0xff]   ;;  %v734_v21 = vld [vmem:[%s1054_s1 + $0x10] ss:$8 sps:$4 sm:$0xff]  }
   0x8   :  { %141 = vmatprep.subr.bf16.mxu0 %v720_v5  ;;  %v749_v22 = vld [vmem:[%s1055_s3 + $0x40] ss:$8 sps:$4 sm:$0xff]   ;;  %v750_v23 = vld [vmem:[%s1055_s3 + $0x34] ss:$8 sps:$4 sm:$0xff]   ;;  %v735_v24 = vld [vmem:[%s1054_s1 + $0x4] ss:$8 sps:$4 sm:$0xff]  }
   0x9   :  { %v737_v25 = vld [vmem:[%s1054_s1] ss:$8 sps:$4 sm:$0xff]   ;;  %v752_v27 = vld [vmem:[%s1055_s3 + $0x30] ss:$8 sps:$4 sm:$0xff]   ;;  %v753_v28 = vld [vmem:[%s1055_s3 + $0x24] ss:$8 sps:$4 sm:$0xff]  }
   0xa   :  { %389 = vmatpush1.bf16.msra.mxu1 %v743_v14  ;;  %v27_v26 = vld [vmem:[%s1056_s0] sm:$0xff]  ;;  %v756_v31 = vld [vmem:[%s1055_s3 + $0x14] ss:$8 sps:$4 sm:$0xff]   ;;  %v758_v32 = vld [vmem:[%s1055_s3 + $0x10] ss:$8 sps:$4 sm:$0xff]   ;;  %v48_v0 = vshrl.u32 %v47_v63, 7 }
   0xb   :  { %142 = vmatpush1.bf16.msra.mxu0 %v722_v6  ;;  %390 = vmatprep.subr.bf16.mxu1 %v744_v15  ;;  %v755_v29 = vld [vmem:[%s1055_s3 + $0x20] ss:$8 sps:$4 sm:$0xff]   ;;  %v28_v30 = vpack.c.bf16 %v27_v26, %v27_v26  ;;  %v759_v33 = vld [vmem:[%s1055_s3 + $0x4] ss:$8 sps:$4 sm:$0xff]   ;;  %v762_v35 = vld [vmem:[%s1055_s3 + $0xf4] ss:$8 sps:$4 sm:$0xff]  }
   0xc   :  { %143 = vmatprep.subr.bf16.mxu0 %v723_v7  ;;  %v761_v34 = vld [vmem:[%s1055_s3] ss:$8 sps:$4 sm:$0xff]   ;;  %v764_v36 = vld [vmem:[%s1055_s3 + $0xf0] ss:$8 sps:$4 sm:$0xff]   ;;  %v765_v37 = vld [vmem:[%s1055_s3 + $0xe4] ss:$8 sps:$4 sm:$0xff]  }
   0xd   :  { %v767_v38 = vld [vmem:[%s1055_s3 + $0xe0] ss:$8 sps:$4 sm:$0xff]   ;;  %v768_v39 = vld [vmem:[%s1055_s3 + $0xd4] ss:$8 sps:$4 sm:$0xff]   ;;  %v770_v40 = vld [vmem:[%s1055_s3 + $0xd0] ss:$8 sps:$4 sm:$0xff]  }
   0xe   :  { %391 = vmatpush1.bf16.msra.mxu1 %v746_v18  ;;  %v771_v41 = vld [vmem:[%s1055_s3 + $0xc4] ss:$8 sps:$4 sm:$0xff]   ;;  %v773_v42 = vld [vmem:[%s1055_s3 + $0xc0] ss:$8 sps:$4 sm:$0xff]   ;;  %v774_v43 = vld [vmem:[%s1055_s3 + $0xb4] ss:$8 sps:$4 sm:$0xff]  }
   0xf   :  { %144 = vmatpush1.bf16.msra.mxu0 %v725_v8  ;;  %392 = vmatprep.subr.bf16.mxu1 %v747_v19  ;;  %v776_v44 = vld [vmem:[%s1055_s3 + $0xb0] ss:$8 sps:$4 sm:$0xff]   ;;  %v777_v45 = vld [vmem:[%s1055_s3 + $0xa4] ss:$8 sps:$4 sm:$0xff]   ;;  %v779_v46 = vld [vmem:[%s1055_s3 + $0xa0] ss:$8 sps:$4 sm:$0xff]  }
  0x10   :  { %145 = vmatprep.subr.bf16.mxu0 %v726_v9  ;;  %v780_v47 = vld [vmem:[%s1055_s3 + $0x94] ss:$8 sps:$4 sm:$0xff]   ;;  %v782_v48 = vld [vmem:[%s1055_s3 + $0x90] ss:$8 sps:$4 sm:$0xff]   ;;  %v783_v49 = vld [vmem:[%s1055_s3 + $0x84] ss:$8 sps:$4 sm:$0xff]  }
  0x11   :  { %v785_v50 = vld [vmem:[%s1055_s3 + $0x80] ss:$8 sps:$4 sm:$0xff]   ;;  %v786_v51 = vld [vmem:[%s1057_s5 + $0x78] sm:$0xff]   ;;  %v788_v53 = vld [vmem:[%s1057_s5 + $0x70] sm:$0xff]   ;;  %v49_v1 = vsub.s32 0, %v48_v0  ;;  %v53_v3 = vsub.s32 1, %v48_v0 }
  0x12   :  { %393 = vmatpush1.bf16.msra.mxu1 %v749_v22  ;;  %v787_v52 = vld [vmem:[%s1057_s5 + $0x38] sm:$0xff]   ;;  %v789_v54 = vld [vmem:[%s1057_s5 + $0x30] sm:$0xff]   ;;  %v790_v55 = vld [vmem:[%s1057_s5 + $0x68] sm:$0xff]  }
  0x13   :  { %146 = vmatpush1.bf16.msra.mxu0 %v728_v13  ;;  %394 = vmatprep.subr.bf16.mxu1 %v750_v23  ;;  %v791_v56 = vld [vmem:[%s1057_s5 + $0x28] sm:$0xff]   ;;  %v792_v57 = vld [vmem:[%s1057_s5 + $0x60] sm:$0xff]   ;;  %v794_v59 = vld [vmem:[%s1057_s5 + $0x58] sm:$0xff]  }
  0x14   :  { %147 = vmatprep.subr.bf16.mxu0 %v729_v16  ;;  %v793_v58 = vld [vmem:[%s1057_s5 + $0x20] sm:$0xff]   ;;  %v795_v60 = vld [vmem:[%s1057_s5 + $0x18] sm:$0xff]   ;;  %v796_v61 = vld [vmem:[%s1057_s5 + $0x50] sm:$0xff]  }
  0x15   :  { %v797_v62 = vld [vmem:[%s1057_s5 + $0x10] sm:$0xff]   ;;  %v45_v2 = vld [vmem:[%s1058_s2] sm:$0x3]  ;;  %v798_v16 = vld [vmem:[%s1057_s5 + $0x48] sm:$0xff]  }
  0x16   :  { %395 = vmatpush1.bf16.msra.mxu1 %v752_v27  ;;  %v50_v4 = vrot.slane %v45_v2, %v49_v1  ;;  %v54_v5 = vrot.slane %v45_v2, %v53_v3  ;;  %v800_v18 = vld [vmem:[%s1057_s5 + $0x40] sm:$0xff]  }
  0x17   :  { %148 = vmatpush1.bf16.msra.mxu0 %v731_v17  ;;  %396 = vmatprep.subr.bf16.mxu1 %v753_v28  ;;  %v799_v17 = vld [vmem:[%s1057_s5 + $0x8] sm:$0xff]   ;;  %v801_v19 = vld [vmem:[%s1057_s5] sm:$0xff]  }
  0x18   :  { %149 = vmatprep.subr.bf16.mxu0 %v732_v20  ;;  %v214_v20 = vld [vmem:[%s1059_s4] sm:$0x3] }
  0x19   :  { %v223_v22 = vrot.slane %v214_v20, %v53_v3 }
  0x1a   :  { %397 = vmatpush1.bf16.msra.mxu1 %v755_v29 }
  0x1b   :  { %150 = vmatpush1.bf16.msra.mxu0 %v734_v21  ;;  %398 = vmatprep.subr.bf16.mxu1 %v756_v31  ;;  %v219_v21 = vrot.slane %v214_v20, %v49_v1 }
  0x1c   :  { %151 = vmatprep.subr.bf16.mxu0 %v735_v24 }
  0x1e   :  { %399 = vmatpush1.bf16.msra.mxu1 %v758_v32 }
  0x1f   :  { %152 = vmatpush1.bf16.msra.mxu0 %v737_v25  ;;  %400 = vmatprep.subr.bf16.mxu1 %v759_v33 }
  0x20   :  { %691 = vmatprep.subr.bf16.mxu0 %v786_v51 }
  0x22   :  { %170 = vmatmul.mubr.bf16.vlgmr.msra.gmra.mxu0 %v28_v30  ;;  %401 = vmatpush1.bf16.msra.mxu1 %v761_v34  ;;  %v607_v34 = vand.u32 127, %v47_v63 }
  0x23   :  { %402 = vmatprep.subr.bf16.mxu1 %v762_v35  ;;  %692 = vmatpush3.bf16.msra.mxu0 %v787_v52  ;;  %v674_v35 = vld [vmem:[%s1060_s6] ss:$0 sm:$0xff] }
  0x24   :  { %693 = vmatprep.subr.bf16.mxu0 %v788_v53  ;;  %vm608_vm0 = vcmp.lt.s32.totalorder %v607_v34, 10 }
  0x26   :  { %403 = vmatpush2.bf16.msra.mxu1 %v764_v36 }
  0x27   :  { %404 = vmatprep.subr.bf16.mxu1 %v765_v37  ;;  %694 = vmatpush3.bf16.msra.mxu0 %v789_v54 }
  0x28   :  { %695 = vmatprep.subr.bf16.mxu0 %v790_v55 }
  0x2a   :  { %405 = vmatpush2.bf16.msra.mxu1 %v767_v38 }
  0x2b   :  { %406 = vmatprep.subr.bf16.mxu1 %v768_v39  ;;  %696 = vmatpush3.bf16.msra.mxu0 %v791_v56 }
  0x2c   :  { %697 = vmatprep.subr.bf16.mxu0 %v792_v57 }
  0x2e   :  { %407 = vmatpush2.bf16.msra.mxu1 %v770_v40 }
  0x2f   :  { %408 = vmatprep.subr.bf16.mxu1 %v771_v41  ;;  %698 = vmatpush3.bf16.msra.mxu0 %v793_v58 }
  0x30   :  { %699 = vmatprep.subr.bf16.mxu0 %v794_v59 }
  0x32   :  { %409 = vmatpush2.bf16.msra.mxu1 %v773_v42 }
  0x33   :  { %410 = vmatprep.subr.bf16.mxu1 %v774_v43  ;;  %700 = vmatpush3.bf16.msra.mxu0 %v795_v60 }
  0x34   :  { %701 = vmatprep.subr.bf16.mxu0 %v796_v61 }
  0x36   :  { %411 = vmatpush2.bf16.msra.mxu1 %v776_v44 }
  0x37   :  { %412 = vmatprep.subr.bf16.mxu1 %v777_v45  ;;  %702 = vmatpush3.bf16.msra.mxu0 %v797_v62 }
  0x38   :  { %703 = vmatprep.subr.bf16.mxu0 %v798_v16 }
  0x3a   :  { %413 = vmatpush2.bf16.msra.mxu1 %v779_v46 }
  0x3b   :  { %414 = vmatprep.subr.bf16.mxu1 %v780_v47  ;;  %704 = vmatpush3.bf16.msra.mxu0 %v799_v17 }
  0x3c   :  { %705 = vmatprep.subr.bf16.mxu0 %v800_v18 }
  0x3e   :  { %415 = vmatpush2.bf16.msra.mxu1 %v782_v48 }
  0x3f   :  { %416 = vmatprep.subr.bf16.mxu1 %v783_v49  ;;  %706 = vmatpush3.bf16.msra.mxu0 %v801_v19 }
  0x42   :  { %417 = vmatpush2.bf16.msra.mxu1 %v785_v50 }
  0xe2   :  { %v171_v6 = vpop.f32.mrf.mxu0 }
  0xe3   :  { %v172_v7 = vadd.f32 %v171_v6, %v50_v4 }
  0xe4   :  { %v173_v8 = vpop.f32.mrf.mxu0 }
  0xe5   :  { %v174_v9 = vadd.f32 %v173_v8, %v54_v5  ;;  %v178_v10 = vmax.f32 %v172_v7, 0.0 }
  0xe6   :  { %v175_v11 = vpop.f32.mrf.mxu0 }
  0xe7   :  { %v179_v12 = vmax.f32 %v174_v9, 0.0  ;;  %v180_v15 = vpack.c.bf16 %v178_v10, %v178_v10 }
  0xe8   :  { %v176_v13 = vpop.f32.mrf.mxu0 }
  0xe9   :  { %v181_v14 = vpack.c.bf16 %v179_v12, %v179_v12 }
  0xeb   :  { %418 = vmatprep.mubr.bf16.mxu1 %v181_v14 }
  0xec   :  { %419 = vmatmul.mubr.bf16.vlgmr.msra.gmra.mxu1 %v180_v15 }
 0x1ac   :  { %v420_v23 = vpop.f32.mrf.mxu1 }
 0x1ad   :  { %v421_v24 = vadd.f32 %v420_v23, %v219_v21 }
 0x1ae   :  { %v422_v25 = vpop.f32.mrf.mxu1 }
 0x1af   :  { %v423_v26 = vadd.f32 %v422_v25, %v223_v22  ;;  %v427_v27 = vmax.f32 %v421_v24, 0.0 }
 0x1b0   :  { %v424_v28 = vpop.f32.mrf.mxu1 }
 0x1b1   :  { %v428_v29 = vmax.f32 %v423_v26, 0.0  ;;  %v429_v32 = vpack.c.bf16 %v427_v27, %v427_v27 }
 0x1b2   :  { %v425_v30 = vpop.f32.mrf.mxu1 }
 0x1b3   :  { %v430_v31 = vpack.c.bf16 %v428_v29, %v428_v29 }
 0x1b5   :  { %598 = vmatprep.mubr.bf16.mxu0 %v430_v31 }
 0x1b6   :  { %599 = vmatmul.mubr.bf16.vlgmr.msra.gmra.mxu0 %v429_v32 }
 0x276   :  { %v707_v33 = vpop.f32.mrf.mxu0 }
 0x278   :  { %v708_v36 = vpop.f32.mrf.mxu0 }
 0x279   :  { %v709_v37 = vadd.f32 %v708_v36, %v707_v33 }
 0x27a   :  { %v710_v38 = vpop.f32.mrf.mxu0 }
 0x27b   :  { %v601_v39 = vadd.f32 %v709_v37, %v674_v35 }
 0x27c   :  { %v711_v40 = vpop.f32.mrf.mxu0 }
 0x27d   :  { %v609_v41 = vsel %vm608_vm0, %v601_v39, -1e+30 }
 0x27e   :  { %610 = vmax.xlane.f32.xlu0 %v609_v41 }
 0x307   :  { %v611_v42 = vpop.xlane.xlu0 %610 }
 0x308   :  { %v612_v43 = vsub.f32 %v609_v41, %v611_v42 }
 0x30a   :  { %v613_v44 = vmul.f32 1.442695, %v612_v43 }
 0x30c   :  { %802 = vpow2.f32 %v613_v44 }
 0x319   :  { %v803_v45 = vpop.eup %802 }
 0x31a   :  { %615 = vadd.xlane.f32.xlu0 %v803_v45 }
 0x3a3   :  { %v616_v46 = vpop.xlane.xlu0 %615 }
 0x3a4   :  { %804 = vlog2.f32 %v616_v46 }
 0x3b1   :  { %v805_v47 = vpop.eup %804 }
 0x3b2   :  { %v618_v48 = vmul.f32 0.6931472, %v805_v47 }
 0x3b4   :  { %v619_v49 = vadd.f32 %v618_v48, %v611_v42 }
 0x3b6   :  { %v620_v50 = vsub.f32 %v609_v41, %v619_v49 }
 0x3b8   :  { %621 = vst [vmem:[%s1061_s7] sm:$0xff] %v620_v50 }

// kernel: dann_forward.10
= control target key start
LH: loop header
LB: loop body
LE: loop exit
PB: predicated region body
PF: predicated region fallthrough
CT: control target
= control target key end

     0   :  { %vm2920_vm0 = vcmask 523264   ;;  %s4717_s1 = inlined_call_operand.vmem [shape: bf16[4096,64], index: 1, kind: input, shape index: {}]   ;;  %s4718_s0 = inlined_call_operand.vmem [shape: bf16[16,4096], index: 0, kind: input, shape index: {}]   ;;  %s4719_s2 = inlined_call_operand.vmem [shape: f32[1,64], index: 2, kind: input, shape index: {}]   ;;  %s4720_s3 = inlined_call_operand.vmem [shape: f32[16,64], index: 3, kind: output, shape index: {}]  }
   0x1   :  { %v3568_v0 = vld [vmem:[%s4717_s1 + $0x78] sm:$0xff]   ;;  %v3572_v4 = vld [vmem:[%s4717_s1 + $0x70] sm:$0xff]   ;;  %v3576_v8 = vld [vmem:[%s4717_s1 + $0x68] sm:$0xff]  }
   0x2   :  { %v3569_v1 = vld [vmem:[%s4717_s1 + $0xf8] sm:$0xff]   ;;  %3216 = vmatprep.subr.bf16.mxu0 %v3568_v0  ;;  %v3573_v5 = vld [vmem:[%s4717_s1 + $0xf0] sm:$0xff]   ;;  %v3577_v9 = vld [vmem:[%s4717_s1 + $0xe8] sm:$0xff]  }
   0x3   :  { %v3570_v2 = vld [vmem:[%s4717_s1 + $0x38] sm:$0xff]   ;;  %3238 = vmatprep.subr.bf16.mxu1 %v3569_v1  ;;  %v3574_v6 = vld [vmem:[%s4717_s1 + $0x30] sm:$0xff]   ;;  %v3578_v10 = vld [vmem:[%s4717_s1 + $0x28] sm:$0xff]  }
   0x4   :  { %v3571_v3 = vld [vmem:[%s4717_s1 + $0xb8] sm:$0xff]   ;;  %3217 = vmatpush3.bf16.msra.mxu0 %v3570_v2  ;;  %v3575_v7 = vld [vmem:[%s4717_s1 + $0xb0] sm:$0xff]   ;;  %v3579_v11 = vld [vmem:[%s4717_s1 + $0xa8] sm:$0xff]  }
   0x5   :  { %3239 = vmatpush3.bf16.msra.mxu1 %v3571_v3  ;;  %3218 = vmatprep.subr.bf16.mxu0 %v3572_v4  ;;  %v3580_v12 = vld [vmem:[%s4717_s1 + $0x60] sm:$0xff]   ;;  %v3584_v16 = vld [vmem:[%s4717_s1 + $0x58] sm:$0xff]   ;;  %v3588_v20 = vld [vmem:[%s4717_s1 + $0x50] sm:$0xff]  }
   0x6   :  { %3240 = vmatprep.subr.bf16.mxu1 %v3573_v5  ;;  %v3581_v13 = vld [vmem:[%s4717_s1 + $0xe0] sm:$0xff]   ;;  %v3585_v17 = vld [vmem:[%s4717_s1 + $0xd8] sm:$0xff]   ;;  %v3589_v21 = vld [vmem:[%s4717_s1 + $0xd0] sm:$0xff]  }
   0x7   :  { %v3582_v14 = vld [vmem:[%s4717_s1 + $0x20] sm:$0xff]   ;;  %v3586_v18 = vld [vmem:[%s4717_s1 + $0x18] sm:$0xff]   ;;  %v3590_v22 = vld [vmem:[%s4717_s1 + $0x10] sm:$0xff]  }
   0x8   :  { %3219 = vmatpush3.bf16.msra.mxu0 %v3574_v6  ;;  %v3583_v15 = vld [vmem:[%s4717_s1 + $0xa0] sm:$0xff]   ;;  %v3587_v19 = vld [vmem:[%s4717_s1 + $0x98] sm:$0xff]   ;;  %v3591_v23 = vld [vmem:[%s4717_s1 + $0x90] sm:$0xff]  }
   0x9   :  { %3241 = vmatpush3.bf16.msra.mxu1 %v3575_v7  ;;  %3220 = vmatprep.subr.bf16.mxu0 %v3576_v8  ;;  %v3592_v24 = vld [vmem:[%s4717_s1 + $0x48] sm:$0xff]   ;;  %v3596_v28 = vld [vmem:[%s4717_s1 + $0x40] sm:$0xff]   ;;  %v3600_v40 = vld [vmem:[%s4717_s1 + $0x178] sm:$0xff]  }
   0xa   :  { %3242 = vmatprep.subr.bf16.mxu1 %v3577_v9  ;;  %v3593_v25 = vld [vmem:[%s4717_s1 + $0xc8] sm:$0xff]   ;;  %v3597_v29 = vld [vmem:[%s4717_s1 + $0xc0] sm:$0xff]   ;;  %v3601_v41 = vld [vmem:[%s4717_s1 + $0x1f8] sm:$0xff]  }
   0xb   :  { %v3594_v26 = vld [vmem:[%s4717_s1 + $0x8] sm:$0xff]   ;;  %v3598_v30 = vld [vmem:[%s4717_s1] sm:$0xff]   ;;  %v3602_v42 = vld [vmem:[%s4717_s1 + $0x138] sm:$0xff]  }
   0xc   :  { %3221 = vmatpush3.bf16.msra.mxu0 %v3578_v10  ;;  %v3595_v27 = vld [vmem:[%s4717_s1 + $0x88] sm:$0xff]   ;;  %v3599_v31 = vld [vmem:[%s4717_s1 + $0x80] sm:$0xff]   ;;  %v3603_v43 = vld [vmem:[%s4717_s1 + $0x1b8] sm:$0xff]  }
   0xd   :  { %3243 = vmatpush3.bf16.msra.mxu1 %v3579_v11  ;;  %3222 = vmatprep.subr.bf16.mxu0 %v3580_v12  ;;  %v15_v32 = vld [vmem:[%s4718_s0] sm:$0xff]  ;;  %v16_v34 = vld [vmem:[%s4718_s0 + $0x8] sm:$0xff]  ;;  %v3604_v44 = vld [vmem:[%s4717_s1 + $0x170] sm:$0xff]  }
   0xe   :  { %3244 = vmatprep.subr.bf16.mxu1 %v3581_v13  ;;  %v31_v33 = vld [vmem:[%s4718_s0 + $0x80] sm:$0xff]  ;;  %v32_v37 = vld [vmem:[%s4718_s0 + $0x88] sm:$0xff]  ;;  %v3605_v45 = vld [vmem:[%s4717_s1 + $0x1f0] sm:$0xff]  }
   0xf   :  { %v2928_v35 = vcombine.low %v15_v32, %v31_v33  ;;  %v2929_v36 = vcombine.high %v15_v32, %v31_v33  ;;  %v2930_v38 = vcombine.low %v16_v34, %v32_v37  ;;  %v2931_v39 = vcombine.high %v16_v34, %v32_v37  ;;  %v3606_v46 = vld [vmem:[%s4717_s1 + $0x130] sm:$0xff]   ;;  %v3608_v48 = vld [vmem:[%s4717_s1 + $0x168] sm:$0xff]   ;;  %v3612_v52 = vld [vmem:[%s4717_s1 + $0x160] sm:$0xff]  }
  0x10   :  { %3223 = vmatpush3.bf16.msra.mxu0 %v3582_v14  ;;  %v3607_v47 = vld [vmem:[%s4717_s1 + $0x1b0] sm:$0xff]   ;;  %v3609_v49 = vld [vmem:[%s4717_s1 + $0x1e8] sm:$0xff]   ;;  %v3613_v53 = vld [vmem:[%s4717_s1 + $0x1e0] sm:$0xff]  }
  0x11   :  { %3245 = vmatpush3.bf16.msra.mxu1 %v3583_v15  ;;  %3224 = vmatprep.subr.bf16.mxu0 %v3584_v16  ;;  %v3610_v50 = vld [vmem:[%s4717_s1 + $0x128] sm:$0xff]   ;;  %v3614_v54 = vld [vmem:[%s4717_s1 + $0x120] sm:$0xff]   ;;  %v3616_v56 = vld [vmem:[%s4717_s1 + $0x158] sm:$0xff]  }
  0x12   :  { %3246 = vmatprep.subr.bf16.mxu1 %v3585_v17  ;;  %2294 = vmatprep.mubr.bf16.mxu0 %v2929_v36  ;;  %v3611_v51 = vld [vmem:[%s4717_s1 + $0x1a8] sm:$0xff]   ;;  %v3615_v55 = vld [vmem:[%s4717_s1 + $0x1a0] sm:$0xff]   ;;  %v3617_v57 = vld [vmem:[%s4717_s1 + $0x1d8] sm:$0xff]  }
  0x13   :  { %2335 = vmatprep.mubr.bf16.mxu1 %v2931_v39  ;;  %v3618_v58 = vld [vmem:[%s4717_s1 + $0x118] sm:$0xff]   ;;  %v3620_v60 = vld [vmem:[%s4717_s1 + $0x150] sm:$0xff]   ;;  %v3624_v0 = vld [vmem:[%s4717_s1 + $0x148] sm:$0xff]  }
  0x14   :  { %3225 = vmatpush3.bf16.msra.mxu0 %v3586_v18  ;;  %v3619_v59 = vld [vmem:[%s4717_s1 + $0x198] sm:$0xff]   ;;  %v3621_v61 = vld [vmem:[%s4717_s1 + $0x1d0] sm:$0xff]   ;;  %v3625_v1 = vld [vmem:[%s4717_s1 + $0x1c8] sm:$0xff]  }
  0x15   :  { %3247 = vmatpush3.bf16.msra.mxu1 %v3587_v19  ;;  %3226 = vmatprep.subr.bf16.mxu0 %v3588_v20  ;;  %v3622_v62 = vld [vmem:[%s4717_s1 + $0x110] sm:$0xff]   ;;  %v3626_v2 = vld [vmem:[%s4717_s1 + $0x108] sm:$0xff]   ;;  %v3628_v4 = vld [vmem:[%s4717_s1 + $0x140] sm:$0xff]  }
  0x16   :  { %3248 = vmatprep.subr.bf16.mxu1 %v3589_v21  ;;  %v3623_v63 = vld [vmem:[%s4717_s1 + $0x190] sm:$0xff]   ;;  %v3627_v3 = vld [vmem:[%s4717_s1 + $0x188] sm:$0xff]   ;;  %v3629_v5 = vld [vmem:[%s4717_s1 + $0x1c0] sm:$0xff]  }
  0x17   :  { %v3630_v6 = vld [vmem:[%s4717_s1 + $0x100] sm:$0xff]   ;;  %v17_v8 = vld [vmem:[%s4718_s0 + $0x10] sm:$0xff]  ;;  %v18_v12 = vld [vmem:[%s4718_s0 + $0x18] sm:$0xff] }
  0x18   :  { %3227 = vmatpush3.bf16.msra.mxu0 %v3590_v22  ;;  %v3631_v7 = vld [vmem:[%s4717_s1 + $0x180] sm:$0xff]   ;;  %v33_v9 = vld [vmem:[%s4718_s0 + $0x90] sm:$0xff]  ;;  %v34_v13 = vld [vmem:[%s4718_s0 + $0x98] sm:$0xff] }
  0x19   :  { %3249 = vmatpush3.bf16.msra.mxu1 %v3591_v23  ;;  %3228 = vmatprep.subr.bf16.mxu0 %v3592_v24  ;;  %v2932_v10 = vcombine.low %v17_v8, %v33_v9  ;;  %v2933_v11 = vcombine.high %v17_v8, %v33_v9  ;;  %v2934_v14 = vcombine.low %v18_v12, %v34_v13  ;;  %v3632_v16 = vld [vmem:[%s4717_s1 + $0x278] sm:$0xff]   ;;  %v3636_v20 = vld [vmem:[%s4717_s1 + $0x270] sm:$0xff]   ;;  %v3640_v24 = vld [vmem:[%s4717_s1 + $0x268] sm:$0xff]  }
  0x1a   :  { %3250 = vmatprep.subr.bf16.mxu1 %v3593_v25  ;;  %v2935_v15 = vcombine.high %v18_v12, %v34_v13  ;;  %v3633_v17 = vld [vmem:[%s4717_s1 + $0x2f8] sm:$0xff]   ;;  %v3637_v21 = vld [vmem:[%s4717_s1 + $0x2f0] sm:$0xff]   ;;  %v3641_v25 = vld [vmem:[%s4717_s1 + $0x2e8] sm:$0xff]  }
  0x1b   :  { %v3634_v18 = vld [vmem:[%s4717_s1 + $0x238] sm:$0xff]   ;;  %v3638_v22 = vld [vmem:[%s4717_s1 + $0x230] sm:$0xff]  }
  0x1c   :  { %3229 = vmatpush3.bf16.msra.mxu0 %v3594_v26  ;;  %v3635_v19 = vld [vmem:[%s4717_s1 + $0x2b8] sm:$0xff]   ;;  %v3639_v23 = vld [vmem:[%s4717_s1 + $0x2b0] sm:$0xff]   ;;  %v3642_v26 = vld [vmem:[%s4717_s1 + $0x228] sm:$0xff]  }
  0x1d   :  { %3251 = vmatpush3.bf16.msra.mxu1 %v3595_v27  ;;  %3230 = vmatprep.subr.bf16.mxu0 %v3596_v28  ;;  %v3643_v27 = vld [vmem:[%s4717_s1 + $0x2a8] sm:$0xff]   ;;  %v3644_v28 = vld [vmem:[%s4717_s1 + $0x260] sm:$0xff]   ;;  %v3648_v32 = vld [vmem:[%s4717_s1 + $0x258] sm:$0xff]  }
  0x1e   :  { %3252 = vmatprep.subr.bf16.mxu1 %v3597_v29  ;;  %v3645_v29 = vld [vmem:[%s4717_s1 + $0x2e0] sm:$0xff]   ;;  %v3649_v33 = vld [vmem:[%s4717_s1 + $0x2d8] sm:$0xff]   ;;  %v3652_v36 = vld [vmem:[%s4717_s1 + $0x250] sm:$0xff]  }
  0x1f   :  { %v3650_v34 = vld [vmem:[%s4717_s1 + $0x218] sm:$0xff]   ;;  %v3653_v37 = vld [vmem:[%s4717_s1 + $0x2d0] sm:$0xff]  }
  0x20   :  { %3231 = vmatpush3.bf16.msra.mxu0 %v3598_v30  ;;  %v3646_v30 = vld [vmem:[%s4717_s1 + $0x220] sm:$0xff]   ;;  %v3655_v39 = vld [vmem:[%s4717_s1 + $0x290] sm:$0xff]   ;;  %v3680_v8 = vld [vmem:[%s4717_s1 + $0x358] sm:$0xff]  }
  0x21   :  { %3253 = vmatpush3.bf16.msra.mxu1 %v3599_v31  ;;  %3260 = vmatprep.subr.bf16.mxu0 %v3600_v40  ;;  %v3647_v31 = vld [vmem:[%s4717_s1 + $0x2a0] sm:$0xff]   ;;  %v3656_v40 = vld [vmem:[%s4717_s1 + $0x248] sm:$0xff]   ;;  %v3681_v9 = vld [vmem:[%s4717_s1 + $0x3d8] sm:$0xff]  }
  0x22   :  { %3282 = vmatprep.subr.bf16.mxu1 %v3601_v41  ;;  %v3657_v41 = vld [vmem:[%s4717_s1 + $0x2c8] sm:$0xff]   ;;  %v3684_v12 = vld [vmem:[%s4717_s1 + $0x350] sm:$0xff]  }
  0x23   :  { %2295 = vmatmul.mubr.bf16.vlgmr.msra.gmra.mxu0 %v2928_v35  ;;  %v3651_v35 = vld [vmem:[%s4717_s1 + $0x298] sm:$0xff]   ;;  %v3685_v13 = vld [vmem:[%s4717_s1 + $0x3d0] sm:$0xff]  }
  0x24   :  { %2336 = vmatmul.mubr.bf16.vlgmr.msra.gmra.mxu1 %v2930_v38  ;;  %3261 = vmatpush3.bf16.msra.mxu0 %v3602_v42  ;;  %v3654_v38 = vld [vmem:[%s4717_s1 + $0x210] sm:$0xff]   ;;  %v3658_v42 = vld [vmem:[%s4717_s1 + $0x208] sm:$0xff]  }
  0x25   :  { %3283 = vmatpush3.bf16.msra.mxu1 %v3603_v43  ;;  %3262 = vmatprep.subr.bf16.mxu0 %v3604_v44  ;;  %v3659_v43 = vld [vmem:[%s4717_s1 + $0x288] sm:$0xff]   ;;  %v3660_v44 = vld [vmem:[%s4717_s1 + $0x240] sm:$0xff]  }
  0x26   :  { %3284 = vmatprep.subr.bf16.mxu1 %v3605_v45  ;;  %2376 = vmatprep.mubr.bf16.mxu0 %v2933_v11  ;;  %v3661_v45 = vld [vmem:[%s4717_s1 + $0x2c0] sm:$0xff]   ;;  %v3683_v11 = vld [vmem:[%s4717_s1 + $0x398] sm:$0xff]  }
  0x27   :  { %2417 = vmatprep.mubr.bf16.mxu1 %v2935_v15  ;;  %v3687_v15 = vld [vmem:[%s4717_s1 + $0x390] sm:$0xff]  }
  0x28   :  { %3263 = vmatpush3.bf16.msra.mxu0 %v3606_v46  ;;  %v3662_v46 = vld [vmem:[%s4717_s1 + $0x200] sm:$0xff]  }
  0x29   :  { %3285 = vmatpush3.bf16.msra.mxu1 %v3607_v47  ;;  %3264 = vmatprep.subr.bf16.mxu0 %v3608_v48  ;;  %v3663_v47 = vld [vmem:[%s4717_s1 + $0x280] sm:$0xff]  }
  0x2a   :  { %3286 = vmatprep.subr.bf16.mxu1 %v3609_v49  ;;  %v19_v48 = vld [vmem:[%s4718_s0 + $0x20] sm:$0xff] }
  0x2b   :  { %v35_v49 = vld [vmem:[%s4718_s0 + $0xa0] sm:$0xff] }
  0x2c   :  { %3265 = vmatpush3.bf16.msra.mxu0 %v3610_v50  ;;  %v20_v50 = vld [vmem:[%s4718_s0 + $0x28] sm:$0xff] }
  0x2d   :  { %3287 = vmatpush3.bf16.msra.mxu1 %v3611_v51  ;;  %3266 = vmatprep.subr.bf16.mxu0 %v3612_v52  ;;  %v36_v51 = vld [vmem:[%s4718_s0 + $0xa8] sm:$0xff]  ;;  %v2936_v52 = vcombine.low %v19_v48, %v35_v49 }
  0x2e   :  { %3288 = vmatprep.subr.bf16.mxu1 %v3613_v53  ;;  %v2937_v53 = vcombine.high %v19_v48, %v35_v49  ;;  %v3712_v48 = vld [vmem:[%s4717_s1 + $0x458] sm:$0xff]  }
  0x2f   :  { %v3713_v49 = vld [vmem:[%s4717_s1 + $0x4d8] sm:$0xff]  }
  0x30   :  { %3267 = vmatpush3.bf16.msra.mxu0 %v3614_v54  ;;  %v2938_v54 = vcombine.low %v20_v50, %v36_v51 }
  0x31   :  { %3289 = vmatpush3.bf16.msra.mxu1 %v3615_v55  ;;  %3268 = vmatprep.subr.bf16.mxu0 %v3616_v56  ;;  %v2939_v55 = vcombine.high %v20_v50, %v36_v51  ;;  %v3664_v56 = vld [vmem:[%s4717_s1 + $0x378] sm:$0xff]  }
  0x32   :  { %3290 = vmatprep.subr.bf16.mxu1 %v3617_v57  ;;  %v3665_v57 = vld [vmem:[%s4717_s1 + $0x3f8] sm:$0xff]  }
  0x33   :  { %v3714_v50 = vld [vmem:[%s4717_s1 + $0x418] sm:$0xff]  }
  0x34   :  { %3269 = vmatpush3.bf16.msra.mxu0 %v3618_v58  ;;  %v3666_v58 = vld [vmem:[%s4717_s1 + $0x338] sm:$0xff]  }
  0x35   :  { %3291 = vmatpush3.bf16.msra.mxu1 %v3619_v59  ;;  %3270 = vmatprep.subr.bf16.mxu0 %v3620_v60  ;;  %v3667_v59 = vld [vmem:[%s4717_s1 + $0x3b8] sm:$0xff]   ;;  %v3668_v60 = vld [vmem:[%s4717_s1 + $0x370] sm:$0xff]  }
  0x36   :  { %3292 = vmatprep.subr.bf16.mxu1 %v3621_v61  ;;  %v3669_v61 = vld [vmem:[%s4717_s1 + $0x3f0] sm:$0xff]   ;;  %v3715_v51 = vld [vmem:[%s4717_s1 + $0x498] sm:$0xff]  }
  0x38   :  { %3271 = vmatpush3.bf16.msra.mxu0 %v3622_v62  ;;  %v3670_v62 = vld [vmem:[%s4717_s1 + $0x330] sm:$0xff]  }
  0x39   :  { %3293 = vmatpush3.bf16.msra.mxu1 %v3623_v63  ;;  %3272 = vmatprep.subr.bf16.mxu0 %v3624_v0  ;;  %v3671_v63 = vld [vmem:[%s4717_s1 + $0x3b0] sm:$0xff]   ;;  %v3672_v0 = vld [vmem:[%s4717_s1 + $0x368] sm:$0xff]  }
  0x3a   :  { %3294 = vmatprep.subr.bf16.mxu1 %v3625_v1  ;;  %v3673_v1 = vld [vmem:[%s4717_s1 + $0x3e8] sm:$0xff]  }
  0x3c   :  { %3273 = vmatpush3.bf16.msra.mxu0 %v3626_v2  ;;  %v3674_v2 = vld [vmem:[%s4717_s1 + $0x328] sm:$0xff]  }
  0x3d   :  { %3295 = vmatpush3.bf16.msra.mxu1 %v3627_v3  ;;  %3274 = vmatprep.subr.bf16.mxu0 %v3628_v4  ;;  %v3675_v3 = vld [vmem:[%s4717_s1 + $0x3a8] sm:$0xff]   ;;  %v3676_v4 = vld [vmem:[%s4717_s1 + $0x360] sm:$0xff]  }
  0x3e   :  { %3296 = vmatprep.subr.bf16.mxu1 %v3629_v5  ;;  %v3677_v5 = vld [vmem:[%s4717_s1 + $0x3e0] sm:$0xff]  }
  0x40   :  { %3275 = vmatpush3.bf16.msra.mxu0 %v3630_v6  ;;  %v3678_v6 = vld [vmem:[%s4717_s1 + $0x320] sm:$0xff]  }
  0x41   :  { %3297 = vmatpush3.bf16.msra.mxu1 %v3631_v7  ;;  %3304 = vmatprep.subr.bf16.mxu0 %v3632_v16  ;;  %v3679_v7 = vld [vmem:[%s4717_s1 + $0x3a0] sm:$0xff]   ;;  %v3688_v16 = vld [vmem:[%s4717_s1 + $0x348] sm:$0xff]  }
  0x42   :  { %3326 = vmatprep.subr.bf16.mxu1 %v3633_v17  ;;  %v3689_v17 = vld [vmem:[%s4717_s1 + $0x3c8] sm:$0xff]  }
  0x43   :  { %2377 = vmatmul.mubr.bf16.vlgmr.msra.gmra.mxu0 %v2932_v10  ;;  %v3682_v10 = vld [vmem:[%s4717_s1 + $0x318] sm:$0xff]  }
  0x44   :  { %2418 = vmatmul.mubr.bf16.vlgmr.msra.gmra.mxu1 %v2934_v14  ;;  %3305 = vmatpush3.bf16.msra.mxu0 %v3634_v18  ;;  %v3686_v14 = vld [vmem:[%s4717_s1 + $0x310] sm:$0xff]   ;;  %v3690_v18 = vld [vmem:[%s4717_s1 + $0x308] sm:$0xff]  }
  0x45   :  { %3327 = vmatpush3.bf16.msra.mxu1 %v3635_v19  ;;  %3306 = vmatprep.subr.bf16.mxu0 %v3636_v20  ;;  %v3691_v19 = vld [vmem:[%s4717_s1 + $0x388] sm:$0xff]   ;;  %v3692_v20 = vld [vmem:[%s4717_s1 + $0x340] sm:$0xff]  }
  0x46   :  { %3328 = vmatprep.subr.bf16.mxu1 %v3637_v21  ;;  %2458 = vmatprep.mubr.bf16.mxu0 %v2937_v53  ;;  %v3693_v21 = vld [vmem:[%s4717_s1 + $0x3c0] sm:$0xff]   ;;  %v3717_v53 = vld [vmem:[%s4717_s1 + $0x4d0] sm:$0xff]  }
  0x47   :  { %2499 = vmatprep.mubr.bf16.mxu1 %v2939_v55  ;;  %v3719_v55 = vld [vmem:[%s4717_s1 + $0x490] sm:$0xff]  }
  0x48   :  { %3307 = vmatpush3.bf16.msra.mxu0 %v3638_v22  ;;  %v3694_v22 = vld [vmem:[%s4717_s1 + $0x300] sm:$0xff]  }
  0x49   :  { %3329 = vmatpush3.bf16.msra.mxu1 %v3639_v23  ;;  %3308 = vmatprep.subr.bf16.mxu0 %v3640_v24  ;;  %v3695_v23 = vld [vmem:[%s4717_s1 + $0x380] sm:$0xff]   ;;  %v21_v24 = vld [vmem:[%s4718_s0 + $0x30] sm:$0xff] }
  0x4a   :  { %3330 = vmatprep.subr.bf16.mxu1 %v3641_v25  ;;  %v37_v25 = vld [vmem:[%s4718_s0 + $0xb0] sm:$0xff] }
  0x4c   :  { %3309 = vmatpush3.bf16.msra.mxu0 %v3642_v26  ;;  %v22_v26 = vld [vmem:[%s4718_s0 + $0x38] sm:$0xff] }
  0x4d   :  { %3331 = vmatpush3.bf16.msra.mxu1 %v3643_v27  ;;  %3310 = vmatprep.subr.bf16.mxu0 %v3644_v28  ;;  %v2940_v27 = vcombine.low %v21_v24, %v37_v25  ;;  %v2941_v28 = vcombine.high %v21_v24, %v37_v25  ;;  %v3744_v24 = vld [vmem:[%s4717_s1 + $0x558] sm:$0xff]  }
  0x4e   :  { %3332 = vmatprep.subr.bf16.mxu1 %v3645_v29  ;;  %v38_v29 = vld [vmem:[%s4718_s0 + $0xb8] sm:$0xff] }
  0x4f   :  { %v3745_v25 = vld [vmem:[%s4717_s1 + $0x5d8] sm:$0xff]  }
  0x50   :  { %3311 = vmatpush3.bf16.msra.mxu0 %v3646_v30  ;;  %v2942_v30 = vcombine.low %v22_v26, %v38_v29 }
  0x51   :  { %3333 = vmatpush3.bf16.msra.mxu1 %v3647_v31  ;;  %3312 = vmatprep.subr.bf16.mxu0 %v3648_v32  ;;  %v2943_v31 = vcombine.high %v22_v26, %v38_v29  ;;  %v3696_v32 = vld [vmem:[%s4717_s1 + $0x478] sm:$0xff]   ;;  %v3749_v29 = vld [vmem:[%s4717_s1 + $0x5d0] sm:$0xff]  }
  0x52   :  { %3334 = vmatprep.subr.bf16.mxu1 %v3649_v33  ;;  %v3697_v33 = vld [vmem:[%s4717_s1 + $0x4f8] sm:$0xff]  }
  0x53   :  { %v3746_v26 = vld [vmem:[%s4717_s1 + $0x518] sm:$0xff]  }
  0x54   :  { %3313 = vmatpush3.bf16.msra.mxu0 %v3650_v34  ;;  %v3698_v34 = vld [vmem:[%s4717_s1 + $0x438] sm:$0xff]  }
  0x55   :  { %3335 = vmatpush3.bf16.msra.mxu1 %v3651_v35  ;;  %3314 = vmatprep.subr.bf16.mxu0 %v3652_v36  ;;  %v3699_v35 = vld [vmem:[%s4717_s1 + $0x4b8] sm:$0xff]   ;;  %v3700_v36 = vld [vmem:[%s4717_s1 + $0x470] sm:$0xff]  }
  0x56   :  { %3336 = vmatprep.subr.bf16.mxu1 %v3653_v37  ;;  %v3701_v37 = vld [vmem:[%s4717_s1 + $0x4f0] sm:$0xff]  }
  0x58   :  { %3315 = vmatpush3.bf16.msra.mxu0 %v3654_v38  ;;  %v3702_v38 = vld [vmem:[%s4717_s1 + $0x430] sm:$0xff]  }
  0x59   :  { %3337 = vmatpush3.bf16.msra.mxu1 %v3655_v39  ;;  %3316 = vmatprep.subr.bf16.mxu0 %v3656_v40  ;;  %v3703_v39 = vld [vmem:[%s4717_s1 + $0x4b0] sm:$0xff]   ;;  %v3704_v40 = vld [vmem:[%s4717_s1 + $0x468] sm:$0xff]  }
  0x5a   :  { %3338 = vmatprep.subr.bf16.mxu1 %v3657_v41  ;;  %v3705_v41 = vld [vmem:[%s4717_s1 + $0x4e8] sm:$0xff]  }
  0x5c   :  { %3317 = vmatpush3.bf16.msra.mxu0 %v3658_v42  ;;  %v3706_v42 = vld [vmem:[%s4717_s1 + $0x428] sm:$0xff]  }
  0x5d   :  { %3339 = vmatpush3.bf16.msra.mxu1 %v3659_v43  ;;  %3318 = vmatprep.subr.bf16.mxu0 %v3660_v44  ;;  %v3707_v43 = vld [vmem:[%s4717_s1 + $0x4a8] sm:$0xff]   ;;  %v3708_v44 = vld [vmem:[%s4717_s1 + $0x460] sm:$0xff]  }
  0x5e   :  { %3340 = vmatprep.subr.bf16.mxu1 %v3661_v45  ;;  %v3709_v45 = vld [vmem:[%s4717_s1 + $0x4e0] sm:$0xff]  }
  0x60   :  { %3319 = vmatpush3.bf16.msra.mxu0 %v3662_v46  ;;  %v3710_v46 = vld [vmem:[%s4717_s1 + $0x420] sm:$0xff]  }
  0x61   :  { %3341 = vmatpush3.bf16.msra.mxu1 %v3663_v47  ;;  %3348 = vmatprep.subr.bf16.mxu0 %v3664_v56  ;;  %v3711_v47 = vld [vmem:[%s4717_s1 + $0x4a0] sm:$0xff]   ;;  %v3720_v56 = vld [vmem:[%s4717_s1 + $0x448] sm:$0xff]  }
  0x62   :  { %3370 = vmatprep.subr.bf16.mxu1 %v3665_v57  ;;  %v3721_v57 = vld [vmem:[%s4717_s1 + $0x4c8] sm:$0xff]  }
  0x63   :  { %2459 = vmatmul.mubr.bf16.vlgmr.msra.gmra.mxu0 %v2936_v52  ;;  %v3716_v52 = vld [vmem:[%s4717_s1 + $0x450] sm:$0xff]  }
  0x64   :  { %2500 = vmatmul.mubr.bf16.vlgmr.msra.gmra.mxu1 %v2938_v54  ;;  %3349 = vmatpush3.bf16.msra.mxu0 %v3666_v58  ;;  %v3718_v54 = vld [vmem:[%s4717_s1 + $0x410] sm:$0xff]   ;;  %v3722_v58 = vld [vmem:[%s4717_s1 + $0x408] sm:$0xff]  }
  0x65   :  { %3371 = vmatpush3.bf16.msra.mxu1 %v3667_v59  ;;  %3350 = vmatprep.subr.bf16.mxu0 %v3668_v60  ;;  %v3723_v59 = vld [vmem:[%s4717_s1 + $0x488] sm:$0xff]   ;;  %v3724_v60 = vld [vmem:[%s4717_s1 + $0x440] sm:$0xff]  }
  0x66   :  { %3372 = vmatprep.subr.bf16.mxu1 %v3669_v61  ;;  %2540 = vmatprep.mubr.bf16.mxu0 %v2941_v28  ;;  %v3725_v61 = vld [vmem:[%s4717_s1 + $0x4c0] sm:$0xff]   ;;  %v3748_v28 = vld [vmem:[%s4717_s1 + $0x550] sm:$0xff]  }
  0x67   :  { %2581 = vmatprep.mubr.bf16.mxu1 %v2943_v31  ;;  %v3751_v31 = vld [vmem:[%s4717_s1 + $0x590] sm:$0xff]  }
  0x68   :  { %3351 = vmatpush3.bf16.msra.mxu0 %v3670_v62  ;;  %v3726_v62 = vld [vmem:[%s4717_s1 + $0x400] sm:$0xff]  }
  0x69   :  { %3373 = vmatpush3.bf16.msra.mxu1 %v3671_v63  ;;  %3352 = vmatprep.subr.bf16.mxu0 %v3672_v0  ;;  %v3727_v63 = vld [vmem:[%s4717_s1 + $0x480] sm:$0xff]  }
  0x6a   :  { %3374 = vmatprep.subr.bf16.mxu1 %v3673_v1  ;;  %v23_v0 = vld [vmem:[%s4718_s0 + $0x40] sm:$0xff] }
  0x6b   :  { %v39_v1 = vld [vmem:[%s4718_s0 + $0xc0] sm:$0xff] }
  0x6c   :  { %3353 = vmatpush3.bf16.msra.mxu0 %v3674_v2  ;;  %v2944_v2 = vcombine.low %v23_v0, %v39_v1 }
  0x6d   :  { %3375 = vmatpush3.bf16.msra.mxu1 %v3675_v3  ;;  %3354 = vmatprep.subr.bf16.mxu0 %v3676_v4  ;;  %v2945_v3 = vcombine.high %v23_v0, %v39_v1  ;;  %v24_v4 = vld [vmem:[%s4718_s0 + $0x48] sm:$0xff]  ;;  %v3776_v0 = vld [vmem:[%s4717_s1 + $0x658] sm:$0xff]  }
  0x6e   :  { %3376 = vmatprep.subr.bf16.mxu1 %v3677_v5  ;;  %v40_v5 = vld [vmem:[%s4718_s0 + $0xc8] sm:$0xff]  ;;  %v3777_v1 = vld [vmem:[%s4717_s1 + $0x6d8] sm:$0xff]  }
  0x70   :  { %3355 = vmatpush3.bf16.msra.mxu0 %v3678_v6  ;;  %v2946_v6 = vcombine.low %v24_v4, %v40_v5 }
  0x71   :  { %3377 = vmatpush3.bf16.msra.mxu1 %v3679_v7  ;;  %3356 = vmatprep.subr.bf16.mxu0 %v3680_v8  ;;  %v2947_v7 = vcombine.high %v24_v4, %v40_v5  ;;  %v3728_v8 = vld [vmem:[%s4717_s1 + $0x578] sm:$0xff]   ;;  %v3780_v4 = vld [vmem:[%s4717_s1 + $0x650] sm:$0xff]  }
  0x72   :  { %3378 = vmatprep.subr.bf16.mxu1 %v3681_v9  ;;  %v3729_v9 = vld [vmem:[%s4717_s1 + $0x5f8] sm:$0xff]   ;;  %v3781_v5 = vld [vmem:[%s4717_s1 + $0x6d0] sm:$0xff]  }
  0x74   :  { %3357 = vmatpush3.bf16.msra.mxu0 %v3682_v10  ;;  %v3730_v10 = vld [vmem:[%s4717_s1 + $0x538] sm:$0xff]  }
  0x75   :  { %3379 = vmatpush3.bf16.msra.mxu1 %v3683_v11  ;;  %3358 = vmatprep.subr.bf16.mxu0 %v3684_v12  ;;  %v3731_v11 = vld [vmem:[%s4717_s1 + $0x5b8] sm:$0xff]   ;;  %v3732_v12 = vld [vmem:[%s4717_s1 + $0x570] sm:$0xff]  }
  0x76   :  { %3380 = vmatprep.subr.bf16.mxu1 %v3685_v13  ;;  %v3733_v13 = vld [vmem:[%s4717_s1 + $0x5f0] sm:$0xff]  }
  0x78   :  { %3359 = vmatpush3.bf16.msra.mxu0 %v3686_v14  ;;  %v3734_v14 = vld [vmem:[%s4717_s1 + $0x530] sm:$0xff]  }
  0x79   :  { %3381 = vmatpush3.bf16.msra.mxu1 %v3687_v15  ;;  %3360 = vmatprep.subr.bf16.mxu0 %v3688_v16  ;;  %v3735_v15 = vld [vmem:[%s4717_s1 + $0x5b0] sm:$0xff]   ;;  %v3736_v16 = vld [vmem:[%s4717_s1 + $0x568] sm:$0xff]  }
  0x7a   :  { %3382 = vmatprep.subr.bf16.mxu1 %v3689_v17  ;;  %v3737_v17 = vld [vmem:[%s4717_s1 + $0x5e8] sm:$0xff]  }
  0x7c   :  { %3361 = vmatpush3.bf16.msra.mxu0 %v3690_v18  ;;  %v3738_v18 = vld [vmem:[%s4717_s1 + $0x528] sm:$0xff]  }
  0x7d   :  { %3383 = vmatpush3.bf16.msra.mxu1 %v3691_v19  ;;  %3362 = vmatprep.subr.bf16.mxu0 %v3692_v20  ;;  %v3739_v19 = vld [vmem:[%s4717_s1 + $0x5a8] sm:$0xff]   ;;  %v3740_v20 = vld [vmem:[%s4717_s1 + $0x560] sm:$0xff]  }
  0x7e   :  { %3384 = vmatprep.subr.bf16.mxu1 %v3693_v21  ;;  %v3741_v21 = vld [vmem:[%s4717_s1 + $0x5e0] sm:$0xff]  }
  0x80   :  { %3363 = vmatpush3.bf16.msra.mxu0 %v3694_v22  ;;  %v3742_v22 = vld [vmem:[%s4717_s1 + $0x520] sm:$0xff]  }
  0x81   :  { %3385 = vmatpush3.bf16.msra.mxu1 %v3695_v23  ;;  %3392 = vmatprep.subr.bf16.mxu0 %v3696_v32  ;;  %v3743_v23 = vld [vmem:[%s4717_s1 + $0x5a0] sm:$0xff]   ;;  %v3752_v32 = vld [vmem:[%s4717_s1 + $0x548] sm:$0xff]  }
  0x82   :  { %3414 = vmatprep.subr.bf16.mxu1 %v3697_v33  ;;  %v3753_v33 = vld [vmem:[%s4717_s1 + $0x5c8] sm:$0xff]  }
  0x83   :  { %2541 = vmatmul.mubr.bf16.vlgmr.msra.gmra.mxu0 %v2940_v27  ;;  %v3747_v27 = vld [vmem:[%s4717_s1 + $0x598] sm:$0xff]  }
  0x84   :  { %2582 = vmatmul.mubr.bf16.vlgmr.msra.gmra.mxu1 %v2942_v30  ;;  %3393 = vmatpush3.bf16.msra.mxu0 %v3698_v34  ;;  %v3750_v30 = vld [vmem:[%s4717_s1 + $0x510] sm:$0xff]   ;;  %v3754_v34 = vld [vmem:[%s4717_s1 + $0x508] sm:$0xff]  }
  0x85   :  { %3415 = vmatpush3.bf16.msra.mxu1 %v3699_v35  ;;  %3394 = vmatprep.subr.bf16.mxu0 %v3700_v36  ;;  %v3755_v35 = vld [vmem:[%s4717_s1 + $0x588] sm:$0xff]   ;;  %v3756_v36 = vld [vmem:[%s4717_s1 + $0x540] sm:$0xff]  }
  0x86   :  { %3416 = vmatprep.subr.bf16.mxu1 %v3701_v37  ;;  %2622 = vmatprep.mubr.bf16.mxu0 %v2945_v3  ;;  %v3757_v37 = vld [vmem:[%s4717_s1 + $0x5c0] sm:$0xff]   ;;  %v3779_v3 = vld [vmem:[%s4717_s1 + $0x698] sm:$0xff]  }
  0x87   :  { %2663 = vmatprep.mubr.bf16.mxu1 %v2947_v7  ;;  %v3783_v7 = vld [vmem:[%s4717_s1 + $0x690] sm:$0xff]  }
  0x88   :  { %3395 = vmatpush3.bf16.msra.mxu0 %v3702_v38  ;;  %v3758_v38 = vld [vmem:[%s4717_s1 + $0x500] sm:$0xff]  }
  0x89   :  { %3417 = vmatpush3.bf16.msra.mxu1 %v3703_v39  ;;  %3396 = vmatprep.subr.bf16.mxu0 %v3704_v40  ;;  %v3759_v39 = vld [vmem:[%s4717_s1 + $0x580] sm:$0xff]   ;;  %v25_v40 = vld [vmem:[%s4718_s0 + $0x50] sm:$0xff] }
  0x8a   :  { %3418 = vmatprep.subr.bf16.mxu1 %v3705_v41  ;;  %v41_v41 = vld [vmem:[%s4718_s0 + $0xd0] sm:$0xff] }
  0x8c   :  { %3397 = vmatpush3.bf16.msra.mxu0 %v3706_v42  ;;  %v26_v42 = vld [vmem:[%s4718_s0 + $0x58] sm:$0xff] }
  0x8d   :  { %3419 = vmatpush3.bf16.msra.mxu1 %v3707_v43  ;;  %3398 = vmatprep.subr.bf16.mxu0 %v3708_v44  ;;  %v42_v43 = vld [vmem:[%s4718_s0 + $0xd8] sm:$0xff]  ;;  %v2948_v44 = vcombine.low %v25_v40, %v41_v41 }
  0x8e   :  { %3420 = vmatprep.subr.bf16.mxu1 %v3709_v45  ;;  %v2949_v45 = vcombine.high %v25_v40, %v41_v41  ;;  %v3808_v40 = vld [vmem:[%s4717_s1 + $0x758] sm:$0xff]  }
  0x8f   :  { %v3809_v41 = vld [vmem:[%s4717_s1 + $0x7d8] sm:$0xff]  }
  0x90   :  { %3399 = vmatpush3.bf16.msra.mxu0 %v3710_v46  ;;  %v2950_v46 = vcombine.low %v26_v42, %v42_v43 }
  0x91   :  { %3421 = vmatpush3.bf16.msra.mxu1 %v3711_v47  ;;  %3400 = vmatprep.subr.bf16.mxu0 %v3712_v48  ;;  %v2951_v47 = vcombine.high %v26_v42, %v42_v43  ;;  %v3760_v48 = vld [vmem:[%s4717_s1 + $0x678] sm:$0xff]  }
  0x92   :  { %3422 = vmatprep.subr.bf16.mxu1 %v3713_v49  ;;  %v3761_v49 = vld [vmem:[%s4717_s1 + $0x6f8] sm:$0xff]  }
  0x93   :  { %v3810_v42 = vld [vmem:[%s4717_s1 + $0x718] sm:$0xff]  }
  0x94   :  { %3401 = vmatpush3.bf16.msra.mxu0 %v3714_v50  ;;  %v3762_v50 = vld [vmem:[%s4717_s1 + $0x638] sm:$0xff]  }
  0x95   :  { %3423 = vmatpush3.bf16.msra.mxu1 %v3715_v51  ;;  %3402 = vmatprep.subr.bf16.mxu0 %v3716_v52  ;;  %v3763_v51 = vld [vmem:[%s4717_s1 + $0x6b8] sm:$0xff]   ;;  %v3764_v52 = vld [vmem:[%s4717_s1 + $0x670] sm:$0xff]  }
  0x96   :  { %3424 = vmatprep.subr.bf16.mxu1 %v3717_v53  ;;  %v3765_v53 = vld [vmem:[%s4717_s1 + $0x6f0] sm:$0xff]   ;;  %v3811_v43 = vld [vmem:[%s4717_s1 + $0x798] sm:$0xff]  }
  0x98   :  { %3403 = vmatpush3.bf16.msra.mxu0 %v3718_v54  ;;  %v3766_v54 = vld [vmem:[%s4717_s1 + $0x630] sm:$0xff]  }
  0x99   :  { %3425 = vmatpush3.bf16.msra.mxu1 %v3719_v55  ;;  %3404 = vmatprep.subr.bf16.mxu0 %v3720_v56  ;;  %v3767_v55 = vld [vmem:[%s4717_s1 + $0x6b0] sm:$0xff]   ;;  %v3768_v56 = vld [vmem:[%s4717_s1 + $0x668] sm:$0xff]  }
  0x9a   :  { %3426 = vmatprep.subr.bf16.mxu1 %v3721_v57  ;;  %v3769_v57 = vld [vmem:[%s4717_s1 + $0x6e8] sm:$0xff]  }
  0x9c   :  { %3405 = vmatpush3.bf16.msra.mxu0 %v3722_v58  ;;  %v3770_v58 = vld [vmem:[%s4717_s1 + $0x628] sm:$0xff]  }
  0x9d   :  { %3427 = vmatpush3.bf16.msra.mxu1 %v3723_v59  ;;  %3406 = vmatprep.subr.bf16.mxu0 %v3724_v60  ;;  %v3771_v59 = vld [vmem:[%s4717_s1 + $0x6a8] sm:$0xff]   ;;  %v3772_v60 = vld [vmem:[%s4717_s1 + $0x660] sm:$0xff]  }
  0x9e   :  { %3428 = vmatprep.subr.bf16.mxu1 %v3725_v61  ;;  %v3773_v61 = vld [vmem:[%s4717_s1 + $0x6e0] sm:$0xff]  }
  0xa0   :  { %3407 = vmatpush3.bf16.msra.mxu0 %v3726_v62  ;;  %v3774_v62 = vld [vmem:[%s4717_s1 + $0x620] sm:$0xff]  }
  0xa1   :  { %3429 = vmatpush3.bf16.msra.mxu1 %v3727_v63  ;;  %3436 = vmatprep.subr.bf16.mxu0 %v3728_v8  ;;  %v3775_v63 = vld [vmem:[%s4717_s1 + $0x6a0] sm:$0xff]   ;;  %v3784_v8 = vld [vmem:[%s4717_s1 + $0x648] sm:$0xff]  }
  0xa2   :  { %3458 = vmatprep.subr.bf16.mxu1 %v3729_v9  ;;  %v3785_v9 = vld [vmem:[%s4717_s1 + $0x6c8] sm:$0xff]  }
  0xa3   :  { %2623 = vmatmul.mubr.bf16.vlgmr.msra.gmra.mxu0 %v2944_v2  ;;  %v3778_v2 = vld [vmem:[%s4717_s1 + $0x618] sm:$0xff]  }
  0xa4   :  { %2664 = vmatmul.mubr.bf16.vlgmr.msra.gmra.mxu1 %v2946_v6  ;;  %3437 = vmatpush3.bf16.msra.mxu0 %v3730_v10  ;;  %v3782_v6 = vld [vmem:[%s4717_s1 + $0x610] sm:$0xff]   ;;  %v3786_v10 = vld [vmem:[%s4717_s1 + $0x608] sm:$0xff]  }
  0xa5   :  { %3459 = vmatpush3.bf16.msra.mxu1 %v3731_v11  ;;  %3438 = vmatprep.subr.bf16.mxu0 %v3732_v12  ;;  %v3787_v11 = vld [vmem:[%s4717_s1 + $0x688] sm:$0xff]   ;;  %v3788_v12 = vld [vmem:[%s4717_s1 + $0x640] sm:$0xff]  }
  0xa6   :  { %3460 = vmatprep.subr.bf16.mxu1 %v3733_v13  ;;  %2704 = vmatprep.mubr.bf16.mxu0 %v2949_v45  ;;  %v3789_v13 = vld [vmem:[%s4717_s1 + $0x6c0] sm:$0xff]   ;;  %v3813_v45 = vld [vmem:[%s4717_s1 + $0x7d0] sm:$0xff]  }
  0xa7   :  { %2745 = vmatprep.mubr.bf16.mxu1 %v2951_v47  ;;  %v3815_v47 = vld [vmem:[%s4717_s1 + $0x790] sm:$0xff]  }
  0xa8   :  { %3439 = vmatpush3.bf16.msra.mxu0 %v3734_v14  ;;  %v3790_v14 = vld [vmem:[%s4717_s1 + $0x600] sm:$0xff]  }
  0xa9   :  { %3461 = vmatpush3.bf16.msra.mxu1 %v3735_v15  ;;  %3440 = vmatprep.subr.bf16.mxu0 %v3736_v16  ;;  %v3791_v15 = vld [vmem:[%s4717_s1 + $0x680] sm:$0xff]  }
  0xaa   :  { %3462 = vmatprep.subr.bf16.mxu1 %v3737_v17  ;;  %v27_v16 = vld [vmem:[%s4718_s0 + $0x60] sm:$0xff] }
  0xab   :  { %v43_v17 = vld [vmem:[%s4718_s0 + $0xe0] sm:$0xff] }
  0xac   :  { %3441 = vmatpush3.bf16.msra.mxu0 %v3738_v18  ;;  %v28_v18 = vld [vmem:[%s4718_s0 + $0x68] sm:$0xff] }
  0xad   :  { %3463 = vmatpush3.bf16.msra.mxu1 %v3739_v19  ;;  %3442 = vmatprep.subr.bf16.mxu0 %v3740_v20  ;;  %v2952_v19 = vcombine.low %v27_v16, %v43_v17  ;;  %v2953_v20 = vcombine.high %v27_v16, %v43_v17 }
  0xae   :  { %3464 = vmatprep.subr.bf16.mxu1 %v3741_v21  ;;  %v44_v21 = vld [vmem:[%s4718_s0 + $0xe8] sm:$0xff] }
  0xb0   :  { %3443 = vmatpush3.bf16.msra.mxu0 %v3742_v22  ;;  %v2954_v22 = vcombine.low %v28_v18, %v44_v21 }
  0xb1   :  { %3465 = vmatpush3.bf16.msra.mxu1 %v3743_v23  ;;  %3444 = vmatprep.subr.bf16.mxu0 %v3744_v24  ;;  %v2955_v23 = vcombine.high %v28_v18, %v44_v21  ;;  %v3792_v24 = vld [vmem:[%s4717_s1 + $0x778] sm:$0xff]  }
  0xb2   :  { %3466 = vmatprep.subr.bf16.mxu1 %v3745_v25  ;;  %v3793_v25 = vld [vmem:[%s4717_s1 + $0x7f8] sm:$0xff]  }
  0xb4   :  { %3445 = vmatpush3.bf16.msra.mxu0 %v3746_v26  ;;  %v3794_v26 = vld [vmem:[%s4717_s1 + $0x738] sm:$0xff]  }
  0xb5   :  { %3467 = vmatpush3.bf16.msra.mxu1 %v3747_v27  ;;  %3446 = vmatprep.subr.bf16.mxu0 %v3748_v28  ;;  %v3795_v27 = vld [vmem:[%s4717_s1 + $0x7b8] sm:$0xff]   ;;  %v3796_v28 = vld [vmem:[%s4717_s1 + $0x770] sm:$0xff]  }
  0xb6   :  { %3468 = vmatprep.subr.bf16.mxu1 %v3749_v29  ;;  %v3797_v29 = vld [vmem:[%s4717_s1 + $0x7f0] sm:$0xff]  }
  0xb8   :  { %3447 = vmatpush3.bf16.msra.mxu0 %v3750_v30  ;;  %v3798_v30 = vld [vmem:[%s4717_s1 + $0x730] sm:$0xff]  }
  0xb9   :  { %3469 = vmatpush3.bf16.msra.mxu1 %v3751_v31  ;;  %3448 = vmatprep.subr.bf16.mxu0 %v3752_v32  ;;  %v3799_v31 = vld [vmem:[%s4717_s1 + $0x7b0] sm:$0xff]   ;;  %v3800_v32 = vld [vmem:[%s4717_s1 + $0x768] sm:$0xff]  }
  0xba   :  { %3470 = vmatprep.subr.bf16.mxu1 %v3753_v33  ;;  %v3801_v33 = vld [vmem:[%s4717_s1 + $0x7e8] sm:$0xff]  }
  0xbc   :  { %3449 = vmatpush3.bf16.msra.mxu0 %v3754_v34  ;;  %v3802_v34 = vld [vmem:[%s4717_s1 + $0x728] sm:$0xff]  }
  0xbd   :  { %3471 = vmatpush3.bf16.msra.mxu1 %v3755_v35  ;;  %3450 = vmatprep.subr.bf16.mxu0 %v3756_v36  ;;  %v3803_v35 = vld [vmem:[%s4717_s1 + $0x7a8] sm:$0xff]   ;;  %v3804_v36 = vld [vmem:[%s4717_s1 + $0x760] sm:$0xff]  }
  0xbe   :  { %3472 = vmatprep.subr.bf16.mxu1 %v3757_v37  ;;  %v3805_v37 = vld [vmem:[%s4717_s1 + $0x7e0] sm:$0xff]  }
  0xc0   :  { %3451 = vmatpush3.bf16.msra.mxu0 %v3758_v38  ;;  %v3806_v38 = vld [vmem:[%s4717_s1 + $0x720] sm:$0xff]  }
  0xc1   :  { %3473 = vmatpush3.bf16.msra.mxu1 %v3759_v39  ;;  %3480 = vmatprep.subr.bf16.mxu0 %v3760_v48  ;;  %v3807_v39 = vld [vmem:[%s4717_s1 + $0x7a0] sm:$0xff]   ;;  %v3816_v48 = vld [vmem:[%s4717_s1 + $0x748] sm:$0xff]  }
  0xc2   :  { %3502 = vmatprep.subr.bf16.mxu1 %v3761_v49  ;;  %v3817_v49 = vld [vmem:[%s4717_s1 + $0x7c8] sm:$0xff]  }
  0xc3   :  { %2705 = vmatmul.mubr.bf16.vlgmr.msra.gmra.mxu0 %v2948_v44  ;;  %v3812_v44 = vld [vmem:[%s4717_s1 + $0x750] sm:$0xff]  }
  0xc4   :  { %2746 = vmatmul.mubr.bf16.vlgmr.msra.gmra.mxu1 %v2950_v46  ;;  %3481 = vmatpush3.bf16.msra.mxu0 %v3762_v50  ;;  %v3814_v46 = vld [vmem:[%s4717_s1 + $0x710] sm:$0xff]   ;;  %v3818_v50 = vld [vmem:[%s4717_s1 + $0x708] sm:$0xff]  }
  0xc5   :  { %3503 = vmatpush3.bf16.msra.mxu1 %v3763_v51  ;;  %3482 = vmatprep.subr.bf16.mxu0 %v3764_v52  ;;  %v3819_v51 = vld [vmem:[%s4717_s1 + $0x788] sm:$0xff]   ;;  %v3820_v52 = vld [vmem:[%s4717_s1 + $0x740] sm:$0xff]  }
  0xc6   :  { %3504 = vmatprep.subr.bf16.mxu1 %v3765_v53  ;;  %2786 = vmatprep.mubr.bf16.mxu0 %v2953_v20  ;;  %v3821_v53 = vld [vmem:[%s4717_s1 + $0x7c0] sm:$0xff]  }
  0xc7   :  { %2827 = vmatprep.mubr.bf16.mxu1 %v2955_v23 }
  0xc8   :  { %3483 = vmatpush3.bf16.msra.mxu0 %v3766_v54  ;;  %v3822_v54 = vld [vmem:[%s4717_s1 + $0x700] sm:$0xff]  }
  0xc9   :  { %3505 = vmatpush3.bf16.msra.mxu1 %v3767_v55  ;;  %3484 = vmatprep.subr.bf16.mxu0 %v3768_v56  ;;  %v3823_v55 = vld [vmem:[%s4717_s1 + $0x780] sm:$0xff]   ;;  %v29_v56 = vld [vmem:[%s4718_s0 + $0x70] sm:$0xff] }
  0xca   :  { %3506 = vmatprep.subr.bf16.mxu1 %v3769_v57  ;;  %v45_v57 = vld [vmem:[%s4718_s0 + $0xf0] sm:$0xff] }
  0xcc   :  { %3485 = vmatpush3.bf16.msra.mxu0 %v3770_v58  ;;  %v30_v58 = vld [vmem:[%s4718_s0 + $0x78] sm:$0xff] }
  0xcd   :  { %3507 = vmatpush3.bf16.msra.mxu1 %v3771_v59  ;;  %3486 = vmatprep.subr.bf16.mxu0 %v3772_v60  ;;  %v46_v59 = vld [vmem:[%s4718_s0 + $0xf8] sm:$0xff]  ;;  %v2956_v60 = vcombine.low %v29_v56, %v45_v57 }
  0xce   :  { %3508 = vmatprep.subr.bf16.mxu1 %v3773_v61  ;;  %v2957_v61 = vcombine.high %v29_v56, %v45_v57 }
  0xd0   :  { %3487 = vmatpush3.bf16.msra.mxu0 %v3774_v62  ;;  %v2958_v62 = vcombine.low %v30_v58, %v46_v59 }
  0xd1   :  { %3509 = vmatpush3.bf16.msra.mxu1 %v3775_v63  ;;  %3488 = vmatprep.subr.bf16.mxu0 %v3776_v0  ;;  %v2959_v63 = vcombine.high %v30_v58, %v46_v59 }
  0xd2   :  { %3510 = vmatprep.subr.bf16.mxu1 %v3777_v1 }
  0xd4   :  { %3489 = vmatpush3.bf16.msra.mxu0 %v3778_v2 }
  0xd5   :  { %3511 = vmatpush3.bf16.msra.mxu1 %v3779_v3  ;;  %3490 = vmatprep.subr.bf16.mxu0 %v3780_v4 }
  0xd6   :  { %3512 = vmatprep.subr.bf16.mxu1 %v3781_v5 }
  0xd8   :  { %3491 = vmatpush3.bf16.msra.mxu0 %v3782_v6 }
  0xd9   :  { %3513 = vmatpush3.bf16.msra.mxu1 %v3783_v7  ;;  %3492 = vmatprep.subr.bf16.mxu0 %v3784_v8 }
  0xda   :  { %3514 = vmatprep.subr.bf16.mxu1 %v3785_v9 }
  0xdc   :  { %3493 = vmatpush3.bf16.msra.mxu0 %v3786_v10 }
  0xdd   :  { %3515 = vmatpush3.bf16.msra.mxu1 %v3787_v11  ;;  %3494 = vmatprep.subr.bf16.mxu0 %v3788_v12 }
  0xde   :  { %3516 = vmatprep.subr.bf16.mxu1 %v3789_v13 }
  0xe0   :  { %3495 = vmatpush3.bf16.msra.mxu0 %v3790_v14 }
  0xe1   :  { %3517 = vmatpush3.bf16.msra.mxu1 %v3791_v15  ;;  %3524 = vmatprep.subr.bf16.mxu0 %v3792_v24 }
  0xe2   :  { %3546 = vmatprep.subr.bf16.mxu1 %v3793_v25 }
  0xe3   :  { %2787 = vmatmul.mubr.bf16.vlgmr.msra.gmra.mxu0 %v2952_v19  ;;  %v3232_v0 = vpop.f32.mrf.mxu0 }
  0xe4   :  { %2828 = vmatmul.mubr.bf16.vlgmr.msra.gmra.mxu1 %v2954_v22  ;;  %3525 = vmatpush3.bf16.msra.mxu0 %v3794_v26  ;;  %v3254_v1 = vpop.f32.mrf.mxu1 }
  0xe5   :  { %3547 = vmatpush3.bf16.msra.mxu1 %v3795_v27  ;;  %3526 = vmatprep.subr.bf16.mxu0 %v3796_v28  ;;  %v3233_v2 = vpop.f32.mrf.mxu0 }
  0xe6   :  { %3548 = vmatprep.subr.bf16.mxu1 %v3797_v29  ;;  %2868 = vmatprep.mubr.bf16.mxu0 %v2957_v61  ;;  %v3255_v3 = vpop.f32.mrf.mxu1 }
  0xe7   :  { %2909 = vmatprep.mubr.bf16.mxu1 %v2959_v63  ;;  %v3235_v4 = vpop.f32.mrf.mxu0 }
  0xe8   :  { %3527 = vmatpush3.bf16.msra.mxu0 %v3798_v30  ;;  %v3257_v5 = vpop.f32.mrf.mxu1 }
  0xe9   :  { %3549 = vmatpush3.bf16.msra.mxu1 %v3799_v31  ;;  %3528 = vmatprep.subr.bf16.mxu0 %v3800_v32  ;;  %v3236_v6 = vpop.f32.mrf.mxu0 }
  0xea   :  { %3550 = vmatprep.subr.bf16.mxu1 %v3801_v33  ;;  %v3258_v7 = vpop.f32.mrf.mxu1 }
  0xec   :  { %3529 = vmatpush3.bf16.msra.mxu0 %v3802_v34  ;;  %v3234_v34 = vadd.f32 %v3233_v2, %v3232_v0 }
  0xed   :  { %3551 = vmatpush3.bf16.msra.mxu1 %v3803_v35  ;;  %3530 = vmatprep.subr.bf16.mxu0 %v3804_v36  ;;  %v2927_v35 = vld [vmem:[%s4719_s2] ss:$0 sm:$0xff] }
  0xee   :  { %3552 = vmatprep.subr.bf16.mxu1 %v3805_v37 }
  0xf0   :  { %3531 = vmatpush3.bf16.msra.mxu0 %v3806_v38  ;;  %v2297_v38 = vadd.f32 %v3234_v34, %v2927_v35 }
  0xf1   :  { %3553 = vmatpush3.bf16.msra.mxu1 %v3807_v39  ;;  %3532 = vmatprep.subr.bf16.mxu0 %v3808_v40  ;;  %v3256_v39 = vadd.f32 %v3255_v3, %v3254_v1  ;;  %v3237_v40 = vadd.f32 %v3236_v6, %v3235_v4 }
  0xf2   :  { %3554 = vmatprep.subr.bf16.mxu1 %v3809_v41 }
  0xf4   :  { %3533 = vmatpush3.bf16.msra.mxu0 %v3810_v42 }
  0xf5   :  { %3555 = vmatpush3.bf16.msra.mxu1 %v3811_v43  ;;  %3534 = vmatprep.subr.bf16.mxu0 %v3812_v44  ;;  %v2338_v44 = vadd.f32 %v3256_v39, %v2297_v38 }
  0xf6   :  { %3556 = vmatprep.subr.bf16.mxu1 %v3813_v45  ;;  %v2300_v45 = vadd.f32 %v3237_v40, %v2927_v35 }
  0xf8   :  { %3535 = vmatpush3.bf16.msra.mxu0 %v3814_v46 }
  0xf9   :  { %3557 = vmatpush3.bf16.msra.mxu1 %v3815_v47  ;;  %3536 = vmatprep.subr.bf16.mxu0 %v3816_v48  ;;  %v3259_v47 = vadd.f32 %v3258_v7, %v3257_v5 }
  0xfa   :  { %3558 = vmatprep.subr.bf16.mxu1 %v3817_v49 }
  0xfc   :  { %3537 = vmatpush3.bf16.msra.mxu0 %v3818_v50 }
  0xfd   :  { %3559 = vmatpush3.bf16.msra.mxu1 %v3819_v51  ;;  %3538 = vmatprep.subr.bf16.mxu0 %v3820_v52 }
  0xfe   :  { %3560 = vmatprep.subr.bf16.mxu1 %v3821_v53  ;;  %v2341_v53 = vadd.f32 %v3259_v47, %v2300_v45 }
 0x100   :  { %3539 = vmatpush3.bf16.msra.mxu0 %v3822_v54 }
 0x101   :  { %3561 = vmatpush3.bf16.msra.mxu1 %v3823_v55 }
 0x103   :  { %2869 = vmatmul.mubr.bf16.vlgmr.msra.gmra.mxu0 %v2956_v60  ;;  %v3276_v8 = vpop.f32.mrf.mxu0 }
 0x104   :  { %2910 = vmatmul.mubr.bf16.vlgmr.msra.gmra.mxu1 %v2958_v62  ;;  %v3298_v9 = vpop.f32.mrf.mxu1 }
 0x105   :  { %v3277_v10 = vpop.f32.mrf.mxu0 }
 0x106   :  { %v3299_v11 = vpop.f32.mrf.mxu1  ;;  %v3278_v42 = vadd.f32 %v3277_v10, %v3276_v8 }
 0x107   :  { %v3279_v12 = vpop.f32.mrf.mxu0  ;;  %v3300_v49 = vadd.f32 %v3299_v11, %v3298_v9 }
 0x108   :  { %v3301_v13 = vpop.f32.mrf.mxu1  ;;  %v2379_v48 = vadd.f32 %v3278_v42, %v2338_v44 }
 0x109   :  { %v3280_v14 = vpop.f32.mrf.mxu0 }
 0x10a   :  { %v3302_v15 = vpop.f32.mrf.mxu1  ;;  %v3281_v50 = vadd.f32 %v3280_v14, %v3279_v12  ;;  %v2420_v56 = vadd.f32 %v3300_v49, %v2379_v48 }
 0x10b   :  { %v3303_v59 = vadd.f32 %v3302_v15, %v3301_v13 }
 0x10c   :  { %v2382_v57 = vadd.f32 %v3281_v50, %v2341_v53 }
 0x10e   :  { %v2423_v0 = vadd.f32 %v3303_v59, %v2382_v57 }
 0x123   :  { %v3320_v16 = vpop.f32.mrf.mxu0 }
 0x124   :  { %v3342_v17 = vpop.f32.mrf.mxu1 }
 0x125   :  { %v3321_v18 = vpop.f32.mrf.mxu0 }
 0x126   :  { %v3343_v19 = vpop.f32.mrf.mxu1  ;;  %v3322_v54 = vadd.f32 %v3321_v18, %v3320_v16 }
 0x127   :  { %v3323_v20 = vpop.f32.mrf.mxu0  ;;  %v3344_v61 = vadd.f32 %v3343_v19, %v3342_v17 }
 0x128   :  { %v3345_v21 = vpop.f32.mrf.mxu1  ;;  %v2461_v60 = vadd.f32 %v3322_v54, %v2420_v56 }
 0x129   :  { %v3324_v22 = vpop.f32.mrf.mxu0 }
 0x12a   :  { %v3346_v23 = vpop.f32.mrf.mxu1  ;;  %v3325_v62 = vadd.f32 %v3324_v22, %v3323_v20  ;;  %v2502_v3 = vadd.f32 %v3344_v61, %v2461_v60 }
 0x12b   :  { %v3347_v6 = vadd.f32 %v3346_v23, %v3345_v21 }
 0x12c   :  { %v2464_v4 = vadd.f32 %v3325_v62, %v2423_v0 }
 0x12e   :  { %v2505_v11 = vadd.f32 %v3347_v6, %v2464_v4 }
 0x143   :  { %v3364_v24 = vpop.f32.mrf.mxu0 }
 0x144   :  { %v3386_v25 = vpop.f32.mrf.mxu1 }
 0x145   :  { %v3365_v26 = vpop.f32.mrf.mxu0 }
 0x146   :  { %v3387_v27 = vpop.f32.mrf.mxu1  ;;  %v3366_v1 = vadd.f32 %v3365_v26, %v3364_v24 }
 0x147   :  { %v3367_v28 = vpop.f32.mrf.mxu0  ;;  %v3388_v8 = vadd.f32 %v3387_v27, %v3386_v25 }
 0x148   :  { %v3389_v29 = vpop.f32.mrf.mxu1  ;;  %v2543_v7 = vadd.f32 %v3366_v1, %v2502_v3 }
 0x149   :  { %v3368_v30 = vpop.f32.mrf.mxu0 }
 0x14a   :  { %v3390_v31 = vpop.f32.mrf.mxu1  ;;  %v3369_v9 = vadd.f32 %v3368_v30, %v3367_v28  ;;  %v2584_v13 = vadd.f32 %v3388_v8, %v2543_v7 }
 0x14b   :  { %v3391_v18 = vadd.f32 %v3390_v31, %v3389_v29 }
 0x14c   :  { %v2546_v15 = vadd.f32 %v3369_v9, %v2505_v11 }
 0x14e   :  { %v2587_v26 = vadd.f32 %v3391_v18, %v2546_v15 }
 0x163   :  { %v3408_v32 = vpop.f32.mrf.mxu0 }
 0x164   :  { %v3430_v33 = vpop.f32.mrf.mxu1 }
 0x165   :  { %v3409_v36 = vpop.f32.mrf.mxu0 }
 0x166   :  { %v3431_v37 = vpop.f32.mrf.mxu1  ;;  %v3410_v12 = vadd.f32 %v3409_v36, %v3408_v32 }
 0x167   :  { %v3411_v41 = vpop.f32.mrf.mxu0  ;;  %v3432_v20 = vadd.f32 %v3431_v37, %v3430_v33 }
 0x168   :  { %v3433_v43 = vpop.f32.mrf.mxu1  ;;  %v2625_v19 = vadd.f32 %v3410_v12, %v2584_v13 }
 0x169   :  { %v3412_v46 = vpop.f32.mrf.mxu0 }
 0x16a   :  { %v3434_v51 = vpop.f32.mrf.mxu1  ;;  %v3413_v22 = vadd.f32 %v3412_v46, %v3411_v41  ;;  %v2666_v21 = vadd.f32 %v3432_v20, %v2625_v19 }
 0x16b   :  { %v3435_v27 = vadd.f32 %v3434_v51, %v3433_v43 }
 0x16c   :  { %v2628_v23 = vadd.f32 %v3413_v22, %v2587_v26 }
 0x16e   :  { %v2669_v38 = vadd.f32 %v3435_v27, %v2628_v23 }
 0x183   :  { %v3452_v52 = vpop.f32.mrf.mxu0 }
 0x184   :  { %v3474_v55 = vpop.f32.mrf.mxu1 }
 0x185   :  { %v3453_v58 = vpop.f32.mrf.mxu0 }
 0x186   :  { %v3475_v63 = vpop.f32.mrf.mxu1  ;;  %v3454_v34 = vadd.f32 %v3453_v58, %v3452_v52 }
 0x187   :  { %v3455_v2 = vpop.f32.mrf.mxu0  ;;  %v3476_v30 = vadd.f32 %v3475_v63, %v3474_v55 }
 0x188   :  { %v3477_v5 = vpop.f32.mrf.mxu1  ;;  %v2707_v28 = vadd.f32 %v3454_v34, %v2666_v21 }
 0x189   :  { %v3456_v10 = vpop.f32.mrf.mxu0 }
 0x18a   :  { %v3478_v14 = vpop.f32.mrf.mxu1  ;;  %v3457_v32 = vadd.f32 %v3456_v10, %v3455_v2  ;;  %v2748_v42 = vadd.f32 %v3476_v30, %v2707_v28 }
 0x18b   :  { %v3479_v33 = vadd.f32 %v3478_v14, %v3477_v5 }
 0x18c   :  { %v2710_v29 = vadd.f32 %v3457_v32, %v2669_v38 }
 0x18e   :  { %v2751_v47 = vadd.f32 %v3479_v33, %v2710_v29 }
 0x1a3   :  { %v3496_v16 = vpop.f32.mrf.mxu0 }
 0x1a4   :  { %v3518_v17 = vpop.f32.mrf.mxu1 }
 0x1a5   :  { %v3497_v24 = vpop.f32.mrf.mxu0 }
 0x1a6   :  { %v3519_v35 = vpop.f32.mrf.mxu1  ;;  %v3498_v39 = vadd.f32 %v3497_v24, %v3496_v16 }
 0x1a7   :  { %v3499_v25 = vpop.f32.mrf.mxu0  ;;  %v3520_v41 = vadd.f32 %v3519_v35, %v3518_v17 }
 0x1a8   :  { %v3521_v36 = vpop.f32.mrf.mxu1  ;;  %v2789_v37 = vadd.f32 %v3498_v39, %v2748_v42 }
 0x1a9   :  { %v3500_v40 = vpop.f32.mrf.mxu0 }
 0x1aa   :  { %v3522_v31 = vpop.f32.mrf.mxu1  ;;  %v3501_v44 = vadd.f32 %v3500_v40, %v3499_v25  ;;  %v2830_v43 = vadd.f32 %v3520_v41, %v2789_v37 }
 0x1ab   :  { %v3523_v54 = vadd.f32 %v3522_v31, %v3521_v36 }
 0x1ac   :  { %v2792_v50 = vadd.f32 %v3501_v44, %v2751_v47 }
 0x1ae   :  { %v2833_v59 = vadd.f32 %v3523_v54, %v2792_v50 }
 0x1c3   :  { %v3540_v45 = vpop.f32.mrf.mxu0 }
 0x1c4   :  { %v3562_v46 = vpop.f32.mrf.mxu1 }
 0x1c5   :  { %v3541_v48 = vpop.f32.mrf.mxu0 }
 0x1c6   :  { %v3563_v49 = vpop.f32.mrf.mxu1  ;;  %v3542_v51 = vadd.f32 %v3541_v48, %v3540_v45 }
 0x1c7   :  { %v3543_v52 = vpop.f32.mrf.mxu0  ;;  %v3564_v56 = vadd.f32 %v3563_v49, %v3562_v46 }
 0x1c8   :  { %v3565_v53 = vpop.f32.mrf.mxu1  ;;  %v2871_v55 = vadd.f32 %v3542_v51, %v2830_v43 }
 0x1c9   :  { %v3544_v57 = vpop.f32.mrf.mxu0 }
 0x1ca   :  { %v3566_v58 = vpop.f32.mrf.mxu1  ;;  %v2912_v60 = vadd.f32 %v3564_v56, %v2871_v55  ;;  %v3545_v61 = vadd.f32 %v3544_v57, %v3543_v52 }
 0x1cb   :  { %v3567_v0 = vadd.f32 %v3566_v58, %v3565_v53 }
 0x1cc   :  { %v2918_v62 = vmax.f32 %v2912_v60, 0.0  ;;  %v2874_v63 = vadd.f32 %v3545_v61, %v2833_v59 }
 0x1ce   :  { %2921 = vst.msk [vmem:[%s4720_s3] sm:$0xff] %vm2920_vm0, %v2918_v62  ;;  %v2915_v1 = vadd.f32 %v3567_v0, %v2874_v63 }
 0x1d0   :  { %v2919_v2 = vmax.f32 %v2915_v1, 0.0 }
 0x1d2   :  { %2922 = vst.msk [vmem:[%s4720_s3 + $0x8] sm:$0xff] %vm2920_vm0, %v2919_v2 }

</bundles_post_ra>
